<compile_context>
chip_gen: v7x
topology: tpu7x:2x2x1
jax: 0.10.0
libtpu: 0.0.40
codegen_flags: <defaults>
</compile_context>

<pallas_src>
import functools
import math

import jax
import jax.numpy as jnp
from jax.experimental import pallas as pl
from jax.experimental.pallas import tpu as pltpu


# ----------------------------------------------------------------------------
# small helpers
# ----------------------------------------------------------------------------
def _round_up(x, m):
    return ((x + m - 1) // m) * m


def _layernorm(x, w, b, eps=1e-5):
    mu = jnp.mean(x, axis=-1, keepdims=True)
    var = jnp.mean((x - mu) ** 2, axis=-1, keepdims=True)
    return (x - mu) * jax.lax.rsqrt(var + eps) * w + b


def _softmax(s):
    s = s - jnp.max(s, axis=-1, keepdims=True)
    e = jnp.exp(s)
    return e * pl.reciprocal(jnp.sum(e, axis=-1, keepdims=True), approx=True)


def _replicated_spec(arr):
    nd = arr.ndim
    return pl.BlockSpec(arr.shape, lambda i, _nd=nd: (0,) * _nd)


# ----------------------------------------------------------------------------
# Row-tiled Linear (+ optional ReLU) kernel: o = act(x @ w + b),  x: [T, Din]
# ----------------------------------------------------------------------------
def _linear_kernel(x_ref, w_ref, b_ref, o_ref, *, act):
    y = jnp.dot(x_ref[...].astype(jnp.float32), w_ref[...],
                preferred_element_type=jnp.float32) + b_ref[...]
    if act == "relu":
        y = jnp.maximum(y, 0.0)
    o_ref[...] = y.astype(o_ref.dtype)


def pallas_linear(x, w, b, act="none", *, tile=1024):
    T, din = x.shape
    dout = w.shape[1]
    t = min(tile, _round_up(T, 8))
    return pl.pallas_call(
        functools.partial(_linear_kernel, act=act),
        out_shape=jax.ShapeDtypeStruct((T, dout), x.dtype),
        grid=(pl.cdiv(T, t),),
        in_specs=[pl.BlockSpec((t, din), lambda i: (i, 0)),
                  _replicated_spec(w), _replicated_spec(b)],
        out_specs=pl.BlockSpec((t, dout), lambda i: (i, 0)),
        compiler_params=pltpu.CompilerParams(dimension_semantics=("parallel",)),
    )(x, w, b)


# ----------------------------------------------------------------------------
# Fused TransformerEncoder stack (all layers + seq-max), B rays per grid step.
# x block: [B, S, D]; weights per layer (QKV pre-split host-side):
#   wq wk wv bq bk bv wo bo ln1w ln1b w1 b1 w2 b2 ln2w ln2b
# ----------------------------------------------------------------------------
_ENC_KEYS = ("wq", "wk", "wv", "bq", "bk", "bv", "wo", "bo", "ln1w", "ln1b",
             "w1", "b1", "w2", "b2", "ln2w", "ln2b")


def _encoder_stack_kernel(x_ref, *rest, n_layers):
    enc_out_ref, max_ref = rest[-2], rest[-1]
    wrefs = rest[:-2]
    npl = len(_ENC_KEYS)
    B, S, D = x_ref.shape
    scale = D ** -0.5
    xf = x_ref[...].astype(jnp.float32).reshape(B * S, D)
    for l in range(n_layers):
        (wq, wk, wv, bq, bk, bv, wo, bo, ln1w, ln1b,
         w1, b1, w2, b2, ln2w, ln2b) = [r[...] for r in wrefs[l * npl:(l + 1) * npl]]
        # --- self-attention (single head) ---
        q = (jnp.dot(xf, wq, preferred_element_type=jnp.float32) + bq).reshape(B, S, D)
        k = (jnp.dot(xf, wk, preferred_element_type=jnp.float32) + bk).reshape(B, S, D)
        v = (jnp.dot(xf, wv, preferred_element_type=jnp.float32) + bv).reshape(B, S, D)
        s = jnp.einsum("bqd,bkd->bqk", q, k, preferred_element_type=jnp.float32) * scale
        a = jnp.einsum("bqk,bkd->bqd", _softmax(s), v, preferred_element_type=jnp.float32)
        af = jnp.dot(a.reshape(B * S, D), wo, preferred_element_type=jnp.float32) + bo
        xf = _layernorm(xf + af, ln1w, ln1b)
        # --- feed-forward ---
        h = jnp.maximum(jnp.dot(xf, w1, preferred_element_type=jnp.float32) + b1, 0.0)
        ff = jnp.dot(h, w2, preferred_element_type=jnp.float32) + b2
        xf = _layernorm(xf + ff, ln2w, ln2b)
    x_out = xf.reshape(B, S, D)
    enc_out_ref[...] = x_out.astype(enc_out_ref.dtype)
    max_ref[...] = jnp.max(x_out, axis=1).astype(max_ref.dtype)


def pallas_encoder_stack(x, layers, *, batch_cap=256):
    n, s, d = x.shape
    b = n if n <= batch_cap else batch_cap
    weights = [lp[k] for lp in layers for k in _ENC_KEYS]
    f_ff = layers[0]["w1"].shape[1]
    nl = len(layers)
    flops = 2 * n * nl * (4 * s * d * d + 2 * s * s * d + 2 * s * d * f_ff)
    trans = n * nl * s * s
    bytes_acc = 4 * (2 * n * s * d + n * d + sum(int(a.size) for a in weights))
    in_specs = [pl.BlockSpec((b, s, d), lambda i: (i, 0, 0))]
    in_specs += [_replicated_spec(a) for a in weights]
    return pl.pallas_call(
        functools.partial(_encoder_stack_kernel, n_layers=nl),
        out_shape=(jax.ShapeDtypeStruct((n, s, d), x.dtype),
                   jax.ShapeDtypeStruct((n, d), x.dtype)),
        grid=(pl.cdiv(n, b),),
        in_specs=in_specs,
        out_specs=(pl.BlockSpec((b, s, d), lambda i: (i, 0, 0)),
                   pl.BlockSpec((b, d), lambda i: (i, 0))),
        compiler_params=pltpu.CompilerParams(
            dimension_semantics=("parallel",),
            vmem_limit_bytes=32 * 1024 * 1024),
        cost_estimate=pl.CostEstimate(flops=int(flops), transcendentals=int(trans),
                                      bytes_accessed=int(bytes_acc)),
    )(x, *weights)


# ----------------------------------------------------------------------------
# Fused TransformerDecoder stack, B rays per grid step.
# tgt block [B, T, D], memory block [B, S, D]; per-layer weights:
#   sa_{wq,wk,wv,bq,bk,bv,wo,bo} ln1{w,b} ca_{...} ln2{w,b} w1 b1 w2 b2 ln3{w,b}
# ----------------------------------------------------------------------------
_DEC_KEYS = ("sa_wq", "sa_wk", "sa_wv", "sa_bq", "sa_bk", "sa_bv", "sa_wo", "sa_bo",
             "ln1w", "ln1b",
             "ca_wq", "ca_wk", "ca_wv", "ca_bq", "ca_bk", "ca_bv", "ca_wo", "ca_bo",
             "ln2w", "ln2b",
             "w1", "b1", "w2", "b2", "ln3w", "ln3b")


def _decoder_stack_kernel(tgt_ref, mem_ref, *rest, n_layers):
    o_ref = rest[-1]
    wrefs = rest[:-1]
    npl = len(_DEC_KEYS)
    B, T, D = tgt_ref.shape
    S = mem_ref.shape[1]
    scale = D ** -0.5
    xf = tgt_ref[...].astype(jnp.float32).reshape(B * T, D)
    memf = mem_ref[...].astype(jnp.float32).reshape(B * S, D)
    for l in range(n_layers):
        (sa_wq, sa_wk, sa_wv, sa_bq, sa_bk, sa_bv, sa_wo, sa_bo,
         ln1w, ln1b,
         ca_wq, ca_wk, ca_wv, ca_bq, ca_bk, ca_bv, ca_wo, ca_bo,
         ln2w, ln2b,
         w1, b1, w2, b2, ln3w, ln3b) = [r[...] for r in wrefs[l * npl:(l + 1) * npl]]

        # --- self-attention block ---
        q = (jnp.dot(xf, sa_wq, preferred_element_type=jnp.float32) + sa_bq).reshape(B, T, D)
        k = (jnp.dot(xf, sa_wk, preferred_element_type=jnp.float32) + sa_bk).reshape(B, T, D)
        v = (jnp.dot(xf, sa_wv, preferred_element_type=jnp.float32) + sa_bv).reshape(B, T, D)
        s = jnp.einsum("bqd,bkd->bqk", q, k, preferred_element_type=jnp.float32) * scale
        a = jnp.einsum("bqk,bkd->bqd", _softmax(s), v, preferred_element_type=jnp.float32)
        af = jnp.dot(a.reshape(B * T, D), sa_wo, preferred_element_type=jnp.float32) + sa_bo
        xf = _layernorm(xf + af, ln1w, ln1b)

        # --- cross-attention block (q from tgt, k/v from encoder memory) ---
        q = (jnp.dot(xf, ca_wq, preferred_element_type=jnp.float32) + ca_bq).reshape(B, T, D)
        k = (jnp.dot(memf, ca_wk, preferred_element_type=jnp.float32) + ca_bk).reshape(B, S, D)
        v = (jnp.dot(memf, ca_wv, preferred_element_type=jnp.float32) + ca_bv).reshape(B, S, D)
        s = jnp.einsum("bqd,bkd->bqk", q, k, preferred_element_type=jnp.float32) * scale
        a = jnp.einsum("bqk,bkd->bqd", _softmax(s), v, preferred_element_type=jnp.float32)
        af = jnp.dot(a.reshape(B * T, D), ca_wo, preferred_element_type=jnp.float32) + ca_bo
        xf = _layernorm(xf + af, ln2w, ln2b)

        # --- feed-forward block ---
        h = jnp.maximum(jnp.dot(xf, w1, preferred_element_type=jnp.float32) + b1, 0.0)
        ff = jnp.dot(h, w2, preferred_element_type=jnp.float32) + b2
        xf = _layernorm(xf + ff, ln3w, ln3b)
    o_ref[...] = xf.reshape(B, T, D).astype(o_ref.dtype)


def pallas_decoder_stack(tgt, mem, layers, *, batch_cap=64):
    # batch_cap=64 keeps the [B*T, 2048] f32 FFN intermediate well under the
    # 32 MiB scoped-VMEM budget that is portable to v7x's 64 MiB physical VMEM.
    n, t, d = tgt.shape
    _, s, _ = mem.shape
    b = n if n <= batch_cap else batch_cap
    weights = [lp[k] for lp in layers for k in _DEC_KEYS]
    f_ff = layers[0]["w1"].shape[1]
    nl = len(layers)
    flops = 2 * n * nl * (4 * t * d * d + 2 * t * t * d
                          + 2 * s * d * d + 2 * t * d * d + 2 * t * s * d
                          + 2 * t * d * f_ff)
    trans = n * nl * (t * t + t * s)
    bytes_acc = 4 * (n * t * d * 2 + n * s * d + sum(int(a.size) for a in weights))
    in_specs = [pl.BlockSpec((b, t, d), lambda i: (i, 0, 0)),
                pl.BlockSpec((b, s, d), lambda i: (i, 0, 0))]
    in_specs += [_replicated_spec(a) for a in weights]
    return pl.pallas_call(
        functools.partial(_decoder_stack_kernel, n_layers=nl),
        out_shape=jax.ShapeDtypeStruct((n, t, d), tgt.dtype),
        grid=(pl.cdiv(n, b),),
        in_specs=in_specs,
        out_specs=pl.BlockSpec((b, t, d), lambda i: (i, 0, 0)),
        compiler_params=pltpu.CompilerParams(
            dimension_semantics=("parallel",),
            vmem_limit_bytes=32 * 1024 * 1024),
        cost_estimate=pl.CostEstimate(flops=int(flops), transcendentals=int(trans),
                                      bytes_accessed=int(bytes_acc)),
    )(tgt, mem, *weights)


# ----------------------------------------------------------------------------
# Fused output heads: alph_fc / rgb_proj(+ReLU) / rgb_fc in one kernel with a
# single lane-dense 128-wide output slab:
#   lanes [0:R)      = rgb_proj = relu(x @ Wp + bp)
#   lane  [R]        = alph     = x @ Wa + ba
#   lanes [R+1:R+4)  = rgb      = rgb_proj @ Wr + br
# Weights are pre-padded host-side so the kernel needs no lane slicing/concat.
# ----------------------------------------------------------------------------
def _heads_kernel(x_ref, w1_ref, b1_ref, w2_ref, b2_ref, o_ref, *, relu_lanes):
    x = x_ref[...].astype(jnp.float32)
    z = jnp.dot(x, w1_ref[...], preferred_element_type=jnp.float32) + b1_ref[...]
    lane = jax.lax.broadcasted_iota(jnp.int32, z.shape, dimension=1)
    h = jnp.where(lane < relu_lanes, jnp.maximum(z, 0.0), z)
    out = h + jnp.dot(h, w2_ref[...], preferred_element_type=jnp.float32) + b2_ref[...]
    o_ref[...] = out.astype(o_ref.dtype)


def _build_head_weights(params, R, slab):
    D = params["rgbp_w"].shape[0]
    w1 = jnp.zeros((D, slab), jnp.float32)
    w1 = w1.at[:, :R].set(params["rgbp_w"]).at[:, R:R + 1].set(params["alph_w"])
    b1 = jnp.zeros((1, slab), jnp.float32)
    b1 = b1.at[:, :R].set(params["rgbp_b"]).at[:, R:R + 1].set(params["alph_b"])
    w2 = jnp.zeros((slab, slab), jnp.float32)
    w2 = w2.at[:R, R + 1:R + 4].set(params["rgb_w"])
    b2 = jnp.zeros((1, slab), jnp.float32)
    b2 = b2.at[:, R + 1:R + 4].set(params["rgb_b"])
    return w1, b1, w2, b2


def pallas_heads(x_flat, w1, b1, w2, b2, relu_lanes, *, tile=2048):
    T, din = x_flat.shape
    slab = w1.shape[1]
    t = min(tile, _round_up(T, 8))
    return pl.pallas_call(
        functools.partial(_heads_kernel, relu_lanes=relu_lanes),
        out_shape=jax.ShapeDtypeStruct((T, slab), x_flat.dtype),
        grid=(pl.cdiv(T, t),),
        in_specs=[pl.BlockSpec((t, din), lambda i: (i, 0)),
                  _replicated_spec(w1), _replicated_spec(b1),
                  _replicated_spec(w2), _replicated_spec(b2)],
        out_specs=pl.BlockSpec((t, slab), lambda i: (i, 0)),
        compiler_params=pltpu.CompilerParams(dimension_semantics=("parallel",)),
    )(x_flat, w1, b1, w2, b2)


# ----------------------------------------------------------------------------
# NeRF positional encoding (Embedder, include_input=False, log sampling).
# Pure elementwise preprocessing; kept in plain JAX glue.
# TODO(synk): Embedder_BARF progressive frequency masking (use_barf_pe=True)
#             and encoder_input_method variants other than 'concat' are not
#             implemented (module defaults used here).
# ----------------------------------------------------------------------------
def pos_encode(x, num_freqs):
    outs = []
    for i in range(num_freqs):
        f = 2.0 ** i
        outs.append(jnp.sin(x * f))
        outs.append(jnp.cos(x * f))
    return jnp.concatenate(outs, axis=-1)


# ----------------------------------------------------------------------------
# Full forward pass (encoder_input_method='concat', use_barf_pe=False, eval)
# ----------------------------------------------------------------------------
def self_attention_encoder_forward(x, params, cfg):
    n_sur = cfg["n_sur_pts"]
    n_nxt = cfg["n_nxt_ray_pts"]
    D = cfg["alph_embed_dim"]
    R = cfg["rgb_embed_dim"]
    s_tot = 1 + n_sur + n_nxt
    chan = 10 + 2 * D + R
    n_rays = x.shape[0] // s_tot
    x = x.reshape(n_rays, s_tot, chan)

    sur_pts = x[..., 0:3]
    alph_embed = x[..., 4:4 + D]
    rgb_embed = x[..., 7 + D:7 + D + R]
    viewdirs = x[..., 7 + D + R:10 + D + R]
    # (alph, rgb, coarse_alph_embed slices are unused by the forward pass)

    # --- encoder inputs: concat alpha / rgb embeddings of surrounding pts ---
    sur_embed = jnp.concatenate(
        [alph_embed[:, 1:1 + n_sur], rgb_embed[:, 1:1 + n_sur]], axis=-1)
    sur_embed = pallas_linear(sur_embed.reshape(n_rays * n_sur, D + R),
                              params["enc_in_w"], params["enc_in_b"],
                              act="relu").reshape(n_rays, n_sur, D)

    # --- decoder inputs: PE(xyz) ++ PE(viewdirs) -> linear+relu ---
    dec_xyz = jnp.concatenate([sur_pts[:, 0:1], sur_pts[:, 1 + n_sur:]], axis=1)
    dec_xyz = pos_encode(dec_xyz.reshape(-1, 3), cfg["pe_multires"])
    dec_vd = jnp.concatenate([viewdirs[:, 0:1], viewdirs[:, 1 + n_sur:]], axis=1)
    dec_vd = pos_encode(dec_vd.reshape(-1, 3), cfg["pe_multires_views"])
    dec_in = jnp.concatenate([dec_xyz, dec_vd], axis=-1)
    dec_in = pallas_linear(dec_in, params["dec_in_w"], params["dec_in_b"],
                           act="relu").reshape(n_rays, 1 + n_nxt, D)

    # --- fused transformer encoder stack (+ seq-max) and decoder stack ---
    enc_out, surround_embed = pallas_encoder_stack(sur_embed, params["encoder_layers"])
    dec_out = pallas_decoder_stack(dec_in, enc_out, params["decoder_layers"])

    # --- heads applied once on the concatenated token stream (identical math:
    #     heads are pointwise linears, so head(concat) == concat(head)) ---
    alph_proj = jnp.concatenate([dec_out[:, 0:1], enc_out, dec_out[:, 1:]], axis=1)
    slab = max(128, _round_up(R + 4, 128))
    hw1, hb1, hw2, hb2 = _build_head_weights(params, R, slab)
    head_out = pallas_heads(alph_proj.reshape(n_rays * s_tot, D),
                            hw1, hb1, hw2, hb2, R)
    rgb_proj = head_out[:, :R].reshape(n_rays, s_tot, R)
    alph = head_out[:, R:R + 1].reshape(n_rays, s_tot, 1)
    rgb = head_out[:, R + 1:R + 4].reshape(n_rays, s_tot, 3)
    return alph, alph_proj, rgb, rgb_proj, surround_embed


# ----------------------------------------------------------------------------
# Deterministic synthetic parameter init (shapes follow the module __init__,
# QKV weights stored pre-split per the attention-projection layout).
# ----------------------------------------------------------------------------
def init_params(key, cfg):
    D = cfg["alph_embed_dim"]
    R = cfg["rgb_embed_dim"]
    f_enc = cfg["dim_ff"]
    f_dec = cfg["dec_dim_ff"]            # PyTorch TransformerDecoderLayer default
    xyz_dim = 3 * 2 * cfg["pe_multires"]
    view_dim = 3 * 2 * cfg["pe_multires_views"]
    kit = iter(jax.random.split(key, 1024))

    def wgt(shape, scale=0.1):
        return scale * jax.random.normal(next(kit), shape, jnp.float32)

    def lin(din, dout):
        return wgt((din, dout)), wgt((1, dout))

    p = {}
    p["enc_in_w"], p["enc_in_b"] = lin(D + R, D)               # encoder_in_fc
    p["dec_in_w"], p["dec_in_b"] = lin(xyz_dim + view_dim, D)  # decoder_in_fc
    p["alph_w"], p["alph_b"] = lin(D, 1)                       # alph_fc
    p["rgbp_w"], p["rgbp_b"] = lin(D, R)                       # rgb_proj
    p["rgb_w"], p["rgb_b"] = lin(R, 3)                         # rgb_fc

    def attn_block(prefix=""):
        lp = {}
        lp[prefix + "wq"], lp[prefix + "bq"] = lin(D, D)
        lp[prefix + "wk"], lp[prefix + "bk"] = lin(D, D)
        lp[prefix + "wv"], lp[prefix + "bv"] = lin(D, D)
        lp[prefix + "wo"], lp[prefix + "bo"] = lin(D, D)
        return lp

    enc_layers = []
    for _ in range(cfg["n_encoder_layers"]):
        lp = attn_block()
        lp["ln1w"], lp["ln1b"] = jnp.ones((1, D)), jnp.zeros((1, D))
        lp["w1"], lp["b1"] = lin(D, f_enc)
        lp["w2"], lp["b2"] = lin(f_enc, D)
        lp["ln2w"], lp["ln2b"] = jnp.ones((1, D)), jnp.zeros((1, D))
        enc_layers.append(lp)
    p["encoder_layers"] = enc_layers

    dec_layers = []
    for _ in range(cfg["n_decoder_layers"]):
        lp = {}
        lp.update({("sa_" + k): v for k, v in attn_block().items()})
        lp["ln1w"], lp["ln1b"] = jnp.ones((1, D)), jnp.zeros((1, D))
        lp.update({("ca_" + k): v for k, v in attn_block().items()})
        lp["ln2w"], lp["ln2b"] = jnp.ones((1, D)), jnp.zeros((1, D))
        lp["w1"], lp["b1"] = lin(D, f_dec)
        lp["w2"], lp["b2"] = lin(f_dec, D)
        lp["ln3w"], lp["ln3b"] = jnp.ones((1, D)), jnp.zeros((1, D))
        dec_layers.append(lp)
    p["decoder_layers"] = dec_layers
    return p


# ----------------------------------------------------------------------------
if __name__ == "__main__":
    cfg = dict(
        n_sur_pts=8, n_nxt_ray_pts=7,
        alph_embed_dim=32, rgb_embed_dim=16,
        n_heads=1, dim_ff=64, dec_dim_ff=2048,
        n_encoder_layers=2, n_decoder_layers=2,
        pe_multires=4, pe_multires_views=3,
    )
    n_rays = 4
    s_tot = 1 + cfg["n_sur_pts"] + cfg["n_nxt_ray_pts"]            # 16
    chan = 10 + 2 * cfg["alph_embed_dim"] + cfg["rgb_embed_dim"]   # 90

    key = jax.random.PRNGKey(0)
    k_in, k_par = jax.random.split(key)
    x = jax.random.normal(k_in, (n_rays * s_tot, chan), jnp.float32)
    params = init_params(k_par, cfg)

    fwd = jax.jit(functools.partial(self_attention_encoder_forward, cfg=cfg))
    alph, alph_proj, rgb, rgb_proj, surround_embed = jax.block_until_ready(
        fwd(x, params))

    assert alph.shape == (n_rays, s_tot, 1)
    assert alph_proj.shape == (n_rays, s_tot, cfg["alph_embed_dim"])
    assert rgb.shape == (n_rays, s_tot, 3)
    assert rgb_proj.shape == (n_rays, s_tot, cfg["rgb_embed_dim"])
    assert surround_embed.shape == (n_rays, cfg["alph_embed_dim"])
    assert all(bool(jnp.all(jnp.isfinite(o))) for o in
               (alph, alph_proj, rgb, rgb_proj, surround_embed))
    print("KERNEL_OK")
</pallas_src>

<mosaic_0001>
module attributes {stable_mosaic.version = 11 : i64} {
  func.func @_linear_kernel(%arg0: i32, %arg1: memref<32x42xf32, #tpu.memory_space<vmem>>, %arg2: memref<42x32xf32, #tpu.memory_space<vmem>>, %arg3: memref<1x32xf32, #tpu.memory_space<vmem>>, %arg4: memref<32x32xf32, #tpu.memory_space<vmem>>) attributes {dimension_semantics = [#tpu.dimension_semantics<parallel>], iteration_bounds = array<i64: 1>, scalar_prefetch = 0 : i64, scratch_operands = 0 : i64, tpu.core_type = #tpu.core_type<tc>, window_params = [{transform_indices = @transform_0, window_bounds = array<i64: 32, 42>}, {pipeline_mode = #tpu.pipeline_mode<synchronous>, transform_indices = @transform_1, window_bounds = array<i64: 42, 32>}, {pipeline_mode = #tpu.pipeline_mode<synchronous>, transform_indices = @transform_2, window_bounds = array<i64: 1, 32>}, {transform_indices = @transform_3, window_bounds = array<i64: 32, 32>}]} {
    %c0 = arith.constant 0 : index
    %c0_0 = arith.constant 0 : index
    %0 = vector.load %arg1[%c0, %c0_0] : memref<32x42xf32, #tpu.memory_space<vmem>>, vector<32x42xf32>
    %c0_1 = arith.constant 0 : index
    %c0_2 = arith.constant 0 : index
    %1 = vector.load %arg2[%c0_1, %c0_2] : memref<42x32xf32, #tpu.memory_space<vmem>>, vector<42x32xf32>
    %cst = arith.constant dense<0.000000e+00> : vector<32x32xf32>
    %2 = tpu.matmul %0, %1, %cst {dimension_numbers = #tpu.dot_dimension_numbers<[1], [0], [0], [1], [0, 0, 1, 1], [], []>} : vector<32x42xf32>, vector<42x32xf32>, vector<32x32xf32> -> vector<32x32xf32>
    %c0_3 = arith.constant 0 : index
    %c0_4 = arith.constant 0 : index
    %3 = vector.load %arg3[%c0_3, %c0_4] : memref<1x32xf32, #tpu.memory_space<vmem>>, vector<1x32xf32>
    %4 = vector.broadcast %3 : vector<1x32xf32> to vector<32x32xf32>
    %5 = arith.addf %2, %4 : vector<32x32xf32>
    %cst_5 = arith.constant 0.000000e+00 : f32
    %6 = vector.broadcast %cst_5 : f32 to vector<32x32xf32>
    %7 = arith.maximumf %5, %6 : vector<32x32xf32>
    %c0_6 = arith.constant 0 : index
    %c0_7 = arith.constant 0 : index
    %8 = vector.load %arg4[%c0_6, %c0_7] : memref<32x32xf32, #tpu.memory_space<vmem>>, vector<32x32xf32>
    tpu.vector_store %arg4[%c0_6, %c0_7], %7 {strides = array<i32>} : memref<32x32xf32, #tpu.memory_space<vmem>>, vector<32x32xf32>,
    return
  }
  func.func @transform_0(%arg0: i32) -> (i32, i32) {
    %c0_i32 = arith.constant 0 : i32
    %c0_i32_0 = arith.constant 0 : i32
    return %arg0, %c0_i32 : i32, i32
  }
  func.func @transform_1(%arg0: i32) -> (i32, i32) {
    %c0_i32 = arith.constant 0 : i32
    %c0_i32_0 = arith.constant 0 : i32
    %c0_i32_1 = arith.constant 0 : i32
    return %c0_i32, %c0_i32_0 : i32, i32
  }
  func.func @transform_2(%arg0: i32) -> (i32, i32) {
    %c0_i32 = arith.constant 0 : i32
    %c0_i32_0 = arith.constant 0 : i32
    %c0_i32_1 = arith.constant 0 : i32
    return %c0_i32, %c0_i32_0 : i32, i32
  }
  func.func @transform_3(%arg0: i32) -> (i32, i32) {
    %c0_i32 = arith.constant 0 : i32
    %c0_i32_0 = arith.constant 0 : i32
    return %arg0, %c0_i32 : i32, i32
  }
}

module attributes {stable_mosaic.version = 11 : i64} {
  func.func @_linear_kernel(%arg0: i32, %arg1: memref<32x48xf32, #tpu.memory_space<vmem>>, %arg2: memref<48x32xf32, #tpu.memory_space<vmem>>, %arg3: memref<1x32xf32, #tpu.memory_space<vmem>>, %arg4: memref<32x32xf32, #tpu.memory_space<vmem>>) attributes {dimension_semantics = [#tpu.dimension_semantics<parallel>], iteration_bounds = array<i64: 1>, scalar_prefetch = 0 : i64, scratch_operands = 0 : i64, tpu.core_type = #tpu.core_type<tc>, window_params = [{transform_indices = @transform_0, window_bounds = array<i64: 32, 48>}, {pipeline_mode = #tpu.pipeline_mode<synchronous>, transform_indices = @transform_1, window_bounds = array<i64: 48, 32>}, {pipeline_mode = #tpu.pipeline_mode<synchronous>, transform_indices = @transform_2, window_bounds = array<i64: 1, 32>}, {transform_indices = @transform_3, window_bounds = array<i64: 32, 32>}]} {
    %c0 = arith.constant 0 : index
    %c0_0 = arith.constant 0 : index
    %0 = vector.load %arg1[%c0, %c0_0] : memref<32x48xf32, #tpu.memory_space<vmem>>, vector<32x48xf32>
    %c0_1 = arith.constant 0 : index
    %c0_2 = arith.constant 0 : index
    %1 = vector.load %arg2[%c0_1, %c0_2] : memref<48x32xf32, #tpu.memory_space<vmem>>, vector<48x32xf32>
    %cst = arith.constant dense<0.000000e+00> : vector<32x32xf32>
    %2 = tpu.matmul %0, %1, %cst {dimension_numbers = #tpu.dot_dimension_numbers<[1], [0], [0], [1], [0, 0, 1, 1], [], []>} : vector<32x48xf32>, vector<48x32xf32>, vector<32x32xf32> -> vector<32x32xf32>
    %c0_3 = arith.constant 0 : index
    %c0_4 = arith.constant 0 : index
    %3 = vector.load %arg3[%c0_3, %c0_4] : memref<1x32xf32, #tpu.memory_space<vmem>>, vector<1x32xf32>
    %4 = vector.broadcast %3 : vector<1x32xf32> to vector<32x32xf32>
    %5 = arith.addf %2, %4 : vector<32x32xf32>
    %cst_5 = arith.constant 0.000000e+00 : f32
    %6 = vector.broadcast %cst_5 : f32 to vector<32x32xf32>
    %7 = arith.maximumf %5, %6 : vector<32x32xf32>
    %c0_6 = arith.constant 0 : index
    %c0_7 = arith.constant 0 : index
    %8 = vector.load %arg4[%c0_6, %c0_7] : memref<32x32xf32, #tpu.memory_space<vmem>>, vector<32x32xf32>
    tpu.vector_store %arg4[%c0_6, %c0_7], %7 {strides = array<i32>} : memref<32x32xf32, #tpu.memory_space<vmem>>, vector<32x32xf32>,
    return
  }
  func.func @transform_0(%arg0: i32) -> (i32, i32) {
    %c0_i32 = arith.constant 0 : i32
    %c0_i32_0 = arith.constant 0 : i32
    return %arg0, %c0_i32 : i32, i32
  }
  func.func @transform_1(%arg0: i32) -> (i32, i32) {
    %c0_i32 = arith.constant 0 : i32
    %c0_i32_0 = arith.constant 0 : i32
    %c0_i32_1 = arith.constant 0 : i32
    return %c0_i32, %c0_i32_0 : i32, i32
  }
  func.func @transform_2(%arg0: i32) -> (i32, i32) {
    %c0_i32 = arith.constant 0 : i32
    %c0_i32_0 = arith.constant 0 : i32
    %c0_i32_1 = arith.constant 0 : i32
    return %c0_i32, %c0_i32_0 : i32, i32
  }
  func.func @transform_3(%arg0: i32) -> (i32, i32) {
    %c0_i32 = arith.constant 0 : i32
    %c0_i32_0 = arith.constant 0 : i32
    return %arg0, %c0_i32 : i32, i32
  }
}

module attributes {stable_mosaic.version = 11 : i64} {
  func.func @_encoder_stack_kernel(%arg0: i32, %arg1: memref<4x8x32xf32, #tpu.memory_space<vmem>>, %arg2: memref<32x32xf32, #tpu.memory_space<vmem>>, %arg3: memref<32x32xf32, #tpu.memory_space<vmem>>, %arg4: memref<32x32xf32, #tpu.memory_space<vmem>>, %arg5: memref<1x32xf32, #tpu.memory_space<vmem>>, %arg6: memref<1x32xf32, #tpu.memory_space<vmem>>, %arg7: memref<1x32xf32, #tpu.memory_space<vmem>>, %arg8: memref<32x32xf32, #tpu.memory_space<vmem>>, %arg9: memref<1x32xf32, #tpu.memory_space<vmem>>, %arg10: memref<1x32xf32, #tpu.memory_space<vmem>>, %arg11: memref<1x32xf32, #tpu.memory_space<vmem>>, %arg12: memref<32x64xf32, #tpu.memory_space<vmem>>, %arg13: memref<1x64xf32, #tpu.memory_space<vmem>>, %arg14: memref<64x32xf32, #tpu.memory_space<vmem>>, %arg15: memref<1x32xf32, #tpu.memory_space<vmem>>, %arg16: memref<1x32xf32, #tpu.memory_space<vmem>>, %arg17: memref<1x32xf32, #tpu.memory_space<vmem>>, %arg18: memref<32x32xf32, #tpu.memory_space<vmem>>, %arg19: memref<32x32xf32, #tpu.memory_space<vmem>>, %arg20: memref<32x32xf32, #tpu.memory_space<vmem>>, %arg21: memref<1x32xf32, #tpu.memory_space<vmem>>, %arg22: memref<1x32xf32, #tpu.memory_space<vmem>>, %arg23: memref<1x32xf32, #tpu.memory_space<vmem>>, %arg24: memref<32x32xf32, #tpu.memory_space<vmem>>, %arg25: memref<1x32xf32, #tpu.memory_space<vmem>>, %arg26: memref<1x32xf32, #tpu.memory_space<vmem>>, %arg27: memref<1x32xf32, #tpu.memory_space<vmem>>, %arg28: memref<32x64xf32, #tpu.memory_space<vmem>>, %arg29: memref<1x64xf32, #tpu.memory_space<vmem>>, %arg30: memref<64x32xf32, #tpu.memory_space<vmem>>, %arg31: memref<1x32xf32, #tpu.memory_space<vmem>>, %arg32: memref<1x32xf32, #tpu.memory_space<vmem>>, %arg33: memref<1x32xf32, #tpu.memory_space<vmem>>, %arg34: memref<4x8x32xf32, #tpu.memory_space<vmem>>, %arg35: memref<4x32xf32, #tpu.memory_space<vmem>>) attributes {dimension_semantics = [#tpu.dimension_semantics<parallel>], iteration_bounds = array<i64: 1>, scalar_prefetch = 0 : i64, scratch_operands = 0 : i64, tpu.core_type = #tpu.core_type<tc>, window_params = [{transform_indices = @transform_0, window_bounds = array<i64: 4, 8, 32>}, {pipeline_mode = #tpu.pipeline_mode<synchronous>, transform_indices = @transform_1, window_bounds = array<i64: 32, 32>}, {pipeline_mode = #tpu.pipeline_mode<synchronous>, transform_indices = @transform_2, window_bounds = array<i64: 32, 32>}, {pipeline_mode = #tpu.pipeline_mode<synchronous>, transform_indices = @transform_3, window_bounds = array<i64: 32, 32>}, {pipeline_mode = #tpu.pipeline_mode<synchronous>, transform_indices = @transform_4, window_bounds = array<i64: 1, 32>}, {pipeline_mode = #tpu.pipeline_mode<synchronous>, transform_indices = @transform_5, window_bounds = array<i64: 1, 32>}, {pipeline_mode = #tpu.pipeline_mode<synchronous>, transform_indices = @transform_6, window_bounds = array<i64: 1, 32>}, {pipeline_mode = #tpu.pipeline_mode<synchronous>, transform_indices = @transform_7, window_bounds = array<i64: 32, 32>}, {pipeline_mode = #tpu.pipeline_mode<synchronous>, transform_indices = @transform_8, window_bounds = array<i64: 1, 32>}, {pipeline_mode = #tpu.pipeline_mode<synchronous>, transform_indices = @transform_9, window_bounds = array<i64: 1, 32>}, {pipeline_mode = #tpu.pipeline_mode<synchronous>, transform_indices = @transform_10, window_bounds = array<i64: 1, 32>}, {pipeline_mode = #tpu.pipeline_mode<synchronous>, transform_indices = @transform_11, window_bounds = array<i64: 32, 64>}, {pipeline_mode = #tpu.pipeline_mode<synchronous>, transform_indices = @transform_12, window_bounds = array<i64: 1, 64>}, {pipeline_mode = #tpu.pipeline_mode<synchronous>, transform_indices = @transform_13, window_bounds = array<i64: 64, 32>}, {pipeline_mode = #tpu.pipeline_mode<synchronous>, transform_indices = @transform_14, window_bounds = array<i64: 1, 32>}, {pipeline_mode = #tpu.pipeline_mode<synchronous>, transform_indices = @transform_15, window_bounds = array<i64: 1, 32>}, {pipeline_mode = #tpu.pipeline_mode<synchronous>, transform_indices = @transform_16, window_bounds = array<i64: 1, 32>}, {pipeline_mode = #tpu.pipeline_mode<synchronous>, transform_indices = @transform_17, window_bounds = array<i64: 32, 32>}, {pipeline_mode = #tpu.pipeline_mode<synchronous>, transform_indices = @transform_18, window_bounds = array<i64: 32, 32>}, {pipeline_mode = #tpu.pipeline_mode<synchronous>, transform_indices = @transform_19, window_bounds = array<i64: 32, 32>}, {pipeline_mode = #tpu.pipeline_mode<synchronous>, transform_indices = @transform_20, window_bounds = array<i64: 1, 32>}, {pipeline_mode = #tpu.pipeline_mode<synchronous>, transform_indices = @transform_21, window_bounds = array<i64: 1, 32>}, {pipeline_mode = #tpu.pipeline_mode<synchronous>, transform_indices = @transform_22, window_bounds = array<i64: 1, 32>}, {pipeline_mode = #tpu.pipeline_mode<synchronous>, transform_indices = @transform_23, window_bounds = array<i64: 32, 32>}, {pipeline_mode = #tpu.pipeline_mode<synchronous>, transform_indices = @transform_24, window_bounds = array<i64: 1, 32>}, {pipeline_mode = #tpu.pipeline_mode<synchronous>, transform_indices = @transform_25, window_bounds = array<i64: 1, 32>}, {pipeline_mode = #tpu.pipeline_mode<synchronous>, transform_indices = @transform_26, window_bounds = array<i64: 1, 32>}, {pipeline_mode = #tpu.pipeline_mode<synchronous>, transform_indices = @transform_27, window_bounds = array<i64: 32, 64>}, {pipeline_mode = #tpu.pipeline_mode<synchronous>, transform_indices = @transform_28, window_bounds = array<i64: 1, 64>}, {pipeline_mode = #tpu.pipeline_mode<synchronous>, transform_indices = @transform_29, window_bounds = array<i64: 64, 32>}, {pipeline_mode = #tpu.pipeline_mode<synchronous>, transform_indices = @transform_30, window_bounds = array<i64: 1, 32>}, {pipeline_mode = #tpu.pipeline_mode<synchronous>, transform_indices = @transform_31, window_bounds = array<i64: 1, 32>}, {pipeline_mode = #tpu.pipeline_mode<synchronous>, transform_indices = @transform_32, window_bounds = array<i64: 1, 32>}, {transform_indices = @transform_33, window_bounds = array<i64: 4, 8, 32>}, {transform_indices = @transform_34, window_bounds = array<i64: 4, 32>}]} {
    %c0 = arith.constant 0 : index
    %c0_0 = arith.constant 0 : index
    %c0_1 = arith.constant 0 : index
    %0 = vector.load %arg1[%c0, %c0_0, %c0_1] : memref<4x8x32xf32, #tpu.memory_space<vmem>>, vector<4x8x32xf32>
    %1 = vector.shape_cast %0 : vector<4x8x32xf32> to vector<32x32xf32>
    %c0_2 = arith.constant 0 : index
    %c0_3 = arith.constant 0 : index
    %2 = vector.load %arg2[%c0_2, %c0_3] : memref<32x32xf32, #tpu.memory_space<vmem>>, vector<32x32xf32>
    %c0_4 = arith.constant 0 : index
    %c0_5 = arith.constant 0 : index
    %3 = vector.load %arg3[%c0_4, %c0_5] : memref<32x32xf32, #tpu.memory_space<vmem>>, vector<32x32xf32>
    %c0_6 = arith.constant 0 : index
    %c0_7 = arith.constant 0 : index
    %4 = vector.load %arg4[%c0_6, %c0_7] : memref<32x32xf32, #tpu.memory_space<vmem>>, vector<32x32xf32>
    %c0_8 = arith.constant 0 : index
    %c0_9 = arith.constant 0 : index
    %5 = vector.load %arg5[%c0_8, %c0_9] : memref<1x32xf32, #tpu.memory_space<vmem>>, vector<1x32xf32>
    %c0_10 = arith.constant 0 : index
    %c0_11 = arith.constant 0 : index
    %6 = vector.load %arg6[%c0_10, %c0_11] : memref<1x32xf32, #tpu.memory_space<vmem>>, vector<1x32xf32>
    %c0_12 = arith.constant 0 : index
    %c0_13 = arith.constant 0 : index
    %7 = vector.load %arg7[%c0_12, %c0_13] : memref<1x32xf32, #tpu.memory_space<vmem>>, vector<1x32xf32>
    %c0_14 = arith.constant 0 : index
    %c0_15 = arith.constant 0 : index
    %8 = vector.load %arg8[%c0_14, %c0_15] : memref<32x32xf32, #tpu.memory_space<vmem>>, vector<32x32xf32>
    %c0_16 = arith.constant 0 : index
    %c0_17 = arith.constant 0 : index
    %9 = vector.load %arg9[%c0_16, %c0_17] : memref<1x32xf32, #tpu.memory_space<vmem>>, vector<1x32xf32>
    %c0_18 = arith.constant 0 : index
    %c0_19 = arith.constant 0 : index
    %10 = vector.load %arg10[%c0_18, %c0_19] : memref<1x32xf32, #tpu.memory_space<vmem>>, vector<1x32xf32>
    %c0_20 = arith.constant 0 : index
    %c0_21 = arith.constant 0 : index
    %11 = vector.load %arg11[%c0_20, %c0_21] : memref<1x32xf32, #tpu.memory_space<vmem>>, vector<1x32xf32>
    %c0_22 = arith.constant 0 : index
    %c0_23 = arith.constant 0 : index
    %12 = vector.load %arg12[%c0_22, %c0_23] : memref<32x64xf32, #tpu.memory_space<vmem>>, vector<32x64xf32>
    %c0_24 = arith.constant 0 : index
    %c0_25 = arith.constant 0 : index
    %13 = vector.load %arg13[%c0_24, %c0_25] : memref<1x64xf32, #tpu.memory_space<vmem>>, vector<1x64xf32>
    %c0_26 = arith.constant 0 : index
    %c0_27 = arith.constant 0 : index
    %14 = vector.load %arg14[%c0_26, %c0_27] : memref<64x32xf32, #tpu.memory_space<vmem>>, vector<64x32xf32>
    %c0_28 = arith.constant 0 : index
    %c0_29 = arith.constant 0 : index
    %15 = vector.load %arg15[%c0_28, %c0_29] : memref<1x32xf32, #tpu.memory_space<vmem>>, vector<1x32xf32>
    %c0_30 = arith.constant 0 : index
    %c0_31 = arith.constant 0 : index
    %16 = vector.load %arg16[%c0_30, %c0_31] : memref<1x32xf32, #tpu.memory_space<vmem>>, vector<1x32xf32>
    %c0_32 = arith.constant 0 : index
    %c0_33 = arith.constant 0 : index
    %17 = vector.load %arg17[%c0_32, %c0_33] : memref<1x32xf32, #tpu.memory_space<vmem>>, vector<1x32xf32>
    %cst = arith.constant dense<0.000000e+00> : vector<32x32xf32>
    %18 = tpu.matmul %1, %2, %cst {dimension_numbers = #tpu.dot_dimension_numbers<[1], [0], [0], [1], [0, 0, 1, 1], [], []>} : vector<32x32xf32>, vector<32x32xf32>, vector<32x32xf32> -> vector<32x32xf32>
    %19 = vector.broadcast %5 : vector<1x32xf32> to vector<32x32xf32>
    %20 = arith.addf %18, %19 : vector<32x32xf32>
    %21 = vector.shape_cast %20 : vector<32x32xf32> to vector<4x8x32xf32>
    %cst_34 = arith.constant dense<0.000000e+00> : vector<32x32xf32>
    %22 = tpu.matmul %1, %3, %cst_34 {dimension_numbers = #tpu.dot_dimension_numbers<[1], [0], [0], [1], [0, 0, 1, 1], [], []>} : vector<32x32xf32>, vector<32x32xf32>, vector<32x32xf32> -> vector<32x32xf32>
    %23 = vector.broadcast %6 : vector<1x32xf32> to vector<32x32xf32>
    %24 = arith.addf %22, %23 : vector<32x32xf32>
    %25 = vector.shape_cast %24 : vector<32x32xf32> to vector<4x8x32xf32>
    %cst_35 = arith.constant dense<0.000000e+00> : vector<32x32xf32>
    %26 = tpu.matmul %1, %4, %cst_35 {dimension_numbers = #tpu.dot_dimension_numbers<[1], [0], [0], [1], [0, 0, 1, 1], [], []>} : vector<32x32xf32>, vector<32x32xf32>, vector<32x32xf32> -> vector<32x32xf32>
    %27 = vector.broadcast %7 : vector<1x32xf32> to vector<32x32xf32>
    %28 = arith.addf %26, %27 : vector<32x32xf32>
    %29 = vector.shape_cast %28 : vector<32x32xf32> to vector<4x8x32xf32>
    "tpu.trace_start"() <{level = 10 : i32, message = "bqd,bkd->bqk"}> : () -> ()
    %cst_36 = arith.constant dense<0.000000e+00> : vector<4x8x8xf32>
    %30 = tpu.matmul %21, %25, %cst_36 {dimension_numbers = #tpu.dot_dimension_numbers<[2], [2], [1], [1], [0, 0, 0, 1, 1, 1], [0], [0]>} : vector<4x8x32xf32>, vector<4x8x32xf32>, vector<4x8x8xf32> -> vector<4x8x8xf32>
    "tpu.trace_stop"() : () -> ()
    %cst_37 = arith.constant 0.176776692 : f32
    %31 = vector.broadcast %cst_37 : f32 to vector<4x8x8xf32>
    %32 = arith.mulf %30, %31 : vector<4x8x8xf32>
    %cst_38 = arith.constant dense<0xFF800000> : vector<4x8xf32>
    %33 = vector.multi_reduction <maximumf>, %32, %cst_38 [2] : vector<4x8x8xf32> to vector<4x8xf32>
    %34 = vector.shape_cast %33 : vector<4x8xf32> to vector<4x8x1xf32>
    %35 = vector.broadcast %34 : vector<4x8x1xf32> to vector<4x8x8xf32>
    %36 = arith.subf %32, %35 : vector<4x8x8xf32>
    %37 = math.exp %36 : vector<4x8x8xf32>
    %cst_39 = arith.constant dense<0.000000e+00> : vector<4x8xf32>
    %38 = vector.multi_reduction <add>, %37, %cst_39 [2] : vector<4x8x8xf32> to vector<4x8xf32>
    %39 = vector.shape_cast %38 : vector<4x8xf32> to vector<4x8x1xf32>
    %40 = tpu.reciprocal %39 {approx = true} : vector<4x8x1xf32> -> vector<4x8x1xf32>
    %41 = vector.broadcast %40 : vector<4x8x1xf32> to vector<4x8x8xf32>
    %42 = arith.mulf %37, %41 : vector<4x8x8xf32>
    "tpu.trace_start"() <{level = 10 : i32, message = "bqk,bkd->bqd"}> : () -> ()
    %cst_40 = arith.constant dense<0.000000e+00> : vector<4x8x32xf32>
    %43 = tpu.matmul %42, %29, %cst_40 {dimension_numbers = #tpu.dot_dimension_numbers<[2], [1], [1], [2], [0, 0, 0, 1, 1, 2], [0], [0]>} : vector<4x8x8xf32>, vector<4x8x32xf32>, vector<4x8x32xf32> -> vector<4x8x32xf32>
    "tpu.trace_stop"() : () -> ()
    %44 = vector.shape_cast %43 : vector<4x8x32xf32> to vector<32x32xf32>
    %cst_41 = arith.constant dense<0.000000e+00> : vector<32x32xf32>
    %45 = tpu.matmul %44, %8, %cst_41 {dimension_numbers = #tpu.dot_dimension_numbers<[1], [0], [0], [1], [0, 0, 1, 1], [], []>} : vector<32x32xf32>, vector<32x32xf32>, vector<32x32xf32> -> vector<32x32xf32>
    %46 = vector.broadcast %9 : vector<1x32xf32> to vector<32x32xf32>
    %47 = arith.addf %45, %46 : vector<32x32xf32>
    %48 = arith.addf %1, %47 : vector<32x32xf32>
    %cst_42 = arith.constant dense<0.000000e+00> : vector<32xf32>
    %49 = vector.multi_reduction <add>, %48, %cst_42 [1] : vector<32x32xf32> to vector<32xf32>
    %50 = vector.shape_cast %49 : vector<32xf32> to vector<32x1xf32>
    %cst_43 = arith.constant 3.200000e+01 : f32
    %51 = vector.broadcast %cst_43 : f32 to vector<32x1xf32>
    %52 = arith.divf %50, %51 : vector<32x1xf32>
    %53 = vector.broadcast %52 : vector<32x1xf32> to vector<32x32xf32>
    %54 = arith.subf %48, %53 : vector<32x32xf32>
    %55 = arith.mulf %54, %54 : vector<32x32xf32>
    %cst_44 = arith.constant dense<0.000000e+00> : vector<32xf32>
    %56 = vector.multi_reduction <add>, %55, %cst_44 [1] : vector<32x32xf32> to vector<32xf32>
    %57 = vector.shape_cast %56 : vector<32xf32> to vector<32x1xf32>
    %cst_45 = arith.constant 3.200000e+01 : f32
    %58 = vector.broadcast %cst_45 : f32 to vector<32x1xf32>
    %59 = arith.divf %57, %58 : vector<32x1xf32>
    %60 = vector.broadcast %52 : vector<32x1xf32> to vector<32x32xf32>
    %61 = arith.subf %48, %60 : vector<32x32xf32>
    %cst_46 = arith.constant 9.99999974E-6 : f32
    %62 = vector.broadcast %cst_46 : f32 to vector<32x1xf32>
    %63 = arith.addf %59, %62 : vector<32x1xf32>
    %64 = math.rsqrt %63 : vector<32x1xf32>
    %65 = vector.broadcast %64 : vector<32x1xf32> to vector<32x32xf32>
    %66 = arith.mulf %61, %65 : vector<32x32xf32>
    %67 = vector.broadcast %10 : vector<1x32xf32> to vector<32x32xf32>
    %68 = arith.mulf %66, %67 : vector<32x32xf32>
    %69 = vector.broadcast %11 : vector<1x32xf32> to vector<32x32xf32>
    %70 = arith.addf %68, %69 : vector<32x32xf32>
    %cst_47 = arith.constant dense<0.000000e+00> : vector<32x64xf32>
    %71 = tpu.matmul %70, %12, %cst_47 {dimension_numbers = #tpu.dot_dimension_numbers<[1], [0], [0], [1], [0, 0, 1, 1], [], []>} : vector<32x32xf32>, vector<32x64xf32>, vector<32x64xf32> -> vector<32x64xf32>
    %72 = vector.broadcast %13 : vector<1x64xf32> to vector<32x64xf32>
    %73 = arith.addf %71, %72 : vector<32x64xf32>
    %cst_48 = arith.constant 0.000000e+00 : f32
    %74 = vector.broadcast %cst_48 : f32 to vector<32x64xf32>
    %75 = arith.maximumf %73, %74 : vector<32x64xf32>
    %cst_49 = arith.constant dense<0.000000e+00> : vector<32x32xf32>
    %76 = tpu.matmul %75, %14, %cst_49 {dimension_numbers = #tpu.dot_dimension_numbers<[1], [0], [0], [1], [0, 0, 1, 1], [], []>} : vector<32x64xf32>, vector<64x32xf32>, vector<32x32xf32> -> vector<32x32xf32>
    %77 = vector.broadcast %15 : vector<1x32xf32> to vector<32x32xf32>
    %78 = arith.addf %76, %77 : vector<32x32xf32>
    %79 = arith.addf %70, %78 : vector<32x32xf32>
    %cst_50 = arith.constant dense<0.000000e+00> : vector<32xf32>
    %80 = vector.multi_reduction <add>, %79, %cst_50 [1] : vector<32x32xf32> to vector<32xf32>
    %81 = vector.shape_cast %80 : vector<32xf32> to vector<32x1xf32>
    %cst_51 = arith.constant 3.200000e+01 : f32
    %82 = vector.broadcast %cst_51 : f32 to vector<32x1xf32>
    %83 = arith.divf %81, %82 : vector<32x1xf32>
    %84 = vector.broadcast %83 : vector<32x1xf32> to vector<32x32xf32>
    %85 = arith.subf %79, %84 : vector<32x32xf32>
    %86 = arith.mulf %85, %85 : vector<32x32xf32>
    %cst_52 = arith.constant dense<0.000000e+00> : vector<32xf32>
    %87 = vector.multi_reduction <add>, %86, %cst_52 [1] : vector<32x32xf32> to vector<32xf32>
    %88 = vector.shape_cast %87 : vector<32xf32> to vector<32x1xf32>
    %cst_53 = arith.constant 3.200000e+01 : f32
    %89 = vector.broadcast %cst_53 : f32 to vector<32x1xf32>
    %90 = arith.divf %88, %89 : vector<32x1xf32>
    %91 = vector.broadcast %83 : vector<32x1xf32> to vector<32x32xf32>
    %92 = arith.subf %79, %91 : vector<32x32xf32>
    %cst_54 = arith.constant 9.99999974E-6 : f32
    %93 = vector.broadcast %cst_54 : f32 to vector<32x1xf32>
    %94 = arith.addf %90, %93 : vector<32x1xf32>
    %95 = math.rsqrt %94 : vector<32x1xf32>
    %96 = vector.broadcast %95 : vector<32x1xf32> to vector<32x32xf32>
    %97 = arith.mulf %92, %96 : vector<32x32xf32>
    %98 = vector.broadcast %16 : vector<1x32xf32> to vector<32x32xf32>
    %99 = arith.mulf %97, %98 : vector<32x32xf32>
    %100 = vector.broadcast %17 : vector<1x32xf32> to vector<32x32xf32>
    %101 = arith.addf %99, %100 : vector<32x32xf32>
    %c0_55 = arith.constant 0 : index
    %c0_56 = arith.constant 0 : index
    %102 = vector.load %arg18[%c0_55, %c0_56] : memref<32x32xf32, #tpu.memory_space<vmem>>, vector<32x32xf32>
    %c0_57 = arith.constant 0 : index
    %c0_58 = arith.constant 0 : index
    %103 = vector.load %arg19[%c0_57, %c0_58] : memref<32x32xf32, #tpu.memory_space<vmem>>, vector<32x32xf32>
    %c0_59 = arith.constant 0 : index
    %c0_60 = arith.constant 0 : index
    %104 = vector.load %arg20[%c0_59, %c0_60] : memref<32x32xf32, #tpu.memory_space<vmem>>, vector<32x32xf32>
    %c0_61 = arith.constant 0 : index
    %c0_62 = arith.constant 0 : index
    %105 = vector.load %arg21[%c0_61, %c0_62] : memref<1x32xf32, #tpu.memory_space<vmem>>, vector<1x32xf32>
    %c0_63 = arith.constant 0 : index
    %c0_64 = arith.constant 0 : index
    %106 = vector.load %arg22[%c0_63, %c0_64] : memref<1x32xf32, #tpu.memory_space<vmem>>, vector<1x32xf32>
    %c0_65 = arith.constant 0 : index
    %c0_66 = arith.constant 0 : index
    %107 = vector.load %arg23[%c0_65, %c0_66] : memref<1x32xf32, #tpu.memory_space<vmem>>, vector<1x32xf32>
    %c0_67 = arith.constant 0 : index
    %c0_68 = arith.constant 0 : index
    %108 = vector.load %arg24[%c0_67, %c0_68] : memref<32x32xf32, #tpu.memory_space<vmem>>, vector<32x32xf32>
    %c0_69 = arith.constant 0 : index
    %c0_70 = arith.constant 0 : index
    %109 = vector.load %arg25[%c0_69, %c0_70] : memref<1x32xf32, #tpu.memory_space<vmem>>, vector<1x32xf32>
    %c0_71 = arith.constant 0 : index
    %c0_72 = arith.constant 0 : index
    %110 = vector.load %arg26[%c0_71, %c0_72] : memref<1x32xf32, #tpu.memory_space<vmem>>, vector<1x32xf32>
    %c0_73 = arith.constant 0 : index
    %c0_74 = arith.constant 0 : index
    %111 = vector.load %arg27[%c0_73, %c0_74] : memref<1x32xf32, #tpu.memory_space<vmem>>, vector<1x32xf32>
    %c0_75 = arith.constant 0 : index
    %c0_76 = arith.constant 0 : index
    %112 = vector.load %arg28[%c0_75, %c0_76] : memref<32x64xf32, #tpu.memory_space<vmem>>, vector<32x64xf32>
    %c0_77 = arith.constant 0 : index
    %c0_78 = arith.constant 0 : index
    %113 = vector.load %arg29[%c0_77, %c0_78] : memref<1x64xf32, #tpu.memory_space<vmem>>, vector<1x64xf32>
    %c0_79 = arith.constant 0 : index
    %c0_80 = arith.constant 0 : index
    %114 = vector.load %arg30[%c0_79, %c0_80] : memref<64x32xf32, #tpu.memory_space<vmem>>, vector<64x32xf32>
    %c0_81 = arith.constant 0 : index
    %c0_82 = arith.constant 0 : index
    %115 = vector.load %arg31[%c0_81, %c0_82] : memref<1x32xf32, #tpu.memory_space<vmem>>, vector<1x32xf32>
    %c0_83 = arith.constant 0 : index
    %c0_84 = arith.constant 0 : index
    %116 = vector.load %arg32[%c0_83, %c0_84] : memref<1x32xf32, #tpu.memory_space<vmem>>, vector<1x32xf32>
    %c0_85 = arith.constant 0 : index
    %c0_86 = arith.constant 0 : index
    %117 = vector.load %arg33[%c0_85, %c0_86] : memref<1x32xf32, #tpu.memory_space<vmem>>, vector<1x32xf32>
    %cst_87 = arith.constant dense<0.000000e+00> : vector<32x32xf32>
    %118 = tpu.matmul %101, %102, %cst_87 {dimension_numbers = #tpu.dot_dimension_numbers<[1], [0], [0], [1], [0, 0, 1, 1], [], []>} : vector<32x32xf32>, vector<32x32xf32>, vector<32x32xf32> -> vector<32x32xf32>
    %119 = vector.broadcast %105 : vector<1x32xf32> to vector<32x32xf32>
    %120 = arith.addf %118, %119 : vector<32x32xf32>
    %121 = vector.shape_cast %120 : vector<32x32xf32> to vector<4x8x32xf32>
    %cst_88 = arith.constant dense<0.000000e+00> : vector<32x32xf32>
    %122 = tpu.matmul %101, %103, %cst_88 {dimension_numbers = #tpu.dot_dimension_numbers<[1], [0], [0], [1], [0, 0, 1, 1], [], []>} : vector<32x32xf32>, vector<32x32xf32>, vector<32x32xf32> -> vector<32x32xf32>
    %123 = vector.broadcast %106 : vector<1x32xf32> to vector<32x32xf32>
    %124 = arith.addf %122, %123 : vector<32x32xf32>
    %125 = vector.shape_cast %124 : vector<32x32xf32> to vector<4x8x32xf32>
    %cst_89 = arith.constant dense<0.000000e+00> : vector<32x32xf32>
    %126 = tpu.matmul %101, %104, %cst_89 {dimension_numbers = #tpu.dot_dimension_numbers<[1], [0], [0], [1], [0, 0, 1, 1], [], []>} : vector<32x32xf32>, vector<32x32xf32>, vector<32x32xf32> -> vector<32x32xf32>
    %127 = vector.broadcast %107 : vector<1x32xf32> to vector<32x32xf32>
    %128 = arith.addf %126, %127 : vector<32x32xf32>
    %129 = vector.shape_cast %128 : vector<32x32xf32> to vector<4x8x32xf32>
    "tpu.trace_start"() <{level = 10 : i32, message = "bqd,bkd->bqk"}> : () -> ()
    %cst_90 = arith.constant dense<0.000000e+00> : vector<4x8x8xf32>
    %130 = tpu.matmul %121, %125, %cst_90 {dimension_numbers = #tpu.dot_dimension_numbers<[2], [2], [1], [1], [0, 0, 0, 1, 1, 1], [0], [0]>} : vector<4x8x32xf32>, vector<4x8x32xf32>, vector<4x8x8xf32> -> vector<4x8x8xf32>
    "tpu.trace_stop"() : () -> ()
    %cst_91 = arith.constant 0.176776692 : f32
    %131 = vector.broadcast %cst_91 : f32 to vector<4x8x8xf32>
    %132 = arith.mulf %130, %131 : vector<4x8x8xf32>
    %cst_92 = arith.constant dense<0xFF800000> : vector<4x8xf32>
    %133 = vector.multi_reduction <maximumf>, %132, %cst_92 [2] : vector<4x8x8xf32> to vector<4x8xf32>
    %134 = vector.shape_cast %133 : vector<4x8xf32> to vector<4x8x1xf32>
    %135 = vector.broadcast %134 : vector<4x8x1xf32> to vector<4x8x8xf32>
    %136 = arith.subf %132, %135 : vector<4x8x8xf32>
    %137 = math.exp %136 : vector<4x8x8xf32>
    %cst_93 = arith.constant dense<0.000000e+00> : vector<4x8xf32>
    %138 = vector.multi_reduction <add>, %137, %cst_93 [2] : vector<4x8x8xf32> to vector<4x8xf32>
    %139 = vector.shape_cast %138 : vector<4x8xf32> to vector<4x8x1xf32>
    %140 = tpu.reciprocal %139 {approx = true} : vector<4x8x1xf32> -> vector<4x8x1xf32>
    %141 = vector.broadcast %140 : vector<4x8x1xf32> to vector<4x8x8xf32>
    %142 = arith.mulf %137, %141 : vector<4x8x8xf32>
    "tpu.trace_start"() <{level = 10 : i32, message = "bqk,bkd->bqd"}> : () -> ()
    %cst_94 = arith.constant dense<0.000000e+00> : vector<4x8x32xf32>
    %143 = tpu.matmul %142, %129, %cst_94 {dimension_numbers = #tpu.dot_dimension_numbers<[2], [1], [1], [2], [0, 0, 0, 1, 1, 2], [0], [0]>} : vector<4x8x8xf32>, vector<4x8x32xf32>, vector<4x8x32xf32> -> vector<4x8x32xf32>
    "tpu.trace_stop"() : () -> ()
    %144 = vector.shape_cast %143 : vector<4x8x32xf32> to vector<32x32xf32>
    %cst_95 = arith.constant dense<0.000000e+00> : vector<32x32xf32>
    %145 = tpu.matmul %144, %108, %cst_95 {dimension_numbers = #tpu.dot_dimension_numbers<[1], [0], [0], [1], [0, 0, 1, 1], [], []>} : vector<32x32xf32>, vector<32x32xf32>, vector<32x32xf32> -> vector<32x32xf32>
    %146 = vector.broadcast %109 : vector<1x32xf32> to vector<32x32xf32>
    %147 = arith.addf %145, %146 : vector<32x32xf32>
    %148 = arith.addf %101, %147 : vector<32x32xf32>
    %cst_96 = arith.constant dense<0.000000e+00> : vector<32xf32>
    %149 = vector.multi_reduction <add>, %148, %cst_96 [1] : vector<32x32xf32> to vector<32xf32>
    %150 = vector.shape_cast %149 : vector<32xf32> to vector<32x1xf32>
    %cst_97 = arith.constant 3.200000e+01 : f32
    %151 = vector.broadcast %cst_97 : f32 to vector<32x1xf32>
    %152 = arith.divf %150, %151 : vector<32x1xf32>
    %153 = vector.broadcast %152 : vector<32x1xf32> to vector<32x32xf32>
    %154 = arith.subf %148, %153 : vector<32x32xf32>
    %155 = arith.mulf %154, %154 : vector<32x32xf32>
    %cst_98 = arith.constant dense<0.000000e+00> : vector<32xf32>
    %156 = vector.multi_reduction <add>, %155, %cst_98 [1] : vector<32x32xf32> to vector<32xf32>
    %157 = vector.shape_cast %156 : vector<32xf32> to vector<32x1xf32>
    %cst_99 = arith.constant 3.200000e+01 : f32
    %158 = vector.broadcast %cst_99 : f32 to vector<32x1xf32>
    %159 = arith.divf %157, %158 : vector<32x1xf32>
    %160 = vector.broadcast %152 : vector<32x1xf32> to vector<32x32xf32>
    %161 = arith.subf %148, %160 : vector<32x32xf32>
    %cst_100 = arith.constant 9.99999974E-6 : f32
    %162 = vector.broadcast %cst_100 : f32 to vector<32x1xf32>
    %163 = arith.addf %159, %162 : vector<32x1xf32>
    %164 = math.rsqrt %163 : vector<32x1xf32>
    %165 = vector.broadcast %164 : vector<32x1xf32> to vector<32x32xf32>
    %166 = arith.mulf %161, %165 : vector<32x32xf32>
    %167 = vector.broadcast %110 : vector<1x32xf32> to vector<32x32xf32>
    %168 = arith.mulf %166, %167 : vector<32x32xf32>
    %169 = vector.broadcast %111 : vector<1x32xf32> to vector<32x32xf32>
    %170 = arith.addf %168, %169 : vector<32x32xf32>
    %cst_101 = arith.constant dense<0.000000e+00> : vector<32x64xf32>
    %171 = tpu.matmul %170, %112, %cst_101 {dimension_numbers = #tpu.dot_dimension_numbers<[1], [0], [0], [1], [0, 0, 1, 1], [], []>} : vector<32x32xf32>, vector<32x64xf32>, vector<32x64xf32> -> vector<32x64xf32>
    %172 = vector.broadcast %113 : vector<1x64xf32> to vector<32x64xf32>
    %173 = arith.addf %171, %172 : vector<32x64xf32>
    %cst_102 = arith.constant 0.000000e+00 : f32
    %174 = vector.broadcast %cst_102 : f32 to vector<32x64xf32>
    %175 = arith.maximumf %173, %174 : vector<32x64xf32>
    %cst_103 = arith.constant dense<0.000000e+00> : vector<32x32xf32>
    %176 = tpu.matmul %175, %114, %cst_103 {dimension_numbers = #tpu.dot_dimension_numbers<[1], [0], [0], [1], [0, 0, 1, 1], [], []>} : vector<32x64xf32>, vector<64x32xf32>, vector<32x32xf32> -> vector<32x32xf32>
    %177 = vector.broadcast %115 : vector<1x32xf32> to vector<32x32xf32>
    %178 = arith.addf %176, %177 : vector<32x32xf32>
    %179 = arith.addf %170, %178 : vector<32x32xf32>
    %cst_104 = arith.constant dense<0.000000e+00> : vector<32xf32>
    %180 = vector.multi_reduction <add>, %179, %cst_104 [1] : vector<32x32xf32> to vector<32xf32>
    %181 = vector.shape_cast %180 : vector<32xf32> to vector<32x1xf32>
    %cst_105 = arith.constant 3.200000e+01 : f32
    %182 = vector.broadcast %cst_105 : f32 to vector<32x1xf32>
    %183 = arith.divf %181, %182 : vector<32x1xf32>
    %184 = vector.broadcast %183 : vector<32x1xf32> to vector<32x32xf32>
    %185 = arith.subf %179, %184 : vector<32x32xf32>
    %186 = arith.mulf %185, %185 : vector<32x32xf32>
    %cst_106 = arith.constant dense<0.000000e+00> : vector<32xf32>
    %187 = vector.multi_reduction <add>, %186, %cst_106 [1] : vector<32x32xf32> to vector<32xf32>
    %188 = vector.shape_cast %187 : vector<32xf32> to vector<32x1xf32>
    %cst_107 = arith.constant 3.200000e+01 : f32
    %189 = vector.broadcast %cst_107 : f32 to vector<32x1xf32>
    %190 = arith.divf %188, %189 : vector<32x1xf32>
    %191 = vector.broadcast %183 : vector<32x1xf32> to vector<32x32xf32>
    %192 = arith.subf %179, %191 : vector<32x32xf32>
    %cst_108 = arith.constant 9.99999974E-6 : f32
    %193 = vector.broadcast %cst_108 : f32 to vector<32x1xf32>
    %194 = arith.addf %190, %193 : vector<32x1xf32>
    %195 = math.rsqrt %194 : vector<32x1xf32>
    %196 = vector.broadcast %195 : vector<32x1xf32> to vector<32x32xf32>
    %197 = arith.mulf %192, %196 : vector<32x32xf32>
    %198 = vector.broadcast %116 : vector<1x32xf32> to vector<32x32xf32>
    %199 = arith.mulf %197, %198 : vector<32x32xf32>
    %200 = vector.broadcast %117 : vector<1x32xf32> to vector<32x32xf32>
    %201 = arith.addf %199, %200 : vector<32x32xf32>
    %202 = vector.shape_cast %201 : vector<32x32xf32> to vector<4x8x32xf32>
    %c0_109 = arith.constant 0 : index
    %c0_110 = arith.constant 0 : index
    %c0_111 = arith.constant 0 : index
    %203 = vector.load %arg34[%c0_109, %c0_110, %c0_111] : memref<4x8x32xf32, #tpu.memory_space<vmem>>, vector<4x8x32xf32>
    tpu.vector_store %arg34[%c0_109, %c0_110, %c0_111], %202 {strides = array<i32>} : memref<4x8x32xf32, #tpu.memory_space<vmem>>, vector<4x8x32xf32>,
    %cst_112 = arith.constant dense<0xFF800000> : vector<4x32xf32>
    %204 = vector.multi_reduction <maximumf>, %202, %cst_112 [1] : vector<4x8x32xf32> to vector<4x32xf32>
    %c0_113 = arith.constant 0 : index
    %c0_114 = arith.constant 0 : index
    %205 = vector.load %arg35[%c0_113, %c0_114] : memref<4x32xf32, #tpu.memory_space<vmem>>, vector<4x32xf32>
    tpu.vector_store %arg35[%c0_113, %c0_114], %204 {strides = array<i32>} : memref<4x32xf32, #tpu.memory_space<vmem>>, vector<4x32xf32>,
    return
  }
  func.func @transform_0(%arg0: i32) -> (i32, i32, i32) {
    %c0_i32 = arith.constant 0 : i32
    %c0_i32_0 = arith.constant 0 : i32
    %c0_i32_1 = arith.constant 0 : i32
    return %arg0, %c0_i32, %c0_i32_0 : i32, i32, i32
  }
  func.func @transform_1(%arg0: i32) -> (i32, i32) {
    %c0_i32 = arith.constant 0 : i32
    %c0_i32_0 = arith.constant 0 : i32
    %c0_i32_1 = arith.constant 0 : i32
    return %c0_i32, %c0_i32_0 : i32, i32
  }
  func.func @transform_2(%arg0: i32) -> (i32, i32) {
    %c0_i32 = arith.constant 0 : i32
    %c0_i32_0 = arith.constant 0 : i32
    %c0_i32_1 = arith.constant 0 : i32
    return %c0_i32, %c0_i32_0 : i32, i32
  }
  func.func @transform_3(%arg0: i32) -> (i32, i32) {
    %c0_i32 = arith.constant 0 : i32
    %c0_i32_0 = arith.constant 0 : i32
    %c0_i32_1 = arith.constant 0 : i32
    return %c0_i32, %c0_i32_0 : i32, i32
  }
  func.func @transform_4(%arg0: i32) -> (i32, i32) {
    %c0_i32 = arith.constant 0 : i32
    %c0_i32_0 = arith.constant 0 : i32
    %c0_i32_1 = arith.constant 0 : i32
    return %c0_i32, %c0_i32_0 : i32, i32
  }
  func.func @transform_5(%arg0: i32) -> (i32, i32) {
    %c0_i32 = arith.constant 0 : i32
    %c0_i32_0 = arith.constant 0 : i32
    %c0_i32_1 = arith.constant 0 : i32
    return %c0_i32, %c0_i32_0 : i32, i32
  }
  func.func @transform_6(%arg0: i32) -> (i32, i32) {
    %c0_i32 = arith.constant 0 : i32
    %c0_i32_0 = arith.constant 0 : i32
    %c0_i32_1 = arith.constant 0 : i32
    return %c0_i32, %c0_i32_0 : i32, i32
  }
  func.func @transform_7(%arg0: i32) -> (i32, i32) {
    %c0_i32 = arith.constant 0 : i32
    %c0_i32_0 = arith.constant 0 : i32
    %c0_i32_1 = arith.constant 0 : i32
    return %c0_i32, %c0_i32_0 : i32, i32
  }
  func.func @transform_8(%arg0: i32) -> (i32, i32) {
    %c0_i32 = arith.constant 0 : i32
    %c0_i32_0 = arith.constant 0 : i32
    %c0_i32_1 = arith.constant 0 : i32
    return %c0_i32, %c0_i32_0 : i32, i32
  }
  func.func @transform_9(%arg0: i32) -> (i32, i32) {
    %c0_i32 = arith.constant 0 : i32
    %c0_i32_0 = arith.constant 0 : i32
    %c0_i32_1 = arith.constant 0 : i32
    return %c0_i32, %c0_i32_0 : i32, i32
  }
  func.func @transform_10(%arg0: i32) -> (i32, i32) {
    %c0_i32 = arith.constant 0 : i32
    %c0_i32_0 = arith.constant 0 : i32
    %c0_i32_1 = arith.constant 0 : i32
    return %c0_i32, %c0_i32_0 : i32, i32
  }
  func.func @transform_11(%arg0: i32) -> (i32, i32) {
    %c0_i32 = arith.constant 0 : i32
    %c0_i32_0 = arith.constant 0 : i32
    %c0_i32_1 = arith.constant 0 : i32
    return %c0_i32, %c0_i32_0 : i32, i32
  }
  func.func @transform_12(%arg0: i32) -> (i32, i32) {
    %c0_i32 = arith.constant 0 : i32
    %c0_i32_0 = arith.constant 0 : i32
    %c0_i32_1 = arith.constant 0 : i32
    return %c0_i32, %c0_i32_0 : i32, i32
  }
  func.func @transform_13(%arg0: i32) -> (i32, i32) {
    %c0_i32 = arith.constant 0 : i32
    %c0_i32_0 = arith.constant 0 : i32
    %c0_i32_1 = arith.constant 0 : i32
    return %c0_i32, %c0_i32_0 : i32, i32
  }
  func.func @transform_14(%arg0: i32) -> (i32, i32) {
    %c0_i32 = arith.constant 0 : i32
    %c0_i32_0 = arith.constant 0 : i32
    %c0_i32_1 = arith.constant 0 : i32
    return %c0_i32, %c0_i32_0 : i32, i32
  }
  func.func @transform_15(%arg0: i32) -> (i32, i32) {
    %c0_i32 = arith.constant 0 : i32
    %c0_i32_0 = arith.constant 0 : i32
    %c0_i32_1 = arith.constant 0 : i32
    return %c0_i32, %c0_i32_0 : i32, i32
  }
  func.func @transform_16(%arg0: i32) -> (i32, i32) {
    %c0_i32 = arith.constant 0 : i32
    %c0_i32_0 = arith.constant 0 : i32
    %c0_i32_1 = arith.constant 0 : i32
    return %c0_i32, %c0_i32_0 : i32, i32
  }
  func.func @transform_17(%arg0: i32) -> (i32, i32) {
    %c0_i32 = arith.constant 0 : i32
    %c0_i32_0 = arith.constant 0 : i32
    %c0_i32_1 = arith.constant 0 : i32
    return %c0_i32, %c0_i32_0 : i32, i32
  }
  func.func @transform_18(%arg0: i32) -> (i32, i32) {
    %c0_i32 = arith.constant 0 : i32
    %c0_i32_0 = arith.constant 0 : i32
    %c0_i32_1 = arith.constant 0 : i32
    return %c0_i32, %c0_i32_0 : i32, i32
  }
  func.func @transform_19(%arg0: i32) -> (i32, i32) {
    %c0_i32 = arith.constant 0 : i32
    %c0_i32_0 = arith.constant 0 : i32
    %c0_i32_1 = arith.constant 0 : i32
    return %c0_i32, %c0_i32_0 : i32, i32
  }
  func.func @transform_20(%arg0: i32) -> (i32, i32) {
    %c0_i32 = arith.constant 0 : i32
    %c0_i32_0 = arith.constant 0 : i32
    %c0_i32_1 = arith.constant 0 : i32
    return %c0_i32, %c0_i32_0 : i32, i32
  }
  func.func @transform_21(%arg0: i32) -> (i32, i32) {
    %c0_i32 = arith.constant 0 : i32
    %c0_i32_0 = arith.constant 0 : i32
    %c0_i32_1 = arith.constant 0 : i32
    return %c0_i32, %c0_i32_0 : i32, i32
  }
  func.func @transform_22(%arg0: i32) -> (i32, i32) {
    %c0_i32 = arith.constant 0 : i32
    %c0_i32_0 = arith.constant 0 : i32
    %c0_i32_1 = arith.constant 0 : i32
    return %c0_i32, %c0_i32_0 : i32, i32
  }
  func.func @transform_23(%arg0: i32) -> (i32, i32) {
    %c0_i32 = arith.constant 0 : i32
    %c0_i32_0 = arith.constant 0 : i32
    %c0_i32_1 = arith.constant 0 : i32
    return %c0_i32, %c0_i32_0 : i32, i32
  }
  func.func @transform_24(%arg0: i32) -> (i32, i32) {
    %c0_i32 = arith.constant 0 : i32
    %c0_i32_0 = arith.constant 0 : i32
    %c0_i32_1 = arith.constant 0 : i32
    return %c0_i32, %c0_i32_0 : i32, i32
  }
  func.func @transform_25(%arg0: i32) -> (i32, i32) {
    %c0_i32 = arith.constant 0 : i32
    %c0_i32_0 = arith.constant 0 : i32
    %c0_i32_1 = arith.constant 0 : i32
    return %c0_i32, %c0_i32_0 : i32, i32
  }
  func.func @transform_26(%arg0: i32) -> (i32, i32) {
    %c0_i32 = arith.constant 0 : i32
    %c0_i32_0 = arith.constant 0 : i32
    %c0_i32_1 = arith.constant 0 : i32
    return %c0_i32, %c0_i32_0 : i32, i32
  }
  func.func @transform_27(%arg0: i32) -> (i32, i32) {
    %c0_i32 = arith.constant 0 : i32
    %c0_i32_0 = arith.constant 0 : i32
    %c0_i32_1 = arith.constant 0 : i32
    return %c0_i32, %c0_i32_0 : i32, i32
  }
  func.func @transform_28(%arg0: i32) -> (i32, i32) {
    %c0_i32 = arith.constant 0 : i32
    %c0_i32_0 = arith.constant 0 : i32
    %c0_i32_1 = arith.constant 0 : i32
    return %c0_i32, %c0_i32_0 : i32, i32
  }
  func.func @transform_29(%arg0: i32) -> (i32, i32) {
    %c0_i32 = arith.constant 0 : i32
    %c0_i32_0 = arith.constant 0 : i32
    %c0_i32_1 = arith.constant 0 : i32
    return %c0_i32, %c0_i32_0 : i32, i32
  }
  func.func @transform_30(%arg0: i32) -> (i32, i32) {
    %c0_i32 = arith.constant 0 : i32
    %c0_i32_0 = arith.constant 0 : i32
    %c0_i32_1 = arith.constant 0 : i32
    return %c0_i32, %c0_i32_0 : i32, i32
  }
  func.func @transform_31(%arg0: i32) -> (i32, i32) {
    %c0_i32 = arith.constant 0 : i32
    %c0_i32_0 = arith.constant 0 : i32
    %c0_i32_1 = arith.constant 0 : i32
    return %c0_i32, %c0_i32_0 : i32, i32
  }
  func.func @transform_32(%arg0: i32) -> (i32, i32) {
    %c0_i32 = arith.constant 0 : i32
    %c0_i32_0 = arith.constant 0 : i32
    %c0_i32_1 = arith.constant 0 : i32
    return %c0_i32, %c0_i32_0 : i32, i32
  }
  func.func @transform_33(%arg0: i32) -> (i32, i32, i32) {
    %c0_i32 = arith.constant 0 : i32
    %c0_i32_0 = arith.constant 0 : i32
    %c0_i32_1 = arith.constant 0 : i32
    return %arg0, %c0_i32, %c0_i32_0 : i32, i32, i32
  }
  func.func @transform_34(%arg0: i32) -> (i32, i32) {
    %c0_i32 = arith.constant 0 : i32
    %c0_i32_0 = arith.constant 0 : i32
    return %arg0, %c0_i32 : i32, i32
  }
}

module attributes {stable_mosaic.version = 11 : i64} {
  func.func @_decoder_stack_kernel(%arg0: i32, %arg1: memref<4x8x32xf32, #tpu.memory_space<vmem>>, %arg2: memref<4x8x32xf32, #tpu.memory_space<vmem>>, %arg3: memref<32x32xf32, #tpu.memory_space<vmem>>, %arg4: memref<32x32xf32, #tpu.memory_space<vmem>>, %arg5: memref<32x32xf32, #tpu.memory_space<vmem>>, %arg6: memref<1x32xf32, #tpu.memory_space<vmem>>, %arg7: memref<1x32xf32, #tpu.memory_space<vmem>>, %arg8: memref<1x32xf32, #tpu.memory_space<vmem>>, %arg9: memref<32x32xf32, #tpu.memory_space<vmem>>, %arg10: memref<1x32xf32, #tpu.memory_space<vmem>>, %arg11: memref<1x32xf32, #tpu.memory_space<vmem>>, %arg12: memref<1x32xf32, #tpu.memory_space<vmem>>, %arg13: memref<32x32xf32, #tpu.memory_space<vmem>>, %arg14: memref<32x32xf32, #tpu.memory_space<vmem>>, %arg15: memref<32x32xf32, #tpu.memory_space<vmem>>, %arg16: memref<1x32xf32, #tpu.memory_space<vmem>>, %arg17: memref<1x32xf32, #tpu.memory_space<vmem>>, %arg18: memref<1x32xf32, #tpu.memory_space<vmem>>, %arg19: memref<32x32xf32, #tpu.memory_space<vmem>>, %arg20: memref<1x32xf32, #tpu.memory_space<vmem>>, %arg21: memref<1x32xf32, #tpu.memory_space<vmem>>, %arg22: memref<1x32xf32, #tpu.memory_space<vmem>>, %arg23: memref<32x2048xf32, #tpu.memory_space<vmem>>, %arg24: memref<1x2048xf32, #tpu.memory_space<vmem>>, %arg25: memref<2048x32xf32, #tpu.memory_space<vmem>>, %arg26: memref<1x32xf32, #tpu.memory_space<vmem>>, %arg27: memref<1x32xf32, #tpu.memory_space<vmem>>, %arg28: memref<1x32xf32, #tpu.memory_space<vmem>>, %arg29: memref<32x32xf32, #tpu.memory_space<vmem>>, %arg30: memref<32x32xf32, #tpu.memory_space<vmem>>, %arg31: memref<32x32xf32, #tpu.memory_space<vmem>>, %arg32: memref<1x32xf32, #tpu.memory_space<vmem>>, %arg33: memref<1x32xf32, #tpu.memory_space<vmem>>, %arg34: memref<1x32xf32, #tpu.memory_space<vmem>>, %arg35: memref<32x32xf32, #tpu.memory_space<vmem>>, %arg36: memref<1x32xf32, #tpu.memory_space<vmem>>, %arg37: memref<1x32xf32, #tpu.memory_space<vmem>>, %arg38: memref<1x32xf32, #tpu.memory_space<vmem>>, %arg39: memref<32x32xf32, #tpu.memory_space<vmem>>, %arg40: memref<32x32xf32, #tpu.memory_space<vmem>>, %arg41: memref<32x32xf32, #tpu.memory_space<vmem>>, %arg42: memref<1x32xf32, #tpu.memory_space<vmem>>, %arg43: memref<1x32xf32, #tpu.memory_space<vmem>>, %arg44: memref<1x32xf32, #tpu.memory_space<vmem>>, %arg45: memref<32x32xf32, #tpu.memory_space<vmem>>, %arg46: memref<1x32xf32, #tpu.memory_space<vmem>>, %arg47: memref<1x32xf32, #tpu.memory_space<vmem>>, %arg48: memref<1x32xf32, #tpu.memory_space<vmem>>, %arg49: memref<32x2048xf32, #tpu.memory_space<vmem>>, %arg50: memref<1x2048xf32, #tpu.memory_space<vmem>>, %arg51: memref<2048x32xf32, #tpu.memory_space<vmem>>, %arg52: memref<1x32xf32, #tpu.memory_space<vmem>>, %arg53: memref<1x32xf32, #tpu.memory_space<vmem>>, %arg54: memref<1x32xf32, #tpu.memory_space<vmem>>, %arg55: memref<4x8x32xf32, #tpu.memory_space<vmem>>) attributes {dimension_semantics = [#tpu.dimension_semantics<parallel>], iteration_bounds = array<i64: 1>, scalar_prefetch = 0 : i64, scratch_operands = 0 : i64, tpu.core_type = #tpu.core_type<tc>, window_params = [{transform_indices = @transform_0, window_bounds = array<i64: 4, 8, 32>}, {transform_indices = @transform_1, window_bounds = array<i64: 4, 8, 32>}, {pipeline_mode = #tpu.pipeline_mode<synchronous>, transform_indices = @transform_2, window_bounds = array<i64: 32, 32>}, {pipeline_mode = #tpu.pipeline_mode<synchronous>, transform_indices = @transform_3, window_bounds = array<i64: 32, 32>}, {pipeline_mode = #tpu.pipeline_mode<synchronous>, transform_indices = @transform_4, window_bounds = array<i64: 32, 32>}, {pipeline_mode = #tpu.pipeline_mode<synchronous>, transform_indices = @transform_5, window_bounds = array<i64: 1, 32>}, {pipeline_mode = #tpu.pipeline_mode<synchronous>, transform_indices = @transform_6, window_bounds = array<i64: 1, 32>}, {pipeline_mode = #tpu.pipeline_mode<synchronous>, transform_indices = @transform_7, window_bounds = array<i64: 1, 32>}, {pipeline_mode = #tpu.pipeline_mode<synchronous>, transform_indices = @transform_8, window_bounds = array<i64: 32, 32>}, {pipeline_mode = #tpu.pipeline_mode<synchronous>, transform_indices = @transform_9, window_bounds = array<i64: 1, 32>}, {pipeline_mode = #tpu.pipeline_mode<synchronous>, transform_indices = @transform_10, window_bounds = array<i64: 1, 32>}, {pipeline_mode = #tpu.pipeline_mode<synchronous>, transform_indices = @transform_11, window_bounds = array<i64: 1, 32>}, {pipeline_mode = #tpu.pipeline_mode<synchronous>, transform_indices = @transform_12, window_bounds = array<i64: 32, 32>}, {pipeline_mode = #tpu.pipeline_mode<synchronous>, transform_indices = @transform_13, window_bounds = array<i64: 32, 32>}, {pipeline_mode = #tpu.pipeline_mode<synchronous>, transform_indices = @transform_14, window_bounds = array<i64: 32, 32>}, {pipeline_mode = #tpu.pipeline_mode<synchronous>, transform_indices = @transform_15, window_bounds = array<i64: 1, 32>}, {pipeline_mode = #tpu.pipeline_mode<synchronous>, transform_indices = @transform_16, window_bounds = array<i64: 1, 32>}, {pipeline_mode = #tpu.pipeline_mode<synchronous>, transform_indices = @transform_17, window_bounds = array<i64: 1, 32>}, {pipeline_mode = #tpu.pipeline_mode<synchronous>, transform_indices = @transform_18, window_bounds = array<i64: 32, 32>}, {pipeline_mode = #tpu.pipeline_mode<synchronous>, transform_indices = @transform_19, window_bounds = array<i64: 1, 32>}, {pipeline_mode = #tpu.pipeline_mode<synchronous>, transform_indices = @transform_20, window_bounds = array<i64: 1, 32>}, {pipeline_mode = #tpu.pipeline_mode<synchronous>, transform_indices = @transform_21, window_bounds = array<i64: 1, 32>}, {pipeline_mode = #tpu.pipeline_mode<synchronous>, transform_indices = @transform_22, window_bounds = array<i64: 32, 2048>}, {pipeline_mode = #tpu.pipeline_mode<synchronous>, transform_indices = @transform_23, window_bounds = array<i64: 1, 2048>}, {pipeline_mode = #tpu.pipeline_mode<synchronous>, transform_indices = @transform_24, window_bounds = array<i64: 2048, 32>}, {pipeline_mode = #tpu.pipeline_mode<synchronous>, transform_indices = @transform_25, window_bounds = array<i64: 1, 32>}, {pipeline_mode = #tpu.pipeline_mode<synchronous>, transform_indices = @transform_26, window_bounds = array<i64: 1, 32>}, {pipeline_mode = #tpu.pipeline_mode<synchronous>, transform_indices = @transform_27, window_bounds = array<i64: 1, 32>}, {pipeline_mode = #tpu.pipeline_mode<synchronous>, transform_indices = @transform_28, window_bounds = array<i64: 32, 32>}, {pipeline_mode = #tpu.pipeline_mode<synchronous>, transform_indices = @transform_29, window_bounds = array<i64: 32, 32>}, {pipeline_mode = #tpu.pipeline_mode<synchronous>, transform_indices = @transform_30, window_bounds = array<i64: 32, 32>}, {pipeline_mode = #tpu.pipeline_mode<synchronous>, transform_indices = @transform_31, window_bounds = array<i64: 1, 32>}, {pipeline_mode = #tpu.pipeline_mode<synchronous>, transform_indices = @transform_32, window_bounds = array<i64: 1, 32>}, {pipeline_mode = #tpu.pipeline_mode<synchronous>, transform_indices = @transform_33, window_bounds = array<i64: 1, 32>}, {pipeline_mode = #tpu.pipeline_mode<synchronous>, transform_indices = @transform_34, window_bounds = array<i64: 32, 32>}, {pipeline_mode = #tpu.pipeline_mode<synchronous>, transform_indices = @transform_35, window_bounds = array<i64: 1, 32>}, {pipeline_mode = #tpu.pipeline_mode<synchronous>, transform_indices = @transform_36, window_bounds = array<i64: 1, 32>}, {pipeline_mode = #tpu.pipeline_mode<synchronous>, transform_indices = @transform_37, window_bounds = array<i64: 1, 32>}, {pipeline_mode = #tpu.pipeline_mode<synchronous>, transform_indices = @transform_38, window_bounds = array<i64: 32, 32>}, {pipeline_mode = #tpu.pipeline_mode<synchronous>, transform_indices = @transform_39, window_bounds = array<i64: 32, 32>}, {pipeline_mode = #tpu.pipeline_mode<synchronous>, transform_indices = @transform_40, window_bounds = array<i64: 32, 32>}, {pipeline_mode = #tpu.pipeline_mode<synchronous>, transform_indices = @transform_41, window_bounds = array<i64: 1, 32>}, {pipeline_mode = #tpu.pipeline_mode<synchronous>, transform_indices = @transform_42, window_bounds = array<i64: 1, 32>}, {pipeline_mode = #tpu.pipeline_mode<synchronous>, transform_indices = @transform_43, window_bounds = array<i64: 1, 32>}, {pipeline_mode = #tpu.pipeline_mode<synchronous>, transform_indices = @transform_44, window_bounds = array<i64: 32, 32>}, {pipeline_mode = #tpu.pipeline_mode<synchronous>, transform_indices = @transform_45, window_bounds = array<i64: 1, 32>}, {pipeline_mode = #tpu.pipeline_mode<synchronous>, transform_indices = @transform_46, window_bounds = array<i64: 1, 32>}, {pipeline_mode = #tpu.pipeline_mode<synchronous>, transform_indices = @transform_47, window_bounds = array<i64: 1, 32>}, {pipeline_mode = #tpu.pipeline_mode<synchronous>, transform_indices = @transform_48, window_bounds = array<i64: 32, 2048>}, {pipeline_mode = #tpu.pipeline_mode<synchronous>, transform_indices = @transform_49, window_bounds = array<i64: 1, 2048>}, {pipeline_mode = #tpu.pipeline_mode<synchronous>, transform_indices = @transform_50, window_bounds = array<i64: 2048, 32>}, {pipeline_mode = #tpu.pipeline_mode<synchronous>, transform_indices = @transform_51, window_bounds = array<i64: 1, 32>}, {pipeline_mode = #tpu.pipeline_mode<synchronous>, transform_indices = @transform_52, window_bounds = array<i64: 1, 32>}, {pipeline_mode = #tpu.pipeline_mode<synchronous>, transform_indices = @transform_53, window_bounds = array<i64: 1, 32>}, {transform_indices = @transform_54, window_bounds = array<i64: 4, 8, 32>}]} {
    %c0 = arith.constant 0 : index
    %c0_0 = arith.constant 0 : index
    %c0_1 = arith.constant 0 : index
    %0 = vector.load %arg1[%c0, %c0_0, %c0_1] : memref<4x8x32xf32, #tpu.memory_space<vmem>>, vector<4x8x32xf32>
    %1 = vector.shape_cast %0 : vector<4x8x32xf32> to vector<32x32xf32>
    %c0_2 = arith.constant 0 : index
    %c0_3 = arith.constant 0 : index
    %c0_4 = arith.constant 0 : index
    %2 = vector.load %arg2[%c0_2, %c0_3, %c0_4] : memref<4x8x32xf32, #tpu.memory_space<vmem>>, vector<4x8x32xf32>
    %3 = vector.shape_cast %2 : vector<4x8x32xf32> to vector<32x32xf32>
    %c0_5 = arith.constant 0 : index
    %c0_6 = arith.constant 0 : index
    %4 = vector.load %arg3[%c0_5, %c0_6] : memref<32x32xf32, #tpu.memory_space<vmem>>, vector<32x32xf32>
    %c0_7 = arith.constant 0 : index
    %c0_8 = arith.constant 0 : index
    %5 = vector.load %arg4[%c0_7, %c0_8] : memref<32x32xf32, #tpu.memory_space<vmem>>, vector<32x32xf32>
    %c0_9 = arith.constant 0 : index
    %c0_10 = arith.constant 0 : index
    %6 = vector.load %arg5[%c0_9, %c0_10] : memref<32x32xf32, #tpu.memory_space<vmem>>, vector<32x32xf32>
    %c0_11 = arith.constant 0 : index
    %c0_12 = arith.constant 0 : index
    %7 = vector.load %arg6[%c0_11, %c0_12] : memref<1x32xf32, #tpu.memory_space<vmem>>, vector<1x32xf32>
    %c0_13 = arith.constant 0 : index
    %c0_14 = arith.constant 0 : index
    %8 = vector.load %arg7[%c0_13, %c0_14] : memref<1x32xf32, #tpu.memory_space<vmem>>, vector<1x32xf32>
    %c0_15 = arith.constant 0 : index
    %c0_16 = arith.constant 0 : index
    %9 = vector.load %arg8[%c0_15, %c0_16] : memref<1x32xf32, #tpu.memory_space<vmem>>, vector<1x32xf32>
    %c0_17 = arith.constant 0 : index
    %c0_18 = arith.constant 0 : index
    %10 = vector.load %arg9[%c0_17, %c0_18] : memref<32x32xf32, #tpu.memory_space<vmem>>, vector<32x32xf32>
    %c0_19 = arith.constant 0 : index
    %c0_20 = arith.constant 0 : index
    %11 = vector.load %arg10[%c0_19, %c0_20] : memref<1x32xf32, #tpu.memory_space<vmem>>, vector<1x32xf32>
    %c0_21 = arith.constant 0 : index
    %c0_22 = arith.constant 0 : index
    %12 = vector.load %arg11[%c0_21, %c0_22] : memref<1x32xf32, #tpu.memory_space<vmem>>, vector<1x32xf32>
    %c0_23 = arith.constant 0 : index
    %c0_24 = arith.constant 0 : index
    %13 = vector.load %arg12[%c0_23, %c0_24] : memref<1x32xf32, #tpu.memory_space<vmem>>, vector<1x32xf32>
    %c0_25 = arith.constant 0 : index
    %c0_26 = arith.constant 0 : index
    %14 = vector.load %arg13[%c0_25, %c0_26] : memref<32x32xf32, #tpu.memory_space<vmem>>, vector<32x32xf32>
    %c0_27 = arith.constant 0 : index
    %c0_28 = arith.constant 0 : index
    %15 = vector.load %arg14[%c0_27, %c0_28] : memref<32x32xf32, #tpu.memory_space<vmem>>, vector<32x32xf32>
    %c0_29 = arith.constant 0 : index
    %c0_30 = arith.constant 0 : index
    %16 = vector.load %arg15[%c0_29, %c0_30] : memref<32x32xf32, #tpu.memory_space<vmem>>, vector<32x32xf32>
    %c0_31 = arith.constant 0 : index
    %c0_32 = arith.constant 0 : index
    %17 = vector.load %arg16[%c0_31, %c0_32] : memref<1x32xf32, #tpu.memory_space<vmem>>, vector<1x32xf32>
    %c0_33 = arith.constant 0 : index
    %c0_34 = arith.constant 0 : index
    %18 = vector.load %arg17[%c0_33, %c0_34] : memref<1x32xf32, #tpu.memory_space<vmem>>, vector<1x32xf32>
    %c0_35 = arith.constant 0 : index
    %c0_36 = arith.constant 0 : index
    %19 = vector.load %arg18[%c0_35, %c0_36] : memref<1x32xf32, #tpu.memory_space<vmem>>, vector<1x32xf32>
    %c0_37 = arith.constant 0 : index
    %c0_38 = arith.constant 0 : index
    %20 = vector.load %arg19[%c0_37, %c0_38] : memref<32x32xf32, #tpu.memory_space<vmem>>, vector<32x32xf32>
    %c0_39 = arith.constant 0 : index
    %c0_40 = arith.constant 0 : index
    %21 = vector.load %arg20[%c0_39, %c0_40] : memref<1x32xf32, #tpu.memory_space<vmem>>, vector<1x32xf32>
    %c0_41 = arith.constant 0 : index
    %c0_42 = arith.constant 0 : index
    %22 = vector.load %arg21[%c0_41, %c0_42] : memref<1x32xf32, #tpu.memory_space<vmem>>, vector<1x32xf32>
    %c0_43 = arith.constant 0 : index
    %c0_44 = arith.constant 0 : index
    %23 = vector.load %arg22[%c0_43, %c0_44] : memref<1x32xf32, #tpu.memory_space<vmem>>, vector<1x32xf32>
    %c0_45 = arith.constant 0 : index
    %c0_46 = arith.constant 0 : index
    %24 = vector.load %arg23[%c0_45, %c0_46] : memref<32x2048xf32, #tpu.memory_space<vmem>>, vector<32x2048xf32>
    %c0_47 = arith.constant 0 : index
    %c0_48 = arith.constant 0 : index
    %25 = vector.load %arg24[%c0_47, %c0_48] : memref<1x2048xf32, #tpu.memory_space<vmem>>, vector<1x2048xf32>
    %c0_49 = arith.constant 0 : index
    %c0_50 = arith.constant 0 : index
    %26 = vector.load %arg25[%c0_49, %c0_50] : memref<2048x32xf32, #tpu.memory_space<vmem>>, vector<2048x32xf32>
    %c0_51 = arith.constant 0 : index
    %c0_52 = arith.constant 0 : index
    %27 = vector.load %arg26[%c0_51, %c0_52] : memref<1x32xf32, #tpu.memory_space<vmem>>, vector<1x32xf32>
    %c0_53 = arith.constant 0 : index
    %c0_54 = arith.constant 0 : index
    %28 = vector.load %arg27[%c0_53, %c0_54] : memref<1x32xf32, #tpu.memory_space<vmem>>, vector<1x32xf32>
    %c0_55 = arith.constant 0 : index
    %c0_56 = arith.constant 0 : index
    %29 = vector.load %arg28[%c0_55, %c0_56] : memref<1x32xf32, #tpu.memory_space<vmem>>, vector<1x32xf32>
    %cst = arith.constant dense<0.000000e+00> : vector<32x32xf32>
    %30 = tpu.matmul %1, %4, %cst {dimension_numbers = #tpu.dot_dimension_numbers<[1], [0], [0], [1], [0, 0, 1, 1], [], []>} : vector<32x32xf32>, vector<32x32xf32>, vector<32x32xf32> -> vector<32x32xf32>
    %31 = vector.broadcast %7 : vector<1x32xf32> to vector<32x32xf32>
    %32 = arith.addf %30, %31 : vector<32x32xf32>
    %33 = vector.shape_cast %32 : vector<32x32xf32> to vector<4x8x32xf32>
    %cst_57 = arith.constant dense<0.000000e+00> : vector<32x32xf32>
    %34 = tpu.matmul %1, %5, %cst_57 {dimension_numbers = #tpu.dot_dimension_numbers<[1], [0], [0], [1], [0, 0, 1, 1], [], []>} : vector<32x32xf32>, vector<32x32xf32>, vector<32x32xf32> -> vector<32x32xf32>
    %35 = vector.broadcast %8 : vector<1x32xf32> to vector<32x32xf32>
    %36 = arith.addf %34, %35 : vector<32x32xf32>
    %37 = vector.shape_cast %36 : vector<32x32xf32> to vector<4x8x32xf32>
    %cst_58 = arith.constant dense<0.000000e+00> : vector<32x32xf32>
    %38 = tpu.matmul %1, %6, %cst_58 {dimension_numbers = #tpu.dot_dimension_numbers<[1], [0], [0], [1], [0, 0, 1, 1], [], []>} : vector<32x32xf32>, vector<32x32xf32>, vector<32x32xf32> -> vector<32x32xf32>
    %39 = vector.broadcast %9 : vector<1x32xf32> to vector<32x32xf32>
    %40 = arith.addf %38, %39 : vector<32x32xf32>
    %41 = vector.shape_cast %40 : vector<32x32xf32> to vector<4x8x32xf32>
    "tpu.trace_start"() <{level = 10 : i32, message = "bqd,bkd->bqk"}> : () -> ()
    %cst_59 = arith.constant dense<0.000000e+00> : vector<4x8x8xf32>
    %42 = tpu.matmul %33, %37, %cst_59 {dimension_numbers = #tpu.dot_dimension_numbers<[2], [2], [1], [1], [0, 0, 0, 1, 1, 1], [0], [0]>} : vector<4x8x32xf32>, vector<4x8x32xf32>, vector<4x8x8xf32> -> vector<4x8x8xf32>
    "tpu.trace_stop"() : () -> ()
    %cst_60 = arith.constant 0.176776692 : f32
    %43 = vector.broadcast %cst_60 : f32 to vector<4x8x8xf32>
    %44 = arith.mulf %42, %43 : vector<4x8x8xf32>
    %cst_61 = arith.constant dense<0xFF800000> : vector<4x8xf32>
    %45 = vector.multi_reduction <maximumf>, %44, %cst_61 [2] : vector<4x8x8xf32> to vector<4x8xf32>
    %46 = vector.shape_cast %45 : vector<4x8xf32> to vector<4x8x1xf32>
    %47 = vector.broadcast %46 : vector<4x8x1xf32> to vector<4x8x8xf32>
    %48 = arith.subf %44, %47 : vector<4x8x8xf32>
    %49 = math.exp %48 : vector<4x8x8xf32>
    %cst_62 = arith.constant dense<0.000000e+00> : vector<4x8xf32>
    %50 = vector.multi_reduction <add>, %49, %cst_62 [2] : vector<4x8x8xf32> to vector<4x8xf32>
    %51 = vector.shape_cast %50 : vector<4x8xf32> to vector<4x8x1xf32>
    %52 = tpu.reciprocal %51 {approx = true} : vector<4x8x1xf32> -> vector<4x8x1xf32>
    %53 = vector.broadcast %52 : vector<4x8x1xf32> to vector<4x8x8xf32>
    %54 = arith.mulf %49, %53 : vector<4x8x8xf32>
    "tpu.trace_start"() <{level = 10 : i32, message = "bqk,bkd->bqd"}> : () -> ()
    %cst_63 = arith.constant dense<0.000000e+00> : vector<4x8x32xf32>
    %55 = tpu.matmul %54, %41, %cst_63 {dimension_numbers = #tpu.dot_dimension_numbers<[2], [1], [1], [2], [0, 0, 0, 1, 1, 2], [0], [0]>} : vector<4x8x8xf32>, vector<4x8x32xf32>, vector<4x8x32xf32> -> vector<4x8x32xf32>
    "tpu.trace_stop"() : () -> ()
    %56 = vector.shape_cast %55 : vector<4x8x32xf32> to vector<32x32xf32>
    %cst_64 = arith.constant dense<0.000000e+00> : vector<32x32xf32>
    %57 = tpu.matmul %56, %10, %cst_64 {dimension_numbers = #tpu.dot_dimension_numbers<[1], [0], [0], [1], [0, 0, 1, 1], [], []>} : vector<32x32xf32>, vector<32x32xf32>, vector<32x32xf32> -> vector<32x32xf32>
    %58 = vector.broadcast %11 : vector<1x32xf32> to vector<32x32xf32>
    %59 = arith.addf %57, %58 : vector<32x32xf32>
    %60 = arith.addf %1, %59 : vector<32x32xf32>
    %cst_65 = arith.constant dense<0.000000e+00> : vector<32xf32>
    %61 = vector.multi_reduction <add>, %60, %cst_65 [1] : vector<32x32xf32> to vector<32xf32>
    %62 = vector.shape_cast %61 : vector<32xf32> to vector<32x1xf32>
    %cst_66 = arith.constant 3.200000e+01 : f32
    %63 = vector.broadcast %cst_66 : f32 to vector<32x1xf32>
    %64 = arith.divf %62, %63 : vector<32x1xf32>
    %65 = vector.broadcast %64 : vector<32x1xf32> to vector<32x32xf32>
    %66 = arith.subf %60, %65 : vector<32x32xf32>
    %67 = arith.mulf %66, %66 : vector<32x32xf32>
    %cst_67 = arith.constant dense<0.000000e+00> : vector<32xf32>
    %68 = vector.multi_reduction <add>, %67, %cst_67 [1] : vector<32x32xf32> to vector<32xf32>
    %69 = vector.shape_cast %68 : vector<32xf32> to vector<32x1xf32>
    %cst_68 = arith.constant 3.200000e+01 : f32
    %70 = vector.broadcast %cst_68 : f32 to vector<32x1xf32>
    %71 = arith.divf %69, %70 : vector<32x1xf32>
    %72 = vector.broadcast %64 : vector<32x1xf32> to vector<32x32xf32>
    %73 = arith.subf %60, %72 : vector<32x32xf32>
    %cst_69 = arith.constant 9.99999974E-6 : f32
    %74 = vector.broadcast %cst_69 : f32 to vector<32x1xf32>
    %75 = arith.addf %71, %74 : vector<32x1xf32>
    %76 = math.rsqrt %75 : vector<32x1xf32>
    %77 = vector.broadcast %76 : vector<32x1xf32> to vector<32x32xf32>
    %78 = arith.mulf %73, %77 : vector<32x32xf32>
    %79 = vector.broadcast %12 : vector<1x32xf32> to vector<32x32xf32>
    %80 = arith.mulf %78, %79 : vector<32x32xf32>
    %81 = vector.broadcast %13 : vector<1x32xf32> to vector<32x32xf32>
    %82 = arith.addf %80, %81 : vector<32x32xf32>
    %cst_70 = arith.constant dense<0.000000e+00> : vector<32x32xf32>
    %83 = tpu.matmul %82, %14, %cst_70 {dimension_numbers = #tpu.dot_dimension_numbers<[1], [0], [0], [1], [0, 0, 1, 1], [], []>} : vector<32x32xf32>, vector<32x32xf32>, vector<32x32xf32> -> vector<32x32xf32>
    %84 = vector.broadcast %17 : vector<1x32xf32> to vector<32x32xf32>
    %85 = arith.addf %83, %84 : vector<32x32xf32>
    %86 = vector.shape_cast %85 : vector<32x32xf32> to vector<4x8x32xf32>
    %cst_71 = arith.constant dense<0.000000e+00> : vector<32x32xf32>
    %87 = tpu.matmul %3, %15, %cst_71 {dimension_numbers = #tpu.dot_dimension_numbers<[1], [0], [0], [1], [0, 0, 1, 1], [], []>} : vector<32x32xf32>, vector<32x32xf32>, vector<32x32xf32> -> vector<32x32xf32>
    %88 = vector.broadcast %18 : vector<1x32xf32> to vector<32x32xf32>
    %89 = arith.addf %87, %88 : vector<32x32xf32>
    %90 = vector.shape_cast %89 : vector<32x32xf32> to vector<4x8x32xf32>
    %cst_72 = arith.constant dense<0.000000e+00> : vector<32x32xf32>
    %91 = tpu.matmul %3, %16, %cst_72 {dimension_numbers = #tpu.dot_dimension_numbers<[1], [0], [0], [1], [0, 0, 1, 1], [], []>} : vector<32x32xf32>, vector<32x32xf32>, vector<32x32xf32> -> vector<32x32xf32>
    %92 = vector.broadcast %19 : vector<1x32xf32> to vector<32x32xf32>
    %93 = arith.addf %91, %92 : vector<32x32xf32>
    %94 = vector.shape_cast %93 : vector<32x32xf32> to vector<4x8x32xf32>
    "tpu.trace_start"() <{level = 10 : i32, message = "bqd,bkd->bqk"}> : () -> ()
    %cst_73 = arith.constant dense<0.000000e+00> : vector<4x8x8xf32>
    %95 = tpu.matmul %86, %90, %cst_73 {dimension_numbers = #tpu.dot_dimension_numbers<[2], [2], [1], [1], [0, 0, 0, 1, 1, 1], [0], [0]>} : vector<4x8x32xf32>, vector<4x8x32xf32>, vector<4x8x8xf32> -> vector<4x8x8xf32>
    "tpu.trace_stop"() : () -> ()
    %cst_74 = arith.constant 0.176776692 : f32
    %96 = vector.broadcast %cst_74 : f32 to vector<4x8x8xf32>
    %97 = arith.mulf %95, %96 : vector<4x8x8xf32>
    %cst_75 = arith.constant dense<0xFF800000> : vector<4x8xf32>
    %98 = vector.multi_reduction <maximumf>, %97, %cst_75 [2] : vector<4x8x8xf32> to vector<4x8xf32>
    %99 = vector.shape_cast %98 : vector<4x8xf32> to vector<4x8x1xf32>
    %100 = vector.broadcast %99 : vector<4x8x1xf32> to vector<4x8x8xf32>
    %101 = arith.subf %97, %100 : vector<4x8x8xf32>
    %102 = math.exp %101 : vector<4x8x8xf32>
    %cst_76 = arith.constant dense<0.000000e+00> : vector<4x8xf32>
    %103 = vector.multi_reduction <add>, %102, %cst_76 [2] : vector<4x8x8xf32> to vector<4x8xf32>
    %104 = vector.shape_cast %103 : vector<4x8xf32> to vector<4x8x1xf32>
    %105 = tpu.reciprocal %104 {approx = true} : vector<4x8x1xf32> -> vector<4x8x1xf32>
    %106 = vector.broadcast %105 : vector<4x8x1xf32> to vector<4x8x8xf32>
    %107 = arith.mulf %102, %106 : vector<4x8x8xf32>
    "tpu.trace_start"() <{level = 10 : i32, message = "bqk,bkd->bqd"}> : () -> ()
    %cst_77 = arith.constant dense<0.000000e+00> : vector<4x8x32xf32>
    %108 = tpu.matmul %107, %94, %cst_77 {dimension_numbers = #tpu.dot_dimension_numbers<[2], [1], [1], [2], [0, 0, 0, 1, 1, 2], [0], [0]>} : vector<4x8x8xf32>, vector<4x8x32xf32>, vector<4x8x32xf32> -> vector<4x8x32xf32>
    "tpu.trace_stop"() : () -> ()
    %109 = vector.shape_cast %108 : vector<4x8x32xf32> to vector<32x32xf32>
    %cst_78 = arith.constant dense<0.000000e+00> : vector<32x32xf32>
    %110 = tpu.matmul %109, %20, %cst_78 {dimension_numbers = #tpu.dot_dimension_numbers<[1], [0], [0], [1], [0, 0, 1, 1], [], []>} : vector<32x32xf32>, vector<32x32xf32>, vector<32x32xf32> -> vector<32x32xf32>
    %111 = vector.broadcast %21 : vector<1x32xf32> to vector<32x32xf32>
    %112 = arith.addf %110, %111 : vector<32x32xf32>
    %113 = arith.addf %82, %112 : vector<32x32xf32>
    %cst_79 = arith.constant dense<0.000000e+00> : vector<32xf32>
    %114 = vector.multi_reduction <add>, %113, %cst_79 [1] : vector<32x32xf32> to vector<32xf32>
    %115 = vector.shape_cast %114 : vector<32xf32> to vector<32x1xf32>
    %cst_80 = arith.constant 3.200000e+01 : f32
    %116 = vector.broadcast %cst_80 : f32 to vector<32x1xf32>
    %117 = arith.divf %115, %116 : vector<32x1xf32>
    %118 = vector.broadcast %117 : vector<32x1xf32> to vector<32x32xf32>
    %119 = arith.subf %113, %118 : vector<32x32xf32>
    %120 = arith.mulf %119, %119 : vector<32x32xf32>
    %cst_81 = arith.constant dense<0.000000e+00> : vector<32xf32>
    %121 = vector.multi_reduction <add>, %120, %cst_81 [1] : vector<32x32xf32> to vector<32xf32>
    %122 = vector.shape_cast %121 : vector<32xf32> to vector<32x1xf32>
    %cst_82 = arith.constant 3.200000e+01 : f32
    %123 = vector.broadcast %cst_82 : f32 to vector<32x1xf32>
    %124 = arith.divf %122, %123 : vector<32x1xf32>
    %125 = vector.broadcast %117 : vector<32x1xf32> to vector<32x32xf32>
    %126 = arith.subf %113, %125 : vector<32x32xf32>
    %cst_83 = arith.constant 9.99999974E-6 : f32
    %127 = vector.broadcast %cst_83 : f32 to vector<32x1xf32>
    %128 = arith.addf %124, %127 : vector<32x1xf32>
    %129 = math.rsqrt %128 : vector<32x1xf32>
    %130 = vector.broadcast %129 : vector<32x1xf32> to vector<32x32xf32>
    %131 = arith.mulf %126, %130 : vector<32x32xf32>
    %132 = vector.broadcast %22 : vector<1x32xf32> to vector<32x32xf32>
    %133 = arith.mulf %131, %132 : vector<32x32xf32>
    %134 = vector.broadcast %23 : vector<1x32xf32> to vector<32x32xf32>
    %135 = arith.addf %133, %134 : vector<32x32xf32>
    %cst_84 = arith.constant dense<0.000000e+00> : vector<32x2048xf32>
    %136 = tpu.matmul %135, %24, %cst_84 {dimension_numbers = #tpu.dot_dimension_numbers<[1], [0], [0], [1], [0, 0, 1, 1], [], []>} : vector<32x32xf32>, vector<32x2048xf32>, vector<32x2048xf32> -> vector<32x2048xf32>
    %137 = vector.broadcast %25 : vector<1x2048xf32> to vector<32x2048xf32>
    %138 = arith.addf %136, %137 : vector<32x2048xf32>
    %cst_85 = arith.constant 0.000000e+00 : f32
    %139 = vector.broadcast %cst_85 : f32 to vector<32x2048xf32>
    %140 = arith.maximumf %138, %139 : vector<32x2048xf32>
    %cst_86 = arith.constant dense<0.000000e+00> : vector<32x32xf32>
    %141 = tpu.matmul %140, %26, %cst_86 {dimension_numbers = #tpu.dot_dimension_numbers<[1], [0], [0], [1], [0, 0, 1, 1], [], []>} : vector<32x2048xf32>, vector<2048x32xf32>, vector<32x32xf32> -> vector<32x32xf32>
    %142 = vector.broadcast %27 : vector<1x32xf32> to vector<32x32xf32>
    %143 = arith.addf %141, %142 : vector<32x32xf32>
    %144 = arith.addf %135, %143 : vector<32x32xf32>
    %cst_87 = arith.constant dense<0.000000e+00> : vector<32xf32>
    %145 = vector.multi_reduction <add>, %144, %cst_87 [1] : vector<32x32xf32> to vector<32xf32>
    %146 = vector.shape_cast %145 : vector<32xf32> to vector<32x1xf32>
    %cst_88 = arith.constant 3.200000e+01 : f32
    %147 = vector.broadcast %cst_88 : f32 to vector<32x1xf32>
    %148 = arith.divf %146, %147 : vector<32x1xf32>
    %149 = vector.broadcast %148 : vector<32x1xf32> to vector<32x32xf32>
    %150 = arith.subf %144, %149 : vector<32x32xf32>
    %151 = arith.mulf %150, %150 : vector<32x32xf32>
    %cst_89 = arith.constant dense<0.000000e+00> : vector<32xf32>
    %152 = vector.multi_reduction <add>, %151, %cst_89 [1] : vector<32x32xf32> to vector<32xf32>
    %153 = vector.shape_cast %152 : vector<32xf32> to vector<32x1xf32>
    %cst_90 = arith.constant 3.200000e+01 : f32
    %154 = vector.broadcast %cst_90 : f32 to vector<32x1xf32>
    %155 = arith.divf %153, %154 : vector<32x1xf32>
    %156 = vector.broadcast %148 : vector<32x1xf32> to vector<32x32xf32>
    %157 = arith.subf %144, %156 : vector<32x32xf32>
    %cst_91 = arith.constant 9.99999974E-6 : f32
    %158 = vector.broadcast %cst_91 : f32 to vector<32x1xf32>
    %159 = arith.addf %155, %158 : vector<32x1xf32>
    %160 = math.rsqrt %159 : vector<32x1xf32>
    %161 = vector.broadcast %160 : vector<32x1xf32> to vector<32x32xf32>
    %162 = arith.mulf %157, %161 : vector<32x32xf32>
    %163 = vector.broadcast %28 : vector<1x32xf32> to vector<32x32xf32>
    %164 = arith.mulf %162, %163 : vector<32x32xf32>
    %165 = vector.broadcast %29 : vector<1x32xf32> to vector<32x32xf32>
    %166 = arith.addf %164, %165 : vector<32x32xf32>
    %c0_92 = arith.constant 0 : index
    %c0_93 = arith.constant 0 : index
    %167 = vector.load %arg29[%c0_92, %c0_93] : memref<32x32xf32, #tpu.memory_space<vmem>>, vector<32x32xf32>
    %c0_94 = arith.constant 0 : index
    %c0_95 = arith.constant 0 : index
    %168 = vector.load %arg30[%c0_94, %c0_95] : memref<32x32xf32, #tpu.memory_space<vmem>>, vector<32x32xf32>
    %c0_96 = arith.constant 0 : index
    %c0_97 = arith.constant 0 : index
    %169 = vector.load %arg31[%c0_96, %c0_97] : memref<32x32xf32, #tpu.memory_space<vmem>>, vector<32x32xf32>
    %c0_98 = arith.constant 0 : index
    %c0_99 = arith.constant 0 : index
    %170 = vector.load %arg32[%c0_98, %c0_99] : memref<1x32xf32, #tpu.memory_space<vmem>>, vector<1x32xf32>
    %c0_100 = arith.constant 0 : index
    %c0_101 = arith.constant 0 : index
    %171 = vector.load %arg33[%c0_100, %c0_101] : memref<1x32xf32, #tpu.memory_space<vmem>>, vector<1x32xf32>
    %c0_102 = arith.constant 0 : index
    %c0_103 = arith.constant 0 : index
    %172 = vector.load %arg34[%c0_102, %c0_103] : memref<1x32xf32, #tpu.memory_space<vmem>>, vector<1x32xf32>
    %c0_104 = arith.constant 0 : index
    %c0_105 = arith.constant 0 : index
    %173 = vector.load %arg35[%c0_104, %c0_105] : memref<32x32xf32, #tpu.memory_space<vmem>>, vector<32x32xf32>
    %c0_106 = arith.constant 0 : index
    %c0_107 = arith.constant 0 : index
    %174 = vector.load %arg36[%c0_106, %c0_107] : memref<1x32xf32, #tpu.memory_space<vmem>>, vector<1x32xf32>
    %c0_108 = arith.constant 0 : index
    %c0_109 = arith.constant 0 : index
    %175 = vector.load %arg37[%c0_108, %c0_109] : memref<1x32xf32, #tpu.memory_space<vmem>>, vector<1x32xf32>
    %c0_110 = arith.constant 0 : index
    %c0_111 = arith.constant 0 : index
    %176 = vector.load %arg38[%c0_110, %c0_111] : memref<1x32xf32, #tpu.memory_space<vmem>>, vector<1x32xf32>
    %c0_112 = arith.constant 0 : index
    %c0_113 = arith.constant 0 : index
    %177 = vector.load %arg39[%c0_112, %c0_113] : memref<32x32xf32, #tpu.memory_space<vmem>>, vector<32x32xf32>
    %c0_114 = arith.constant 0 : index
    %c0_115 = arith.constant 0 : index
    %178 = vector.load %arg40[%c0_114, %c0_115] : memref<32x32xf32, #tpu.memory_space<vmem>>, vector<32x32xf32>
    %c0_116 = arith.constant 0 : index
    %c0_117 = arith.constant 0 : index
    %179 = vector.load %arg41[%c0_116, %c0_117] : memref<32x32xf32, #tpu.memory_space<vmem>>, vector<32x32xf32>
    %c0_118 = arith.constant 0 : index
    %c0_119 = arith.constant 0 : index
    %180 = vector.load %arg42[%c0_118, %c0_119] : memref<1x32xf32, #tpu.memory_space<vmem>>, vector<1x32xf32>
    %c0_120 = arith.constant 0 : index
    %c0_121 = arith.constant 0 : index
    %181 = vector.load %arg43[%c0_120, %c0_121] : memref<1x32xf32, #tpu.memory_space<vmem>>, vector<1x32xf32>
    %c0_122 = arith.constant 0 : index
    %c0_123 = arith.constant 0 : index
    %182 = vector.load %arg44[%c0_122, %c0_123] : memref<1x32xf32, #tpu.memory_space<vmem>>, vector<1x32xf32>
    %c0_124 = arith.constant 0 : index
    %c0_125 = arith.constant 0 : index
    %183 = vector.load %arg45[%c0_124, %c0_125] : memref<32x32xf32, #tpu.memory_space<vmem>>, vector<32x32xf32>
    %c0_126 = arith.constant 0 : index
    %c0_127 = arith.constant 0 : index
    %184 = vector.load %arg46[%c0_126, %c0_127] : memref<1x32xf32, #tpu.memory_space<vmem>>, vector<1x32xf32>
    %c0_128 = arith.constant 0 : index
    %c0_129 = arith.constant 0 : index
    %185 = vector.load %arg47[%c0_128, %c0_129] : memref<1x32xf32, #tpu.memory_space<vmem>>, vector<1x32xf32>
    %c0_130 = arith.constant 0 : index
    %c0_131 = arith.constant 0 : index
    %186 = vector.load %arg48[%c0_130, %c0_131] : memref<1x32xf32, #tpu.memory_space<vmem>>, vector<1x32xf32>
    %c0_132 = arith.constant 0 : index
    %c0_133 = arith.constant 0 : index
    %187 = vector.load %arg49[%c0_132, %c0_133] : memref<32x2048xf32, #tpu.memory_space<vmem>>, vector<32x2048xf32>
    %c0_134 = arith.constant 0 : index
    %c0_135 = arith.constant 0 : index
    %188 = vector.load %arg50[%c0_134, %c0_135] : memref<1x2048xf32, #tpu.memory_space<vmem>>, vector<1x2048xf32>
    %c0_136 = arith.constant 0 : index
    %c0_137 = arith.constant 0 : index
    %189 = vector.load %arg51[%c0_136, %c0_137] : memref<2048x32xf32, #tpu.memory_space<vmem>>, vector<2048x32xf32>
    %c0_138 = arith.constant 0 : index
    %c0_139 = arith.constant 0 : index
    %190 = vector.load %arg52[%c0_138, %c0_139] : memref<1x32xf32, #tpu.memory_space<vmem>>, vector<1x32xf32>
    %c0_140 = arith.constant 0 : index
    %c0_141 = arith.constant 0 : index
    %191 = vector.load %arg53[%c0_140, %c0_141] : memref<1x32xf32, #tpu.memory_space<vmem>>, vector<1x32xf32>
    %c0_142 = arith.constant 0 : index
    %c0_143 = arith.constant 0 : index
    %192 = vector.load %arg54[%c0_142, %c0_143] : memref<1x32xf32, #tpu.memory_space<vmem>>, vector<1x32xf32>
    %cst_144 = arith.constant dense<0.000000e+00> : vector<32x32xf32>
    %193 = tpu.matmul %166, %167, %cst_144 {dimension_numbers = #tpu.dot_dimension_numbers<[1], [0], [0], [1], [0, 0, 1, 1], [], []>} : vector<32x32xf32>, vector<32x32xf32>, vector<32x32xf32> -> vector<32x32xf32>
    %194 = vector.broadcast %170 : vector<1x32xf32> to vector<32x32xf32>
    %195 = arith.addf %193, %194 : vector<32x32xf32>
    %196 = vector.shape_cast %195 : vector<32x32xf32> to vector<4x8x32xf32>
    %cst_145 = arith.constant dense<0.000000e+00> : vector<32x32xf32>
    %197 = tpu.matmul %166, %168, %cst_145 {dimension_numbers = #tpu.dot_dimension_numbers<[1], [0], [0], [1], [0, 0, 1, 1], [], []>} : vector<32x32xf32>, vector<32x32xf32>, vector<32x32xf32> -> vector<32x32xf32>
    %198 = vector.broadcast %171 : vector<1x32xf32> to vector<32x32xf32>
    %199 = arith.addf %197, %198 : vector<32x32xf32>
    %200 = vector.shape_cast %199 : vector<32x32xf32> to vector<4x8x32xf32>
    %cst_146 = arith.constant dense<0.000000e+00> : vector<32x32xf32>
    %201 = tpu.matmul %166, %169, %cst_146 {dimension_numbers = #tpu.dot_dimension_numbers<[1], [0], [0], [1], [0, 0, 1, 1], [], []>} : vector<32x32xf32>, vector<32x32xf32>, vector<32x32xf32> -> vector<32x32xf32>
    %202 = vector.broadcast %172 : vector<1x32xf32> to vector<32x32xf32>
    %203 = arith.addf %201, %202 : vector<32x32xf32>
    %204 = vector.shape_cast %203 : vector<32x32xf32> to vector<4x8x32xf32>
    "tpu.trace_start"() <{level = 10 : i32, message = "bqd,bkd->bqk"}> : () -> ()
    %cst_147 = arith.constant dense<0.000000e+00> : vector<4x8x8xf32>
    %205 = tpu.matmul %196, %200, %cst_147 {dimension_numbers = #tpu.dot_dimension_numbers<[2], [2], [1], [1], [0, 0, 0, 1, 1, 1], [0], [0]>} : vector<4x8x32xf32>, vector<4x8x32xf32>, vector<4x8x8xf32> -> vector<4x8x8xf32>
    "tpu.trace_stop"() : () -> ()
    %cst_148 = arith.constant 0.176776692 : f32
    %206 = vector.broadcast %cst_148 : f32 to vector<4x8x8xf32>
    %207 = arith.mulf %205, %206 : vector<4x8x8xf32>
    %cst_149 = arith.constant dense<0xFF800000> : vector<4x8xf32>
    %208 = vector.multi_reduction <maximumf>, %207, %cst_149 [2] : vector<4x8x8xf32> to vector<4x8xf32>
    %209 = vector.shape_cast %208 : vector<4x8xf32> to vector<4x8x1xf32>
    %210 = vector.broadcast %209 : vector<4x8x1xf32> to vector<4x8x8xf32>
    %211 = arith.subf %207, %210 : vector<4x8x8xf32>
    %212 = math.exp %211 : vector<4x8x8xf32>
    %cst_150 = arith.constant dense<0.000000e+00> : vector<4x8xf32>
    %213 = vector.multi_reduction <add>, %212, %cst_150 [2] : vector<4x8x8xf32> to vector<4x8xf32>
    %214 = vector.shape_cast %213 : vector<4x8xf32> to vector<4x8x1xf32>
    %215 = tpu.reciprocal %214 {approx = true} : vector<4x8x1xf32> -> vector<4x8x1xf32>
    %216 = vector.broadcast %215 : vector<4x8x1xf32> to vector<4x8x8xf32>
    %217 = arith.mulf %212, %216 : vector<4x8x8xf32>
    "tpu.trace_start"() <{level = 10 : i32, message = "bqk,bkd->bqd"}> : () -> ()
    %cst_151 = arith.constant dense<0.000000e+00> : vector<4x8x32xf32>
    %218 = tpu.matmul %217, %204, %cst_151 {dimension_numbers = #tpu.dot_dimension_numbers<[2], [1], [1], [2], [0, 0, 0, 1, 1, 2], [0], [0]>} : vector<4x8x8xf32>, vector<4x8x32xf32>, vector<4x8x32xf32> -> vector<4x8x32xf32>
    "tpu.trace_stop"() : () -> ()
    %219 = vector.shape_cast %218 : vector<4x8x32xf32> to vector<32x32xf32>
    %cst_152 = arith.constant dense<0.000000e+00> : vector<32x32xf32>
    %220 = tpu.matmul %219, %173, %cst_152 {dimension_numbers = #tpu.dot_dimension_numbers<[1], [0], [0], [1], [0, 0, 1, 1], [], []>} : vector<32x32xf32>, vector<32x32xf32>, vector<32x32xf32> -> vector<32x32xf32>
    %221 = vector.broadcast %174 : vector<1x32xf32> to vector<32x32xf32>
    %222 = arith.addf %220, %221 : vector<32x32xf32>
    %223 = arith.addf %166, %222 : vector<32x32xf32>
    %cst_153 = arith.constant dense<0.000000e+00> : vector<32xf32>
    %224 = vector.multi_reduction <add>, %223, %cst_153 [1] : vector<32x32xf32> to vector<32xf32>
    %225 = vector.shape_cast %224 : vector<32xf32> to vector<32x1xf32>
    %cst_154 = arith.constant 3.200000e+01 : f32
    %226 = vector.broadcast %cst_154 : f32 to vector<32x1xf32>
    %227 = arith.divf %225, %226 : vector<32x1xf32>
    %228 = vector.broadcast %227 : vector<32x1xf32> to vector<32x32xf32>
    %229 = arith.subf %223, %228 : vector<32x32xf32>
    %230 = arith.mulf %229, %229 : vector<32x32xf32>
    %cst_155 = arith.constant dense<0.000000e+00> : vector<32xf32>
    %231 = vector.multi_reduction <add>, %230, %cst_155 [1] : vector<32x32xf32> to vector<32xf32>
    %232 = vector.shape_cast %231 : vector<32xf32> to vector<32x1xf32>
    %cst_156 = arith.constant 3.200000e+01 : f32
    %233 = vector.broadcast %cst_156 : f32 to vector<32x1xf32>
    %234 = arith.divf %232, %233 : vector<32x1xf32>
    %235 = vector.broadcast %227 : vector<32x1xf32> to vector<32x32xf32>
    %236 = arith.subf %223, %235 : vector<32x32xf32>
    %cst_157 = arith.constant 9.99999974E-6 : f32
    %237 = vector.broadcast %cst_157 : f32 to vector<32x1xf32>
    %238 = arith.addf %234, %237 : vector<32x1xf32>
    %239 = math.rsqrt %238 : vector<32x1xf32>
    %240 = vector.broadcast %239 : vector<32x1xf32> to vector<32x32xf32>
    %241 = arith.mulf %236, %240 : vector<32x32xf32>
    %242 = vector.broadcast %175 : vector<1x32xf32> to vector<32x32xf32>
    %243 = arith.mulf %241, %242 : vector<32x32xf32>
    %244 = vector.broadcast %176 : vector<1x32xf32> to vector<32x32xf32>
    %245 = arith.addf %243, %244 : vector<32x32xf32>
    %cst_158 = arith.constant dense<0.000000e+00> : vector<32x32xf32>
    %246 = tpu.matmul %245, %177, %cst_158 {dimension_numbers = #tpu.dot_dimension_numbers<[1], [0], [0], [1], [0, 0, 1, 1], [], []>} : vector<32x32xf32>, vector<32x32xf32>, vector<32x32xf32> -> vector<32x32xf32>
    %247 = vector.broadcast %180 : vector<1x32xf32> to vector<32x32xf32>
    %248 = arith.addf %246, %247 : vector<32x32xf32>
    %249 = vector.shape_cast %248 : vector<32x32xf32> to vector<4x8x32xf32>
    %cst_159 = arith.constant dense<0.000000e+00> : vector<32x32xf32>
    %250 = tpu.matmul %3, %178, %cst_159 {dimension_numbers = #tpu.dot_dimension_numbers<[1], [0], [0], [1], [0, 0, 1, 1], [], []>} : vector<32x32xf32>, vector<32x32xf32>, vector<32x32xf32> -> vector<32x32xf32>
    %251 = vector.broadcast %181 : vector<1x32xf32> to vector<32x32xf32>
    %252 = arith.addf %250, %251 : vector<32x32xf32>
    %253 = vector.shape_cast %252 : vector<32x32xf32> to vector<4x8x32xf32>
    %cst_160 = arith.constant dense<0.000000e+00> : vector<32x32xf32>
    %254 = tpu.matmul %3, %179, %cst_160 {dimension_numbers = #tpu.dot_dimension_numbers<[1], [0], [0], [1], [0, 0, 1, 1], [], []>} : vector<32x32xf32>, vector<32x32xf32>, vector<32x32xf32> -> vector<32x32xf32>
    %255 = vector.broadcast %182 : vector<1x32xf32> to vector<32x32xf32>
    %256 = arith.addf %254, %255 : vector<32x32xf32>
    %257 = vector.shape_cast %256 : vector<32x32xf32> to vector<4x8x32xf32>
    "tpu.trace_start"() <{level = 10 : i32, message = "bqd,bkd->bqk"}> : () -> ()
    %cst_161 = arith.constant dense<0.000000e+00> : vector<4x8x8xf32>
    %258 = tpu.matmul %249, %253, %cst_161 {dimension_numbers = #tpu.dot_dimension_numbers<[2], [2], [1], [1], [0, 0, 0, 1, 1, 1], [0], [0]>} : vector<4x8x32xf32>, vector<4x8x32xf32>, vector<4x8x8xf32> -> vector<4x8x8xf32>
    "tpu.trace_stop"() : () -> ()
    %cst_162 = arith.constant 0.176776692 : f32
    %259 = vector.broadcast %cst_162 : f32 to vector<4x8x8xf32>
    %260 = arith.mulf %258, %259 : vector<4x8x8xf32>
    %cst_163 = arith.constant dense<0xFF800000> : vector<4x8xf32>
    %261 = vector.multi_reduction <maximumf>, %260, %cst_163 [2] : vector<4x8x8xf32> to vector<4x8xf32>
    %262 = vector.shape_cast %261 : vector<4x8xf32> to vector<4x8x1xf32>
    %263 = vector.broadcast %262 : vector<4x8x1xf32> to vector<4x8x8xf32>
    %264 = arith.subf %260, %263 : vector<4x8x8xf32>
    %265 = math.exp %264 : vector<4x8x8xf32>
    %cst_164 = arith.constant dense<0.000000e+00> : vector<4x8xf32>
    %266 = vector.multi_reduction <add>, %265, %cst_164 [2] : vector<4x8x8xf32> to vector<4x8xf32>
    %267 = vector.shape_cast %266 : vector<4x8xf32> to vector<4x8x1xf32>
    %268 = tpu.reciprocal %267 {approx = true} : vector<4x8x1xf32> -> vector<4x8x1xf32>
    %269 = vector.broadcast %268 : vector<4x8x1xf32> to vector<4x8x8xf32>
    %270 = arith.mulf %265, %269 : vector<4x8x8xf32>
    "tpu.trace_start"() <{level = 10 : i32, message = "bqk,bkd->bqd"}> : () -> ()
    %cst_165 = arith.constant dense<0.000000e+00> : vector<4x8x32xf32>
    %271 = tpu.matmul %270, %257, %cst_165 {dimension_numbers = #tpu.dot_dimension_numbers<[2], [1], [1], [2], [0, 0, 0, 1, 1, 2], [0], [0]>} : vector<4x8x8xf32>, vector<4x8x32xf32>, vector<4x8x32xf32> -> vector<4x8x32xf32>
    "tpu.trace_stop"() : () -> ()
    %272 = vector.shape_cast %271 : vector<4x8x32xf32> to vector<32x32xf32>
    %cst_166 = arith.constant dense<0.000000e+00> : vector<32x32xf32>
    %273 = tpu.matmul %272, %183, %cst_166 {dimension_numbers = #tpu.dot_dimension_numbers<[1], [0], [0], [1], [0, 0, 1, 1], [], []>} : vector<32x32xf32>, vector<32x32xf32>, vector<32x32xf32> -> vector<32x32xf32>
    %274 = vector.broadcast %184 : vector<1x32xf32> to vector<32x32xf32>
    %275 = arith.addf %273, %274 : vector<32x32xf32>
    %276 = arith.addf %245, %275 : vector<32x32xf32>
    %cst_167 = arith.constant dense<0.000000e+00> : vector<32xf32>
    %277 = vector.multi_reduction <add>, %276, %cst_167 [1] : vector<32x32xf32> to vector<32xf32>
    %278 = vector.shape_cast %277 : vector<32xf32> to vector<32x1xf32>
    %cst_168 = arith.constant 3.200000e+01 : f32
    %279 = vector.broadcast %cst_168 : f32 to vector<32x1xf32>
    %280 = arith.divf %278, %279 : vector<32x1xf32>
    %281 = vector.broadcast %280 : vector<32x1xf32> to vector<32x32xf32>
    %282 = arith.subf %276, %281 : vector<32x32xf32>
    %283 = arith.mulf %282, %282 : vector<32x32xf32>
    %cst_169 = arith.constant dense<0.000000e+00> : vector<32xf32>
    %284 = vector.multi_reduction <add>, %283, %cst_169 [1] : vector<32x32xf32> to vector<32xf32>
    %285 = vector.shape_cast %284 : vector<32xf32> to vector<32x1xf32>
    %cst_170 = arith.constant 3.200000e+01 : f32
    %286 = vector.broadcast %cst_170 : f32 to vector<32x1xf32>
    %287 = arith.divf %285, %286 : vector<32x1xf32>
    %288 = vector.broadcast %280 : vector<32x1xf32> to vector<32x32xf32>
    %289 = arith.subf %276, %288 : vector<32x32xf32>
    %cst_171 = arith.constant 9.99999974E-6 : f32
    %290 = vector.broadcast %cst_171 : f32 to vector<32x1xf32>
    %291 = arith.addf %287, %290 : vector<32x1xf32>
    %292 = math.rsqrt %291 : vector<32x1xf32>
    %293 = vector.broadcast %292 : vector<32x1xf32> to vector<32x32xf32>
    %294 = arith.mulf %289, %293 : vector<32x32xf32>
    %295 = vector.broadcast %185 : vector<1x32xf32> to vector<32x32xf32>
    %296 = arith.mulf %294, %295 : vector<32x32xf32>
    %297 = vector.broadcast %186 : vector<1x32xf32> to vector<32x32xf32>
    %298 = arith.addf %296, %297 : vector<32x32xf32>
    %cst_172 = arith.constant dense<0.000000e+00> : vector<32x2048xf32>
    %299 = tpu.matmul %298, %187, %cst_172 {dimension_numbers = #tpu.dot_dimension_numbers<[1], [0], [0], [1], [0, 0, 1, 1], [], []>} : vector<32x32xf32>, vector<32x2048xf32>, vector<32x2048xf32> -> vector<32x2048xf32>
    %300 = vector.broadcast %188 : vector<1x2048xf32> to vector<32x2048xf32>
    %301 = arith.addf %299, %300 : vector<32x2048xf32>
    %cst_173 = arith.constant 0.000000e+00 : f32
    %302 = vector.broadcast %cst_173 : f32 to vector<32x2048xf32>
    %303 = arith.maximumf %301, %302 : vector<32x2048xf32>
    %cst_174 = arith.constant dense<0.000000e+00> : vector<32x32xf32>
    %304 = tpu.matmul %303, %189, %cst_174 {dimension_numbers = #tpu.dot_dimension_numbers<[1], [0], [0], [1], [0, 0, 1, 1], [], []>} : vector<32x2048xf32>, vector<2048x32xf32>, vector<32x32xf32> -> vector<32x32xf32>
    %305 = vector.broadcast %190 : vector<1x32xf32> to vector<32x32xf32>
    %306 = arith.addf %304, %305 : vector<32x32xf32>
    %307 = arith.addf %298, %306 : vector<32x32xf32>
    %cst_175 = arith.constant dense<0.000000e+00> : vector<32xf32>
    %308 = vector.multi_reduction <add>, %307, %cst_175 [1] : vector<32x32xf32> to vector<32xf32>
    %309 = vector.shape_cast %308 : vector<32xf32> to vector<32x1xf32>
    %cst_176 = arith.constant 3.200000e+01 : f32
    %310 = vector.broadcast %cst_176 : f32 to vector<32x1xf32>
    %311 = arith.divf %309, %310 : vector<32x1xf32>
    %312 = vector.broadcast %311 : vector<32x1xf32> to vector<32x32xf32>
    %313 = arith.subf %307, %312 : vector<32x32xf32>
    %314 = arith.mulf %313, %313 : vector<32x32xf32>
    %cst_177 = arith.constant dense<0.000000e+00> : vector<32xf32>
    %315 = vector.multi_reduction <add>, %314, %cst_177 [1] : vector<32x32xf32> to vector<32xf32>
    %316 = vector.shape_cast %315 : vector<32xf32> to vector<32x1xf32>
    %cst_178 = arith.constant 3.200000e+01 : f32
    %317 = vector.broadcast %cst_178 : f32 to vector<32x1xf32>
    %318 = arith.divf %316, %317 : vector<32x1xf32>
    %319 = vector.broadcast %311 : vector<32x1xf32> to vector<32x32xf32>
    %320 = arith.subf %307, %319 : vector<32x32xf32>
    %cst_179 = arith.constant 9.99999974E-6 : f32
    %321 = vector.broadcast %cst_179 : f32 to vector<32x1xf32>
    %322 = arith.addf %318, %321 : vector<32x1xf32>
    %323 = math.rsqrt %322 : vector<32x1xf32>
    %324 = vector.broadcast %323 : vector<32x1xf32> to vector<32x32xf32>
    %325 = arith.mulf %320, %324 : vector<32x32xf32>
    %326 = vector.broadcast %191 : vector<1x32xf32> to vector<32x32xf32>
    %327 = arith.mulf %325, %326 : vector<32x32xf32>
    %328 = vector.broadcast %192 : vector<1x32xf32> to vector<32x32xf32>
    %329 = arith.addf %327, %328 : vector<32x32xf32>
    %330 = vector.shape_cast %329 : vector<32x32xf32> to vector<4x8x32xf32>
    %c0_180 = arith.constant 0 : index
    %c0_181 = arith.constant 0 : index
    %c0_182 = arith.constant 0 : index
    %331 = vector.load %arg55[%c0_180, %c0_181, %c0_182] : memref<4x8x32xf32, #tpu.memory_space<vmem>>, vector<4x8x32xf32>
    tpu.vector_store %arg55[%c0_180, %c0_181, %c0_182], %330 {strides = array<i32>} : memref<4x8x32xf32, #tpu.memory_space<vmem>>, vector<4x8x32xf32>,
    return
  }
  func.func @transform_0(%arg0: i32) -> (i32, i32, i32) {
    %c0_i32 = arith.constant 0 : i32
    %c0_i32_0 = arith.constant 0 : i32
    %c0_i32_1 = arith.constant 0 : i32
    return %arg0, %c0_i32, %c0_i32_0 : i32, i32, i32
  }
  func.func @transform_1(%arg0: i32) -> (i32, i32, i32) {
    %c0_i32 = arith.constant 0 : i32
    %c0_i32_0 = arith.constant 0 : i32
    %c0_i32_1 = arith.constant 0 : i32
    return %arg0, %c0_i32, %c0_i32_0 : i32, i32, i32
  }
  func.func @transform_2(%arg0: i32) -> (i32, i32) {
    %c0_i32 = arith.constant 0 : i32
    %c0_i32_0 = arith.constant 0 : i32
    %c0_i32_1 = arith.constant 0 : i32
    return %c0_i32, %c0_i32_0 : i32, i32
  }
  func.func @transform_3(%arg0: i32) -> (i32, i32) {
    %c0_i32 = arith.constant 0 : i32
    %c0_i32_0 = arith.constant 0 : i32
    %c0_i32_1 = arith.constant 0 : i32
    return %c0_i32, %c0_i32_0 : i32, i32
  }
  func.func @transform_4(%arg0: i32) -> (i32, i32) {
    %c0_i32 = arith.constant 0 : i32
    %c0_i32_0 = arith.constant 0 : i32
    %c0_i32_1 = arith.constant 0 : i32
    return %c0_i32, %c0_i32_0 : i32, i32
  }
  func.func @transform_5(%arg0: i32) -> (i32, i32) {
    %c0_i32 = arith.constant 0 : i32
    %c0_i32_0 = arith.constant 0 : i32
    %c0_i32_1 = arith.constant 0 : i32
    return %c0_i32, %c0_i32_0 : i32, i32
  }
  func.func @transform_6(%arg0: i32) -> (i32, i32) {
    %c0_i32 = arith.constant 0 : i32
    %c0_i32_0 = arith.constant 0 : i32
    %c0_i32_1 = arith.constant 0 : i32
    return %c0_i32, %c0_i32_0 : i32, i32
  }
  func.func @transform_7(%arg0: i32) -> (i32, i32) {
    %c0_i32 = arith.constant 0 : i32
    %c0_i32_0 = arith.constant 0 : i32
    %c0_i32_1 = arith.constant 0 : i32
    return %c0_i32, %c0_i32_0 : i32, i32
  }
  func.func @transform_8(%arg0: i32) -> (i32, i32) {
    %c0_i32 = arith.constant 0 : i32
    %c0_i32_0 = arith.constant 0 : i32
    %c0_i32_1 = arith.constant 0 : i32
    return %c0_i32, %c0_i32_0 : i32, i32
  }
  func.func @transform_9(%arg0: i32) -> (i32, i32) {
    %c0_i32 = arith.constant 0 : i32
    %c0_i32_0 = arith.constant 0 : i32
    %c0_i32_1 = arith.constant 0 : i32
    return %c0_i32, %c0_i32_0 : i32, i32
  }
  func.func @transform_10(%arg0: i32) -> (i32, i32) {
    %c0_i32 = arith.constant 0 : i32
    %c0_i32_0 = arith.constant 0 : i32
    %c0_i32_1 = arith.constant 0 : i32
    return %c0_i32, %c0_i32_0 : i32, i32
  }
  func.func @transform_11(%arg0: i32) -> (i32, i32) {
    %c0_i32 = arith.constant 0 : i32
    %c0_i32_0 = arith.constant 0 : i32
    %c0_i32_1 = arith.constant 0 : i32
    return %c0_i32, %c0_i32_0 : i32, i32
  }
  func.func @transform_12(%arg0: i32) -> (i32, i32) {
    %c0_i32 = arith.constant 0 : i32
    %c0_i32_0 = arith.constant 0 : i32
    %c0_i32_1 = arith.constant 0 : i32
    return %c0_i32, %c0_i32_0 : i32, i32
  }
  func.func @transform_13(%arg0: i32) -> (i32, i32) {
    %c0_i32 = arith.constant 0 : i32
    %c0_i32_0 = arith.constant 0 : i32
    %c0_i32_1 = arith.constant 0 : i32
    return %c0_i32, %c0_i32_0 : i32, i32
  }
  func.func @transform_14(%arg0: i32) -> (i32, i32) {
    %c0_i32 = arith.constant 0 : i32
    %c0_i32_0 = arith.constant 0 : i32
    %c0_i32_1 = arith.constant 0 : i32
    return %c0_i32, %c0_i32_0 : i32, i32
  }
  func.func @transform_15(%arg0: i32) -> (i32, i32) {
    %c0_i32 = arith.constant 0 : i32
    %c0_i32_0 = arith.constant 0 : i32
    %c0_i32_1 = arith.constant 0 : i32
    return %c0_i32, %c0_i32_0 : i32, i32
  }
  func.func @transform_16(%arg0: i32) -> (i32, i32) {
    %c0_i32 = arith.constant 0 : i32
    %c0_i32_0 = arith.constant 0 : i32
    %c0_i32_1 = arith.constant 0 : i32
    return %c0_i32, %c0_i32_0 : i32, i32
  }
  func.func @transform_17(%arg0: i32) -> (i32, i32) {
    %c0_i32 = arith.constant 0 : i32
    %c0_i32_0 = arith.constant 0 : i32
    %c0_i32_1 = arith.constant 0 : i32
    return %c0_i32, %c0_i32_0 : i32, i32
  }
  func.func @transform_18(%arg0: i32) -> (i32, i32) {
    %c0_i32 = arith.constant 0 : i32
    %c0_i32_0 = arith.constant 0 : i32
    %c0_i32_1 = arith.constant 0 : i32
    return %c0_i32, %c0_i32_0 : i32, i32
  }
  func.func @transform_19(%arg0: i32) -> (i32, i32) {
    %c0_i32 = arith.constant 0 : i32
    %c0_i32_0 = arith.constant 0 : i32
    %c0_i32_1 = arith.constant 0 : i32
    return %c0_i32, %c0_i32_0 : i32, i32
  }
  func.func @transform_20(%arg0: i32) -> (i32, i32) {
    %c0_i32 = arith.constant 0 : i32
    %c0_i32_0 = arith.constant 0 : i32
    %c0_i32_1 = arith.constant 0 : i32
    return %c0_i32, %c0_i32_0 : i32, i32
  }
  func.func @transform_21(%arg0: i32) -> (i32, i32) {
    %c0_i32 = arith.constant 0 : i32
    %c0_i32_0 = arith.constant 0 : i32
    %c0_i32_1 = arith.constant 0 : i32
    return %c0_i32, %c0_i32_0 : i32, i32
  }
  func.func @transform_22(%arg0: i32) -> (i32, i32) {
    %c0_i32 = arith.constant 0 : i32
    %c0_i32_0 = arith.constant 0 : i32
    %c0_i32_1 = arith.constant 0 : i32
    return %c0_i32, %c0_i32_0 : i32, i32
  }
  func.func @transform_23(%arg0: i32) -> (i32, i32) {
    %c0_i32 = arith.constant 0 : i32
    %c0_i32_0 = arith.constant 0 : i32
    %c0_i32_1 = arith.constant 0 : i32
    return %c0_i32, %c0_i32_0 : i32, i32
  }
  func.func @transform_24(%arg0: i32) -> (i32, i32) {
    %c0_i32 = arith.constant 0 : i32
    %c0_i32_0 = arith.constant 0 : i32
    %c0_i32_1 = arith.constant 0 : i32
    return %c0_i32, %c0_i32_0 : i32, i32
  }
  func.func @transform_25(%arg0: i32) -> (i32, i32) {
    %c0_i32 = arith.constant 0 : i32
    %c0_i32_0 = arith.constant 0 : i32
    %c0_i32_1 = arith.constant 0 : i32
    return %c0_i32, %c0_i32_0 : i32, i32
  }
  func.func @transform_26(%arg0: i32) -> (i32, i32) {
    %c0_i32 = arith.constant 0 : i32
    %c0_i32_0 = arith.constant 0 : i32
    %c0_i32_1 = arith.constant 0 : i32
    return %c0_i32, %c0_i32_0 : i32, i32
  }
  func.func @transform_27(%arg0: i32) -> (i32, i32) {
    %c0_i32 = arith.constant 0 : i32
    %c0_i32_0 = arith.constant 0 : i32
    %c0_i32_1 = arith.constant 0 : i32
    return %c0_i32, %c0_i32_0 : i32, i32
  }
  func.func @transform_28(%arg0: i32) -> (i32, i32) {
    %c0_i32 = arith.constant 0 : i32
    %c0_i32_0 = arith.constant 0 : i32
    %c0_i32_1 = arith.constant 0 : i32
    return %c0_i32, %c0_i32_0 : i32, i32
  }
  func.func @transform_29(%arg0: i32) -> (i32, i32) {
    %c0_i32 = arith.constant 0 : i32
    %c0_i32_0 = arith.constant 0 : i32
    %c0_i32_1 = arith.constant 0 : i32
    return %c0_i32, %c0_i32_0 : i32, i32
  }
  func.func @transform_30(%arg0: i32) -> (i32, i32) {
    %c0_i32 = arith.constant 0 : i32
    %c0_i32_0 = arith.constant 0 : i32
    %c0_i32_1 = arith.constant 0 : i32
    return %c0_i32, %c0_i32_0 : i32, i32
  }
  func.func @transform_31(%arg0: i32) -> (i32, i32) {
    %c0_i32 = arith.constant 0 : i32
    %c0_i32_0 = arith.constant 0 : i32
    %c0_i32_1 = arith.constant 0 : i32
    return %c0_i32, %c0_i32_0 : i32, i32
  }
  func.func @transform_32(%arg0: i32) -> (i32, i32) {
    %c0_i32 = arith.constant 0 : i32
    %c0_i32_0 = arith.constant 0 : i32
    %c0_i32_1 = arith.constant 0 : i32
    return %c0_i32, %c0_i32_0 : i32, i32
  }
  func.func @transform_33(%arg0: i32) -> (i32, i32) {
    %c0_i32 = arith.constant 0 : i32
    %c0_i32_0 = arith.constant 0 : i32
    %c0_i32_1 = arith.constant 0 : i32
    return %c0_i32, %c0_i32_0 : i32, i32
  }
  func.func @transform_34(%arg0: i32) -> (i32, i32) {
    %c0_i32 = arith.constant 0 : i32
    %c0_i32_0 = arith.constant 0 : i32
    %c0_i32_1 = arith.constant 0 : i32
    return %c0_i32, %c0_i32_0 : i32, i32
  }
  func.func @transform_35(%arg0: i32) -> (i32, i32) {
    %c0_i32 = arith.constant 0 : i32
    %c0_i32_0 = arith.constant 0 : i32
    %c0_i32_1 = arith.constant 0 : i32
    return %c0_i32, %c0_i32_0 : i32, i32
  }
  func.func @transform_36(%arg0: i32) -> (i32, i32) {
    %c0_i32 = arith.constant 0 : i32
    %c0_i32_0 = arith.constant 0 : i32
    %c0_i32_1 = arith.constant 0 : i32
    return %c0_i32, %c0_i32_0 : i32, i32
  }
  func.func @transform_37(%arg0: i32) -> (i32, i32) {
    %c0_i32 = arith.constant 0 : i32
    %c0_i32_0 = arith.constant 0 : i32
    %c0_i32_1 = arith.constant 0 : i32
    return %c0_i32, %c0_i32_0 : i32, i32
  }
  func.func @transform_38(%arg0: i32) -> (i32, i32) {
    %c0_i32 = arith.constant 0 : i32
    %c0_i32_0 = arith.constant 0 : i32
    %c0_i32_1 = arith.constant 0 : i32
    return %c0_i32, %c0_i32_0 : i32, i32
  }
  func.func @transform_39(%arg0: i32) -> (i32, i32) {
    %c0_i32 = arith.constant 0 : i32
    %c0_i32_0 = arith.constant 0 : i32
    %c0_i32_1 = arith.constant 0 : i32
    return %c0_i32, %c0_i32_0 : i32, i32
  }
  func.func @transform_40(%arg0: i32) -> (i32, i32) {
    %c0_i32 = arith.constant 0 : i32
    %c0_i32_0 = arith.constant 0 : i32
    %c0_i32_1 = arith.constant 0 : i32
    return %c0_i32, %c0_i32_0 : i32, i32
  }
  func.func @transform_41(%arg0: i32) -> (i32, i32) {
    %c0_i32 = arith.constant 0 : i32
    %c0_i32_0 = arith.constant 0 : i32
    %c0_i32_1 = arith.constant 0 : i32
    return %c0_i32, %c0_i32_0 : i32, i32
  }
  func.func @transform_42(%arg0: i32) -> (i32, i32) {
    %c0_i32 = arith.constant 0 : i32
    %c0_i32_0 = arith.constant 0 : i32
    %c0_i32_1 = arith.constant 0 : i32
    return %c0_i32, %c0_i32_0 : i32, i32
  }
  func.func @transform_43(%arg0: i32) -> (i32, i32) {
    %c0_i32 = arith.constant 0 : i32
    %c0_i32_0 = arith.constant 0 : i32
    %c0_i32_1 = arith.constant 0 : i32
    return %c0_i32, %c0_i32_0 : i32, i32
  }
  func.func @transform_44(%arg0: i32) -> (i32, i32) {
    %c0_i32 = arith.constant 0 : i32
    %c0_i32_0 = arith.constant 0 : i32
    %c0_i32_1 = arith.constant 0 : i32
    return %c0_i32, %c0_i32_0 : i32, i32
  }
  func.func @transform_45(%arg0: i32) -> (i32, i32) {
    %c0_i32 = arith.constant 0 : i32
    %c0_i32_0 = arith.constant 0 : i32
    %c0_i32_1 = arith.constant 0 : i32
    return %c0_i32, %c0_i32_0 : i32, i32
  }
  func.func @transform_46(%arg0: i32) -> (i32, i32) {
    %c0_i32 = arith.constant 0 : i32
    %c0_i32_0 = arith.constant 0 : i32
    %c0_i32_1 = arith.constant 0 : i32
    return %c0_i32, %c0_i32_0 : i32, i32
  }
  func.func @transform_47(%arg0: i32) -> (i32, i32) {
    %c0_i32 = arith.constant 0 : i32
    %c0_i32_0 = arith.constant 0 : i32
    %c0_i32_1 = arith.constant 0 : i32
    return %c0_i32, %c0_i32_0 : i32, i32
  }
  func.func @transform_48(%arg0: i32) -> (i32, i32) {
    %c0_i32 = arith.constant 0 : i32
    %c0_i32_0 = arith.constant 0 : i32
    %c0_i32_1 = arith.constant 0 : i32
    return %c0_i32, %c0_i32_0 : i32, i32
  }
  func.func @transform_49(%arg0: i32) -> (i32, i32) {
    %c0_i32 = arith.constant 0 : i32
    %c0_i32_0 = arith.constant 0 : i32
    %c0_i32_1 = arith.constant 0 : i32
    return %c0_i32, %c0_i32_0 : i32, i32
  }
  func.func @transform_50(%arg0: i32) -> (i32, i32) {
    %c0_i32 = arith.constant 0 : i32
    %c0_i32_0 = arith.constant 0 : i32
    %c0_i32_1 = arith.constant 0 : i32
    return %c0_i32, %c0_i32_0 : i32, i32
  }
  func.func @transform_51(%arg0: i32) -> (i32, i32) {
    %c0_i32 = arith.constant 0 : i32
    %c0_i32_0 = arith.constant 0 : i32
    %c0_i32_1 = arith.constant 0 : i32
    return %c0_i32, %c0_i32_0 : i32, i32
  }
  func.func @transform_52(%arg0: i32) -> (i32, i32) {
    %c0_i32 = arith.constant 0 : i32
    %c0_i32_0 = arith.constant 0 : i32
    %c0_i32_1 = arith.constant 0 : i32
    return %c0_i32, %c0_i32_0 : i32, i32
  }
  func.func @transform_53(%arg0: i32) -> (i32, i32) {
    %c0_i32 = arith.constant 0 : i32
    %c0_i32_0 = arith.constant 0 : i32
    %c0_i32_1 = arith.constant 0 : i32
    return %c0_i32, %c0_i32_0 : i32, i32
  }
  func.func @transform_54(%arg0: i32) -> (i32, i32, i32) {
    %c0_i32 = arith.constant 0 : i32
    %c0_i32_0 = arith.constant 0 : i32
    %c0_i32_1 = arith.constant 0 : i32
    return %arg0, %c0_i32, %c0_i32_0 : i32, i32, i32
  }
}

module attributes {stable_mosaic.version = 11 : i64} {
  func.func @_heads_kernel(%arg0: i32, %arg1: memref<64x32xf32, #tpu.memory_space<vmem>>, %arg2: memref<32x128xf32, #tpu.memory_space<vmem>>, %arg3: memref<1x128xf32, #tpu.memory_space<vmem>>, %arg4: memref<128x128xf32, #tpu.memory_space<vmem>>, %arg5: memref<1x128xf32, #tpu.memory_space<vmem>>, %arg6: memref<64x128xf32, #tpu.memory_space<vmem>>) attributes {dimension_semantics = [#tpu.dimension_semantics<parallel>], iteration_bounds = array<i64: 1>, scalar_prefetch = 0 : i64, scratch_operands = 0 : i64, tpu.core_type = #tpu.core_type<tc>, window_params = [{transform_indices = @transform_0, window_bounds = array<i64: 64, 32>}, {pipeline_mode = #tpu.pipeline_mode<synchronous>, transform_indices = @transform_1, window_bounds = array<i64: 32, 128>}, {pipeline_mode = #tpu.pipeline_mode<synchronous>, transform_indices = @transform_2, window_bounds = array<i64: 1, 128>}, {pipeline_mode = #tpu.pipeline_mode<synchronous>, transform_indices = @transform_3, window_bounds = array<i64: 128, 128>}, {pipeline_mode = #tpu.pipeline_mode<synchronous>, transform_indices = @transform_4, window_bounds = array<i64: 1, 128>}, {transform_indices = @transform_5, window_bounds = array<i64: 64, 128>}]} {
    %c0 = arith.constant 0 : index
    %c0_0 = arith.constant 0 : index
    %0 = vector.load %arg1[%c0, %c0_0] : memref<64x32xf32, #tpu.memory_space<vmem>>, vector<64x32xf32>
    %c0_1 = arith.constant 0 : index
    %c0_2 = arith.constant 0 : index
    %1 = vector.load %arg2[%c0_1, %c0_2] : memref<32x128xf32, #tpu.memory_space<vmem>>, vector<32x128xf32>
    %cst = arith.constant dense<0.000000e+00> : vector<64x128xf32>
    %2 = tpu.matmul %0, %1, %cst {dimension_numbers = #tpu.dot_dimension_numbers<[1], [0], [0], [1], [0, 0, 1, 1], [], []>} : vector<64x32xf32>, vector<32x128xf32>, vector<64x128xf32> -> vector<64x128xf32>
    %c0_3 = arith.constant 0 : index
    %c0_4 = arith.constant 0 : index
    %3 = vector.load %arg3[%c0_3, %c0_4] : memref<1x128xf32, #tpu.memory_space<vmem>>, vector<1x128xf32>
    %4 = vector.broadcast %3 : vector<1x128xf32> to vector<64x128xf32>
    %5 = arith.addf %2, %4 : vector<64x128xf32>
    %6 = tpu.iota {dimensions = array<i32: 1>} : vector<64x128xi32>
    %c16_i32 = arith.constant 16 : i32
    %7 = vector.broadcast %c16_i32 : i32 to vector<64x128xi32>
    %8 = arith.cmpi slt, %6, %7 : vector<64x128xi32>
    %cst_5 = arith.constant 0.000000e+00 : f32
    %9 = vector.broadcast %cst_5 : f32 to vector<64x128xf32>
    %10 = arith.maximumf %5, %9 : vector<64x128xf32>
    %11 = arith.select %8, %10, %5 : vector<64x128xi1>, vector<64x128xf32>
    %c0_6 = arith.constant 0 : index
    %c0_7 = arith.constant 0 : index
    %12 = vector.load %arg4[%c0_6, %c0_7] : memref<128x128xf32, #tpu.memory_space<vmem>>, vector<128x128xf32>
    %cst_8 = arith.constant dense<0.000000e+00> : vector<64x128xf32>
    %13 = tpu.matmul %11, %12, %cst_8 {dimension_numbers = #tpu.dot_dimension_numbers<[1], [0], [0], [1], [0, 0, 1, 1], [], []>} : vector<64x128xf32>, vector<128x128xf32>, vector<64x128xf32> -> vector<64x128xf32>
    %14 = arith.addf %11, %13 : vector<64x128xf32>
    %c0_9 = arith.constant 0 : index
    %c0_10 = arith.constant 0 : index
    %15 = vector.load %arg5[%c0_9, %c0_10] : memref<1x128xf32, #tpu.memory_space<vmem>>, vector<1x128xf32>
    %16 = vector.broadcast %15 : vector<1x128xf32> to vector<64x128xf32>
    %17 = arith.addf %14, %16 : vector<64x128xf32>
    %c0_11 = arith.constant 0 : index
    %c0_12 = arith.constant 0 : index
    %18 = vector.load %arg6[%c0_11, %c0_12] : memref<64x128xf32, #tpu.memory_space<vmem>>, vector<64x128xf32>
    tpu.vector_store %arg6[%c0_11, %c0_12], %17 {strides = array<i32>} : memref<64x128xf32, #tpu.memory_space<vmem>>, vector<64x128xf32>,
    return
  }
  func.func @transform_0(%arg0: i32) -> (i32, i32) {
    %c0_i32 = arith.constant 0 : i32
    %c0_i32_0 = arith.constant 0 : i32
    return %arg0, %c0_i32 : i32, i32
  }
  func.func @transform_1(%arg0: i32) -> (i32, i32) {
    %c0_i32 = arith.constant 0 : i32
    %c0_i32_0 = arith.constant 0 : i32
    %c0_i32_1 = arith.constant 0 : i32
    return %c0_i32, %c0_i32_0 : i32, i32
  }
  func.func @transform_2(%arg0: i32) -> (i32, i32) {
    %c0_i32 = arith.constant 0 : i32
    %c0_i32_0 = arith.constant 0 : i32
    %c0_i32_1 = arith.constant 0 : i32
    return %c0_i32, %c0_i32_0 : i32, i32
  }
  func.func @transform_3(%arg0: i32) -> (i32, i32) {
    %c0_i32 = arith.constant 0 : i32
    %c0_i32_0 = arith.constant 0 : i32
    %c0_i32_1 = arith.constant 0 : i32
    return %c0_i32, %c0_i32_0 : i32, i32
  }
  func.func @transform_4(%arg0: i32) -> (i32, i32) {
    %c0_i32 = arith.constant 0 : i32
    %c0_i32_0 = arith.constant 0 : i32
    %c0_i32_1 = arith.constant 0 : i32
    return %c0_i32, %c0_i32_0 : i32, i32
  }
  func.func @transform_5(%arg0: i32) -> (i32, i32) {
    %c0_i32 = arith.constant 0 : i32
    %c0_i32_0 = arith.constant 0 : i32
    return %arg0, %c0_i32 : i32, i32
  }
}

</mosaic_0001>

<bundles_post_ra>
// kernel: self_attention_encoder_forward.5
= control target key start
LH: loop header
LB: loop body
LE: loop exit
PB: predicated region body
PF: predicated region fallthrough
CT: control target
= control target key end

     0   :  { %vm31_vm0 = vcmask 392192   ;;  %vm133_vm1 = vcmask 261120   ;;  %s262_s1 = inlined_call_operand.vmem [shape: f32[48,32], index: 1, kind: input, shape index: {}]   ;;  %s263_s0 = inlined_call_operand.vmem [shape: f32[32,48], index: 0, kind: input, shape index: {}]   ;;  %s264_s2 = inlined_call_operand.vmem [shape: f32[1,32], index: 2, kind: input, shape index: {}]   ;;  %s265_s3 = inlined_call_operand.vmem [shape: f32[32,32], index: 3, kind: output, shape index: {}]  }
   0x1   :  { %v18_v0 = vld [vmem:[%s262_s1] sm:$0xff]  ;;  %v19_v1 = vld [vmem:[%s262_s1 + $0x8] sm:$0xff]  ;;  %v20_v2 = vld [vmem:[%s262_s1 + $0x10] sm:$0xff] }
   0x2   :  { %v175_v3 = vpack.c.bf16 %v19_v1, %v18_v0  ;;  %v21_v4 = vld [vmem:[%s262_s1 + $0x18] sm:$0xff]  ;;  %v22_v6 = vld [vmem:[%s262_s1 + $0x20] sm:$0xff]  ;;  %v23_v7 = vld [vmem:[%s262_s1 + $0x28] sm:$0xff] }
   0x3   :  { %v179_v5 = vpack.c.bf16 %v21_v4, %v20_v2  ;;  %v14_v8 = vld [vmem:[%s263_s0] sm:$0xff]  ;;  %v16_v9 = vld [vmem:[%s263_s0 + $0x10] sm:$0xff]  ;;  %v183_v10 = vpack.c.bf16 %v23_v7, %v22_v6  ;;  %v15_v11 = vld [vmem:[%s263_s0 + $0x8] sm:$0xff] }
   0x4   :  { %176 = vmatprep.subr.bf16.mxu0 %v175_v3  ;;  %187 = vmatprep.subr.bf16.mxu1 %v175_v3  ;;  %v17_v12 = vld [vmem:[%s263_s0 + $0x18] sm:$0xff]  ;;  %v142_v13 = vld [vmem:[%s264_s2] ss:$0 sm:$0xff] }
   0x5   :  { %178 = vmatpush3.bf16.msra.mxu0 %v175_v3  ;;  %190 = vmatpush3.bf16.msra.mxu1 %v175_v3 }
   0x6   :  { %180 = vmatprep.subr.bf16.mxu0 %v179_v5  ;;  %188 = vmatprep.subr.bf16.mxu1 %v179_v5 }
   0x7   :  { %169 = vmatprep.mubr.msk.f32.mxu0 %vm31_vm0, %v14_v8  ;;  %172 = vmatprep.mubr.msk.f32.mxu1 %vm31_vm0, %v16_v9 }
   0x9   :  { %182 = vmatpush3.bf16.msra.mxu0 %v179_v5  ;;  %191 = vmatpush3.bf16.msra.mxu1 %v179_v5 }
   0xa   :  { %184 = vmatprep.subr.bf16.mxu0 %v183_v10  ;;  %189 = vmatprep.subr.bf16.mxu1 %v183_v10 }
   0xd   :  { %186 = vmatpush3.bf16.msra.mxu0 %v183_v10  ;;  %192 = vmatpush3.bf16.msra.mxu1 %v183_v10 }
  0x10   :  { %170 = vmatmul.mubr.msk.f32.vlgmr.msra.gmra.mrb[0].mxu0 %vm31_vm0, %v15_v11  ;;  %173 = vmatmul.mubr.msk.f32.vlgmr.msra.gmra.mrb[0].mxu1 %vm31_vm0, %v17_v12 }
  0xe3   :  { %v171_v14 = vpop.f32.mrb[0].mxu0  ;;  %v174_v15 = vpop.f32.mrb[0].mxu1 }
  0xe4   :  { %v116_v16 = vadd.f32 %v171_v14, %v142_v13  ;;  %v126_v17 = vadd.f32 %v174_v15, %v142_v13  ;;  %v110_v18 = vpop.f32.mrb[1].mxu0  ;;  %v120_v19 = vpop.f32.mrb[1].mxu1 }
  0xe5   :  { %v111_v20 = vadd.f32 %v142_v13, %v110_v18  ;;  %v121_v21 = vadd.f32 %v142_v13, %v120_v19 }
  0xe6   :  { %v130_v22 = vmax.f32 %v116_v16, 0.0  ;;  %v132_v23 = vmax.f32 %v126_v17, 0.0 }
  0xe7   :  { %v129_v24 = vmax.f32 %v111_v20, 0.0  ;;  %v131_v25 = vmax.f32 %v121_v21, 0.0 }
  0xe8   :  { %135 = vst.msk [vmem:[%s265_s3 + $0x8] sm:$0xff] %vm133_vm1, %v130_v22  ;;  %137 = vst.msk [vmem:[%s265_s3 + $0x18] sm:$0xff] %vm133_vm1, %v132_v23 }
  0xe9   :  { %134 = vst.msk [vmem:[%s265_s3] sm:$0xff] %vm133_vm1, %v129_v24  ;;  %136 = vst.msk [vmem:[%s265_s3 + $0x10] sm:$0xff] %vm133_vm1, %v131_v25 }

// kernel: self_attention_encoder_forward.6
= control target key start
LH: loop header
LB: loop body
LE: loop exit
PB: predicated region body
PF: predicated region fallthrough
CT: control target
= control target key end

     0   :  { %vm44_vm0 = vcmask 1041408   ;;  %vm31_vm1 = vcmask 343040   ;;  %vm201_vm2 = vmmov 1   ;;  %vm137_vm4 = vcmask 261120   ;;  %s271_s1 = inlined_call_operand.vmem [shape: f32[42,32], index: 1, kind: input, shape index: {}]   ;;  %s272_s0 = inlined_call_operand.vmem [shape: f32[32,42], index: 0, kind: input, shape index: {}]   ;;  %s273_s2 = inlined_call_operand.vmem [shape: f32[1,32], index: 2, kind: input, shape index: {}]   ;;  %s274_s3 = inlined_call_operand.vmem [shape: f32[32,32], index: 3, kind: output, shape index: {}]  }
   0x1   :  { %v18_v0 = vld [vmem:[%s271_s1] sm:$0xff]  ;;  %v19_v1 = vld [vmem:[%s271_s1 + $0x8] sm:$0xff]  ;;  %v20_v2 = vld [vmem:[%s271_s1 + $0x10] sm:$0xff] }
   0x2   :  { %v180_v3 = vpack.c.bf16 %v19_v1, %v18_v0  ;;  %v21_v4 = vld [vmem:[%s271_s1 + $0x18] sm:$0xff]  ;;  %v22_v6 = vld [vmem:[%s271_s1 + $0x20] sm:$0xff]  ;;  %v23_v7 = vld [vmem:[%s271_s1 + $0x28] sm:$0x3] }
   0x3   :  { %v184_v5 = vpack.c.bf16 %v21_v4, %v20_v2  ;;  %v14_v8 = vld [vmem:[%s272_s0] sm:$0xff]  ;;  %v16_v9 = vld [vmem:[%s272_s0 + $0x10] sm:$0xff]  ;;  %v188_v10 = vpack.c.bf16 %v23_v7, %v22_v6  ;;  %vm189_vm3 = vmpackc.low %vm44_vm0, %vm201_vm2 }
   0x4   :  { %181 = vmatprep.subr.bf16.mxu0 %v180_v3  ;;  %194 = vmatprep.subr.bf16.mxu1 %v180_v3  ;;  %v15_v11 = vld [vmem:[%s272_s0 + $0x8] sm:$0xff]  ;;  %v17_v12 = vld [vmem:[%s272_s0 + $0x18] sm:$0xff]  ;;  %v146_v13 = vld [vmem:[%s273_s2] ss:$0 sm:$0xff] }
   0x5   :  { %183 = vmatpush3.bf16.msra.mxu0 %v180_v3  ;;  %197 = vmatpush3.bf16.msra.mxu1 %v180_v3 }
   0x6   :  { %185 = vmatprep.subr.bf16.mxu0 %v184_v5  ;;  %195 = vmatprep.subr.bf16.mxu1 %v184_v5 }
   0x7   :  { %174 = vmatprep.mubr.msk.f32.mxu0 %vm31_vm1, %v14_v8  ;;  %177 = vmatprep.mubr.msk.f32.mxu1 %vm31_vm1, %v16_v9 }
   0x9   :  { %187 = vmatpush3.bf16.msra.mxu0 %v184_v5  ;;  %198 = vmatpush3.bf16.msra.mxu1 %v184_v5 }
   0xa   :  { %190 = vmatprep.subr.msk.bf16.mxu0 %vm189_vm3, %v188_v10  ;;  %196 = vmatprep.subr.msk.bf16.mxu1 %vm189_vm3, %v188_v10 }
   0xd   :  { %193 = vmatpush3.bf16.msk.msra.mxu0 %vm189_vm3, %v188_v10  ;;  %199 = vmatpush3.bf16.msk.msra.mxu1 %vm189_vm3, %v188_v10 }
  0x10   :  { %175 = vmatmul.mubr.msk.f32.vlgmr.msra.gmra.mrb[0].mxu0 %vm31_vm1, %v15_v11  ;;  %178 = vmatmul.mubr.msk.f32.vlgmr.msra.gmra.mrb[0].mxu1 %vm31_vm1, %v17_v12 }
  0xe3   :  { %v176_v14 = vpop.f32.mrb[0].mxu0  ;;  %v179_v15 = vpop.f32.mrb[0].mxu1 }
  0xe4   :  { %v120_v16 = vadd.f32 %v176_v14, %v146_v13  ;;  %v130_v17 = vadd.f32 %v179_v15, %v146_v13  ;;  %v114_v18 = vpop.f32.mrb[1].mxu0  ;;  %v124_v19 = vpop.f32.mrb[1].mxu1 }
  0xe5   :  { %v115_v20 = vadd.f32 %v146_v13, %v114_v18  ;;  %v125_v21 = vadd.f32 %v146_v13, %v124_v19 }
  0xe6   :  { %v134_v22 = vmax.f32 %v120_v16, 0.0  ;;  %v136_v23 = vmax.f32 %v130_v17, 0.0 }
  0xe7   :  { %v133_v24 = vmax.f32 %v115_v20, 0.0  ;;  %v135_v25 = vmax.f32 %v125_v21, 0.0 }
  0xe8   :  { %139 = vst.msk [vmem:[%s274_s3 + $0x8] sm:$0xff] %vm137_vm4, %v134_v22  ;;  %141 = vst.msk [vmem:[%s274_s3 + $0x18] sm:$0xff] %vm137_vm4, %v136_v23 }
  0xe9   :  { %138 = vst.msk [vmem:[%s274_s3] sm:$0xff] %vm137_vm4, %v133_v24  ;;  %140 = vst.msk [vmem:[%s274_s3 + $0x10] sm:$0xff] %vm137_vm4, %v135_v25 }

// kernel: self_attention_encoder_forward.7
= control target key start
LH: loop header
LB: loop body
LE: loop exit
PB: predicated region body
PF: predicated region fallthrough
CT: control target
= control target key end

     0   :  { %s3840_s6 = smov 1   ;;  %s3841_s10 = smov 2   ;;  %s4441_s0 = inlined_call_operand.smem [shape: u32[35], index: -1, kind: input, shape index: {}] }
   0x1   :  { %s3885_s5 = sld [smem:[%s4441_s0]]   ;;  %s3842_s14 = smov 3  }
   0x2   :  { %s3890_s9 = sld [smem:[%s4441_s0 + %s3840_s6]]   ;;  %s3843_s18 = smov 4  }
   0x3   :  { %s3895_s13 = sld [smem:[%s4441_s0 + %s3841_s10]]   ;;  %s3844_s22 = smov 5  }
   0x4   :  { %s3900_s17 = sld [smem:[%s4441_s0 + %s3842_s14]]   ;;  %s3845_s26 = smov 6  }
   0x5   :  { %s3905_s21 = sld [smem:[%s4441_s0 + %s3843_s18]]   ;;  %s3846_s30 = smov 7  }
   0x6   :  { %s3910_s25 = sld [smem:[%s4441_s0 + %s3844_s22]]   ;;  %s3847_s4 = smov 8  }
   0x7   :  { %s3915_s29 = sld [smem:[%s4441_s0 + %s3845_s26]]   ;;  %s3848_s10 = smov 9  }
   0x8   :  { %s3920_s3 = sld [smem:[%s4441_s0 + %s3846_s30]]   ;;  %s3849_s15 = smov 10  }
   0x9   :  { %s3925_s8 = sld [smem:[%s4441_s0 + %s3847_s4]]   ;;  %s3850_s20 = smov 11  }
   0xa   :  { %s3930_s14 = sld [smem:[%s4441_s0 + %s3848_s10]]   ;;  %s3851_s26 = smov 12  }
   0xb   :  { %s3935_s19 = sld [smem:[%s4441_s0 + %s3849_s15]]   ;;  %s3852_s1 = smov 13  }
   0xc   :  { %s3940_s24 = sld [smem:[%s4441_s0 + %s3850_s20]]   ;;  %s3853_s7 = smov 14  }
   0xd   :  { %s3945_s30 = sld [smem:[%s4441_s0 + %s3851_s26]]   ;;  %s3854_s15 = smov 15  }
   0xe   :  { %s3950_s6 = sld [smem:[%s4441_s0 + %s3852_s1]]   ;;  %s3855_s22 = smov 16  }
   0xf   :  { %s3955_s12 = sld [smem:[%s4441_s0 + %s3853_s7]]   ;;  %s3856_s28 = smov 17  }
  0x10   :  { %s3960_s20 = sld [smem:[%s4441_s0 + %s3854_s15]]   ;;  %s3857_s7 = smov 18  }
  0x11   :  { %s3965_s27 = sld [smem:[%s4441_s0 + %s3855_s22]]   ;;  %s3858_s15 = smov 19  }
  0x12   :  { %s3970_s4 = sld [smem:[%s4441_s0 + %s3856_s28]]   ;;  %s3859_s22 = smov 20  }
  0x13   :  { %s3860_s28 = smov 21  }
  0x15   :  { %4448 = sst [smem:[#allocation5_spill]] %s3955_s12 }
  0x16   :  { %4449 = sst [smem:[#allocation6_spill]] %s3960_s20 }
  0x17   :  { %4450 = sst [smem:[#allocation7_spill]] %s3965_s27 }
  0x18   :  { %4451 = sst [smem:[#allocation8_spill]] %s3970_s4 }
  0x19   :  { %s3975_s12 = sld [smem:[%s4441_s0 + %s3857_s7]]   ;;  %s3861_s7 = smov 22  }
  0x1a   :  { %s3980_s20 = sld [smem:[%s4441_s0 + %s3858_s15]]   ;;  %s3862_s15 = smov 23  }
  0x1b   :  { %s3985_s27 = sld [smem:[%s4441_s0 + %s3859_s22]]   ;;  %s3863_s22 = smov 24  }
  0x1c   :  { %s3990_s4 = sld [smem:[%s4441_s0 + %s3860_s28]]   ;;  %s3864_s28 = smov 25  }
  0x1f   :  { %4452 = sst [smem:[#allocation9_spill]] %s3975_s12 }
  0x20   :  { %4453 = sst [smem:[#allocation10_spill]] %s3980_s20 }
  0x21   :  { %4454 = sst [smem:[#allocation11_spill]] %s3985_s27 }
  0x22   :  { %4455 = sst [smem:[#allocation12_spill]] %s3990_s4 }
  0x23   :  { %s3995_s12 = sld [smem:[%s4441_s0 + %s3861_s7]]   ;;  %s3865_s7 = smov 26  }
  0x24   :  { %s4000_s20 = sld [smem:[%s4441_s0 + %s3862_s15]]   ;;  %s3866_s15 = smov 27  }
  0x25   :  { %s4005_s27 = sld [smem:[%s4441_s0 + %s3863_s22]]   ;;  %s3867_s22 = smov 28  }
  0x26   :  { %s4010_s4 = sld [smem:[%s4441_s0 + %s3864_s28]]   ;;  %s3868_s28 = smov 29  }
  0x29   :  { %4456 = sst [smem:[#allocation13_spill]] %s3995_s12 }
  0x2a   :  { %4457 = sst [smem:[#allocation14_spill]] %s4000_s20 }
  0x2b   :  { %4458 = sst [smem:[#allocation15_spill]] %s4005_s27 }
  0x2c   :  { %4459 = sst [smem:[#allocation16_spill]] %s4010_s4 }
  0x2d   :  { %s4015_s12 = sld [smem:[%s4441_s0 + %s3865_s7]]   ;;  %s3869_s7 = smov 30  }
  0x2e   :  { %s4020_s20 = sld [smem:[%s4441_s0 + %s3866_s15]]   ;;  %s3870_s15 = smov 31  }
  0x2f   :  { %s4025_s27 = sld [smem:[%s4441_s0 + %s3867_s22]]   ;;  %s3871_s22 = smov 32  }
  0x30   :  { %s4030_s4 = sld [smem:[%s4441_s0 + %s3868_s28]]   ;;  %s3872_s28 = smov 33  }
  0x33   :  { %4460 = sst [smem:[#allocation17_spill]] %s4015_s12 }
  0x34   :  { %4461 = sst [smem:[#allocation18_spill]] %s4020_s20 }
  0x35   :  { %4462 = sst [smem:[#allocation19_spill]] %s4025_s27 }
  0x36   :  { %4463 = sst [smem:[#allocation20_spill]] %s4030_s4 }
  0x37   :  { %s4035_s12 = sld [smem:[%s4441_s0 + %s3869_s7]]   ;;  %s3873_s7 = smov 34  }
  0x38   :  { %s4040_s20 = sld [smem:[%s4441_s0 + %s3870_s15]]  }
  0x39   :  { %s4045_s27 = sld [smem:[%s4441_s0 + %s3871_s22]]  }
  0x3a   :  { %s4050_s4 = sld [smem:[%s4441_s0 + %s3872_s28]]  }
  0x3d   :  { %4464 = sst [smem:[#allocation21_spill]] %s4035_s12 }
  0x3e   :  { %s4055_s12 = sld [smem:[%s4441_s0 + %s3873_s7]]  }
  0x3f   :  { %v146_v0 = vld [vmem:[%s3890_s9] sm:$0xff]  ;;  %v147_v1 = vld [vmem:[%s3890_s9 + $0x8] sm:$0xff]  ;;  %v148_v2 = vld [vmem:[%s3890_s9 + $0x10] sm:$0xff]  ;;  %vm190_vm0 = vcmask 261120  }
  0x40   :  { %v3603_v3 = vpack.c.bf16 %v147_v1, %v146_v0  ;;  %v149_v4 = vld [vmem:[%s3890_s9 + $0x18] sm:$0xff]  ;;  %v4062_v5 = vld [vmem:[%s3885_s5] sm:$0xff]  ;;  %v151_v8 = vld [vmem:[%s3895_s13 + $0x8] sm:$0xff] }
  0x41   :  { %v3607_v6 = vpack.c.bf16 %v149_v4, %v148_v2  ;;  %3347 = vmatprep.mubr.msk.f32.mxu1 %vm190_vm0, %v4062_v5  ;;  %v150_v7 = vld [vmem:[%s3895_s13] sm:$0xff]  ;;  %3375 = vmatprep.mubr.msk.f32.mxu0 %vm190_vm0, %v4062_v5 }
  0x42   :  { %3604 = vmatprep.subr.bf16.mxu1 %v3603_v3 }
  0x43   :  { %3606 = vmatpush3.bf16.msra.mxu1 %v3603_v3 }
  0x44   :  { %75 = vsyncpa [#allocation3], 0  ;;  %3608 = vmatprep.subr.bf16.mxu1 %v3607_v6  ;;  %v3611_v9 = vpack.c.bf16 %v151_v8, %v150_v7  ;;  %v152_v10 = vld [vmem:[%s3895_s13 + $0x10] sm:$0xff]  ;;  %v153_v11 = vld [vmem:[%s3895_s13 + $0x18] sm:$0xff]  ;;  %v3874_v22 = vmov 0.0   ;;  %vm3875_vm1 = vmmov 0  }
  0x45   :  { %v4073_v12 = vld [vmem:[%s3885_s5 + $0x8] sm:$0xff]  ;;  %v4076_v13 = vld [vmem:[%s3885_s5 + $0x10] sm:$0xff]  ;;  %v3615_v14 = vpack.c.bf16 %v153_v11, %v152_v10  ;;  %v4083_v15 = vld [vmem:[%s3885_s5 + $0x18] sm:$0xff]  ;;  %vm778_vm2 = vcmask 64512   ;;  %s4465_s0 = sld [smem:[#allocation5_spill]]  ;;  %vm1408_vm3 = vcmask 523264  }
  0x46   :  { %v154_v16 = vld [vmem:[%s3900_s17] sm:$0xff]  ;;  %v155_v17 = vld [vmem:[%s3900_s17 + $0x8] sm:$0xff]  ;;  %v156_v19 = vld [vmem:[%s3900_s17 + $0x10] sm:$0xff]  ;;  %s4466_s5 = sld [smem:[#allocation8_spill]]  ;;  %s4467_s9 = sld [smem:[#allocation10_spill]]  ;;  %vm3050_vm4 = vcmask 1041409  }
  0x47   :  { %3610 = vmatpush3.bf16.msra.mxu1 %v3607_v6  ;;  %v3619_v18 = vpack.c.bf16 %v155_v17, %v154_v16  ;;  %v157_v20 = vld [vmem:[%s3900_s17 + $0x18] sm:$0xff]  ;;  %v3116_v27 = vld [vmem:[%s3910_s25] ss:$0 sm:$0xff]  ;;  %s4468_s13 = sld [smem:[#allocation9_spill]]  ;;  %s4469_s17 = sld [smem:[#allocation6_spill]]  ;;  %vm3052_vm5 = vcmask 1042434  }
  0x48   :  { %3612 = vmatprep.subr.bf16.mxu1 %v3611_v9  ;;  %v3623_v21 = vpack.c.bf16 %v157_v20, %v156_v19  ;;  %v3111_v30 = vld [vmem:[%s3905_s21] ss:$0 sm:$0xff]  ;;  %s4470_s21 = sld [smem:[#allocation7_spill]]  ;;  %s4471_s25 = sld [smem:[#allocation13_spill]]  ;;  %vm3054_vm6 = vcmask 1043459   ;;  %vm3057_vm7 = vcmask 257024  }
  0x49   :  { %3620 = vmatprep.subr.bf16.mxu0 %v3619_v18  ;;  %v3121_v41 = vld [vmem:[%s3915_s29] ss:$0 sm:$0xff]  ;;  %s4472_s29 = sld [smem:[#allocation12_spill]]  ;;  %s4480_s15 = sld [smem:[#allocation19_spill]] }
  0x4a   :  { %3348 = vmatmul.mubr.msk.f32.vlgmr.msra.gmra.mrb[0].mxu1 %vm190_vm0, %v4073_v12  ;;  %3622 = vmatpush3.bf16.msra.mxu0 %v3619_v18  ;;  %s4481_s16 = sld [smem:[#allocation21_spill]] }
  0x4b   :  { %3614 = vmatpush3.bf16.msra.mxu1 %v3611_v9  ;;  %3350 = vmatprep.mubr.msk.f32.mxu1 %vm190_vm0, %v4076_v13 }
  0x4c   :  { %3616 = vmatprep.subr.bf16.mxu1 %v3615_v14  ;;  %3624 = vmatprep.subr.bf16.mxu0 %v3623_v21 }
  0x4e   :  { %3351 = vmatmul.mubr.msk.f32.gmra.mrb[2].mxu1 %vm190_vm0, %v4083_v15  ;;  %3626 = vmatpush3.bf16.msra.mxu0 %v3623_v21 }
  0x4f   :  { %3618 = vmatpush3.bf16.msra.mxu1 %v3615_v14  ;;  %3361 = vmatprep.mubr.msk.f32.mxu1 %vm190_vm0, %v4062_v5 }
  0x50   :  { %3381 = vmatprep.subr.mxu1 %v3874_v22  ;;  %3391 = vmatprep.subr.mxu0 %v3874_v22 }
  0x51   :  { %3376 = vmatmul.mubr.msk.f32.vlgmr.msra.gmra.mrb[0].mxu0 %vm190_vm0, %v4073_v12 }
  0x52   :  { %3362 = vmatmul.mubr.msk.f32.vlgmr.msra.gmra.mrb[4].mxu1 %vm190_vm0, %v4073_v12  ;;  %3378 = vmatprep.mubr.msk.f32.mxu0 %vm190_vm0, %v4076_v13 }
  0x53   :  { %3364 = vmatprep.mubr.msk.f32.mxu1 %vm190_vm0, %v4076_v13 }
  0x55   :  { %3379 = vmatmul.mubr.msk.f32.gmra.mrb[2].mxu0 %vm190_vm0, %v4083_v15 }
  0x56   :  { %3365 = vmatmul.mubr.msk.f32.gmra.mrb[6].mxu1 %vm190_vm0, %v4083_v15  ;;  %3393 = vmatprep.mubr.msk.f32.mxu0 %vm3875_vm1, %v3874_v22 }
  0x57   :  { %3383 = vmatprep.mubr.msk.f32.mxu1 %vm3875_vm1, %v3874_v22 }
 0x11d   :  { %v3349_v23 = vpop.f32.mrb[0].mxu1 }
 0x11e   :  { %v269_v24 = vpop.f32.mrb[1].mxu1  ;;  %v275_v37 = vadd.f32 %v3349_v23, %v3111_v30 }
 0x11f   :  { %v270_v33 = vadd.f32 %v3111_v30, %v269_v24 }
 0x121   :  { %v3352_v25 = vpop.f32.mrb[2].mxu1 }
 0x122   :  { %v279_v26 = vpop.f32.mrb[3].mxu1  ;;  %v285_v40 = vadd.f32 %v3352_v25, %v3111_v30 }
 0x123   :  { %v280_v38 = vadd.f32 %v3111_v30, %v279_v26 }
 0x124   :  { %v3377_v42 = vpop.f32.mrb[0].mxu0 }
 0x125   :  { %v3363_v28 = vpop.f32.mrb[4].mxu1  ;;  %v457_v43 = vadd.f32 %v3377_v42, %v3121_v41  ;;  %v451_v44 = vpop.f32.mrb[1].mxu0  ;;  %v163_v42 = vld [vmem:[%s3920_s3 + $0x10] sm:$0xff] }
 0x126   :  { %v360_v29 = vpop.f32.mrb[5].mxu1  ;;  %v366_v35 = vadd.f32 %v3363_v28, %v3116_v27  ;;  %v452_v45 = vadd.f32 %v3121_v41, %v451_v44 }
 0x127   :  { %v361_v31 = vadd.f32 %v3116_v27, %v360_v29 }
 0x128   :  { %v3380_v46 = vpop.f32.mrb[2].mxu0 }
 0x129   :  { %v3366_v32 = vpop.f32.mrb[6].mxu1  ;;  %3382 = vmatpush3.xpose.msk.msra.mxu1 %vm190_vm0, %v361_v31  ;;  %v4135_v47 = vadd.f32 %v3380_v46, %v3121_v41  ;;  %v461_v48 = vpop.f32.mrb[3].mxu0  ;;  %v161_v31 = vld [vmem:[%s3920_s3] sm:$0xff] }
 0x12a   :  { %v370_v34 = vpop.f32.mrb[7].mxu1  ;;  %3386 = vmatprep.subr.mxu1 %v3874_v22  ;;  %v376_v39 = vadd.f32 %v3366_v32, %v3116_v27  ;;  %v4138_v49 = vadd.f32 %v3121_v41, %v461_v48  ;;  %v162_v32 = vld [vmem:[%s3920_s3 + $0x8] sm:$0xff] }
 0x12b   :  { %v371_v36 = vadd.f32 %v3116_v27, %v370_v34 }
 0x12c   :  { %3384 = vmatmul.mubr.msk.f32.vlgmr.msra.gmra.mrb[8].mxu1 %vm190_vm0, %v270_v33 }
 0x12d   :  { %3387 = vmatpush3.xpose.msk.msra.mxu1 %vm190_vm0, %v366_v35  ;;  %3392 = vmatpush3.xpose.msk.msra.mxu0 %vm190_vm0, %v371_v36  ;;  %v3627_v35 = vpack.c.bf16 %v162_v32, %v161_v31  ;;  %v171_v31 = vld [vmem:[%s3940_s24 + $0x18] sm:$0xff] }
 0x12e   :  { %3388 = vmatprep.mubr.msk.f32.mxu1 %vm3875_vm1, %v3874_v22  ;;  %3396 = vmatprep.subr.mxu1 %v3874_v22 }
 0x12f   :  { %3401 = vmatprep.subr.mxu0 %v3874_v22 }
 0x130   :  { %3389 = vmatmul.mubr.msk.f32.vlgmr.msra.gmra.mrb[10].mxu1 %vm190_vm0, %v275_v37  ;;  %3394 = vmatmul.mubr.msk.f32.vlgmr.msra.gmra.mrb[4].mxu0 %vm190_vm0, %v280_v38 }
 0x131   :  { %3397 = vmatpush3.xpose.msk.msra.mxu1 %vm190_vm0, %v376_v39  ;;  %3398 = vmatprep.mubr.msk.f32.mxu1 %vm3875_vm1, %v3874_v22 }
 0x132   :  { %3406 = vmatprep.subr.mxu1 %v3874_v22  ;;  %3403 = vmatprep.mubr.msk.f32.mxu0 %vm3875_vm1, %v3874_v22 }
 0x133   :  { %3402 = vmatpush3.msra.mxu0 %v452_v45 }
 0x134   :  { %3399 = vmatmul.mubr.msk.f32.vlgmr.msra.gmra.mrb[12].mxu1 %vm190_vm0, %v285_v40  ;;  %3411 = vmatprep.subr.mxu0 %v3874_v22 }
 0x135   :  { %3408 = vmatprep.mubr.msk.f32.mxu1 %vm3875_vm1, %v3874_v22  ;;  %3407 = vmatpush3.msra.mxu1 %v457_v43  ;;  %v164_v43 = vld [vmem:[%s3920_s3 + $0x18] sm:$0xff]  ;;  %s4473_s3 = sld [smem:[#allocation11_spill]] }
 0x136   :  { %3416 = vmatprep.subr.mxu1 %v3874_v22  ;;  %v3631_v44 = vpack.c.bf16 %v164_v43, %v163_v42 }
 0x1ff   :  { %v542_v50 = vpop.f32.mrb[8].mxu1 }
 0x200   :  { %v774_v51 = vmul.f32 0.17677669, %v542_v50  ;;  %v3385_v52 = vpop.f32.mrb[9].mxu1 }
 0x202   :  { %v779_v53 = vsel %vm778_vm2, %v774_v51, -inf }
 0x203   :  { %v694_v54 = vpop.f32.mrb[4].mxu0  ;;  %780 = vmax.xlane.f32.xlu0 %v779_v53  ;;  %v618_v55 = vpop.f32.mrb[10].mxu1  ;;  %v3138_v53 = vld [vmem:[%s3925_s8] ss:$0 sm:$0xff]  ;;  %s4474_s8 = sld [smem:[#allocation14_spill]] }
 0x204   :  { %v776_v56 = vmul.f32 0.17677669, %v694_v54  ;;  %v775_v57 = vmul.f32 0.17677669, %v618_v55  ;;  %v3390_v58 = vpop.f32.mrb[11].mxu1  ;;  %v3395_v59 = vpop.f32.mrb[5].mxu0 }
 0x206   :  { %v785_v60 = vsel %vm778_vm2, %v776_v56, -inf  ;;  %v782_v61 = vsel %vm778_vm2, %v775_v57, -inf }
 0x207   :  { %786 = vmax.xlane.f32.xlu1 %v785_v60  ;;  %783 = vmax.xlane.f32.xlu0 %v782_v61  ;;  %v770_v62 = vpop.f32.mrb[12].mxu1 }
 0x208   :  { %v777_v63 = vmul.f32 0.17677669, %v770_v62  ;;  %v3400_v0 = vpop.f32.mrb[13].mxu1 }
 0x20a   :  { %v788_v1 = vsel %vm778_vm2, %v777_v63, -inf }
 0x20b   :  { %789 = vmax.xlane.f32.xlu1 %v788_v1 }
 0x290   :  { %v781_v2 = vpop.xlane.xlu0 %780 }
 0x291   :  { %v791_v3 = vsub.f32 %v774_v51, %v781_v2 }
 0x293   :  { %v795_v4 = vmul.f32 1.442695, %v791_v3 }
 0x294   :  { %v787_v6 = vpop.xlane.xlu1 %786  ;;  %v784_v7 = vpop.xlane.xlu0 %783 }
 0x295   :  { %3752 = vpow2.f32 %v795_v4  ;;  %v793_v8 = vsub.f32 %v776_v56, %v787_v6  ;;  %v792_v9 = vsub.f32 %v775_v57, %v784_v7 }
 0x297   :  { %v799_v10 = vmul.f32 1.442695, %v793_v8  ;;  %v797_v11 = vmul.f32 1.442695, %v792_v9 }
 0x298   :  { %v790_v14 = vpop.xlane.xlu1 %789 }
 0x299   :  { %3754 = vpow2.f32 %v799_v10  ;;  %v794_v16 = vsub.f32 %v777_v63, %v790_v14 }
 0x29a   :  { %3756 = vpow2.f32 %v797_v11 }
 0x29b   :  { %v801_v17 = vmul.f32 1.442695, %v794_v16 }
 0x29d   :  { %3758 = vpow2.f32 %v801_v17 }
 0x29f   :  { %v3753_v18 = vpop.eup %3752 }
 0x2a0   :  { %v803_v19 = vsel %vm778_vm2, %v3753_v18, 0.0 }
 0x2a1   :  { %804 = vadd.xlane.f32.xlu0 %v803_v19 }
 0x2a3   :  { %v3755_v20 = vpop.eup %3754 }
 0x2a4   :  { %v3757_v21 = vpop.eup %3756  ;;  %v809_v23 = vsel %vm778_vm2, %v3755_v20, 0.0 }
 0x2a5   :  { %810 = vadd.xlane.f32.xlu0 %v809_v23  ;;  %v806_v24 = vsel %vm778_vm2, %v3757_v21, 0.0 }
 0x2a6   :  { %807 = vadd.xlane.f32.xlu1 %v806_v24 }
 0x2a7   :  { %v3759_v25 = vpop.eup %3758 }
 0x2a8   :  { %v812_v26 = vsel %vm778_vm2, %v3759_v25, 0.0 }
 0x2aa   :  { %813 = vadd.xlane.f32.xlu1 %v812_v26 }
 0x32e   :  { %v805_v27 = vpop.xlane.xlu0 %804 }
 0x32f   :  { %3760 = vrcp.f32 %v805_v27  ;;  %v168_v27 = vld [vmem:[%s3940_s24] sm:$0xff] }
 0x332   :  { %v811_v28 = vpop.xlane.xlu0 %810 }
 0x333   :  { %3762 = vrcp.f32 %v811_v28  ;;  %v808_v29 = vpop.xlane.xlu1 %807  ;;  %v169_v28 = vld [vmem:[%s3940_s24 + $0x8] sm:$0xff] }
 0x334   :  { %3764 = vrcp.f32 %v808_v29  ;;  %v3635_v29 = vpack.c.bf16 %v169_v28, %v168_v27 }
 0x337   :  { %v814_v30 = vpop.xlane.xlu1 %813 }
 0x338   :  { %3766 = vrcp.f32 %v814_v30  ;;  %v170_v30 = vld [vmem:[%s3940_s24 + $0x10] sm:$0xff]  ;;  %s4477_s24 = sld [smem:[#allocation20_spill]] }
 0x339   :  { %v3761_v33 = vpop.eup %3760  ;;  %v3639_v32 = vpack.c.bf16 %v171_v31, %v170_v30 }
 0x33a   :  { %v819_v34 = vmul.f32 %v3761_v33, %v3753_v18  ;;  %v173_v33 = vld [vmem:[%s3950_s6] sm:$0xff] }
 0x33c   :  { %3404 = vmatmul.mubr.msk.f32.vlgmr.msra.gmra.mrb[6].mxu0 %vm778_vm2, %v819_v34  ;;  %v174_v34 = vld [vmem:[%s3950_s6 + $0x8] sm:$0xff] }
 0x33d   :  { %v3763_v36 = vpop.eup %3762  ;;  %3412 = vmatpush3.msra.mxu0 %v4138_v49  ;;  %3413 = vmatprep.mubr.msk.f32.mxu0 %vm3875_vm1, %v3874_v22 }
 0x33e   :  { %v3765_v37 = vpop.eup %3764  ;;  %v821_v38 = vmul.f32 %v3763_v36, %v3755_v20  ;;  %3628 = vmatprep.subr.bf16.mxu0 %v3627_v35  ;;  %v3643_v36 = vpack.c.bf16 %v174_v34, %v173_v33 }
 0x33f   :  { %v820_v39 = vmul.f32 %v3765_v37, %v3757_v21  ;;  %v176_v37 = vld [vmem:[%s3950_s6 + $0x18] sm:$0xff] }
 0x340   :  { %3414 = vmatmul.mubr.msk.f32.vlgmr.msra.gmra.mrb[8].mxu0 %vm778_vm2, %v821_v38 }
 0x341   :  { %3409 = vmatmul.mubr.msk.f32.vlgmr.msra.gmra.mrb[14].mxu1 %vm778_vm2, %v820_v39  ;;  %3630 = vmatpush3.bf16.msra.mxu0 %v3627_v35  ;;  %v175_v35 = vld [vmem:[%s3950_s6 + $0x10] sm:$0xff]  ;;  %v177_v39 = vld [vmem:[%s3950_s6 + $0x20] sm:$0xff] }
 0x342   :  { %v3767_v40 = vpop.eup %3766  ;;  %3417 = vmatpush3.msra.mxu1 %v4135_v47  ;;  %3418 = vmatprep.mubr.msk.f32.mxu1 %vm3875_vm1, %v3874_v22  ;;  %v3647_v38 = vpack.c.bf16 %v176_v37, %v175_v35 }
 0x343   :  { %v822_v41 = vmul.f32 %v3767_v40, %v3759_v25  ;;  %3632 = vmatprep.subr.bf16.mxu0 %v3631_v44  ;;  %3636 = vmatprep.subr.bf16.mxu1 %v3635_v29  ;;  %v178_v40 = vld [vmem:[%s3950_s6 + $0x28] sm:$0xff] }
 0x345   :  { %3419 = vmatmul.mubr.msk.f32.vlgmr.msra.gmra.mrb[16].mxu1 %vm778_vm2, %v822_v41  ;;  %3634 = vmatpush3.bf16.msra.mxu0 %v3631_v44  ;;  %v3651_v41 = vpack.c.bf16 %v178_v40, %v177_v39 }
 0x346   :  { %3638 = vmatpush3.bf16.msra.mxu1 %v3635_v29  ;;  %3644 = vmatprep.subr.bf16.mxu0 %v3643_v36 }
 0x347   :  { %3640 = vmatprep.subr.bf16.mxu1 %v3639_v32 }
 0x34a   :  { %3642 = vmatpush3.bf16.msra.mxu1 %v3639_v32 }
 0x40f   :  { %v892_v45 = vpop.f32.mrb[6].mxu0 }
 0x410   :  { %v3405_v46 = vpop.f32.mrb[7].mxu0  ;;  %3429 = vmatprep.mubr.msk.f32.mxu0 %vm190_vm0, %v892_v45 }
 0x413   :  { %v1038_v48 = vpop.f32.mrb[8].mxu0 }
 0x414   :  { %v965_v49 = vpop.f32.mrb[14].mxu1  ;;  %v3415_v50 = vpop.f32.mrb[9].mxu0 }
 0x415   :  { %v3410_v47 = vpop.f32.mrb[15].mxu1  ;;  %3430 = vmatmul.mubr.msk.f32.vlgmr.msra.gmra.mrb[10].mxu0 %vm190_vm0, %v965_v49 }
 0x416   :  { %3432 = vmatprep.mubr.msk.f32.mxu0 %vm190_vm0, %v1038_v48  ;;  %3646 = vmatpush3.bf16.msra.mxu0 %v3643_v36 }
 0x417   :  { %3648 = vmatprep.subr.bf16.mxu0 %v3647_v38 }
 0x418   :  { %v1111_v51 = vpop.f32.mrb[16].mxu1 }
 0x419   :  { %v3420_v52 = vpop.f32.mrb[17].mxu1  ;;  %3433 = vmatmul.mubr.msk.f32.gmra.mrb[12].mxu0 %vm190_vm0, %v1111_v51 }
 0x41a   :  { %3650 = vmatpush3.bf16.msra.mxu0 %v3647_v38 }
 0x41b   :  { %3652 = vmatprep.subr.bf16.mxu0 %v3651_v41 }
 0x41e   :  { %3654 = vmatpush3.bf16.msra.mxu0 %v3651_v41 }
 0x4e8   :  { %v3431_v54 = vpop.f32.mrb[10].mxu0 }
 0x4e9   :  { %v1205_v55 = vadd.f32 %v3431_v54, %v3138_v53  ;;  %v1199_v56 = vpop.f32.mrb[11].mxu0 }
 0x4ea   :  { %v1200_v57 = vadd.f32 %v3138_v53, %v1199_v56 }
 0x4eb   :  { %v1219_v58 = vadd.f32 %v1205_v55, %v4073_v12  ;;  %v3143_v55 = vld [vmem:[%s3930_s14] ss:$0 sm:$0xff]  ;;  %s4475_s14 = sld [smem:[#allocation15_spill]] }
 0x4ec   :  { %v3434_v59 = vpop.f32.mrb[12].mxu0  ;;  %v1218_v60 = vadd.f32 %v1200_v57, %v4062_v5 }
 0x4ed   :  { %v1215_v61 = vadd.f32 %v3434_v59, %v3138_v53  ;;  %v1209_v62 = vpop.f32.mrb[13].mxu0  ;;  %v1225_v63 = vsel %vm190_vm0, %v1219_v58, 0.0  ;;  %v3144_v59 = vld [vmem:[%s3935_s19] ss:$0 sm:$0xff]  ;;  %s4476_s19 = sld [smem:[#allocation18_spill]] }
 0x4ee   :  { %v1210_v0 = vadd.f32 %v3138_v53, %v1209_v62  ;;  %1226 = vadd.xlane.f32.xlu1 %v1225_v63  ;;  %v1222_v1 = vsel %vm190_vm0, %v1218_v60, 0.0 }
 0x4ef   :  { %1223 = vadd.xlane.f32.xlu0 %v1222_v1  ;;  %v1221_v2 = vadd.f32 %v1215_v61, %v4083_v15 }
 0x4f0   :  { %v1220_v3 = vadd.f32 %v1210_v0, %v4076_v13 }
 0x4f1   :  { %v1231_v4 = vsel %vm190_vm0, %v1221_v2, 0.0 }
 0x4f2   :  { %1232 = vadd.xlane.f32.xlu1 %v1231_v4  ;;  %v1228_v12 = vsel %vm190_vm0, %v1220_v3, 0.0 }
 0x4f3   :  { %1229 = vadd.xlane.f32.xlu0 %v1228_v12 }
 0x57b   :  { %v1227_v5 = vpop.xlane.xlu1 %1226 }
 0x57c   :  { %v1236_v6 = vmul.f32 0.03125, %v1227_v5  ;;  %v1224_v7 = vpop.xlane.xlu0 %1223 }
 0x57d   :  { %v1235_v8 = vmul.f32 0.03125, %v1224_v7  ;;  %v179_v7 = vld [vmem:[%s3950_s6 + $0x30] sm:$0xff] }
 0x57e   :  { %v4175_v9 = vsub.f32 %v1219_v58, %v1236_v6 }
 0x57f   :  { %v4177_v10 = vsub.f32 %v1218_v60, %v1235_v8  ;;  %v1233_v11 = vpop.xlane.xlu1 %1232  ;;  %v180_v8 = vld [vmem:[%s3950_s6 + $0x38] sm:$0xff]  ;;  %s4479_s6 = sld [smem:[#allocation17_spill]] }
 0x580   :  { %v1238_v14 = vmul.f32 0.03125, %v1233_v11  ;;  %v1230_v16 = vpop.xlane.xlu0 %1229  ;;  %v1244_v13 = vmul.f32 %v4175_v9, %v4175_v9 }
 0x581   :  { %v1237_v15 = vmul.f32 0.03125, %v1230_v16  ;;  %v1243_v17 = vmul.f32 %v4177_v10, %v4177_v10 }
 0x582   :  { %v4183_v18 = vsub.f32 %v1221_v2, %v1238_v14  ;;  %v1250_v19 = vsel %vm190_vm0, %v1244_v13, 0.0 }
 0x583   :  { %v4186_v20 = vsub.f32 %v1220_v3, %v1237_v15  ;;  %1251 = vadd.xlane.f32.xlu1 %v1250_v19  ;;  %v1247_v21 = vsel %vm190_vm0, %v1243_v17, 0.0 }
 0x584   :  { %1248 = vadd.xlane.f32.xlu0 %v1247_v21  ;;  %v1246_v23 = vmul.f32 %v4183_v18, %v4183_v18 }
 0x585   :  { %v1245_v24 = vmul.f32 %v4186_v20, %v4186_v20 }
 0x586   :  { %v1256_v25 = vsel %vm190_vm0, %v1246_v23, 0.0 }
 0x587   :  { %1257 = vadd.xlane.f32.xlu1 %v1256_v25  ;;  %v1253_v26 = vsel %vm190_vm0, %v1245_v24, 0.0  ;;  %v3150_v25 = vld [vmem:[%s4465_s0] ss:$0 sm:$0xff] }
 0x588   :  { %1254 = vadd.xlane.f32.xlu0 %v1253_v26 }
 0x610   :  { %v1252_v42 = vpop.xlane.xlu1 %1251 }
 0x611   :  { %v1260_v43 = vmul.f32 0.03125, %v1252_v42  ;;  %v1249_v44 = vpop.xlane.xlu0 %1248 }
 0x612   :  { %v1259_v45 = vmul.f32 0.03125, %v1249_v44 }
 0x613   :  { %v1264_v46 = vadd.f32 1e-05, %v1260_v43 }
 0x614   :  { %v1263_v48 = vadd.f32 1e-05, %v1259_v45  ;;  %v1258_v49 = vpop.xlane.xlu1 %1257 }
 0x615   :  { %3768 = vrsqrt.f32 %v1264_v46  ;;  %v1262_v50 = vmul.f32 0.03125, %v1258_v49  ;;  %v1255_v47 = vpop.xlane.xlu0 %1254 }
 0x616   :  { %3770 = vrsqrt.f32 %v1263_v48  ;;  %v1261_v51 = vmul.f32 0.03125, %v1255_v47 }
 0x617   :  { %v1266_v52 = vadd.f32 1e-05, %v1262_v50 }
 0x618   :  { %v1265_v53 = vadd.f32 1e-05, %v1261_v51 }
 0x619   :  { %3772 = vrsqrt.f32 %v1266_v52 }
 0x61a   :  { %3774 = vrsqrt.f32 %v1265_v53 }
 0x61f   :  { %v3769_v54 = vpop.eup %3768 }
 0x620   :  { %v3771_v56 = vpop.eup %3770  ;;  %v1272_v57 = vmul.f32 %v3769_v54, %v4175_v9  ;;  %v3655_v9 = vpack.c.bf16 %v180_v8, %v179_v7  ;;  %v1593_v7 = vld [vmem:[%s4467_s9 + $0x18] sm:$0xff] }
 0x621   :  { %v1271_v58 = vmul.f32 %v3771_v56, %v4177_v10  ;;  %v3145_v10 = vld [vmem:[%s3945_s30] ss:$0 sm:$0xff]  ;;  %s4478_s30 = sld [smem:[#allocation16_spill]] }
 0x622   :  { %v1282_v60 = vmul.f32 %v3143_v55, %v1272_v57  ;;  %3656 = vmatprep.subr.bf16.mxu0 %v3655_v9 }
 0x623   :  { %v3773_v61 = vpop.eup %3772  ;;  %v1281_v62 = vmul.f32 %v3143_v55, %v1271_v58  ;;  %3658 = vmatpush3.bf16.msra.mxu0 %v3655_v9  ;;  %v1586_v9 = vld [vmem:[%s4468_s13] sm:$0xff] }
 0x624   :  { %v3775_v63 = vpop.eup %3774  ;;  %v1274_v0 = vmul.f32 %v3773_v61, %v4183_v18  ;;  %v1292_v3 = vadd.f32 %v3144_v59, %v1282_v60 }
 0x625   :  { %v1291_v1 = vadd.f32 %v3144_v59, %v1281_v62  ;;  %v1273_v2 = vmul.f32 %v3775_v63, %v4186_v20  ;;  %v1582_v62 = vld [vmem:[%s4466_s5] sm:$0xff]  ;;  %v1583_v63 = vld [vmem:[%s4466_s5 + $0x8] sm:$0xff] }
 0x626   :  { %v1284_v4 = vmul.f32 %v3143_v55, %v1274_v0  ;;  %v1590_v0 = vld [vmem:[%s4467_s9] sm:$0xff] }
 0x627   :  { %3443 = vmatprep.mubr.msk.f32.mxu1 %vm190_vm0, %v1291_v1  ;;  %v1283_v12 = vmul.f32 %v3143_v55, %v1273_v2  ;;  %v1591_v2 = vld [vmem:[%s4467_s9 + $0x8] sm:$0xff] }
 0x628   :  { %3444 = vmatmul.mubr.msk.f32.vlgmr.msra.gmra.mrb[18].mxu1 %vm190_vm0, %v1292_v3  ;;  %v1294_v6 = vadd.f32 %v3144_v59, %v1284_v4  ;;  %v1584_v4 = vld [vmem:[%s4466_s5 + $0x10] sm:$0xff] }
 0x629   :  { %v1293_v5 = vadd.f32 %v3144_v59, %v1283_v12  ;;  %v1585_v12 = vld [vmem:[%s4466_s5 + $0x18] sm:$0xff] }
 0x62b   :  { %3446 = vmatprep.mubr.msk.f32.mxu1 %vm190_vm0, %v1293_v5 }
 0x62c   :  { %3447 = vmatmul.mubr.msk.f32.gmra.mrb[20].mxu1 %vm190_vm0, %v1294_v6 }
 0x6fb   :  { %v3445_v11 = vpop.f32.mrb[18].mxu1 }
 0x6fc   :  { %v1385_v14 = vadd.f32 %v3445_v11, %v3145_v10  ;;  %v1379_v16 = vpop.f32.mrb[19].mxu1 }
 0x6fd   :  { %v1380_v13 = vadd.f32 %v3145_v10, %v1379_v16 }
 0x6fe   :  { %v1399_v18 = vmax.f32 %v1385_v14, 0.0 }
 0x6ff   :  { %v1398_v15 = vmax.f32 %v1380_v13, 0.0  ;;  %v3448_v17 = vpop.f32.mrb[20].mxu1 }
 0x700   :  { %v1395_v19 = vadd.f32 %v3448_v17, %v3145_v10  ;;  %v1389_v20 = vpop.f32.mrb[21].mxu1 }
 0x701   :  { %v1390_v21 = vadd.f32 %v3145_v10, %v1389_v20  ;;  %3465 = vmatprep.mubr.msk.f32.mxu0 %vm1408_vm3, %v1398_v15  ;;  %v1587_v10 = vld [vmem:[%s4468_s13 + $0x8] sm:$0xff] }
 0x702   :  { %3466 = vmatmul.mubr.msk.f32.vlgmr.msra.gmra.mrb[14].mxu0 %vm1408_vm3, %v1399_v18  ;;  %v1401_v24 = vmax.f32 %v1395_v19, 0.0  ;;  %v3667_v11 = vpack.c.bf16 %v1587_v10, %v1586_v9 }
 0x703   :  { %v1400_v23 = vmax.f32 %v1390_v21, 0.0 }
 0x705   :  { %3468 = vmatprep.mubr.msk.f32.mxu0 %vm1408_vm3, %v1400_v23 }
 0x706   :  { %3469 = vmatmul.mubr.msk.f32.gmra.mrb[16].mxu0 %vm1408_vm3, %v1401_v24 }
 0x7d5   :  { %v3467_v26 = vpop.f32.mrb[14].mxu0 }
 0x7d6   :  { %v1493_v27 = vadd.f32 %v3467_v26, %v3150_v25  ;;  %v1487_v28 = vpop.f32.mrb[15].mxu0 }
 0x7d7   :  { %v1488_v29 = vadd.f32 %v3150_v25, %v1487_v28 }
 0x7d8   :  { %v1507_v30 = vadd.f32 %v1493_v27, %v1292_v3  ;;  %v3675_v3 = vpack.c.bf16 %v1591_v2, %v1590_v0  ;;  %v3155_v27 = vld [vmem:[%s4469_s17] ss:$0 sm:$0xff] }
 0x7d9   :  { %v3470_v31 = vpop.f32.mrb[16].mxu0  ;;  %v1506_v32 = vadd.f32 %v1488_v29, %v1291_v1  ;;  %v3659_v1 = vpack.c.bf16 %v1583_v63, %v1582_v62 }
 0x7da   :  { %v1503_v33 = vadd.f32 %v3470_v31, %v3150_v25  ;;  %v1497_v34 = vpop.f32.mrb[17].mxu0  ;;  %v1513_v35 = vsel %vm190_vm0, %v1507_v30, 0.0  ;;  %3676 = vmatprep.subr.bf16.mxu0 %v3675_v3  ;;  %v3156_v31 = vld [vmem:[%s4470_s21] ss:$0 sm:$0xff] }
 0x7db   :  { %v1498_v36 = vadd.f32 %v3150_v25, %v1497_v34  ;;  %1514 = vadd.xlane.f32.xlu1 %v1513_v35  ;;  %v1510_v37 = vsel %vm190_vm0, %v1506_v32, 0.0  ;;  %3660 = vmatprep.subr.bf16.mxu1 %v3659_v1  ;;  %v1588_v35 = vld [vmem:[%s4468_s13 + $0x10] sm:$0xff] }
 0x7dc   :  { %1511 = vadd.xlane.f32.xlu0 %v1510_v37  ;;  %v1509_v38 = vadd.f32 %v1503_v33, %v1294_v6  ;;  %v3663_v6 = vpack.c.bf16 %v1585_v12, %v1584_v4  ;;  %3662 = vmatpush3.bf16.msra.mxu1 %v3659_v1 }
 0x7dd   :  { %v1508_v39 = vadd.f32 %v1498_v36, %v1293_v5  ;;  %v1592_v5 = vld [vmem:[%s4467_s9 + $0x10] sm:$0xff]  ;;  %3678 = vmatpush3.bf16.msra.mxu0 %v3675_v3  ;;  %v1589_v36 = vld [vmem:[%s4468_s13 + $0x18] sm:$0xff] }
 0x7de   :  { %v1519_v40 = vsel %vm190_vm0, %v1509_v38, 0.0  ;;  %v3679_v8 = vpack.c.bf16 %v1593_v7, %v1592_v5  ;;  %3664 = vmatprep.subr.bf16.mxu1 %v3663_v6 }
 0x7df   :  { %1520 = vadd.xlane.f32.xlu1 %v1519_v40  ;;  %v1516_v41 = vsel %vm190_vm0, %v1508_v39, 0.0 }
 0x7e0   :  { %1517 = vadd.xlane.f32.xlu0 %v1516_v41  ;;  %3680 = vmatprep.subr.bf16.mxu0 %v3679_v8 }
 0x7e1   :  { %3666 = vmatpush3.bf16.msra.mxu1 %v3663_v6  ;;  %3682 = vmatpush3.bf16.msra.mxu0 %v3679_v8 }
 0x7e2   :  { %3523 = vmatprep.subr.mxu0 %v3874_v22  ;;  %3668 = vmatprep.subr.bf16.mxu1 %v3667_v11 }
 0x868   :  { %v1515_v42 = vpop.xlane.xlu1 %1514 }
 0x869   :  { %v1523_v43 = vmul.f32 0.03125, %v1515_v42  ;;  %v1512_v44 = vpop.xlane.xlu0 %1511 }
 0x86a   :  { %v1522_v45 = vmul.f32 0.03125, %v1512_v44 }
 0x86b   :  { %v4227_v46 = vsub.f32 %v1507_v30, %v1523_v43  ;;  %v3671_v43 = vpack.c.bf16 %v1589_v36, %v1588_v35 }
 0x86c   :  { %v4229_v48 = vsub.f32 %v1506_v32, %v1522_v45  ;;  %v1521_v49 = vpop.xlane.xlu1 %1520 }
 0x86d   :  { %v1525_v50 = vmul.f32 0.03125, %v1521_v49  ;;  %v1518_v47 = vpop.xlane.xlu0 %1517  ;;  %v1531_v51 = vmul.f32 %v4227_v46, %v4227_v46 }
 0x86e   :  { %v1524_v52 = vmul.f32 0.03125, %v1518_v47  ;;  %v1530_v53 = vmul.f32 %v4229_v48, %v4229_v48 }
 0x86f   :  { %v4235_v54 = vsub.f32 %v1509_v38, %v1525_v50  ;;  %v1537_v55 = vsel %vm190_vm0, %v1531_v51, 0.0  ;;  %v3167_v51 = vld [vmem:[%s4471_s25] ss:$0 sm:$0xff] }
 0x870   :  { %v4238_v56 = vsub.f32 %v1508_v39, %v1524_v52  ;;  %1538 = vadd.xlane.f32.xlu1 %v1537_v55  ;;  %v1534_v57 = vsel %vm190_vm0, %v1530_v53, 0.0 }
 0x871   :  { %1535 = vadd.xlane.f32.xlu0 %v1534_v57  ;;  %v1533_v58 = vmul.f32 %v4235_v54, %v4235_v54 }
 0x872   :  { %v1532_v59 = vmul.f32 %v4238_v56, %v4238_v56 }
 0x873   :  { %v1543_v60 = vsel %vm190_vm0, %v1533_v58, 0.0  ;;  %v3162_v58 = vld [vmem:[%s4472_s29] ss:$0 sm:$0xff] }
 0x874   :  { %1544 = vadd.xlane.f32.xlu1 %v1543_v60  ;;  %v1540_v61 = vsel %vm190_vm0, %v1532_v59, 0.0 }
 0x875   :  { %1541 = vadd.xlane.f32.xlu0 %v1540_v61  ;;  %v3157_v61 = vld [vmem:[%s4473_s3] ss:$0 sm:$0xff] }
 0x8fd   :  { %v1539_v14 = vpop.xlane.xlu1 %1538 }
 0x8fe   :  { %v1547_v16 = vmul.f32 0.03125, %v1539_v14  ;;  %v1536_v13 = vpop.xlane.xlu0 %1535 }
 0x8ff   :  { %v1546_v15 = vmul.f32 0.03125, %v1536_v13 }
 0x900   :  { %v1551_v17 = vadd.f32 1e-05, %v1547_v16 }
 0x901   :  { %v1550_v18 = vadd.f32 1e-05, %v1546_v15  ;;  %v1545_v19 = vpop.xlane.xlu1 %1544 }
 0x902   :  { %3776 = vrsqrt.f32 %v1551_v17  ;;  %v1549_v20 = vmul.f32 0.03125, %v1545_v19  ;;  %v1542_v21 = vpop.xlane.xlu0 %1541 }
 0x903   :  { %3778 = vrsqrt.f32 %v1550_v18  ;;  %v1548_v23 = vmul.f32 0.03125, %v1542_v21 }
 0x904   :  { %v1553_v24 = vadd.f32 1e-05, %v1549_v20 }
 0x905   :  { %v1552_v25 = vadd.f32 1e-05, %v1548_v23 }
 0x906   :  { %3780 = vrsqrt.f32 %v1553_v24 }
 0x907   :  { %3782 = vrsqrt.f32 %v1552_v25 }
 0x90c   :  { %v3777_v26 = vpop.eup %3776 }
 0x90d   :  { %v3779_v28 = vpop.eup %3778  ;;  %v1559_v29 = vmul.f32 %v3777_v26, %v4227_v46 }
 0x90e   :  { %v1558_v30 = vmul.f32 %v3779_v28, %v4229_v48 }
 0x90f   :  { %v1569_v32 = vmul.f32 %v3155_v27, %v1559_v29 }
 0x910   :  { %v3781_v33 = vpop.eup %3780  ;;  %v1568_v34 = vmul.f32 %v3155_v27, %v1558_v30 }
 0x911   :  { %v3783_v37 = vpop.eup %3782  ;;  %v1561_v38 = vmul.f32 %v3781_v33, %v4235_v54  ;;  %v4268_v41 = vadd.f32 %v3156_v31, %v1569_v32 }
 0x912   :  { %v4265_v39 = vadd.f32 %v3156_v31, %v1568_v34  ;;  %v1560_v40 = vmul.f32 %v3783_v37, %v4238_v56 }
 0x913   :  { %v1571_v42 = vmul.f32 %v3155_v27, %v1561_v38 }
 0x914   :  { %3479 = vmatprep.mubr.msk.f32.mxu1 %vm190_vm0, %v4265_v39  ;;  %3507 = vmatprep.mubr.msk.f32.mxu0 %vm190_vm0, %v4265_v39  ;;  %v1570_v44 = vmul.f32 %v3155_v27, %v1560_v40 }
 0x915   :  { %3480 = vmatmul.mubr.msk.f32.vlgmr.msra.gmra.mrb[22].mxu1 %vm190_vm0, %v4268_v41  ;;  %3508 = vmatmul.mubr.msk.f32.vlgmr.msra.gmra.mrb[18].mxu0 %vm190_vm0, %v4268_v41  ;;  %v4280_v46 = vadd.f32 %v3156_v31, %v1571_v42 }
 0x916   :  { %3670 = vmatpush3.bf16.msra.mxu1 %v3667_v11  ;;  %v4278_v45 = vadd.f32 %v3156_v31, %v1570_v44 }
 0x917   :  { %3672 = vmatprep.subr.bf16.mxu1 %v3671_v43 }
 0x918   :  { %3482 = vmatprep.mubr.msk.f32.mxu1 %vm190_vm0, %v4278_v45  ;;  %3510 = vmatprep.mubr.msk.f32.mxu0 %vm190_vm0, %v4278_v45 }
 0x919   :  { %3483 = vmatmul.mubr.msk.f32.gmra.mrb[24].mxu1 %vm190_vm0, %v4280_v46  ;;  %3511 = vmatmul.mubr.msk.f32.gmra.mrb[20].mxu0 %vm190_vm0, %v4280_v46 }
 0x91a   :  { %3674 = vmatpush3.bf16.msra.mxu1 %v3671_v43  ;;  %3493 = vmatprep.mubr.msk.f32.mxu1 %vm190_vm0, %v4265_v39 }
 0x91b   :  { %3513 = vmatprep.subr.mxu1 %v3874_v22  ;;  %3525 = vmatprep.mubr.msk.f32.mxu0 %vm3875_vm1, %v3874_v22 }
 0x91d   :  { %3494 = vmatmul.mubr.msk.f32.vlgmr.msra.gmra.mrb[26].mxu1 %vm190_vm0, %v4268_v41 }
 0x91e   :  { %3496 = vmatprep.mubr.msk.f32.mxu1 %vm190_vm0, %v4278_v45 }
 0x921   :  { %3497 = vmatmul.mubr.msk.f32.gmra.mrb[28].mxu1 %vm190_vm0, %v4280_v46 }
 0x922   :  { %3515 = vmatprep.mubr.msk.f32.mxu1 %vm3875_vm1, %v3874_v22 }
 0x9e8   :  { %v3481_v48 = vpop.f32.mrb[22].mxu1  ;;  %v3509_v49 = vpop.f32.mrb[18].mxu0 }
 0x9e9   :  { %v1704_v50 = vpop.f32.mrb[23].mxu1  ;;  %v1886_v47 = vpop.f32.mrb[19].mxu0  ;;  %v1710_v4 = vadd.f32 %v3481_v48, %v3157_v61  ;;  %v1892_v8 = vadd.f32 %v3509_v49, %v3167_v51 }
 0x9ea   :  { %v1705_v0 = vadd.f32 %v3157_v61, %v1704_v50  ;;  %v1887_v5 = vadd.f32 %v3167_v51, %v1886_v47 }
 0x9ec   :  { %v3484_v52 = vpop.f32.mrb[24].mxu1  ;;  %v3512_v53 = vpop.f32.mrb[20].mxu0 }
 0x9ed   :  { %v4304_v54 = vadd.f32 %v3512_v53, %v3167_v51  ;;  %v1714_v55 = vpop.f32.mrb[25].mxu1  ;;  %v1896_v56 = vpop.f32.mrb[21].mxu0  ;;  %v1720_v7 = vadd.f32 %v3484_v52, %v3157_v61 }
 0x9ee   :  { %v4306_v57 = vadd.f32 %v3167_v51, %v1896_v56  ;;  %v1715_v12 = vadd.f32 %v3157_v61, %v1714_v55  ;;  %v1597_v56 = vld [vmem:[%s4474_s8] sm:$0xff] }
 0x9f0   :  { %v3495_v59 = vpop.f32.mrb[26].mxu1 }
 0x9f1   :  { %v1795_v60 = vpop.f32.mrb[27].mxu1  ;;  %v1801_v2 = vadd.f32 %v3495_v59, %v3162_v58 }
 0x9f2   :  { %v1796_v62 = vadd.f32 %v3162_v58, %v1795_v60 }
 0x9f4   :  { %v3498_v63 = vpop.f32.mrb[28].mxu1  ;;  %3514 = vmatpush3.xpose.msk.msra.mxu1 %vm190_vm0, %v1796_v62 }
 0x9f5   :  { %v1805_v1 = vpop.f32.mrb[29].mxu1  ;;  %3518 = vmatprep.subr.mxu1 %v3874_v22  ;;  %v1811_v6 = vadd.f32 %v3498_v63, %v3162_v58 }
 0x9f6   :  { %v1806_v3 = vadd.f32 %v3162_v58, %v1805_v1  ;;  %v1598_v58 = vld [vmem:[%s4474_s8 + $0x8] sm:$0xff] }
 0x9f7   :  { %3516 = vmatmul.mubr.msk.f32.vlgmr.msra.gmra.mrb[30].mxu1 %vm190_vm0, %v1705_v0  ;;  %v3683_v61 = vpack.c.bf16 %v1598_v58, %v1597_v56  ;;  %v1609_v58 = vld [vmem:[%s4477_s24] sm:$0xff] }
 0x9f8   :  { %3519 = vmatpush3.xpose.msk.msra.mxu1 %vm190_vm0, %v1801_v2  ;;  %3524 = vmatpush3.xpose.msk.msra.mxu0 %vm190_vm0, %v1806_v3 }
 0x9f9   :  { %3520 = vmatprep.mubr.msk.f32.mxu1 %vm3875_vm1, %v3874_v22  ;;  %3528 = vmatprep.subr.mxu1 %v3874_v22 }
 0x9fa   :  { %3533 = vmatprep.subr.mxu0 %v3874_v22 }
 0x9fb   :  { %3521 = vmatmul.mubr.msk.f32.vlgmr.msra.gmra.mrb[32].mxu1 %vm190_vm0, %v1710_v4  ;;  %3526 = vmatmul.mubr.msk.f32.vlgmr.msra.gmra.mrb[22].mxu0 %vm190_vm0, %v1715_v12  ;;  %v1600_v4 = vld [vmem:[%s4474_s8 + $0x18] sm:$0xff] }
 0x9fc   :  { %3529 = vmatpush3.xpose.msk.msra.mxu1 %vm190_vm0, %v1811_v6  ;;  %3534 = vmatpush3.msra.mxu0 %v1887_v5 }
 0x9fd   :  { %3530 = vmatprep.mubr.msk.f32.mxu1 %vm3875_vm1, %v3874_v22  ;;  %3538 = vmatprep.subr.mxu1 %v3874_v22 }
 0x9fe   :  { %3535 = vmatprep.mubr.msk.f32.mxu0 %vm3875_vm1, %v3874_v22  ;;  %3543 = vmatprep.subr.mxu0 %v3874_v22 }
 0x9ff   :  { %3531 = vmatmul.mubr.msk.f32.vlgmr.msra.gmra.mrb[34].mxu1 %vm190_vm0, %v1720_v7 }
 0xa00   :  { %3539 = vmatpush3.msra.mxu1 %v1892_v8  ;;  %3540 = vmatprep.mubr.msk.f32.mxu1 %vm3875_vm1, %v3874_v22 }
 0xa01   :  { %3548 = vmatprep.subr.mxu1 %v3874_v22 }
 0xaca   :  { %v1977_v9 = vpop.f32.mrb[30].mxu1 }
 0xacb   :  { %v2209_v10 = vmul.f32 0.17677669, %v1977_v9  ;;  %v3517_v11 = vpop.f32.mrb[31].mxu1 }
 0xacc   :  { %v3184_v11 = vld [vmem:[%s4475_s14] ss:$0 sm:$0xff] }
 0xacd   :  { %v2213_v14 = vsel %vm778_vm2, %v2209_v10, -inf }
 0xace   :  { %2214 = vmax.xlane.f32.xlu0 %v2213_v14  ;;  %v2053_v16 = vpop.f32.mrb[32].mxu1  ;;  %v2129_v13 = vpop.f32.mrb[22].mxu0 }
 0xacf   :  { %v2210_v15 = vmul.f32 0.17677669, %v2053_v16  ;;  %v2211_v17 = vmul.f32 0.17677669, %v2129_v13  ;;  %v3522_v18 = vpop.f32.mrb[33].mxu1  ;;  %v3527_v19 = vpop.f32.mrb[23].mxu0 }
 0xad1   :  { %v2216_v20 = vsel %vm778_vm2, %v2210_v15, -inf  ;;  %v2219_v21 = vsel %vm778_vm2, %v2211_v17, -inf }
 0xad2   :  { %2217 = vmax.xlane.f32.xlu1 %v2216_v20  ;;  %v2205_v23 = vpop.f32.mrb[34].mxu1  ;;  %2220 = vmax.xlane.f32.xlu0 %v2219_v21 }
 0xad3   :  { %v2212_v24 = vmul.f32 0.17677669, %v2205_v23  ;;  %v3532_v25 = vpop.f32.mrb[35].mxu1 }
 0xad5   :  { %v2222_v26 = vsel %vm778_vm2, %v2212_v24, -inf }
 0xad6   :  { %2223 = vmax.xlane.f32.xlu1 %v2222_v26 }
 0xb5b   :  { %v2215_v27 = vpop.xlane.xlu0 %2214 }
 0xb5c   :  { %v2225_v28 = vsub.f32 %v2209_v10, %v2215_v27 }
 0xb5e   :  { %v2229_v29 = vmul.f32 1.442695, %v2225_v28 }
 0xb5f   :  { %v2218_v30 = vpop.xlane.xlu1 %2217  ;;  %v2221_v31 = vpop.xlane.xlu0 %2220 }
 0xb60   :  { %3784 = vpow2.f32 %v2229_v29  ;;  %v2226_v32 = vsub.f32 %v2210_v15, %v2218_v30  ;;  %v2227_v33 = vsub.f32 %v2211_v17, %v2221_v31 }
 0xb62   :  { %v2231_v34 = vmul.f32 1.442695, %v2226_v32  ;;  %v2233_v35 = vmul.f32 1.442695, %v2227_v33 }
 0xb63   :  { %v2224_v36 = vpop.xlane.xlu1 %2223 }
 0xb64   :  { %3786 = vpow2.f32 %v2231_v34  ;;  %v2228_v37 = vsub.f32 %v2212_v24, %v2224_v36 }
 0xb65   :  { %3788 = vpow2.f32 %v2233_v35 }
 0xb66   :  { %v2235_v38 = vmul.f32 1.442695, %v2228_v37 }
 0xb68   :  { %3790 = vpow2.f32 %v2235_v38 }
 0xb6a   :  { %v3785_v40 = vpop.eup %3784 }
 0xb6b   :  { %v2237_v42 = vsel %vm778_vm2, %v3785_v40, 0.0 }
 0xb6c   :  { %2238 = vadd.xlane.f32.xlu0 %v2237_v42 }
 0xb6e   :  { %v3787_v43 = vpop.eup %3786 }
 0xb6f   :  { %v3789_v44 = vpop.eup %3788  ;;  %v2240_v48 = vsel %vm778_vm2, %v3787_v43, 0.0 }
 0xb70   :  { %2241 = vadd.xlane.f32.xlu1 %v2240_v48  ;;  %v2243_v49 = vsel %vm778_vm2, %v3789_v44, 0.0 }
 0xb71   :  { %2244 = vadd.xlane.f32.xlu0 %v2243_v49 }
 0xb72   :  { %v3791_v50 = vpop.eup %3790 }
 0xb73   :  { %v2246_v47 = vsel %vm778_vm2, %v3791_v50, 0.0 }
 0xb74   :  { %2247 = vadd.xlane.f32.xlu1 %v2246_v47  ;;  %v1604_v47 = vld [vmem:[%s4476_s19] sm:$0xff] }
 0xbf9   :  { %v2239_v51 = vpop.xlane.xlu0 %2238 }
 0xbfa   :  { %3792 = vrcp.f32 %v2239_v51  ;;  %v1605_v51 = vld [vmem:[%s4476_s19 + $0x8] sm:$0xff] }
 0xbfd   :  { %v2242_v52 = vpop.xlane.xlu1 %2241 }
 0xbfe   :  { %3794 = vrcp.f32 %v2242_v52  ;;  %v2245_v53 = vpop.xlane.xlu0 %2244  ;;  %v3691_v52 = vpack.c.bf16 %v1605_v51, %v1604_v47 }
 0xbff   :  { %3796 = vrcp.f32 %v2245_v53  ;;  %v1606_v53 = vld [vmem:[%s4476_s19 + $0x10] sm:$0xff] }
 0xc01   :  { %v2248_v55 = vpop.xlane.xlu1 %2247 }
 0xc02   :  { %3798 = vrcp.f32 %v2248_v55  ;;  %v1607_v55 = vld [vmem:[%s4476_s19 + $0x18] sm:$0xff] }
 0xc03   :  { %v3695_v56 = vpack.c.bf16 %v1607_v55, %v1606_v53 }
 0xc04   :  { %v3793_v59 = vpop.eup %3792 }
 0xc05   :  { %v2253_v60 = vmul.f32 %v3793_v59, %v3785_v40  ;;  %v1610_v59 = vld [vmem:[%s4477_s24 + $0x8] sm:$0xff] }
 0xc07   :  { %3536 = vmatmul.mubr.msk.f32.vlgmr.msra.gmra.mrb[24].mxu0 %vm778_vm2, %v2253_v60  ;;  %v1611_v60 = vld [vmem:[%s4477_s24 + $0x10] sm:$0xff] }
 0xc08   :  { %v3795_v62 = vpop.eup %3794  ;;  %3544 = vmatpush3.msra.mxu0 %v4306_v57  ;;  %3545 = vmatprep.mubr.msk.f32.mxu0 %vm3875_vm1, %v3874_v22  ;;  %v1599_v57 = vld [vmem:[%s4474_s8 + $0x10] sm:$0xff] }
 0xc09   :  { %v3797_v63 = vpop.eup %3796  ;;  %v2254_v0 = vmul.f32 %v3795_v62, %v3787_v43  ;;  %3684 = vmatprep.subr.bf16.mxu0 %v3683_v61  ;;  %v3687_v12 = vpack.c.bf16 %v1600_v4, %v1599_v57  ;;  %v1612_v62 = vld [vmem:[%s4477_s24 + $0x18] sm:$0xff] }
 0xc0a   :  { %v2255_v1 = vmul.f32 %v3797_v63, %v3789_v44  ;;  %v3703_v63 = vpack.c.bf16 %v1612_v62, %v1611_v60 }
 0xc0b   :  { %3541 = vmatmul.mubr.msk.f32.vlgmr.msra.gmra.mrb[36].mxu1 %vm778_vm2, %v2254_v0  ;;  %v1613_v0 = vld [vmem:[%s4477_s24 + $0x20] sm:$0xff] }
 0xc0c   :  { %v3799_v2 = vpop.eup %3798  ;;  %3546 = vmatmul.mubr.msk.f32.vlgmr.msra.gmra.mrb[26].mxu0 %vm778_vm2, %v2255_v1  ;;  %3549 = vmatpush3.msra.mxu1 %v4304_v54  ;;  %v1614_v1 = vld [vmem:[%s4477_s24 + $0x28] sm:$0xff] }
 0xc0d   :  { %v2256_v3 = vmul.f32 %v3799_v2, %v3791_v50  ;;  %3550 = vmatprep.mubr.msk.f32.mxu1 %vm3875_vm1, %v3874_v22  ;;  %3686 = vmatpush3.bf16.msra.mxu0 %v3683_v61  ;;  %v3699_v61 = vpack.c.bf16 %v1610_v59, %v1609_v58  ;;  %v3707_v2 = vpack.c.bf16 %v1614_v1, %v1613_v0 }
 0xc0e   :  { %3688 = vmatprep.subr.bf16.mxu0 %v3687_v12  ;;  %3692 = vmatprep.subr.bf16.mxu1 %v3691_v52 }
 0xc0f   :  { %3551 = vmatmul.mubr.msk.f32.vlgmr.msra.gmra.mrb[38].mxu1 %vm778_vm2, %v2256_v3 }
 0xc10   :  { %3694 = vmatpush3.bf16.msra.mxu1 %v3691_v52 }
 0xc11   :  { %3690 = vmatpush3.bf16.msra.mxu0 %v3687_v12  ;;  %3696 = vmatprep.subr.bf16.mxu1 %v3695_v56 }
 0xc12   :  { %3700 = vmatprep.subr.bf16.mxu0 %v3699_v61 }
 0xc14   :  { %3698 = vmatpush3.bf16.msra.mxu1 %v3695_v56 }
 0xcda   :  { %v2326_v5 = vpop.f32.mrb[24].mxu0 }
 0xcdb   :  { %v3537_v6 = vpop.f32.mrb[25].mxu0  ;;  %3561 = vmatprep.mubr.msk.f32.mxu0 %vm190_vm0, %v2326_v5 }
 0xcde   :  { %v2399_v7 = vpop.f32.mrb[36].mxu1 }
 0xcdf   :  { %v2472_v8 = vpop.f32.mrb[26].mxu0  ;;  %v3542_v54 = vpop.f32.mrb[37].mxu1  ;;  %3562 = vmatmul.mubr.msk.f32.vlgmr.msra.gmra.mrb[28].mxu0 %vm190_vm0, %v2399_v7 }
 0xce0   :  { %v3547_v9 = vpop.f32.mrb[27].mxu0  ;;  %3564 = vmatprep.mubr.msk.f32.mxu0 %vm190_vm0, %v2472_v8  ;;  %3702 = vmatpush3.bf16.msra.mxu0 %v3699_v61 }
 0xce1   :  { %3704 = vmatprep.subr.bf16.mxu0 %v3703_v63 }
 0xce2   :  { %v2545_v22 = vpop.f32.mrb[38].mxu1 }
 0xce3   :  { %v3552_v10 = vpop.f32.mrb[39].mxu1  ;;  %3565 = vmatmul.mubr.msk.f32.gmra.mrb[30].mxu0 %vm190_vm0, %v2545_v22 }
 0xce4   :  { %3706 = vmatpush3.bf16.msra.mxu0 %v3703_v63 }
 0xce5   :  { %3708 = vmatprep.subr.bf16.mxu0 %v3707_v2 }
 0xce8   :  { %3710 = vmatpush3.bf16.msra.mxu0 %v3707_v2 }
 0xdb2   :  { %v3563_v14 = vpop.f32.mrb[28].mxu0 }
 0xdb3   :  { %v2639_v16 = vadd.f32 %v3563_v14, %v3184_v11  ;;  %v2633_v13 = vpop.f32.mrb[29].mxu0  ;;  %v3189_v14 = vld [vmem:[%s4478_s30] ss:$0 sm:$0xff] }
 0xdb4   :  { %v2634_v15 = vadd.f32 %v3184_v11, %v2633_v13 }
 0xdb5   :  { %v2653_v17 = vadd.f32 %v2639_v16, %v4268_v41 }
 0xdb6   :  { %v3566_v18 = vpop.f32.mrb[30].mxu0  ;;  %v2652_v19 = vadd.f32 %v2634_v15, %v4265_v39 }
 0xdb7   :  { %v2649_v20 = vadd.f32 %v3566_v18, %v3184_v11  ;;  %v2643_v21 = vpop.f32.mrb[31].mxu0  ;;  %v2659_v23 = vsel %vm190_vm0, %v2653_v17, 0.0 }
 0xdb8   :  { %v2644_v24 = vadd.f32 %v3184_v11, %v2643_v21  ;;  %2660 = vadd.xlane.f32.xlu1 %v2659_v23  ;;  %v2656_v25 = vsel %vm190_vm0, %v2652_v19, 0.0 }
 0xdb9   :  { %2657 = vadd.xlane.f32.xlu0 %v2656_v25  ;;  %v2655_v26 = vadd.f32 %v2649_v20, %v4280_v46 }
 0xdba   :  { %v2654_v27 = vadd.f32 %v2644_v24, %v4278_v45 }
 0xdbb   :  { %v2665_v28 = vsel %vm190_vm0, %v2655_v26, 0.0 }
 0xdbc   :  { %2666 = vadd.xlane.f32.xlu1 %v2665_v28  ;;  %v2662_v41 = vsel %vm190_vm0, %v2654_v27, 0.0 }
 0xdbd   :  { %2663 = vadd.xlane.f32.xlu0 %v2662_v41 }
 0xe45   :  { %v2661_v39 = vpop.xlane.xlu1 %2660 }
 0xe46   :  { %v2669_v29 = vmul.f32 0.03125, %v2661_v39  ;;  %v2658_v30 = vpop.xlane.xlu0 %2657 }
 0xe47   :  { %v2668_v31 = vmul.f32 0.03125, %v2658_v30  ;;  %v1616_v30 = vld [vmem:[%s4477_s24 + $0x38] sm:$0xff] }
 0xe48   :  { %v4367_v32 = vsub.f32 %v2653_v17, %v2669_v29  ;;  %v3190_v17 = vld [vmem:[%s4479_s6] ss:$0 sm:$0xff]  ;;  %v1615_v29 = vld [vmem:[%s4477_s24 + $0x30] sm:$0xff] }
 0xe49   :  { %v4369_v33 = vsub.f32 %v2652_v19, %v2668_v31  ;;  %v2667_v34 = vpop.xlane.xlu1 %2666  ;;  %v3711_v31 = vpack.c.bf16 %v1616_v30, %v1615_v29 }
 0xe4a   :  { %v2671_v35 = vmul.f32 0.03125, %v2667_v34  ;;  %v2664_v36 = vpop.xlane.xlu0 %2663  ;;  %v2677_v45 = vmul.f32 %v4367_v32, %v4367_v32 }
 0xe4b   :  { %v2670_v46 = vmul.f32 0.03125, %v2664_v36  ;;  %v2676_v37 = vmul.f32 %v4369_v33, %v4369_v33  ;;  %3712 = vmatprep.subr.bf16.mxu0 %v3711_v31 }
 0xe4c   :  { %v4375_v38 = vsub.f32 %v2655_v26, %v2671_v35  ;;  %v2683_v40 = vsel %vm190_vm0, %v2677_v45, 0.0  ;;  %3714 = vmatpush3.bf16.msra.mxu0 %v3711_v31  ;;  %v3201_v31 = vld [vmem:[%s4040_s20] ss:$0 sm:$0xff]  ;;  %s3876_s20 = smov [#allocation2]  }
 0xe4d   :  { %v4378_v42 = vsub.f32 %v2654_v27, %v2670_v46  ;;  %2684 = vadd.xlane.f32.xlu1 %v2683_v40  ;;  %v2680_v43 = vsel %vm190_vm0, %v2676_v37, 0.0 }
 0xe4e   :  { %2681 = vadd.xlane.f32.xlu0 %v2680_v43  ;;  %v2679_v44 = vmul.f32 %v4375_v38, %v4375_v38 }
 0xe4f   :  { %v2678_v48 = vmul.f32 %v4378_v42, %v4378_v42 }
 0xe50   :  { %v2689_v49 = vsel %vm190_vm0, %v2679_v44, 0.0 }
 0xe51   :  { %2690 = vadd.xlane.f32.xlu1 %v2689_v49  ;;  %v2686_v50 = vsel %vm190_vm0, %v2678_v48, 0.0  ;;  %v3196_v48 = vld [vmem:[%s4481_s16] ss:$0 sm:$0xff] }
 0xe52   :  { %2687 = vadd.xlane.f32.xlu0 %v2686_v50 }
 0xeda   :  { %v2685_v3 = vpop.xlane.xlu1 %2684 }
 0xedb   :  { %v2693_v57 = vmul.f32 0.03125, %v2685_v3  ;;  %v2682_v4 = vpop.xlane.xlu0 %2681 }
 0xedc   :  { %v2692_v12 = vmul.f32 0.03125, %v2682_v4 }
 0xedd   :  { %v2697_v5 = vadd.f32 1e-05, %v2693_v57 }
 0xede   :  { %v2696_v6 = vadd.f32 1e-05, %v2692_v12  ;;  %v2691_v7 = vpop.xlane.xlu1 %2690 }
 0xedf   :  { %3800 = vrsqrt.f32 %v2697_v5  ;;  %v2695_v8 = vmul.f32 0.03125, %v2691_v7  ;;  %v2688_v54 = vpop.xlane.xlu0 %2687 }
 0xee0   :  { %3802 = vrsqrt.f32 %v2696_v6  ;;  %v2694_v9 = vmul.f32 0.03125, %v2688_v54 }
 0xee1   :  { %v2699_v22 = vadd.f32 1e-05, %v2695_v8 }
 0xee2   :  { %v2698_v10 = vadd.f32 1e-05, %v2694_v9 }
 0xee3   :  { %3804 = vrsqrt.f32 %v2699_v22 }
 0xee4   :  { %3806 = vrsqrt.f32 %v2698_v10 }
 0xee9   :  { %v3801_v11 = vpop.eup %3800 }
 0xeea   :  { %v3803_v16 = vpop.eup %3802  ;;  %v2705_v13 = vmul.f32 %v3801_v11, %v4367_v32  ;;  %v3191_v32 = vld [vmem:[%s4480_s15] ss:$0 sm:$0xff] }
 0xeeb   :  { %v2704_v15 = vmul.f32 %v3803_v16, %v4369_v33 }
 0xeec   :  { %v2715_v18 = vmul.f32 %v3189_v14, %v2705_v13 }
 0xeed   :  { %v3805_v19 = vpop.eup %3804  ;;  %v2714_v20 = vmul.f32 %v3189_v14, %v2704_v15 }
 0xeee   :  { %v3807_v21 = vpop.eup %3806  ;;  %v2707_v23 = vmul.f32 %v3805_v19, %v4375_v38  ;;  %v2725_v26 = vadd.f32 %v3190_v17, %v2715_v18 }
 0xeef   :  { %v2724_v24 = vadd.f32 %v3190_v17, %v2714_v20  ;;  %v2706_v25 = vmul.f32 %v3807_v21, %v4378_v42 }
 0xef0   :  { %v2717_v27 = vmul.f32 %v3189_v14, %v2707_v23 }
 0xef1   :  { %3575 = vmatprep.mubr.msk.f32.mxu1 %vm190_vm0, %v2724_v24  ;;  %v2716_v28 = vmul.f32 %v3189_v14, %v2706_v25 }
 0xef2   :  { %3576 = vmatmul.mubr.msk.f32.vlgmr.msra.gmra.mrb[40].mxu1 %vm190_vm0, %v2725_v26  ;;  %v2727_v39 = vadd.f32 %v3190_v17, %v2717_v27 }
 0xef3   :  { %v2726_v41 = vadd.f32 %v3190_v17, %v2716_v28 }
 0xef5   :  { %3578 = vmatprep.mubr.msk.f32.mxu1 %vm190_vm0, %v2726_v41 }
 0xef6   :  { %3579 = vmatmul.mubr.msk.f32.gmra.mrb[42].mxu1 %vm190_vm0, %v2727_v39 }
 0xfc5   :  { %v3577_v33 = vpop.f32.mrb[40].mxu1 }
 0xfc6   :  { %v2818_v34 = vadd.f32 %v3577_v33, %v3191_v32  ;;  %v2812_v35 = vpop.f32.mrb[41].mxu1 }
 0xfc7   :  { %v2813_v36 = vadd.f32 %v3191_v32, %v2812_v35 }
 0xfc8   :  { %v2832_v37 = vmax.f32 %v2818_v34, 0.0  ;;  %v3202_v34 = vld [vmem:[%s4045_s27] ss:$0 sm:$0xff]  ;;  %s3067_s27 = sshll.u32 %s3876_s20, 4  ;;  %s3068_s27 = int_to_ptr.vmem [resolvable:$true] %s3067_s27 }
 0xfc9   :  { %v2831_v45 = vmax.f32 %v2813_v36, 0.0  ;;  %v3580_v46 = vpop.f32.mrb[42].mxu1  ;;  %p3821_p1 = scmp.lt.s32.totalorder %s3068_s27, %s3068_s27 }
 0xfca   :  { %v2828_v38 = vadd.f32 %v3580_v46, %v3191_v32  ;;  %v2822_v40 = vpop.f32.mrb[43].mxu1 }
 0xfcb   :  { %v2823_v42 = vadd.f32 %v3191_v32, %v2822_v40  ;;  %3597 = vmatprep.mubr.msk.f32.mxu0 %vm1408_vm3, %v2831_v45 }
 0xfcc   :  { %3598 = vmatmul.mubr.msk.f32.vlgmr.msra.gmra.mrb[32].mxu0 %vm1408_vm3, %v2832_v37  ;;  %v2834_v44 = vmax.f32 %v2828_v38, 0.0 }
 0xfcd   :  { %v2833_v43 = vmax.f32 %v2823_v42, 0.0 }
 0xfcf   :  { %3600 = vmatprep.mubr.msk.f32.mxu0 %vm1408_vm3, %v2833_v43 }
 0xfd0   :  { %3601 = vmatmul.mubr.msk.f32.gmra.mrb[34].mxu0 %vm1408_vm3, %v2834_v44 }
0x109f   :  { %v3599_v49 = vpop.f32.mrb[32].mxu0 }
0x10a0   :  { %v2925_v50 = vadd.f32 %v3599_v49, %v3196_v48  ;;  %v2919_v47 = vpop.f32.mrb[33].mxu0 }
0x10a1   :  { %v2920_v51 = vadd.f32 %v3196_v48, %v2919_v47 }
0x10a2   :  { %v2939_v52 = vadd.f32 %v2925_v50, %v2725_v26 }
0x10a3   :  { %v3602_v53 = vpop.f32.mrb[34].mxu0  ;;  %v2938_v55 = vadd.f32 %v2920_v51, %v2724_v24 }
0x10a4   :  { %v2935_v56 = vadd.f32 %v3602_v53, %v3196_v48  ;;  %v2929_v58 = vpop.f32.mrb[35].mxu0  ;;  %v2945_v59 = vsel %vm190_vm0, %v2939_v52, 0.0 }
0x10a5   :  { %v2930_v60 = vadd.f32 %v3196_v48, %v2929_v58  ;;  %2946 = vadd.xlane.f32.xlu1 %v2945_v59  ;;  %v2942_v61 = vsel %vm190_vm0, %v2938_v55, 0.0 }
0x10a6   :  { %2943 = vadd.xlane.f32.xlu0 %v2942_v61  ;;  %v2941_v62 = vadd.f32 %v2935_v56, %v2727_v39 }
0x10a7   :  { %v2940_v63 = vadd.f32 %v2930_v60, %v2726_v41 }
0x10a8   :  { %v2951_v0 = vsel %vm190_vm0, %v2941_v62, 0.0 }
0x10a9   :  { %2952 = vadd.xlane.f32.xlu1 %v2951_v0  ;;  %v2948_v1 = vsel %vm190_vm0, %v2940_v63, 0.0 }
0x10aa   :  { %2949 = vadd.xlane.f32.xlu0 %v2948_v1 }
0x1132   :  { %v2947_v2 = vpop.xlane.xlu1 %2946 }
0x1133   :  { %v2955_v3 = vmul.f32 0.03125, %v2947_v2  ;;  %v2944_v57 = vpop.xlane.xlu0 %2943 }
0x1134   :  { %v2954_v4 = vmul.f32 0.03125, %v2944_v57 }
0x1135   :  { %v2959_v12 = vsub.f32 %v2939_v52, %v2955_v3 }
0x1136   :  { %v2958_v5 = vsub.f32 %v2938_v55, %v2954_v4  ;;  %v2953_v6 = vpop.xlane.xlu1 %2952 }
0x1137   :  { %v2957_v7 = vmul.f32 0.03125, %v2953_v6  ;;  %v2950_v8 = vpop.xlane.xlu0 %2949  ;;  %v2963_v54 = vmul.f32 %v2959_v12, %v2959_v12 }
0x1138   :  { %v2956_v9 = vmul.f32 0.03125, %v2950_v8  ;;  %v2962_v22 = vmul.f32 %v2958_v5, %v2958_v5 }
0x1139   :  { %v2961_v10 = vsub.f32 %v2941_v62, %v2957_v7  ;;  %v2969_v11 = vsel %vm190_vm0, %v2963_v54, 0.0 }
0x113a   :  { %v2960_v14 = vsub.f32 %v2940_v63, %v2956_v9  ;;  %2970 = vadd.xlane.f32.xlu1 %v2969_v11  ;;  %v2966_v16 = vsel %vm190_vm0, %v2962_v22, 0.0 }
0x113b   :  { %2967 = vadd.xlane.f32.xlu0 %v2966_v16  ;;  %v2965_v13 = vmul.f32 %v2961_v10, %v2961_v10 }
0x113c   :  { %v2964_v15 = vmul.f32 %v2960_v14, %v2960_v14 }
0x113d   :  { %v2975_v17 = vsel %vm190_vm0, %v2965_v13, 0.0 }
0x113e   :  { %2976 = vadd.xlane.f32.xlu1 %v2975_v17  ;;  %v2972_v18 = vsel %vm190_vm0, %v2964_v15, 0.0 }
0x113f   :  { %2973 = vadd.xlane.f32.xlu0 %v2972_v18 }
0x11c7   :  { %v2971_v19 = vpop.xlane.xlu1 %2970 }
0x11c8   :  { %v2979_v20 = vmul.f32 0.03125, %v2971_v19  ;;  %v2968_v21 = vpop.xlane.xlu0 %2967 }
0x11c9   :  { %v2978_v23 = vmul.f32 0.03125, %v2968_v21 }
0x11ca   :  { %v2983_v24 = vadd.f32 1e-05, %v2979_v20 }
0x11cb   :  { %v2982_v25 = vadd.f32 1e-05, %v2978_v23  ;;  %v2977_v26 = vpop.xlane.xlu1 %2976 }
0x11cc   :  { %3808 = vrsqrt.f32 %v2983_v24  ;;  %v2981_v27 = vmul.f32 0.03125, %v2977_v26  ;;  %v2974_v28 = vpop.xlane.xlu0 %2973 }
0x11cd   :  { %3810 = vrsqrt.f32 %v2982_v25  ;;  %v2980_v41 = vmul.f32 0.03125, %v2974_v28 }
0x11ce   :  { %v2985_v39 = vadd.f32 1e-05, %v2981_v27 }
0x11cf   :  { %v2984_v29 = vadd.f32 1e-05, %v2980_v41 }
0x11d0   :  { %3812 = vrsqrt.f32 %v2985_v39 }
0x11d1   :  { %3814 = vrsqrt.f32 %v2984_v29 }
0x11d6   :  { %v3809_v30 = vpop.eup %3808 }
0x11d7   :  { %v3811_v32 = vpop.eup %3810  ;;  %v2991_v33 = vmul.f32 %v3809_v30, %v2959_v12 }
0x11d8   :  { %v2990_v35 = vmul.f32 %v3811_v32, %v2958_v5 }
0x11d9   :  { %v3001_v36 = vmul.f32 %v3201_v31, %v2991_v33 }
0x11da   :  { %v3813_v45 = vpop.eup %3812  ;;  %v3000_v46 = vmul.f32 %v3201_v31, %v2990_v35 }
0x11db   :  { %v3815_v37 = vpop.eup %3814  ;;  %v3011_v38 = vadd.f32 %v3202_v34, %v3001_v36  ;;  %v2993_v40 = vmul.f32 %v3813_v45, %v2961_v10 }
0x11dc   :  { %v3010_v42 = vadd.f32 %v3202_v34, %v3000_v46  ;;  %v2992_v43 = vmul.f32 %v3815_v37, %v2960_v14 }
0x11dd   :  { %3015 = vst.msk [vmem:[%s4050_s4 + $0x8] sm:$0xff] %vm190_vm0, %v3011_v38  ;;  %v3003_v44 = vmul.f32 %v3201_v31, %v2993_v40  ;;  %v3025_v48 = vsel %vm190_vm0, %v3011_v38, -inf }
0x11de   :  { %3014 = vst.msk [vmem:[%s4050_s4] sm:$0xff] %vm190_vm0, %v3010_v42  ;;  %v3002_v49 = vmul.f32 %v3201_v31, %v2992_v43  ;;  %v3018_v50 = vsel %vm190_vm0, %v3010_v42, -inf  ;;  %v3026_v47 = vrot.slane %v3025_v48, 4 }
0x11df   :  { %v3013_v51 = vadd.f32 %v3202_v34, %v3003_v44  ;;  %v3019_v52 = vrot.slane %v3018_v50, 4 }
0x11e0   :  { %v3012_v53 = vadd.f32 %v3202_v34, %v3002_v49  ;;  %v3027_v55 = vmax.f32 %v3025_v48, %v3026_v47 }
0x11e1   :  { %3017 = vst.msk [vmem:[%s4050_s4 + $0x18] sm:$0xff] %vm190_vm0, %v3013_v51  ;;  %v3020_v56 = vmax.f32 %v3018_v50, %v3019_v52  ;;  %v3039_v58 = vsel %vm190_vm0, %v3013_v51, -inf }
0x11e2   :  { %3016 = vst.msk [vmem:[%s4050_s4 + $0x10] sm:$0xff] %vm190_vm0, %v3012_v53  ;;  %v3028_v59 = vrot.slane %v3027_v55, 2  ;;  %v3032_v60 = vsel %vm190_vm0, %v3012_v53, -inf  ;;  %v3040_v61 = vrot.slane %v3039_v58, 4  ;;  %s3816_s4 = scalar_lea.vmem %s3068_s27, 64 }
0x11e3   :  { %v3021_v62 = vrot.slane %v3020_v56, 2  ;;  %v3033_v63 = vrot.slane %v3032_v60, 4  ;;  %p3817_p0 = scmp.ne.s32.totalorder %s3068_s27, %s3816_s4  ;;  %p3822_p2 = scmp.lt.s32.totalorder %s3816_s4, %s3816_s4 }
0x11e4   :  { %v3029_v0 = vmax.f32 %v3027_v55, %v3028_v59  ;;  %v3041_v1 = vmax.f32 %v3039_v58, %v3040_v61 }
0x11e5   :  { %v3022_v2 = vmax.f32 %v3020_v56, %v3021_v62  ;;  %v3034_v3 = vmax.f32 %v3032_v60, %v3033_v63  ;;  %p3823_p3 = por %p3822_p2, %p3821_p1 }
0x11e6   :  { %v3030_v57 = vrot.slane %v3029_v0, 1  ;;  %v3042_v4 = vrot.slane %v3041_v1, 2 }
0x11e7   :  { %v3023_v12 = vrot.slane %v3022_v2, 1  ;;  %v3035_v5 = vrot.slane %v3034_v3, 2  ;;  %p3824_p4 = pnand %p3823_p3, %p3817_p0 }
0x11e8   :  { %v3043_v6 = vmax.f32 %v3041_v1, %v3042_v4  ;;  %v3031_v54 = vmax.f32 %v3029_v0, %v3030_v57 }
0x11e9   :  { %v3036_v7 = vmax.f32 %v3034_v3, %v3035_v5  ;;  %v3024_v8 = vmax.f32 %v3022_v2, %v3023_v12 }
0x11ea   :  { %v3044_v9 = vrot.slane %v3043_v6, 1 }
0x11eb   :  { %v3037_v22 = vrot.slane %v3036_v7, 1  ;;  %v3051_v14 = vsel %vm3050_vm4, %v3031_v54, %v3024_v8 }
0x11ec   :  { %v3045_v11 = vmax.f32 %v3043_v6, %v3044_v9 }
0x11ed   :  { %v3038_v10 = vmax.f32 %v3036_v7, %v3037_v22 }
0x11ef   :  { %v3053_v16 = vsel %vm3052_vm5, %v3038_v10, %v3051_v14 }
0x11f0   :  { %v3055_v13 = vsel %vm3054_vm6, %v3045_v11, %v3053_v16 }
0x11f1   :  { %3058 = vst.msk [vmem:[#allocation2] sm:$0xf] %vm3057_vm7, %v3055_v13 }
0x11f2   :  { %3827 = shalt.err (!%p3824_p4)
}
0x11f3   :  { %s3828_s18 = scalar_lea.hbm %s4055_s12, 64 }
0x11f4   :  { %p3829_p5 = scmp.ne.s32.totalorder %s4055_s12, %s3828_s18  ;;  %p3832_p6 = scmp.lt.u32.totalorder %s3828_s18, %s4055_s12 }
0x11f6   :  { %p3834_p7 = pnand %p3832_p6, %p3829_p5 }
0x11f8   :  { %3837 = shalt.err (!%p3834_p7)
}
0x11f9   :  { %3070 = dma.vmem_to_hbm [thread:$0]  %s3068_s27, 64, %s4055_s12, [#allocation3]  }
0x11fa   :  { %3838 = dma.done.wait [#allocation3], 64  }
0x11fb   :  { %3839 = vsyncadd [#allocation3], 4294967232 }
0x11fc   :  { %3076 = vsyncpa [#allocation3], 1 }

// kernel: self_attention_encoder_forward.9
= control target key start
LH: loop header
LB: loop body
LE: loop exit
PB: predicated region body
PF: predicated region fallthrough
CT: control target
= control target key end

     0   :  { %vm39_vm0 = vcmask 261120   ;;  %v169_v38 = vlaneseq  ;;  %s670_s1 = inlined_call_operand.vmem [shape: f32[32,128], index: 1, kind: input, shape index: {}]   ;;  %s671_s0 = inlined_call_operand.vmem [shape: f32[64,32], index: 0, kind: input, shape index: {}]   ;;  %s672_s3 = inlined_call_operand.vmem [shape: f32[128,128], index: 3, kind: input, shape index: {}]   ;;  %s673_s2 = inlined_call_operand.vmem [shape: f32[1,128], index: 2, kind: input, shape index: {}]   ;;  %s674_s4 = inlined_call_operand.vmem [shape: f32[1,128], index: 4, kind: input, shape index: {}]   ;;  %s675_s5 = inlined_call_operand.vmem [shape: f32[64,128], index: 5, kind: output, shape index: {}]  }
   0x1   :  { %v28_v0 = vld [vmem:[%s670_s1] sm:$0xff]  ;;  %v29_v1 = vld [vmem:[%s670_s1 + $0x8] sm:$0xff]  ;;  %v30_v2 = vld [vmem:[%s670_s1 + $0x10] sm:$0xff] }
   0x2   :  { %v454_v3 = vpack.c.bf16 %v29_v1, %v28_v0  ;;  %v31_v4 = vld [vmem:[%s670_s1 + $0x18] sm:$0xff]  ;;  %v20_v5 = vld [vmem:[%s671_s0] sm:$0xff]  ;;  %v189_v8 = vld [vmem:[%s672_s3 + $0x8] sm:$0xff]  ;;  %v170_v40 = vand.u32 127, %v169_v38 }
   0x3   :  { %v458_v6 = vpack.c.bf16 %v31_v4, %v30_v2  ;;  %398 = vmatprep.mubr.msk.f32.mxu0 %vm39_vm0, %v20_v5  ;;  %v188_v7 = vld [vmem:[%s672_s3] sm:$0xff]  ;;  %v190_v9 = vld [vmem:[%s672_s3 + $0x10] sm:$0xff]  ;;  %v191_v11 = vld [vmem:[%s672_s3 + $0x18] sm:$0xff] }
   0x4   :  { %455 = vmatprep.subr.bf16.mxu0 %v454_v3  ;;  %v462_v10 = vpack.c.bf16 %v189_v8, %v188_v7  ;;  %v466_v12 = vpack.c.bf16 %v191_v11, %v190_v9  ;;  %v21_v13 = vld [vmem:[%s671_s0 + $0x8] sm:$0xff]  ;;  %v22_v14 = vld [vmem:[%s671_s0 + $0x10] sm:$0xff]  ;;  %v192_v15 = vld [vmem:[%s672_s3 + $0x20] sm:$0xff]  ;;  %vm171_vm1 = vcmp.lt.s32.totalorder %v170_v40, 16 }
   0x5   :  { %457 = vmatpush3.bf16.msra.mxu0 %v454_v3  ;;  %v193_v16 = vld [vmem:[%s672_s3 + $0x28] sm:$0xff]  ;;  %v23_v17 = vld [vmem:[%s671_s0 + $0x18] sm:$0xff]  ;;  %v24_v19 = vld [vmem:[%s671_s0 + $0x20] sm:$0xff] }
   0x6   :  { %459 = vmatprep.subr.bf16.mxu0 %v458_v6  ;;  %494 = vmatprep.subr.bf16.mxu1 %v462_v10  ;;  %v470_v18 = vpack.c.bf16 %v193_v16, %v192_v15  ;;  %v194_v20 = vld [vmem:[%s672_s3 + $0x30] sm:$0xff]  ;;  %v195_v21 = vld [vmem:[%s672_s3 + $0x38] sm:$0xff]  ;;  %v25_v22 = vld [vmem:[%s671_s0 + $0x28] sm:$0xff] }
   0x7   :  { %502 = vmatpush3.bf16.msra.mxu1 %v462_v10  ;;  %v474_v23 = vpack.c.bf16 %v195_v21, %v194_v20  ;;  %v26_v24 = vld [vmem:[%s671_s0 + $0x30] sm:$0xff]  ;;  %v196_v25 = vld [vmem:[%s672_s3 + $0x40] sm:$0xff]  ;;  %v197_v26 = vld [vmem:[%s672_s3 + $0x48] sm:$0xff] }
   0x8   :  { %495 = vmatprep.subr.bf16.mxu1 %v466_v12  ;;  %v27_v27 = vld [vmem:[%s671_s0 + $0x38] sm:$0xff]  ;;  %v478_v28 = vpack.c.bf16 %v197_v26, %v196_v25  ;;  %v198_v29 = vld [vmem:[%s672_s3 + $0x50] sm:$0xff]  ;;  %v200_v32 = vld [vmem:[%s672_s3 + $0x60] sm:$0xff] }
   0x9   :  { %461 = vmatpush3.bf16.msra.mxu0 %v458_v6  ;;  %v199_v30 = vld [vmem:[%s672_s3 + $0x58] sm:$0xff]  ;;  %v201_v33 = vld [vmem:[%s672_s3 + $0x68] sm:$0xff]  ;;  %v202_v35 = vld [vmem:[%s672_s3 + $0x70] sm:$0xff] }
   0xa   :  { %463 = vmatprep.subr.bf16.mxu0 %v462_v10  ;;  %v482_v31 = vpack.c.bf16 %v199_v30, %v198_v29  ;;  %v486_v34 = vpack.c.bf16 %v201_v33, %v200_v32  ;;  %v203_v36 = vld [vmem:[%s672_s3 + $0x78] sm:$0xff]  ;;  %v344_v39 = vld [vmem:[%s673_s2] ss:$0 sm:$0xff] }
   0xb   :  { %503 = vmatpush3.bf16.msra.mxu1 %v466_v12  ;;  %v490_v37 = vpack.c.bf16 %v203_v36, %v202_v35 }
   0xc   :  { %399 = vmatmul.mubr.msk.f32.vlgmr.msra.gmra.mrb[0].mxu0 %vm39_vm0, %v21_v13  ;;  %496 = vmatprep.subr.bf16.mxu1 %v470_v18 }
   0xd   :  { %401 = vmatprep.mubr.msk.f32.mxu0 %vm39_vm0, %v22_v14  ;;  %465 = vmatpush3.bf16.msra.mxu0 %v462_v10  ;;  %v353_v10 = vld [vmem:[%s674_s4] ss:$0 sm:$0xff] }
   0xe   :  { %467 = vmatprep.subr.bf16.mxu0 %v466_v12 }
   0xf   :  { %504 = vmatpush3.bf16.msra.mxu1 %v470_v18 }
  0x10   :  { %402 = vmatmul.mubr.msk.f32.gmra.mrb[2].mxu0 %vm39_vm0, %v23_v17  ;;  %497 = vmatprep.subr.bf16.mxu1 %v474_v23 }
  0x11   :  { %404 = vmatprep.mubr.msk.f32.mxu0 %vm39_vm0, %v24_v19  ;;  %469 = vmatpush3.bf16.msra.mxu0 %v466_v12 }
  0x12   :  { %471 = vmatprep.subr.bf16.mxu0 %v470_v18 }
  0x13   :  { %505 = vmatpush3.bf16.msra.mxu1 %v474_v23 }
  0x14   :  { %405 = vmatmul.mubr.msk.f32.gmra.mrb[4].mxu0 %vm39_vm0, %v25_v22  ;;  %498 = vmatprep.subr.bf16.mxu1 %v478_v28 }
  0x15   :  { %407 = vmatprep.mubr.msk.f32.mxu0 %vm39_vm0, %v26_v24  ;;  %473 = vmatpush3.bf16.msra.mxu0 %v470_v18 }
  0x16   :  { %475 = vmatprep.subr.bf16.mxu0 %v474_v23 }
  0x17   :  { %506 = vmatpush3.bf16.msra.mxu1 %v478_v28 }
  0x18   :  { %408 = vmatmul.mubr.msk.f32.gmra.mrb[6].mxu0 %vm39_vm0, %v27_v27  ;;  %499 = vmatprep.subr.bf16.mxu1 %v482_v31 }
  0x19   :  { %477 = vmatpush3.bf16.msra.mxu0 %v474_v23 }
  0x1a   :  { %479 = vmatprep.subr.bf16.mxu0 %v478_v28 }
  0x1b   :  { %507 = vmatpush3.bf16.msra.mxu1 %v482_v31 }
  0x1c   :  { %500 = vmatprep.subr.bf16.mxu1 %v486_v34 }
  0x1d   :  { %481 = vmatpush3.bf16.msra.mxu0 %v478_v28 }
  0x1e   :  { %483 = vmatprep.subr.bf16.mxu0 %v482_v31 }
  0x1f   :  { %508 = vmatpush3.bf16.msra.mxu1 %v486_v34 }
  0x20   :  { %501 = vmatprep.subr.bf16.mxu1 %v490_v37 }
  0x21   :  { %485 = vmatpush3.bf16.msra.mxu0 %v482_v31 }
  0x22   :  { %487 = vmatprep.subr.bf16.mxu0 %v486_v34 }
  0x23   :  { %509 = vmatpush3.bf16.msra.mxu1 %v490_v37 }
  0x25   :  { %489 = vmatpush3.bf16.msra.mxu0 %v486_v34 }
  0x26   :  { %491 = vmatprep.subr.bf16.mxu0 %v490_v37 }
  0x29   :  { %493 = vmatpush3.bf16.msra.mxu0 %v490_v37 }
  0xdf   :  { %v400_v41 = vpop.f32.mrb[0].mxu0 }
  0xe0   :  { %v136_v42 = vadd.f32 %v400_v41, %v344_v39  ;;  %v130_v43 = vpop.f32.mrb[1].mxu0 }
  0xe1   :  { %v131_v44 = vadd.f32 %v344_v39, %v130_v43 }
  0xe2   :  { %v173_v45 = vmax.f32 %v136_v42, 0.0 }
  0xe3   :  { %v172_v46 = vmax.f32 %v131_v44, 0.0  ;;  %v403_v47 = vpop.f32.mrb[2].mxu0 }
  0xe4   :  { %v146_v48 = vadd.f32 %v403_v47, %v344_v39  ;;  %v140_v49 = vpop.f32.mrb[3].mxu0  ;;  %v181_v52 = vsel %vm171_vm1, %v173_v45, %v136_v42 }
  0xe5   :  { %v141_v50 = vadd.f32 %v344_v39, %v140_v49  ;;  %v180_v51 = vsel %vm171_vm1, %v172_v46, %v131_v44 }
  0xe6   :  { %v175_v53 = vmax.f32 %v146_v48, 0.0  ;;  %442 = vmatprep.mubr.f32.mxu0 %v180_v51 }
  0xe7   :  { %v174_v54 = vmax.f32 %v141_v50, 0.0  ;;  %v406_v55 = vpop.f32.mrb[4].mxu0  ;;  %443 = vmatmul.mubr.f32.vlgmr.msra.gmra.mrb[8].mxu0 %v181_v52 }
  0xe8   :  { %v156_v56 = vadd.f32 %v406_v55, %v344_v39  ;;  %v150_v57 = vpop.f32.mrb[5].mxu0  ;;  %v183_v61 = vsel %vm171_vm1, %v175_v53, %v146_v48 }
  0xe9   :  { %v151_v58 = vadd.f32 %v344_v39, %v150_v57  ;;  %v182_v59 = vsel %vm171_vm1, %v174_v54, %v141_v50 }
  0xea   :  { %v177_v60 = vmax.f32 %v156_v56, 0.0  ;;  %445 = vmatprep.mubr.f32.mxu1 %v182_v59 }
  0xeb   :  { %v176_v62 = vmax.f32 %v151_v58, 0.0  ;;  %v409_v63 = vpop.f32.mrb[6].mxu0  ;;  %446 = vmatmul.mubr.f32.vlgmr.msra.gmra.mrb[0].mxu1 %v183_v61 }
  0xec   :  { %v166_v0 = vadd.f32 %v409_v63, %v344_v39  ;;  %v160_v1 = vpop.f32.mrb[7].mxu0  ;;  %v185_v5 = vsel %vm171_vm1, %v177_v60, %v156_v56 }
  0xed   :  { %v161_v2 = vadd.f32 %v344_v39, %v160_v1  ;;  %v184_v3 = vsel %vm171_vm1, %v176_v62, %v151_v58 }
  0xee   :  { %v179_v4 = vmax.f32 %v166_v0, 0.0  ;;  %448 = vmatprep.mubr.f32.mxu1 %v184_v3 }
  0xef   :  { %v178_v6 = vmax.f32 %v161_v2, 0.0  ;;  %449 = vmatmul.mubr.f32.gmra.mrb[2].mxu1 %v185_v5 }
  0xf0   :  { %v187_v8 = vsel %vm171_vm1, %v179_v4, %v166_v0 }
  0xf1   :  { %v186_v7 = vsel %vm171_vm1, %v178_v6, %v161_v2 }
  0xf2   :  { %451 = vmatprep.mubr.f32.mxu1 %v186_v7 }
  0xf3   :  { %452 = vmatmul.mubr.f32.gmra.mrb[4].mxu1 %v187_v8 }
 0x1ba   :  { %v444_v9 = vpop.f32.mrb[8].mxu0 }
 0x1bb   :  { %v310_v11 = vadd.f32 %v444_v9, %v181_v52  ;;  %v270_v12 = vpop.f32.mrb[9].mxu0 }
 0x1bc   :  { %v309_v13 = vadd.f32 %v270_v12, %v180_v51 }
 0x1bd   :  { %v325_v14 = vadd.f32 %v353_v10, %v310_v11 }
 0x1be   :  { %v324_v15 = vadd.f32 %v353_v10, %v309_v13  ;;  %v447_v16 = vpop.f32.mrb[0].mxu1 }
 0x1bf   :  { %333 = vst [vmem:[%s675_s5 + $0x8] sm:$0xff] %v325_v14  ;;  %v312_v17 = vadd.f32 %v447_v16, %v183_v61  ;;  %v280_v18 = vpop.f32.mrb[1].mxu1 }
 0x1c0   :  { %332 = vst [vmem:[%s675_s5] sm:$0xff] %v324_v15  ;;  %v311_v19 = vadd.f32 %v280_v18, %v182_v59 }
 0x1c1   :  { %v327_v20 = vadd.f32 %v353_v10, %v312_v17 }
 0x1c2   :  { %v326_v21 = vadd.f32 %v353_v10, %v311_v19  ;;  %v450_v22 = vpop.f32.mrb[2].mxu1 }
 0x1c3   :  { %335 = vst [vmem:[%s675_s5 + $0x18] sm:$0xff] %v327_v20  ;;  %v314_v23 = vadd.f32 %v450_v22, %v185_v5  ;;  %v290_v24 = vpop.f32.mrb[3].mxu1 }
 0x1c4   :  { %334 = vst [vmem:[%s675_s5 + $0x10] sm:$0xff] %v326_v21  ;;  %v313_v25 = vadd.f32 %v290_v24, %v184_v3 }
 0x1c5   :  { %v329_v26 = vadd.f32 %v353_v10, %v314_v23 }
 0x1c6   :  { %v328_v27 = vadd.f32 %v353_v10, %v313_v25  ;;  %v453_v28 = vpop.f32.mrb[4].mxu1 }
 0x1c7   :  { %337 = vst [vmem:[%s675_s5 + $0x28] sm:$0xff] %v329_v26  ;;  %v316_v29 = vadd.f32 %v453_v28, %v187_v8  ;;  %v300_v30 = vpop.f32.mrb[5].mxu1 }
 0x1c8   :  { %336 = vst [vmem:[%s675_s5 + $0x20] sm:$0xff] %v328_v27  ;;  %v315_v31 = vadd.f32 %v300_v30, %v186_v7 }
 0x1c9   :  { %v331_v32 = vadd.f32 %v353_v10, %v316_v29 }
 0x1ca   :  { %v330_v33 = vadd.f32 %v353_v10, %v315_v31 }
 0x1cb   :  { %339 = vst [vmem:[%s675_s5 + $0x38] sm:$0xff] %v331_v32 }
 0x1cc   :  { %338 = vst [vmem:[%s675_s5 + $0x30] sm:$0xff] %v330_v33 }

// kernel: self_attention_encoder_forward.8
= control target key start
LH: loop header
LB: loop body
LE: loop exit
PB: predicated region body
PF: predicated region fallthrough
CT: control target
= control target key end

     0   :  { %s11607_s6 = smov 1   ;;  %s11608_s10 = smov 2   ;;  %s14247_s0 = inlined_call_operand.smem [shape: u32[55], index: -1, kind: input, shape index: {}] }
   0x1   :  { %s11683_s5 = sld [smem:[%s14247_s0]]   ;;  %s11609_s14 = smov 3  }
   0x2   :  { %s11688_s9 = sld [smem:[%s14247_s0 + %s11607_s6]]   ;;  %s11610_s18 = smov 4  }
   0x3   :  { %s11693_s13 = sld [smem:[%s14247_s0 + %s11608_s10]]   ;;  %s11611_s22 = smov 5  }
   0x4   :  { %s11698_s17 = sld [smem:[%s14247_s0 + %s11609_s14]]   ;;  %s11612_s26 = smov 6  }
   0x5   :  { %s11703_s21 = sld [smem:[%s14247_s0 + %s11610_s18]]   ;;  %s11613_s30 = smov 7  }
   0x6   :  { %s11708_s25 = sld [smem:[%s14247_s0 + %s11611_s22]]   ;;  %s11614_s4 = smov 8  }
   0x7   :  { %s11713_s29 = sld [smem:[%s14247_s0 + %s11612_s26]]   ;;  %s11615_s10 = smov 9  }
   0x8   :  { %14284 = sst [smem:[#allocation28_spill]] %s11688_s9  ;;  %s11616_s15 = smov 10  }
   0x9   :  { %s11718_s3 = sld [smem:[%s14247_s0 + %s11613_s30]]   ;;  %s11617_s20 = smov 11  }
   0xa   :  { %s11723_s8 = sld [smem:[%s14247_s0 + %s11614_s4]]   ;;  %s11618_s26 = smov 12  }
   0xb   :  { %s11728_s14 = sld [smem:[%s14247_s0 + %s11615_s10]]   ;;  %s11619_s1 = smov 13  }
   0xc   :  { %14285 = sst [smem:[#allocation29_spill]] %s11708_s25  ;;  %s11620_s7 = smov 14  }
   0xd   :  { %s11733_s19 = sld [smem:[%s14247_s0 + %s11616_s15]]   ;;  %s11621_s15 = smov 15  }
   0xe   :  { %s11738_s24 = sld [smem:[%s14247_s0 + %s11617_s20]]   ;;  %s11622_s22 = smov 16  }
   0xf   :  { %14286 = sst [smem:[#allocation30_spill]] %s11718_s3  ;;  %s11623_s28 = smov 17  }
  0x10   :  { %14287 = sst [smem:[#allocation31_spill]] %s11723_s8 }
  0x11   :  { %14288 = sst [smem:[#allocation32_spill]] %s11728_s14 }
  0x12   :  { %s11743_s30 = sld [smem:[%s14247_s0 + %s11618_s26]]  }
  0x13   :  { %14289 = sst [smem:[#allocation33_spill]] %s11733_s19 }
  0x14   :  { %14290 = sst [smem:[#allocation34_spill]] %s11738_s24 }
  0x15   :  { %s11748_s6 = sld [smem:[%s14247_s0 + %s11619_s1]]  }
  0x16   :  { %s11753_s12 = sld [smem:[%s14247_s0 + %s11620_s7]]   ;;  %s11624_s7 = smov 18  }
  0x17   :  { %s11758_s20 = sld [smem:[%s14247_s0 + %s11621_s15]]   ;;  %s11625_s15 = smov 19  }
  0x18   :  { %14291 = sst [smem:[#allocation35_spill]] %s11743_s30 }
  0x19   :  { %s11763_s27 = sld [smem:[%s14247_s0 + %s11622_s22]]   ;;  %s11626_s22 = smov 20  }
  0x1a   :  { %s11768_s4 = sld [smem:[%s14247_s0 + %s11623_s28]]   ;;  %s11627_s28 = smov 21  }
  0x1b   :  { %14292 = sst [smem:[#allocation36_spill]] %s11748_s6 }
  0x1c   :  { %14293 = sst [smem:[#allocation37_spill]] %s11753_s12 }
  0x1d   :  { %14294 = sst [smem:[#allocation38_spill]] %s11758_s20 }
  0x1e   :  { %s11773_s24 = sld [smem:[%s14247_s0 + %s11624_s7]]   ;;  %s11628_s7 = smov 22  }
  0x1f   :  { %14295 = sst [smem:[#allocation39_spill]] %s11763_s27 }
  0x20   :  { %14296 = sst [smem:[#allocation40_spill]] %s11768_s4 }
  0x21   :  { %s11778_s20 = sld [smem:[%s14247_s0 + %s11625_s15]]   ;;  %s11629_s15 = smov 23  }
  0x22   :  { %s11783_s27 = sld [smem:[%s14247_s0 + %s11626_s22]]   ;;  %s11630_s22 = smov 24  }
  0x23   :  { %s11788_s4 = sld [smem:[%s14247_s0 + %s11627_s28]]   ;;  %s11631_s28 = smov 25  }
  0x24   :  { %14297 = sst [smem:[#allocation41_spill]] %s11773_s24 }
  0x25   :  { %s11793_s24 = sld [smem:[%s14247_s0 + %s11628_s7]]   ;;  %s11632_s7 = smov 26  }
  0x27   :  { %14298 = sst [smem:[#allocation42_spill]] %s11778_s20 }
  0x28   :  { %14299 = sst [smem:[#allocation43_spill]] %s11783_s27 }
  0x29   :  { %14300 = sst [smem:[#allocation44_spill]] %s11788_s4 }
  0x2a   :  { %s11798_s20 = sld [smem:[%s14247_s0 + %s11629_s15]]   ;;  %s11633_s15 = smov 27  }
  0x2b   :  { %14301 = sst [smem:[#allocation45_spill]] %s11793_s24 }
  0x2c   :  { %s11803_s27 = sld [smem:[%s14247_s0 + %s11630_s22]]   ;;  %s11634_s22 = smov 28  }
  0x2d   :  { %s11808_s4 = sld [smem:[%s14247_s0 + %s11631_s28]]   ;;  %s11635_s28 = smov 29  }
  0x2e   :  { %s11813_s24 = sld [smem:[%s14247_s0 + %s11632_s7]]   ;;  %s11636_s7 = smov 30  }
  0x30   :  { %14302 = sst [smem:[#allocation46_spill]] %s11798_s20 }
  0x31   :  { %s11818_s20 = sld [smem:[%s14247_s0 + %s11633_s15]]   ;;  %s11637_s15 = smov 31  }
  0x32   :  { %14303 = sst [smem:[#allocation47_spill]] %s11803_s27 }
  0x33   :  { %14304 = sst [smem:[#allocation48_spill]] %s11808_s4 }
  0x34   :  { %14305 = sst [smem:[#allocation49_spill]] %s11813_s24 }
  0x35   :  { %s11823_s27 = sld [smem:[%s14247_s0 + %s11634_s22]]   ;;  %s11638_s22 = smov 32  }
  0x36   :  { %s11828_s4 = sld [smem:[%s14247_s0 + %s11635_s28]]   ;;  %s11639_s28 = smov 33  }
  0x37   :  { %14306 = sst [smem:[#allocation50_spill]] %s11818_s20 }
  0x38   :  { %s11833_s24 = sld [smem:[%s14247_s0 + %s11636_s7]]   ;;  %s11640_s7 = smov 34  }
  0x39   :  { %s11838_s20 = sld [smem:[%s14247_s0 + %s11637_s15]]   ;;  %s11641_s15 = smov 35  }
  0x3b   :  { %14307 = sst [smem:[#allocation51_spill]] %s11823_s27 }
  0x3c   :  { %14308 = sst [smem:[#allocation52_spill]] %s11828_s4 }
  0x3d   :  { %s11843_s27 = sld [smem:[%s14247_s0 + %s11638_s22]]   ;;  %s11642_s22 = smov 36  }
  0x3e   :  { %14309 = sst [smem:[#allocation53_spill]] %s11833_s24 }
  0x3f   :  { %14310 = sst [smem:[#allocation54_spill]] %s11838_s20 }
  0x40   :  { %s11848_s4 = sld [smem:[%s14247_s0 + %s11639_s28]]   ;;  %s11643_s28 = smov 37  }
  0x41   :  { %s11853_s24 = sld [smem:[%s14247_s0 + %s11640_s7]]   ;;  %s11644_s7 = smov 38  }
  0x42   :  { %s11858_s20 = sld [smem:[%s14247_s0 + %s11641_s15]]   ;;  %s11645_s15 = smov 39  }
  0x43   :  { %14311 = sst [smem:[#allocation55_spill]] %s11843_s27 }
  0x44   :  { %s11863_s27 = sld [smem:[%s14247_s0 + %s11642_s22]]   ;;  %s11646_s22 = smov 40  }
  0x45   :  { %s11878_s19 = sld [smem:[%s14247_s0 + %s11645_s15]]   ;;  %s11649_s15 = smov 43  }
  0x46   :  { %14312 = sst [smem:[#allocation56_spill]] %s11848_s4 }
  0x47   :  { %14313 = sst [smem:[#allocation57_spill]] %s11853_s24 }
  0x48   :  { %s11868_s4 = sld [smem:[%s14247_s0 + %s11643_s28]]   ;;  %s11647_s28 = smov 41  }
  0x49   :  { %s11873_s24 = sld [smem:[%s14247_s0 + %s11644_s7]]   ;;  %s11648_s7 = smov 42  }
  0x4a   :  { %s11883_s12 = sld [smem:[%s14247_s0 + %s11646_s22]]   ;;  %s11650_s22 = smov 44  }
  0x4b   :  { %14315 = sst [smem:[#allocation59_spill]] %s11878_s19 }
  0x4c   :  { %s11888_s9 = sld [smem:[%s14247_s0 + %s11647_s28]]   ;;  %s11651_s28 = smov 45  }
  0x4d   :  { %s11898_s19 = sld [smem:[%s14247_s0 + %s11649_s15]]   ;;  %s11653_s15 = smov 47  }
  0x4e   :  { %s11908_s30 = sld [smem:[%s14247_s0 + %s11651_s28]]   ;;  %s11655_s28 = smov 49  }
  0x4f   :  { %14314 = sst [smem:[#allocation58_spill]] %s11873_s24 }
  0x50   :  { %14316 = sst [smem:[#allocation60_spill]] %s11883_s12 }
  0x51   :  { %s11893_s24 = sld [smem:[%s14247_s0 + %s11648_s7]]   ;;  %s11652_s7 = smov 46  }
  0x52   :  { %s11903_s12 = sld [smem:[%s14247_s0 + %s11650_s22]]   ;;  %s11654_s22 = smov 48  }
  0x53   :  { %s11913_s6 = sld [smem:[%s14247_s0 + %s11652_s7]]   ;;  %s11656_s7 = smov 50  }
  0x54   :  { %s11918_s14 = sld [smem:[%s14247_s0 + %s11653_s15]]   ;;  %s11657_s15 = smov 51  }
  0x55   :  { %s11928_s8 = sld [smem:[%s14247_s0 + %s11655_s28]]   ;;  %s11659_s28 = smov 53  }
  0x56   :  { %s11933_s3 = sld [smem:[%s14247_s0 + %s11656_s7]]   ;;  %s11660_s7 = smov 54  }
  0x57   :  { %s11938_s25 = sld [smem:[%s14247_s0 + %s11657_s15]]  }
  0x58   :  { %14317 = sst [smem:[#allocation61_spill]] %s11903_s12 }
  0x59   :  { %s11923_s12 = sld [smem:[%s14247_s0 + %s11654_s22]]   ;;  %s11658_s22 = smov 52  }
  0x5b   :  { %14319 = sst [smem:[#allocation63_spill]] %s11928_s8 }
  0x5c   :  { %14320 = sst [smem:[#allocation64_spill]] %s11933_s3 }
  0x5d   :  { %s11948_s8 = sld [smem:[%s14247_s0 + %s11659_s28]]  }
  0x5e   :  { %s11953_s3 = sld [smem:[%s14247_s0 + %s11660_s7]]  }
  0x5f   :  { %14318 = sst [smem:[#allocation62_spill]] %s11923_s12 }
  0x60   :  { %s11943_s12 = sld [smem:[%s14247_s0 + %s11658_s22]]  }
  0x61   :  { %114 = vsyncpa [#allocation3], 0 }
  0x62   :  { %115 = vsyncpa [#allocation5], 0 }
  0x63   :  { %116 = vsyncpa [#allocation8], 0 }
  0x64   :  { %117 = vsyncpa [#allocation11], 0 }
  0x65   :  { %118 = vsyncpa [#allocation14], 0 }
  0x66   :  { %119 = vsyncpa [#allocation17], 0 }
  0x67   :  { %120 = vsyncpa [#allocation20], 0  ;;  %s11661_s15 = smov [#allocation4]   ;;  %s11662_s18 = smov [#allocation7]  }
  0x68   :  { %s207_s16 = sshll.u32 %s11661_s15, 4  ;;  %s233_s22 = sshll.u32 %s11662_s18, 4  ;;  %s208_s16 = int_to_ptr.vmem [resolvable:$true] %s207_s16  ;;  %s234_s22 = int_to_ptr.vmem [resolvable:$true] %s233_s22 }
  0x69   :  { %s11329_s23 = scalar_lea.hbm %s11863_s27, 16 }
  0x6a   :  { %p11330_p0 = scmp.ne.s32.totalorder %s11863_s27, %s11329_s23  ;;  %p11333_p1 = scmp.lt.u32.totalorder %s11329_s23, %s11863_s27 }
  0x6c   :  { %p11335_p2 = pnand %p11333_p1, %p11330_p0 }
  0x6e   :  { %11338 = shalt.err (!%p11335_p2)
}
  0x6f   :  { %s11339_s0 = scalar_lea.vmem %s208_s16, 16  ;;  %s11343_s26 = scalar_lea.vmem %s208_s16, 32 }
  0x70   :  { %p11340_p3 = scmp.ne.s32.totalorder %s208_s16, %s11339_s0  ;;  %p11344_p4 = scmp.lt.s32.totalorder %s208_s16, %s208_s16 }
  0x71   :  { %p11345_p5 = scmp.lt.s32.totalorder %s11343_s26, %s11339_s0 }
  0x73   :  { %p11346_p6 = por %p11345_p5, %p11344_p4 }
  0x75   :  { %p11347_p7 = pnand %p11346_p6, %p11340_p3 }
  0x77   :  { %11350 = shalt.err (!%p11347_p7)
}
  0x78   :  { %210 = dma.hbm_to_vmem [thread:$0]  %s11863_s27, 16, %s208_s16, [#allocation5]  }
  0x79   :  { %s11351_s28 = scalar_lea.hbm %s11888_s9, 16 }
  0x7a   :  { %p11352_p8 = scmp.ne.s32.totalorder %s11888_s9, %s11351_s28  ;;  %p11355_p9 = scmp.lt.u32.totalorder %s11351_s28, %s11888_s9 }
  0x7c   :  { %p11357_p10 = pnand %p11355_p9, %p11352_p8 }
  0x7e   :  { %11360 = shalt.err (!%p11357_p10)
}
  0x7f   :  { %s11361_s1 = scalar_lea.vmem %s234_s22, 16  ;;  %s11365_s2 = scalar_lea.vmem %s234_s22, 32 }
  0x80   :  { %p11362_p11 = scmp.ne.s32.totalorder %s234_s22, %s11361_s1  ;;  %p11366_p12 = scmp.lt.s32.totalorder %s234_s22, %s234_s22 }
  0x81   :  { %p11367_p13 = scmp.lt.s32.totalorder %s11365_s2, %s11361_s1 }
  0x83   :  { %p11368_p0 = por %p11367_p13, %p11366_p12 }
  0x85   :  { %p11369_p1 = pnand %p11368_p0, %p11362_p11 }
  0x87   :  { %11372 = shalt.err (!%p11369_p1)
}
  0x88   :  { %236 = dma.hbm_to_vmem [thread:$0]  %s11888_s9, 16, %s234_s22, [#allocation8]  }
  0x89   :  { %s11663_s7 = smov [#allocation10]   ;;  %s11664_s10 = smov [#allocation13]  }
  0x8a   :  { %s253_s27 = sshll.u32 %s11663_s7, 4  ;;  %s275_s11 = sshll.u32 %s11664_s10, 4  ;;  %s254_s27 = int_to_ptr.vmem [resolvable:$true] %s253_s27  ;;  %s276_s11 = int_to_ptr.vmem [resolvable:$true] %s275_s11 }
  0x8b   :  { %s11373_s15 = scalar_lea.hbm %s11898_s19, 16 }
  0x8c   :  { %p11374_p2 = scmp.ne.s32.totalorder %s11898_s19, %s11373_s15  ;;  %p11377_p3 = scmp.lt.u32.totalorder %s11373_s15, %s11898_s19 }
  0x8e   :  { %p11379_p4 = pnand %p11377_p3, %p11374_p2 }
  0x90   :  { %11382 = shalt.err (!%p11379_p4)
}
  0x91   :  { %s11383_s16 = scalar_lea.vmem %s254_s27, 16  ;;  %s11387_s18 = scalar_lea.vmem %s254_s27, 32 }
  0x92   :  { %p11384_p5 = scmp.ne.s32.totalorder %s254_s27, %s11383_s16  ;;  %p11388_p6 = scmp.lt.s32.totalorder %s254_s27, %s254_s27 }
  0x93   :  { %p11389_p7 = scmp.lt.s32.totalorder %s11387_s18, %s11383_s16 }
  0x95   :  { %p11390_p8 = por %p11389_p7, %p11388_p6 }
  0x97   :  { %p11391_p9 = pnand %p11390_p8, %p11384_p5 }
  0x99   :  { %11394 = shalt.err (!%p11391_p9)
}
  0x9a   :  { %256 = dma.hbm_to_vmem [thread:$0]  %s11898_s19, 16, %s254_s27, [#allocation11]  }
  0x9b   :  { %s11395_s9 = scalar_lea.hbm %s11913_s6, 16 }
  0x9c   :  { %p11396_p10 = scmp.ne.s32.totalorder %s11913_s6, %s11395_s9  ;;  %p11399_p11 = scmp.lt.u32.totalorder %s11395_s9, %s11913_s6 }
  0x9e   :  { %p11401_p12 = pnand %p11399_p11, %p11396_p10 }
  0xa0   :  { %11404 = shalt.err (!%p11401_p12)
}
  0xa1   :  { %s11405_s22 = scalar_lea.vmem %s276_s11, 16  ;;  %s11409_s23 = scalar_lea.vmem %s276_s11, 32 }
  0xa2   :  { %p11406_p13 = scmp.ne.s32.totalorder %s276_s11, %s11405_s22  ;;  %p11410_p0 = scmp.lt.s32.totalorder %s276_s11, %s276_s11 }
  0xa3   :  { %p11411_p1 = scmp.lt.s32.totalorder %s11409_s23, %s11405_s22 }
  0xa5   :  { %p11412_p2 = por %p11411_p1, %p11410_p0 }
  0xa7   :  { %p11413_p3 = pnand %p11412_p2, %p11406_p13 }
  0xa9   :  { %11416 = shalt.err (!%p11413_p3)
}
  0xaa   :  { %278 = dma.hbm_to_vmem [thread:$0]  %s11913_s6, 16, %s276_s11, [#allocation14]  }
  0xab   :  { %s11665_s0 = smov [#allocation16]   ;;  %s11666_s26 = smov [#allocation2]  }
  0xac   :  { %s301_s19 = sshll.u32 %s11665_s0, 4  ;;  %s197_s28 = sshll.u32 %s11666_s26, 4  ;;  %s302_s19 = int_to_ptr.vmem [resolvable:$true] %s301_s19  ;;  %s198_s28 = int_to_ptr.vmem [resolvable:$true] %s197_s28 }
  0xad   :  { %s11417_s1 = scalar_lea.hbm %s11938_s25, 16 }
  0xae   :  { %p11418_p4 = scmp.ne.s32.totalorder %s11938_s25, %s11417_s1  ;;  %p11421_p5 = scmp.lt.u32.totalorder %s11417_s1, %s11938_s25 }
  0xb0   :  { %p11423_p6 = pnand %p11421_p5, %p11418_p4 }
  0xb2   :  { %11426 = shalt.err (!%p11423_p6)
}
  0xb3   :  { %s11427_s2 = scalar_lea.vmem %s302_s19, 16  ;;  %s11431_s7 = scalar_lea.vmem %s302_s19, 32 }
  0xb4   :  { %p11428_p7 = scmp.ne.s32.totalorder %s302_s19, %s11427_s2  ;;  %p11432_p8 = scmp.lt.s32.totalorder %s302_s19, %s302_s19 }
  0xb5   :  { %p11433_p9 = scmp.lt.s32.totalorder %s11431_s7, %s11427_s2 }
  0xb7   :  { %p11434_p10 = por %p11433_p9, %p11432_p8 }
  0xb9   :  { %p11435_p11 = pnand %p11434_p10, %p11428_p7 }
  0xbb   :  { %11438 = shalt.err (!%p11435_p11)
}
  0xbc   :  { %304 = dma.hbm_to_vmem [thread:$0]  %s11938_s25, 16, %s302_s19, [#allocation17]  }
  0xbd   :  { %s11439_s6 = scalar_lea.hbm %s11858_s20, 16 }
  0xbe   :  { %p11440_p12 = scmp.ne.s32.totalorder %s11858_s20, %s11439_s6  ;;  %p11443_p13 = scmp.lt.u32.totalorder %s11439_s6, %s11858_s20 }
  0xc0   :  { %p11445_p0 = pnand %p11443_p13, %p11440_p12 }
  0xc2   :  { %11448 = shalt.err (!%p11445_p0)
}
  0xc3   :  { %s11449_s27 = scalar_lea.vmem %s198_s28, 16  ;;  %s11453_s10 = scalar_lea.vmem %s198_s28, 32 }
  0xc4   :  { %p11450_p1 = scmp.ne.s32.totalorder %s198_s28, %s11449_s27  ;;  %p11454_p2 = scmp.lt.s32.totalorder %s198_s28, %s198_s28 }
  0xc5   :  { %p11455_p3 = scmp.lt.s32.totalorder %s11453_s10, %s11449_s27 }
  0xc7   :  { %p11456_p4 = por %p11455_p3, %p11454_p2 }
  0xc9   :  { %p11457_p5 = pnand %p11456_p4, %p11450_p1 }
  0xcb   :  { %11460 = shalt.err (!%p11457_p5)
}
  0xcc   :  { %200 = dma.hbm_to_vmem [thread:$0]  %s11858_s20, 16, %s198_s28, [#allocation3]  }
  0xcd   :  { %s11667_s11 = smov [#allocation6]   ;;  %s11668_s15 = smov [#allocation9]  }
  0xce   :  { %s217_s25 = sshll.u32 %s11667_s11, 4  ;;  %s243_s16 = sshll.u32 %s11668_s15, 4  ;;  %s218_s25 = int_to_ptr.vmem [resolvable:$true] %s217_s25  ;;  %s244_s16 = int_to_ptr.vmem [resolvable:$true] %s243_s16 }
  0xcf   :  { %s11461_s18 = scalar_lea.hbm %s11868_s4, 16 }
  0xd0   :  { %p11462_p6 = scmp.ne.s32.totalorder %s11868_s4, %s11461_s18  ;;  %p11465_p7 = scmp.lt.u32.totalorder %s11461_s18, %s11868_s4 }
  0xd2   :  { %p11467_p8 = pnand %p11465_p7, %p11462_p6 }
  0xd4   :  { %11470 = shalt.err (!%p11467_p8)
}
  0xd5   :  { %s11471_s9 = scalar_lea.vmem %s218_s25, 16  ;;  %s11475_s22 = scalar_lea.vmem %s218_s25, 32 }
  0xd6   :  { %p11472_p9 = scmp.ne.s32.totalorder %s218_s25, %s11471_s9  ;;  %p11476_p10 = scmp.lt.s32.totalorder %s218_s25, %s218_s25 }
  0xd7   :  { %p11477_p11 = scmp.lt.s32.totalorder %s11475_s22, %s11471_s9 }
  0xd9   :  { %p11478_p12 = por %p11477_p11, %p11476_p10 }
  0xdb   :  { %p11479_p13 = pnand %p11478_p12, %p11472_p9 }
  0xdd   :  { %11482 = shalt.err (!%p11479_p13)
}
  0xde   :  { %220 = dma.hbm_to_vmem [thread:$0]  %s11868_s4, 16, %s218_s25, [#allocation5]  }
  0xdf   :  { %s11483_s20 = scalar_lea.hbm %s11893_s24, 16 }
  0xe0   :  { %p11484_p0 = scmp.ne.s32.totalorder %s11893_s24, %s11483_s20  ;;  %p11487_p1 = scmp.lt.u32.totalorder %s11483_s20, %s11893_s24 }
  0xe2   :  { %p11489_p2 = pnand %p11487_p1, %p11484_p0 }
  0xe4   :  { %11492 = shalt.err (!%p11489_p2)
}
  0xe5   :  { %s11493_s23 = scalar_lea.vmem %s244_s16, 16  ;;  %s11497_s0 = scalar_lea.vmem %s244_s16, 32 }
  0xe6   :  { %p11494_p3 = scmp.ne.s32.totalorder %s244_s16, %s11493_s23  ;;  %p11498_p4 = scmp.lt.s32.totalorder %s244_s16, %s244_s16 }
  0xe7   :  { %p11499_p5 = scmp.lt.s32.totalorder %s11497_s0, %s11493_s23 }
  0xe9   :  { %p11500_p6 = por %p11499_p5, %p11498_p4 }
  0xeb   :  { %p11501_p7 = pnand %p11500_p6, %p11494_p3 }
  0xed   :  { %11504 = shalt.err (!%p11501_p7)
}
  0xee   :  { %246 = dma.hbm_to_vmem [thread:$0]  %s11893_s24, 16, %s244_s16, [#allocation8]  }
  0xef   :  { %s11669_s19 = smov [#allocation12]   ;;  %s11670_s26 = smov [#allocation15]  }
  0xf0   :  { %s265_s4 = sshll.u32 %s11669_s19, 4  ;;  %s285_s28 = sshll.u32 %s11670_s26, 4  ;;  %s266_s4 = int_to_ptr.vmem [resolvable:$true] %s265_s4  ;;  %s286_s28 = int_to_ptr.vmem [resolvable:$true] %s285_s28 }
  0xf1   :  { %s11505_s1 = scalar_lea.hbm %s11908_s30, 16 }
  0xf2   :  { %p11506_p8 = scmp.ne.s32.totalorder %s11908_s30, %s11505_s1  ;;  %p11509_p9 = scmp.lt.u32.totalorder %s11505_s1, %s11908_s30 }
  0xf4   :  { %p11511_p10 = pnand %p11509_p9, %p11506_p8 }
  0xf6   :  { %11514 = shalt.err (!%p11511_p10)
}
  0xf7   :  { %s11515_s2 = scalar_lea.vmem %s266_s4, 16  ;;  %s11519_s7 = scalar_lea.vmem %s266_s4, 32 }
  0xf8   :  { %p11516_p11 = scmp.ne.s32.totalorder %s266_s4, %s11515_s2  ;;  %p11520_p12 = scmp.lt.s32.totalorder %s266_s4, %s266_s4 }
  0xf9   :  { %p11521_p13 = scmp.lt.s32.totalorder %s11519_s7, %s11515_s2 }
  0xfb   :  { %p11522_p0 = por %p11521_p13, %p11520_p12 }
  0xfd   :  { %p11523_p1 = pnand %p11522_p0, %p11516_p11 }
  0xff   :  { %11526 = shalt.err (!%p11523_p1)
}
 0x100   :  { %268 = dma.hbm_to_vmem [thread:$0]  %s11908_s30, 16, %s266_s4, [#allocation11]  }
 0x101   :  { %s11527_s24 = scalar_lea.hbm %s11918_s14, 16 }
 0x102   :  { %p11528_p2 = scmp.ne.s32.totalorder %s11918_s14, %s11527_s24  ;;  %p11531_p3 = scmp.lt.u32.totalorder %s11527_s24, %s11918_s14 }
 0x104   :  { %p11533_p4 = pnand %p11531_p3, %p11528_p2 }
 0x106   :  { %11536 = shalt.err (!%p11533_p4)
}
 0x107   :  { %s11537_s6 = scalar_lea.vmem %s286_s28, 16  ;;  %s11541_s27 = scalar_lea.vmem %s286_s28, 32 }
 0x108   :  { %p11538_p5 = scmp.ne.s32.totalorder %s286_s28, %s11537_s6  ;;  %p11542_p6 = scmp.lt.s32.totalorder %s286_s28, %s286_s28 }
 0x109   :  { %p11543_p7 = scmp.lt.s32.totalorder %s11541_s27, %s11537_s6 }
 0x10b   :  { %p11544_p8 = por %p11543_p7, %p11542_p6 }
 0x10d   :  { %p11545_p9 = pnand %p11544_p8, %p11538_p5 }
 0x10f   :  { %11548 = shalt.err (!%p11545_p9)
}
 0x110   :  { %288 = dma.hbm_to_vmem [thread:$0]  %s11918_s14, 16, %s286_s28, [#allocation14]  }
 0x111   :  { %s11671_s10 = smov [#allocation18]   ;;  %s11672_s11 = smov [#allocation19]  }
 0x112   :  { %s311_s30 = sshll.u32 %s11671_s10, 4  ;;  %s321_s25 = sshll.u32 %s11672_s11, 4  ;;  %s312_s30 = int_to_ptr.vmem [resolvable:$true] %s311_s30  ;;  %s322_s25 = int_to_ptr.vmem [resolvable:$true] %s321_s25 }
 0x113   :  { %s11549_s15 = scalar_lea.hbm %s11943_s12, 16 }
 0x114   :  { %p11550_p10 = scmp.ne.s32.totalorder %s11943_s12, %s11549_s15  ;;  %p11553_p11 = scmp.lt.u32.totalorder %s11549_s15, %s11943_s12 }
 0x116   :  { %p11555_p12 = pnand %p11553_p11, %p11550_p10 }
 0x118   :  { %11558 = shalt.err (!%p11555_p12)
}
 0x119   :  { %s11559_s16 = scalar_lea.vmem %s312_s30, 16  ;;  %s11563_s18 = scalar_lea.vmem %s312_s30, 32 }
 0x11a   :  { %p11560_p13 = scmp.ne.s32.totalorder %s312_s30, %s11559_s16  ;;  %p11564_p0 = scmp.lt.s32.totalorder %s312_s30, %s312_s30 }
 0x11b   :  { %p11565_p1 = scmp.lt.s32.totalorder %s11563_s18, %s11559_s16 }
 0x11d   :  { %p11566_p2 = por %p11565_p1, %p11564_p0 }
 0x11f   :  { %p11567_p3 = pnand %p11566_p2, %p11560_p13 }
 0x121   :  { %11570 = shalt.err (!%p11567_p3)
}
 0x122   :  { %314 = dma.hbm_to_vmem [thread:$0]  %s11943_s12, 16, %s312_s30, [#allocation17]  }
 0x123   :  { %s11571_s14 = scalar_lea.hbm %s11948_s8, 16 }
 0x124   :  { %p11572_p4 = scmp.ne.s32.totalorder %s11948_s8, %s11571_s14  ;;  %p11575_p5 = scmp.lt.u32.totalorder %s11571_s14, %s11948_s8 }
 0x126   :  { %p11577_p6 = pnand %p11575_p5, %p11572_p4 }
 0x128   :  { %11580 = shalt.err (!%p11577_p6)
}
 0x129   :  { %s11581_s9 = scalar_lea.vmem %s322_s25, 16  ;;  %s11585_s22 = scalar_lea.vmem %s322_s25, 32 }
 0x12a   :  { %p11582_p7 = scmp.ne.s32.totalorder %s322_s25, %s11581_s9  ;;  %p11586_p8 = scmp.lt.s32.totalorder %s322_s25, %s322_s25 }
 0x12b   :  { %p11587_p9 = scmp.lt.s32.totalorder %s11585_s22, %s11581_s9 }
 0x12d   :  { %p11588_p10 = por %p11587_p9, %p11586_p8 }
 0x12f   :  { %p11589_p11 = pnand %p11588_p10, %p11582_p7 }
 0x131   :  { %11592 = shalt.err (!%p11589_p11)
}
 0x132   :  { %324 = dma.hbm_to_vmem [thread:$0]  %s11948_s8, 16, %s322_s25, [#allocation20]  }
 0x133   :  { %11593 = dma.done.wait [#allocation3], 16  }
 0x134   :  { %11594 = vsyncadd [#allocation3], 4294967280 }
 0x135   :  { %11595 = dma.done.wait [#allocation5], 32  }
 0x136   :  { %11596 = vsyncadd [#allocation5], 4294967264 }
 0x137   :  { %11597 = dma.done.wait [#allocation8], 32  }
 0x138   :  { %11598 = vsyncadd [#allocation8], 4294967264 }
 0x139   :  { %11599 = dma.done.wait [#allocation11], 32  }
 0x13a   :  { %11600 = vsyncadd [#allocation11], 4294967264 }
 0x13b   :  { %11601 = dma.done.wait [#allocation14], 32  }
 0x13c   :  { %11602 = vsyncadd [#allocation14], 4294967264 }
 0x13d   :  { %11603 = dma.done.wait [#allocation17], 32  }
 0x13e   :  { %11604 = vsyncadd [#allocation17], 4294967264 }
 0x13f   :  { %11605 = dma.done.wait [#allocation20], 16  }
 0x140   :  { %11606 = vsyncadd [#allocation20], 4294967280  ;;  %v373_v0 = vld [vmem:[%s11698_s17] sm:$0xff]  ;;  %v374_v1 = vld [vmem:[%s11698_s17 + $0x8] sm:$0xff]  ;;  %vm744_vm0 = vcmask 261120   ;;  %v14268_v22 = vmov 0.0  }
 0x141   :  { %v369_v2 = vld [vmem:[%s11693_s13] sm:$0xff]  ;;  %v10381_v3 = vpack.c.bf16 %v374_v1, %v373_v0  ;;  %v370_v4 = vld [vmem:[%s11693_s13 + $0x8] sm:$0xff]  ;;  %v375_v5 = vld [vmem:[%s11698_s17 + $0x10] sm:$0xff]  ;;  %vm11674_vm1 = vmmov 0   ;;  %vm1332_vm2 = vcmask 64512   ;;  %s14326_s8 = sld [smem:[#allocation35_spill]] }
 0x142   :  { %v376_v6 = vld [vmem:[%s11698_s17 + $0x18] sm:$0xff]  ;;  %v10373_v7 = vpack.c.bf16 %v370_v4, %v369_v2  ;;  %v371_v9 = vld [vmem:[%s11693_s13 + $0x10] sm:$0xff]  ;;  %v12012_v11 = vld [vmem:[%s11683_s5] sm:$0xff]  ;;  %s14323_s17 = sld [smem:[#allocation31_spill]]  ;;  %s14327_s12 = sld [smem:[#allocation28_spill]] }
 0x143   :  { %v10385_v8 = vpack.c.bf16 %v376_v6, %v375_v5  ;;  %v372_v10 = vld [vmem:[%s11693_s13 + $0x18] sm:$0xff]  ;;  %10382 = vmatprep.subr.bf16.mxu1 %v10381_v3  ;;  %10011 = vmatprep.mubr.msk.f32.mxu1 %vm744_vm0, %v12012_v11  ;;  %v377_v13 = vld [vmem:[%s11703_s21] sm:$0xff]  ;;  %v378_v14 = vld [vmem:[%s11703_s21 + $0x8] sm:$0xff]  ;;  %s14321_s13 = sld [smem:[#allocation29_spill]]  ;;  %s14329_s23 = sld [smem:[#allocation33_spill]] }
 0x144   :  { %v10377_v12 = vpack.c.bf16 %v372_v10, %v371_v9  ;;  %10384 = vmatpush3.bf16.msra.mxu1 %v10381_v3  ;;  %10374 = vmatprep.subr.bf16.mxu0 %v10373_v7  ;;  %v10389_v15 = vpack.c.bf16 %v378_v14, %v377_v13  ;;  %v379_v16 = vld [vmem:[%s11703_s21 + $0x10] sm:$0xff]  ;;  %v380_v17 = vld [vmem:[%s11703_s21 + $0x18] sm:$0xff]  ;;  %v12023_v18 = vld [vmem:[%s11683_s5 + $0x8] sm:$0xff]  ;;  %s14324_s21 = sld [smem:[#allocation32_spill]]  ;;  %s14328_s20 = sld [smem:[#allocation37_spill]] }
 0x145   :  { %10376 = vmatpush3.bf16.msra.mxu0 %v10373_v7  ;;  %10386 = vmatprep.subr.bf16.mxu1 %v10385_v8  ;;  %v12026_v19 = vld [vmem:[%s11683_s5 + $0x10] sm:$0xff]  ;;  %v10393_v20 = vpack.c.bf16 %v380_v17, %v379_v16  ;;  %v12035_v21 = vld [vmem:[%s11683_s5 + $0x18] sm:$0xff]  ;;  %v8892_v23 = vld [vmem:[%s11713_s29] ss:$0 sm:$0xff]  ;;  %s14322_s5 = sld [smem:[#allocation30_spill]]  ;;  %s14325_s29 = sld [smem:[#allocation36_spill]] }
 0x146   :  { %10378 = vmatprep.subr.bf16.mxu0 %v10377_v12  ;;  %9997 = vmatprep.mubr.msk.f32.mxu0 %vm744_vm0, %v12012_v11  ;;  %s14330_s0 = sld [smem:[#allocation34_spill]]  ;;  %s14331_s19 = sld [smem:[#allocation39_spill]] }
 0x147   :  { %s14332_s4 = sld [smem:[#allocation38_spill]]  ;;  %s14333_s26 = sld [smem:[#allocation40_spill]] }
 0x148   :  { %10388 = vmatpush3.bf16.msra.mxu1 %v10385_v8  ;;  %s14334_s28 = sld [smem:[#allocation41_spill]]  ;;  %s14335_s1 = sld [smem:[#allocation42_spill]] }
 0x149   :  { %10380 = vmatpush3.bf16.msra.mxu0 %v10377_v12  ;;  %11141 = vmatprep.subr.bf16.mxu1 %v10389_v15  ;;  %v8887_v25 = vld [vmem:[%s14321_s13] ss:$0 sm:$0xff]  ;;  %s14336_s2 = sld [smem:[#allocation45_spill]]  ;;  %s14337_s7 = sld [smem:[#allocation43_spill]] }
 0x14a   :  { %10390 = vmatprep.subr.bf16.mxu0 %v10389_v15  ;;  %s14338_s24 = sld [smem:[#allocation44_spill]]  ;;  %s14341_s6 = sld [smem:[#allocation47_spill]] }
 0x14b   :  { %10012 = vmatmul.mubr.msk.f32.vlgmr.msra.gmra.mrb[0].mxu1 %vm744_vm0, %v12023_v18  ;;  %v12084_v43 = vld [vmem:[%s14322_s5] ss:$0 sm:$0xff]  ;;  %s14342_s27 = sld [smem:[#allocation46_spill]]  ;;  %s14348_s10 = sld [smem:[#allocation48_spill]] }
 0x14c   :  { %9998 = vmatmul.mubr.msk.f32.vlgmr.msra.gmra.mrb[0].mxu0 %vm744_vm0, %v12023_v18  ;;  %10014 = vmatprep.mubr.msk.f32.mxu1 %vm744_vm0, %v12026_v19  ;;  %s14351_s30 = sld [smem:[#allocation52_spill]]  ;;  %s14352_s11 = sld [smem:[#allocation51_spill]] }
 0x14d   :  { %10000 = vmatprep.mubr.msk.f32.mxu0 %vm744_vm0, %v12026_v19  ;;  %11143 = vmatpush3.bf16.msra.mxu1 %v10389_v15  ;;  %s14353_s25 = sld [smem:[#allocation53_spill]]  ;;  %s14355_s15 = sld [smem:[#allocation49_spill]] }
 0x14e   :  { %11142 = vmatprep.subr.bf16.mxu1 %v10393_v20  ;;  %10392 = vmatpush3.bf16.msra.mxu0 %v10389_v15  ;;  %s14356_s16 = sld [smem:[#allocation50_spill]]  ;;  %s14357_s18 = sld [smem:[#allocation55_spill]] }
 0x14f   :  { %10015 = vmatmul.mubr.msk.f32.gmra.mrb[2].mxu1 %vm744_vm0, %v12035_v21  ;;  %10394 = vmatprep.subr.bf16.mxu0 %v10393_v20  ;;  %s14358_s14 = sld [smem:[#allocation54_spill]]  ;;  %s14359_s9 = sld [smem:[#allocation56_spill]] }
 0x150   :  { %10001 = vmatmul.mubr.msk.f32.gmra.mrb[2].mxu0 %vm744_vm0, %v12035_v21  ;;  %10028 = vmatprep.mubr.msk.f32.mxu1 %vm744_vm0, %v12026_v19  ;;  %s14360_s22 = sld [smem:[#allocation57_spill]]  ;;  %s14361_s13 = sld [smem:[#allocation59_spill]] }
 0x151   :  { %11144 = vmatpush3.bf16.msra.mxu1 %v10393_v20  ;;  %10025 = vmatprep.mubr.msk.f32.mxu0 %vm744_vm0, %v12012_v11  ;;  %s14362_s5 = sld [smem:[#allocation58_spill]] }
 0x152   :  { %10396 = vmatpush3.bf16.msra.mxu0 %v10393_v20  ;;  %10031 = vmatprep.subr.mxu1 %v14268_v22 }
 0x153   :  { %10041 = vmatprep.subr.mxu0 %v14268_v22 }
 0x154   :  { %10029 = vmatmul.mubr.msk.f32.vlgmr.msra.gmra.mrb[4].mxu1 %vm744_vm0, %v12035_v21 }
 0x155   :  { %10026 = vmatmul.mubr.msk.f32.vlgmr.msra.gmra.mrb[4].mxu0 %vm744_vm0, %v12023_v18  ;;  %10033 = vmatprep.mubr.msk.f32.mxu1 %vm11674_vm1, %v14268_v22 }
 0x156   :  { %10043 = vmatprep.mubr.msk.f32.mxu0 %vm11674_vm1, %v14268_v22 }
 0x21e   :  { %v10013_v24 = vpop.f32.mrb[0].mxu1 }
 0x21f   :  { %v914_v26 = vpop.f32.mrb[1].mxu1  ;;  %v9999_v27 = vpop.f32.mrb[0].mxu0  ;;  %v920_v34 = vadd.f32 %v10013_v24, %v8892_v23 }
 0x220   :  { %v915_v28 = vadd.f32 %v8892_v23, %v914_v26  ;;  %v823_v29 = vpop.f32.mrb[1].mxu0  ;;  %v829_v39 = vadd.f32 %v9999_v27, %v8887_v25 }
 0x221   :  { %v824_v30 = vadd.f32 %v8887_v25, %v823_v29  ;;  %v384_v29 = vld [vmem:[%s14323_s17] sm:$0xff] }
 0x222   :  { %v10016_v31 = vpop.f32.mrb[2].mxu1  ;;  %10032 = vmatpush3.xpose.msk.msra.mxu1 %vm744_vm0, %v915_v28 }
 0x223   :  { %v924_v32 = vpop.f32.mrb[3].mxu1  ;;  %v10002_v33 = vpop.f32.mrb[2].mxu0  ;;  %10036 = vmatprep.subr.mxu1 %v14268_v22  ;;  %v930_v38 = vadd.f32 %v10016_v31, %v8892_v23 }
 0x224   :  { %v925_v35 = vadd.f32 %v8892_v23, %v924_v32  ;;  %v833_v36 = vpop.f32.mrb[3].mxu0  ;;  %v839_v42 = vadd.f32 %v10002_v33, %v8887_v25 }
 0x225   :  { %10034 = vmatmul.mubr.msk.f32.vlgmr.msra.gmra.mrb[6].mxu1 %vm744_vm0, %v824_v30  ;;  %v834_v37 = vadd.f32 %v8887_v25, %v833_v36  ;;  %v385_v30 = vld [vmem:[%s14323_s17 + $0x8] sm:$0xff] }
 0x226   :  { %10037 = vmatpush3.xpose.msk.msra.mxu1 %vm744_vm0, %v920_v34  ;;  %10042 = vmatpush3.xpose.msk.msra.mxu0 %vm744_vm0, %v925_v35  ;;  %v10397_v33 = vpack.c.bf16 %v385_v30, %v384_v29  ;;  %v391_v30 = vld [vmem:[%s14326_s8] sm:$0xff] }
 0x227   :  { %10038 = vmatprep.mubr.msk.f32.mxu1 %vm11674_vm1, %v14268_v22  ;;  %10046 = vmatprep.subr.mxu1 %v14268_v22  ;;  %v12067_v40 = vpop.f32.mrb[4].mxu1 }
 0x228   :  { %v12069_v41 = vpop.f32.mrb[5].mxu1  ;;  %10051 = vmatprep.subr.mxu0 %v14268_v22  ;;  %v10027_v44 = vpop.f32.mrb[4].mxu0 }
 0x229   :  { %10039 = vmatmul.mubr.msk.f32.vlgmr.msra.gmra.mrb[8].mxu1 %vm744_vm0, %v829_v39  ;;  %10044 = vmatmul.mubr.msk.f32.vlgmr.msra.gmra.mrb[6].mxu0 %vm744_vm0, %v834_v37  ;;  %v1011_v45 = vadd.f32 %v10027_v44, %v12084_v43  ;;  %v1005_v46 = vpop.f32.mrb[5].mxu0  ;;  %v1016_v34 = vadd.f32 %v12084_v43, %v12069_v41  ;;  %v1021_v39 = vadd.f32 %v12067_v40, %v12084_v43  ;;  %v386_v44 = vld [vmem:[%s14323_s17 + $0x10] sm:$0xff] }
 0x22a   :  { %10047 = vmatpush3.xpose.msk.msra.mxu1 %vm744_vm0, %v930_v38  ;;  %10048 = vmatprep.mubr.msk.f32.mxu1 %vm11674_vm1, %v14268_v22  ;;  %v1006_v47 = vadd.f32 %v12084_v43, %v1005_v46 }
 0x22b   :  { %10056 = vmatprep.subr.mxu1 %v14268_v22  ;;  %10053 = vmatprep.mubr.msk.f32.mxu0 %vm11674_vm1, %v14268_v22 }
 0x22c   :  { %10052 = vmatpush3.msra.mxu0 %v1006_v47 }
 0x22d   :  { %10049 = vmatmul.mubr.msk.f32.vlgmr.msra.gmra.mrb[10].mxu1 %vm744_vm0, %v839_v42  ;;  %10061 = vmatprep.subr.mxu0 %v14268_v22 }
 0x22e   :  { %10058 = vmatprep.mubr.msk.f32.mxu1 %vm11674_vm1, %v14268_v22  ;;  %10057 = vmatpush3.msra.mxu1 %v1011_v45  ;;  %v387_v45 = vld [vmem:[%s14323_s17 + $0x18] sm:$0xff]  ;;  %s14363_s17 = sld [smem:[#allocation60_spill]] }
 0x22f   :  { %10066 = vmatprep.subr.mxu1 %v14268_v22  ;;  %v10401_v46 = vpack.c.bf16 %v387_v45, %v386_v44  ;;  %v368_v44 = vld [vmem:[%s14327_s12 + $0x18] sm:$0xff]  ;;  %v399_v45 = vld [vmem:[%s14328_s20] sm:$0xff] }
 0x2f8   :  { %v1096_v48 = vpop.f32.mrb[6].mxu1 }
 0x2f9   :  { %v1328_v49 = vmul.f32 0.17677669, %v1096_v48  ;;  %v10035_v50 = vpop.f32.mrb[7].mxu1 }
 0x2fb   :  { %v1333_v51 = vsel %vm1332_vm2, %v1328_v49, -inf }
 0x2fc   :  { %v1248_v52 = vpop.f32.mrb[6].mxu0  ;;  %1334 = vmax.xlane.f32.xlu0 %v1333_v51  ;;  %v1172_v53 = vpop.f32.mrb[8].mxu1 }
 0x2fd   :  { %v1330_v54 = vmul.f32 0.17677669, %v1248_v52  ;;  %v1329_v55 = vmul.f32 0.17677669, %v1172_v53  ;;  %v10040_v56 = vpop.f32.mrb[9].mxu1  ;;  %v10045_v57 = vpop.f32.mrb[7].mxu0 }
 0x2fe   :  { %v8914_v53 = vld [vmem:[%s14324_s21] ss:$0 sm:$0xff]  ;;  %s14364_s21 = sld [smem:[#allocation61_spill]] }
 0x2ff   :  { %v1339_v58 = vsel %vm1332_vm2, %v1330_v54, -inf  ;;  %v1336_v59 = vsel %vm1332_vm2, %v1329_v55, -inf }
 0x300   :  { %1340 = vmax.xlane.f32.xlu1 %v1339_v58  ;;  %1337 = vmax.xlane.f32.xlu0 %v1336_v59  ;;  %v1324_v60 = vpop.f32.mrb[10].mxu1 }
 0x301   :  { %v1331_v61 = vmul.f32 0.17677669, %v1324_v60  ;;  %v10050_v62 = vpop.f32.mrb[11].mxu1 }
 0x303   :  { %v1342_v63 = vsel %vm1332_vm2, %v1331_v61, -inf }
 0x304   :  { %1343 = vmax.xlane.f32.xlu1 %v1342_v63 }
 0x389   :  { %v1335_v0 = vpop.xlane.xlu0 %1334 }
 0x38a   :  { %v1345_v1 = vsub.f32 %v1328_v49, %v1335_v0 }
 0x38c   :  { %v1349_v2 = vmul.f32 1.442695, %v1345_v1 }
 0x38d   :  { %v1341_v3 = vpop.xlane.xlu1 %1340  ;;  %v1338_v4 = vpop.xlane.xlu0 %1337 }
 0x38e   :  { %11213 = vpow2.f32 %v1349_v2  ;;  %v1347_v5 = vsub.f32 %v1330_v54, %v1341_v3  ;;  %v1346_v6 = vsub.f32 %v1329_v55, %v1338_v4 }
 0x390   :  { %v1353_v7 = vmul.f32 1.442695, %v1347_v5  ;;  %v1351_v8 = vmul.f32 1.442695, %v1346_v6 }
 0x391   :  { %v1344_v9 = vpop.xlane.xlu1 %1343 }
 0x392   :  { %11215 = vpow2.f32 %v1353_v7  ;;  %v1348_v10 = vsub.f32 %v1331_v61, %v1344_v9 }
 0x393   :  { %11217 = vpow2.f32 %v1351_v8 }
 0x394   :  { %v1355_v12 = vmul.f32 1.442695, %v1348_v10 }
 0x396   :  { %11219 = vpow2.f32 %v1355_v12 }
 0x398   :  { %v11214_v13 = vpop.eup %11213 }
 0x399   :  { %v1357_v14 = vsel %vm1332_vm2, %v11214_v13, 0.0 }
 0x39a   :  { %1358 = vadd.xlane.f32.xlu0 %v1357_v14 }
 0x39c   :  { %v11216_v15 = vpop.eup %11215 }
 0x39d   :  { %v11218_v16 = vpop.eup %11217  ;;  %v1363_v17 = vsel %vm1332_vm2, %v11216_v15, 0.0 }
 0x39e   :  { %1364 = vadd.xlane.f32.xlu0 %v1363_v17  ;;  %v1360_v20 = vsel %vm1332_vm2, %v11218_v16, 0.0 }
 0x39f   :  { %1361 = vadd.xlane.f32.xlu1 %v1360_v20 }
 0x3a0   :  { %v11220_v23 = vpop.eup %11219 }
 0x3a1   :  { %v1366_v24 = vsel %vm1332_vm2, %v11220_v23, 0.0 }
 0x3a3   :  { %1367 = vadd.xlane.f32.xlu1 %v1366_v24 }
 0x427   :  { %v1359_v25 = vpop.xlane.xlu0 %1358 }
 0x428   :  { %11221 = vrcp.f32 %v1359_v25 }
 0x42b   :  { %v1365_v26 = vpop.xlane.xlu0 %1364 }
 0x42c   :  { %11223 = vrcp.f32 %v1365_v26  ;;  %v1362_v27 = vpop.xlane.xlu1 %1361 }
 0x42d   :  { %11225 = vrcp.f32 %v1362_v27  ;;  %v395_v27 = vld [vmem:[%s14325_s29] sm:$0xff] }
 0x430   :  { %v1368_v28 = vpop.xlane.xlu1 %1367 }
 0x431   :  { %11227 = vrcp.f32 %v1368_v28  ;;  %v396_v28 = vld [vmem:[%s14325_s29 + $0x8] sm:$0xff] }
 0x432   :  { %v11222_v31 = vpop.eup %11221  ;;  %v10413_v29 = vpack.c.bf16 %v396_v28, %v395_v27 }
 0x433   :  { %v1373_v32 = vmul.f32 %v11222_v31, %v11214_v13  ;;  %v392_v31 = vld [vmem:[%s14326_s8 + $0x8] sm:$0xff] }
 0x435   :  { %10054 = vmatmul.mubr.msk.f32.vlgmr.msra.gmra.mrb[8].mxu0 %vm1332_vm2, %v1373_v32  ;;  %v397_v32 = vld [vmem:[%s14325_s29 + $0x10] sm:$0xff] }
 0x436   :  { %v11224_v35 = vpop.eup %11223  ;;  %10062 = vmatpush3.msra.mxu0 %v1016_v34  ;;  %10063 = vmatprep.mubr.msk.f32.mxu0 %vm11674_vm1, %v14268_v22  ;;  %v398_v34 = vld [vmem:[%s14325_s29 + $0x18] sm:$0xff]  ;;  %s14365_s29 = sld [smem:[#allocation62_spill]] }
 0x437   :  { %v11226_v36 = vpop.eup %11225  ;;  %v1375_v37 = vmul.f32 %v11224_v35, %v11216_v15  ;;  %10398 = vmatprep.subr.bf16.mxu0 %v10397_v33  ;;  %v10417_v35 = vpack.c.bf16 %v398_v34, %v397_v32  ;;  %v8931_v34 = vld [vmem:[%s14333_s26] ss:$0 sm:$0xff] }
 0x438   :  { %v1374_v38 = vmul.f32 %v11226_v36, %v11218_v16  ;;  %v12154_v36 = vld [vmem:[%s14327_s12] sm:$0xff] }
 0x439   :  { %10064 = vmatmul.mubr.msk.f32.vlgmr.msra.gmra.mrb[10].mxu0 %vm1332_vm2, %v1375_v37  ;;  %v393_v37 = vld [vmem:[%s14326_s8 + $0x10] sm:$0xff] }
 0x43a   :  { %10059 = vmatmul.mubr.msk.f32.vlgmr.msra.gmra.mrb[12].mxu1 %vm1332_vm2, %v1374_v38  ;;  %10400 = vmatpush3.bf16.msra.mxu0 %v10397_v33  ;;  %v10405_v33 = vpack.c.bf16 %v392_v31, %v391_v30  ;;  %v394_v38 = vld [vmem:[%s14326_s8 + $0x18] sm:$0xff]  ;;  %s14368_s8 = sld [smem:[#allocation64_spill]] }
 0x43b   :  { %v11228_v41 = vpop.eup %11227  ;;  %10067 = vmatpush3.msra.mxu1 %v1021_v39  ;;  %10068 = vmatprep.mubr.msk.f32.mxu1 %vm11674_vm1, %v14268_v22  ;;  %v10409_v39 = vpack.c.bf16 %v394_v38, %v393_v37 }
 0x43c   :  { %v1376_v42 = vmul.f32 %v11228_v41, %v11220_v23  ;;  %10402 = vmatprep.subr.bf16.mxu0 %v10401_v46  ;;  %10406 = vmatprep.subr.bf16.mxu1 %v10405_v33  ;;  %v366_v41 = vld [vmem:[%s14327_s12 + $0x8] sm:$0xff] }
 0x43e   :  { %10069 = vmatmul.mubr.msk.f32.vlgmr.msra.gmra.mrb[14].mxu1 %vm1332_vm2, %v1376_v42  ;;  %10404 = vmatpush3.bf16.msra.mxu0 %v10401_v46  ;;  %v367_v42 = vld [vmem:[%s14327_s12 + $0x10] sm:$0xff]  ;;  %v400_v46 = vld [vmem:[%s14328_s20 + $0x8] sm:$0xff] }
 0x43f   :  { %10414 = vmatprep.subr.bf16.mxu0 %v10413_v29  ;;  %10408 = vmatpush3.bf16.msra.mxu1 %v10405_v33 }
 0x440   :  { %10410 = vmatprep.subr.bf16.mxu1 %v10409_v39 }
 0x443   :  { %10412 = vmatpush3.bf16.msra.mxu1 %v10409_v39 }
 0x508   :  { %v1446_v40 = vpop.f32.mrb[8].mxu0 }
 0x509   :  { %v10055_v43 = vpop.f32.mrb[9].mxu0  ;;  %10079 = vmatprep.mubr.msk.f32.mxu0 %vm744_vm0, %v1446_v40  ;;  %v10421_v40 = vpack.c.bf16 %v400_v46, %v399_v45 }
 0x50b   :  { %10422 = vmatprep.subr.bf16.mxu1 %v10421_v40 }
 0x50c   :  { %v1592_v47 = vpop.f32.mrb[10].mxu0 }
 0x50d   :  { %v1519_v48 = vpop.f32.mrb[12].mxu1  ;;  %v10065_v49 = vpop.f32.mrb[11].mxu0 }
 0x50e   :  { %v10060_v50 = vpop.f32.mrb[13].mxu1  ;;  %10080 = vmatmul.mubr.msk.f32.vlgmr.msra.gmra.mrb[12].mxu0 %vm744_vm0, %v1519_v48 }
 0x50f   :  { %10082 = vmatprep.mubr.msk.f32.mxu0 %vm744_vm0, %v1592_v47  ;;  %10416 = vmatpush3.bf16.msra.mxu0 %v10413_v29 }
 0x510   :  { %10418 = vmatprep.subr.bf16.mxu0 %v10417_v35 }
 0x511   :  { %v1665_v51 = vpop.f32.mrb[14].mxu1 }
 0x512   :  { %v10070_v52 = vpop.f32.mrb[15].mxu1  ;;  %10083 = vmatmul.mubr.msk.f32.gmra.mrb[14].mxu0 %vm744_vm0, %v1665_v51 }
 0x513   :  { %10107 = vmatprep.mubr.msk.f32.mxu0 %vm744_vm0, %v12154_v36  ;;  %10420 = vmatpush3.bf16.msra.mxu0 %v10417_v35 }
 0x514   :  { %10127 = vmatprep.subr.mxu0 %v14268_v22 }
 0x516   :  { %10108 = vmatmul.mubr.msk.f32.vlgmr.msra.gmra.mrb[16].mxu0 %vm744_vm0, %v366_v41 }
 0x517   :  { %10110 = vmatprep.mubr.msk.f32.mxu0 %vm744_vm0, %v367_v42 }
 0x51a   :  { %10111 = vmatmul.mubr.msk.f32.gmra.mrb[18].mxu0 %vm744_vm0, %v368_v44 }
 0x51b   :  { %10129 = vmatprep.mubr.msk.f32.mxu0 %vm11674_vm1, %v14268_v22 }
 0x5e1   :  { %v10081_v54 = vpop.f32.mrb[12].mxu0 }
 0x5e2   :  { %v1759_v55 = vadd.f32 %v10081_v54, %v8914_v53  ;;  %v1753_v56 = vpop.f32.mrb[13].mxu0 }
 0x5e3   :  { %v1754_v57 = vadd.f32 %v8914_v53, %v1753_v56 }
 0x5e4   :  { %v1773_v58 = vadd.f32 %v1759_v55, %v12023_v18 }
 0x5e5   :  { %v10084_v59 = vpop.f32.mrb[14].mxu0  ;;  %v1772_v60 = vadd.f32 %v1754_v57, %v12012_v11 }
 0x5e6   :  { %v1769_v61 = vadd.f32 %v10084_v59, %v8914_v53  ;;  %v1763_v62 = vpop.f32.mrb[15].mxu0  ;;  %v1779_v63 = vsel %vm744_vm0, %v1773_v58, 0.0  ;;  %v8919_v59 = vld [vmem:[%s14329_s23] ss:$0 sm:$0xff] }
 0x5e7   :  { %v1764_v0 = vadd.f32 %v8914_v53, %v1763_v62  ;;  %1780 = vadd.xlane.f32.xlu1 %v1779_v63  ;;  %v1776_v1 = vsel %vm744_vm0, %v1772_v60, 0.0  ;;  %v8920_v63 = vld [vmem:[%s14330_s0] ss:$0 sm:$0xff] }
 0x5e8   :  { %1777 = vadd.xlane.f32.xlu0 %v1776_v1  ;;  %v1775_v2 = vadd.f32 %v1769_v61, %v12035_v21 }
 0x5e9   :  { %v1774_v3 = vadd.f32 %v1764_v0, %v12026_v19 }
 0x5ea   :  { %v1785_v4 = vsel %vm744_vm0, %v1775_v2, 0.0 }
 0x5eb   :  { %1786 = vadd.xlane.f32.xlu1 %v1785_v4  ;;  %v1782_v18 = vsel %vm744_vm0, %v1774_v3, 0.0  ;;  %v402_v4 = vld [vmem:[%s14328_s20 + $0x18] sm:$0xff] }
 0x5ec   :  { %1783 = vadd.xlane.f32.xlu0 %v1782_v18 }
 0x674   :  { %v1781_v11 = vpop.xlane.xlu1 %1780 }
 0x675   :  { %v1790_v5 = vmul.f32 0.03125, %v1781_v11  ;;  %v1778_v6 = vpop.xlane.xlu0 %1777 }
 0x676   :  { %v1789_v7 = vmul.f32 0.03125, %v1778_v6 }
 0x677   :  { %v12127_v8 = vsub.f32 %v1773_v58, %v1790_v5 }
 0x678   :  { %v12129_v9 = vsub.f32 %v1772_v60, %v1789_v7  ;;  %v1787_v10 = vpop.xlane.xlu1 %1786 }
 0x679   :  { %v1792_v12 = vmul.f32 0.03125, %v1787_v10  ;;  %v1784_v13 = vpop.xlane.xlu0 %1783  ;;  %v1798_v19 = vmul.f32 %v12127_v8, %v12127_v8 }
 0x67a   :  { %v1791_v21 = vmul.f32 0.03125, %v1784_v13  ;;  %v1797_v14 = vmul.f32 %v12129_v9, %v12129_v9 }
 0x67b   :  { %v12135_v15 = vsub.f32 %v1775_v2, %v1792_v12  ;;  %v1804_v16 = vsel %vm744_vm0, %v1798_v19, 0.0  ;;  %v8926_v19 = vld [vmem:[%s14331_s19] ss:$0 sm:$0xff] }
 0x67c   :  { %v12138_v17 = vsub.f32 %v1774_v3, %v1791_v21  ;;  %1805 = vadd.xlane.f32.xlu1 %v1804_v16  ;;  %v1801_v20 = vsel %vm744_vm0, %v1797_v14, 0.0  ;;  %v401_v3 = vld [vmem:[%s14328_s20 + $0x10] sm:$0xff]  ;;  %v10109_v21 = vpop.f32.mrb[16].mxu0 }
 0x67d   :  { %1802 = vadd.xlane.f32.xlu0 %v1801_v20  ;;  %v1800_v23 = vmul.f32 %v12135_v15, %v12135_v15  ;;  %v10425_v12 = vpack.c.bf16 %v402_v4, %v401_v3  ;;  %v2042_v14 = vadd.f32 %v10109_v21, %v8926_v19 }
 0x67e   :  { %v1799_v24 = vmul.f32 %v12138_v17, %v12138_v17 }
 0x67f   :  { %v1810_v25 = vsel %vm744_vm0, %v1800_v23, 0.0 }
 0x680   :  { %1811 = vadd.xlane.f32.xlu1 %v1810_v25  ;;  %v1807_v26 = vsel %vm744_vm0, %v1799_v24, 0.0  ;;  %v8921_v25 = vld [vmem:[%s14332_s4] ss:$0 sm:$0xff] }
 0x681   :  { %1808 = vadd.xlane.f32.xlu0 %v1807_v26 }
 0x709   :  { %v1806_v43 = vpop.xlane.xlu1 %1805 }
 0x70a   :  { %v1814_v47 = vmul.f32 0.03125, %v1806_v43  ;;  %v1803_v48 = vpop.xlane.xlu0 %1802 }
 0x70b   :  { %v1813_v49 = vmul.f32 0.03125, %v1803_v48 }
 0x70c   :  { %v1818_v50 = vadd.f32 1e-05, %v1814_v47 }
 0x70d   :  { %v1817_v51 = vadd.f32 1e-05, %v1813_v49  ;;  %v1812_v52 = vpop.xlane.xlu1 %1811 }
 0x70e   :  { %11229 = vrsqrt.f32 %v1818_v50  ;;  %v1816_v53 = vmul.f32 0.03125, %v1812_v52  ;;  %v1809_v54 = vpop.xlane.xlu0 %1808 }
 0x70f   :  { %11231 = vrsqrt.f32 %v1817_v51  ;;  %v1815_v55 = vmul.f32 0.03125, %v1809_v54 }
 0x710   :  { %v1820_v56 = vadd.f32 1e-05, %v1816_v53 }
 0x711   :  { %v1819_v57 = vadd.f32 1e-05, %v1815_v55 }
 0x712   :  { %11233 = vrsqrt.f32 %v1820_v56 }
 0x713   :  { %11235 = vrsqrt.f32 %v1819_v57 }
 0x718   :  { %v11230_v58 = vpop.eup %11229 }
 0x719   :  { %v11232_v60 = vpop.eup %11231  ;;  %v1826_v61 = vmul.f32 %v11230_v58, %v12127_v8 }
 0x71a   :  { %v1825_v62 = vmul.f32 %v11232_v60, %v12129_v9 }
 0x71b   :  { %v1836_v0 = vmul.f32 %v8919_v59, %v1826_v61 }
 0x71c   :  { %v11234_v1 = vpop.eup %11233  ;;  %v1835_v2 = vmul.f32 %v8919_v59, %v1825_v62 }
 0x71d   :  { %v11236_v18 = vpop.eup %11235  ;;  %v1828_v11 = vmul.f32 %v11234_v1, %v12135_v15  ;;  %v12181_v7 = vadd.f32 %v8920_v63, %v1836_v0  ;;  %v2036_v15 = vpop.f32.mrb[17].mxu0 }
 0x71e   :  { %v12178_v5 = vadd.f32 %v8920_v63, %v1835_v2  ;;  %v1827_v6 = vmul.f32 %v11236_v18, %v12138_v17  ;;  %v2037_v16 = vadd.f32 %v8926_v19, %v2036_v15  ;;  %v10112_v17 = vpop.f32.mrb[18].mxu0 }
 0x71f   :  { %v1838_v10 = vmul.f32 %v8919_v59, %v1828_v11  ;;  %v2052_v20 = vadd.f32 %v10112_v17, %v8926_v19  ;;  %v2046_v23 = vpop.f32.mrb[19].mxu0 }
 0x720   :  { %10093 = vmatprep.mubr.msk.f32.mxu1 %vm744_vm0, %v12178_v5  ;;  %v1837_v8 = vmul.f32 %v8919_v59, %v1827_v6  ;;  %10128 = vmatpush3.xpose.msk.msra.mxu0 %vm744_vm0, %v2037_v16  ;;  %v2047_v24 = vadd.f32 %v8926_v19, %v2046_v23 }
 0x721   :  { %10094 = vmatmul.mubr.msk.f32.vlgmr.msra.gmra.mrb[16].mxu1 %vm744_vm0, %v12181_v7  ;;  %v12189_v13 = vadd.f32 %v8920_v63, %v1838_v10  ;;  %10137 = vmatprep.subr.mxu0 %v14268_v22 }
 0x722   :  { %v12187_v9 = vadd.f32 %v8920_v63, %v1837_v8  ;;  %10424 = vmatpush3.bf16.msra.mxu1 %v10421_v40 }
 0x723   :  { %10426 = vmatprep.subr.bf16.mxu1 %v10425_v12 }
 0x724   :  { %10096 = vmatprep.mubr.msk.f32.mxu1 %vm744_vm0, %v12187_v9 }
 0x725   :  { %10097 = vmatmul.mubr.msk.f32.gmra.mrb[18].mxu1 %vm744_vm0, %v12189_v13 }
 0x726   :  { %10428 = vmatpush3.bf16.msra.mxu1 %v10425_v12  ;;  %10121 = vmatprep.mubr.msk.f32.mxu1 %vm744_vm0, %v12154_v36 }
 0x727   :  { %10132 = vmatprep.subr.mxu1 %v14268_v22 }
 0x729   :  { %10122 = vmatmul.mubr.msk.f32.vlgmr.msra.gmra.mrb[20].mxu1 %vm744_vm0, %v366_v41 }
 0x72a   :  { %10124 = vmatprep.mubr.msk.f32.mxu1 %vm744_vm0, %v367_v42 }
 0x72d   :  { %10125 = vmatmul.mubr.msk.f32.gmra.mrb[22].mxu1 %vm744_vm0, %v368_v44 }
 0x72e   :  { %10134 = vmatprep.mubr.msk.f32.mxu1 %vm11674_vm1, %v14268_v22 }
 0x72f   :  { %10133 = vmatpush3.xpose.msk.msra.mxu1 %vm744_vm0, %v2042_v14 }
 0x730   :  { %10142 = vmatprep.subr.mxu1 %v14268_v22 }
 0x7f4   :  { %v10095_v26 = vpop.f32.mrb[16].mxu1 }
 0x7f5   :  { %v1939_v27 = vadd.f32 %v10095_v26, %v8921_v25  ;;  %v1933_v28 = vpop.f32.mrb[17].mxu1 }
 0x7f6   :  { %v1934_v29 = vadd.f32 %v8921_v25, %v1933_v28 }
 0x7f7   :  { %10135 = vmatmul.mubr.msk.f32.vlgmr.msra.gmra.mrb[24].mxu1 %vm744_vm0, %v1939_v27 }
 0x7f8   :  { %v10098_v30 = vpop.f32.mrb[18].mxu1  ;;  %10130 = vmatmul.mubr.msk.f32.vlgmr.msra.gmra.mrb[20].mxu0 %vm744_vm0, %v1934_v29  ;;  %10143 = vmatpush3.xpose.msk.msra.mxu1 %vm744_vm0, %v2052_v20 }
 0x7f9   :  { %v1949_v31 = vadd.f32 %v10098_v30, %v8921_v25  ;;  %v1943_v32 = vpop.f32.mrb[19].mxu1  ;;  %10138 = vmatpush3.xpose.msk.msra.mxu0 %vm744_vm0, %v2047_v24  ;;  %10144 = vmatprep.mubr.msk.f32.mxu1 %vm11674_vm1, %v14268_v22  ;;  %v406_v24 = vld [vmem:[%s14334_s28] sm:$0xff] }
 0x7fa   :  { %v1944_v33 = vadd.f32 %v8921_v25, %v1943_v32  ;;  %10139 = vmatprep.mubr.msk.f32.mxu0 %vm11674_vm1, %v14268_v22  ;;  %10147 = vmatprep.subr.mxu0 %v14268_v22  ;;  %v407_v25 = vld [vmem:[%s14334_s28 + $0x8] sm:$0xff]  ;;  %v409_v32 = vld [vmem:[%s14334_s28 + $0x18] sm:$0xff] }
 0x7fb   :  { %10145 = vmatmul.mubr.msk.f32.vlgmr.msra.gmra.mrb[26].mxu1 %vm744_vm0, %v1949_v31  ;;  %10152 = vmatprep.subr.mxu1 %v14268_v22  ;;  %v10429_v30 = vpack.c.bf16 %v407_v25, %v406_v24  ;;  %v408_v31 = vld [vmem:[%s14334_s28 + $0x10] sm:$0xff]  ;;  %v432_v24 = vld [vmem:[%s14336_s2 + $0x98] sm:$0xff]  ;;  %v413_v25 = vld [vmem:[%s14336_s2] sm:$0xff] }
 0x7fc   :  { %10140 = vmatmul.mubr.msk.f32.vlgmr.msra.gmra.mrb[22].mxu0 %vm744_vm0, %v1944_v33  ;;  %v10123_v35 = vpop.f32.mrb[20].mxu1  ;;  %10154 = vmatprep.mubr.msk.f32.mxu1 %vm11674_vm1, %v14268_v22 }
 0x7fd   :  { %v2133_v36 = vadd.f32 %v10123_v35, %v8931_v34  ;;  %v2127_v37 = vpop.f32.mrb[21].mxu1  ;;  %10149 = vmatprep.mubr.msk.f32.mxu0 %vm11674_vm1, %v14268_v22 }
 0x7fe   :  { %v2128_v38 = vadd.f32 %v8931_v34, %v2127_v37  ;;  %v10433_v37 = vpack.c.bf16 %v409_v32, %v408_v31  ;;  %v446_v32 = vld [vmem:[%s14336_s2 + $0x108] sm:$0xff] }
 0x7ff   :  { %10153 = vmatpush3.msra.mxu1 %v2133_v36 }
 0x800   :  { %v10126_v39 = vpop.f32.mrb[22].mxu1  ;;  %10148 = vmatpush3.msra.mxu0 %v2128_v38  ;;  %10162 = vmatprep.subr.mxu1 %v14268_v22 }
 0x801   :  { %v12227_v41 = vadd.f32 %v10126_v39, %v8931_v34  ;;  %v2137_v42 = vpop.f32.mrb[23].mxu1  ;;  %10157 = vmatprep.subr.mxu0 %v14268_v22 }
 0x802   :  { %v12230_v44 = vadd.f32 %v8931_v34, %v2137_v42 }
 0x8ca   :  { %v2294_v45 = vpop.f32.mrb[24].mxu1 }
 0x8cb   :  { %v2451_v46 = vmul.f32 0.17677669, %v2294_v45  ;;  %v2218_v40 = vpop.f32.mrb[20].mxu0  ;;  %v10136_v43 = vpop.f32.mrb[25].mxu1 }
 0x8cc   :  { %v2450_v47 = vmul.f32 0.17677669, %v2218_v40  ;;  %v10131_v48 = vpop.f32.mrb[21].mxu0  ;;  %v8948_v43 = vld [vmem:[%s14335_s1] ss:$0 sm:$0xff] }
 0x8cd   :  { %v2457_v49 = vsel %vm1332_vm2, %v2451_v46, -inf }
 0x8ce   :  { %2458 = vmax.xlane.f32.xlu1 %v2457_v49  ;;  %v2446_v50 = vpop.f32.mrb[26].mxu1  ;;  %v2454_v51 = vsel %vm1332_vm2, %v2450_v47, -inf }
 0x8cf   :  { %v2453_v52 = vmul.f32 0.17677669, %v2446_v50  ;;  %v10146_v53 = vpop.f32.mrb[27].mxu1  ;;  %2455 = vmax.xlane.f32.xlu0 %v2454_v51  ;;  %v2370_v54 = vpop.f32.mrb[22].mxu0 }
 0x8d0   :  { %v2452_v55 = vmul.f32 0.17677669, %v2370_v54  ;;  %v10141_v56 = vpop.f32.mrb[23].mxu0 }
 0x8d1   :  { %v2463_v57 = vsel %vm1332_vm2, %v2453_v52, -inf }
 0x8d2   :  { %2464 = vmax.xlane.f32.xlu1 %v2463_v57  ;;  %v2460_v58 = vsel %vm1332_vm2, %v2452_v55, -inf }
 0x8d3   :  { %2461 = vmax.xlane.f32.xlu0 %v2460_v58 }
 0x95b   :  { %v2459_v59 = vpop.xlane.xlu1 %2458 }
 0x95c   :  { %v2467_v60 = vsub.f32 %v2451_v46, %v2459_v59  ;;  %v2456_v61 = vpop.xlane.xlu0 %2455 }
 0x95d   :  { %v2466_v62 = vsub.f32 %v2450_v47, %v2456_v61 }
 0x95e   :  { %v2472_v63 = vmul.f32 1.442695, %v2467_v60 }
 0x95f   :  { %v2470_v0 = vmul.f32 1.442695, %v2466_v62  ;;  %v2465_v1 = vpop.xlane.xlu1 %2464 }
 0x960   :  { %11237 = vpow2.f32 %v2472_v63  ;;  %v2469_v2 = vsub.f32 %v2453_v52, %v2465_v1  ;;  %v2462_v3 = vpop.xlane.xlu0 %2461 }
 0x961   :  { %11239 = vpow2.f32 %v2470_v0  ;;  %v2468_v4 = vsub.f32 %v2452_v55, %v2462_v3 }
 0x962   :  { %v2476_v18 = vmul.f32 1.442695, %v2469_v2 }
 0x963   :  { %v2474_v11 = vmul.f32 1.442695, %v2468_v4 }
 0x964   :  { %11241 = vpow2.f32 %v2476_v18 }
 0x965   :  { %11243 = vpow2.f32 %v2474_v11 }
 0x96a   :  { %v11238_v6 = vpop.eup %11237 }
 0x96b   :  { %v11240_v10 = vpop.eup %11239  ;;  %v2481_v12 = vsel %vm1332_vm2, %v11238_v6, 0.0 }
 0x96c   :  { %2482 = vadd.xlane.f32.xlu1 %v2481_v12  ;;  %v2478_v8 = vsel %vm1332_vm2, %v11240_v10, 0.0 }
 0x96d   :  { %2479 = vadd.xlane.f32.xlu0 %v2478_v8 }
 0x96e   :  { %v11242_v19 = vpop.eup %11241 }
 0x96f   :  { %v11244_v21 = vpop.eup %11243  ;;  %v2487_v14 = vsel %vm1332_vm2, %v11242_v19, 0.0 }
 0x970   :  { %2488 = vadd.xlane.f32.xlu1 %v2487_v14  ;;  %v2484_v15 = vsel %vm1332_vm2, %v11244_v21, 0.0 }
 0x971   :  { %2485 = vadd.xlane.f32.xlu0 %v2484_v15 }
 0x9f9   :  { %v2483_v16 = vpop.xlane.xlu1 %2482 }
 0x9fa   :  { %11245 = vrcp.f32 %v2483_v16  ;;  %v2480_v17 = vpop.xlane.xlu0 %2479  ;;  %v414_v16 = vld [vmem:[%s14336_s2 + $0x8] sm:$0xff] }
 0x9fb   :  { %11247 = vrcp.f32 %v2480_v17  ;;  %v430_v17 = vld [vmem:[%s14336_s2 + $0x88] sm:$0xff] }
 0x9fd   :  { %v2489_v20 = vpop.xlane.xlu1 %2488 }
 0x9fe   :  { %11249 = vrcp.f32 %v2489_v20  ;;  %v2486_v23 = vpop.xlane.xlu0 %2485  ;;  %v416_v20 = vld [vmem:[%s14336_s2 + $0x18] sm:$0xff] }
 0x9ff   :  { %11251 = vrcp.f32 %v2486_v23  ;;  %v10437_v23 = vpack.c.bf16 %v430_v17, %v414_v16 }
 0xa04   :  { %v11246_v26 = vpop.eup %11245 }
 0xa05   :  { %v11248_v27 = vpop.eup %11247  ;;  %v2495_v28 = vmul.f32 %v11246_v26, %v11238_v6  ;;  %v429_v26 = vld [vmem:[%s14336_s2 + $0x80] sm:$0xff] }
 0xa06   :  { %v2494_v29 = vmul.f32 %v11248_v27, %v11240_v10  ;;  %v10445_v27 = vpack.c.bf16 %v432_v24, %v416_v20  ;;  %v451_v24 = vld [vmem:[%s14336_s2 + $0x130] sm:$0xff] }
 0xa07   :  { %10155 = vmatmul.mubr.msk.f32.vlgmr.msra.gmra.mrb[28].mxu1 %vm1332_vm2, %v2495_v28  ;;  %v10439_v28 = vpack.c.bf16 %v429_v26, %v413_v25  ;;  %v467_v25 = vld [vmem:[%s14336_s2 + $0x1b0] sm:$0xff] }
 0xa08   :  { %v11250_v33 = vpop.eup %11249  ;;  %10163 = vmatpush3.msra.mxu1 %v12227_v41  ;;  %10150 = vmatmul.mubr.msk.f32.vlgmr.msra.gmra.mrb[24].mxu0 %vm1332_vm2, %v2494_v29  ;;  %v415_v29 = vld [vmem:[%s14336_s2 + $0x10] sm:$0xff] }
 0xa09   :  { %v11252_v34 = vpop.eup %11251  ;;  %v2497_v35 = vmul.f32 %v11250_v33, %v11242_v19  ;;  %10158 = vmatpush3.msra.mxu0 %v12230_v44  ;;  %10164 = vmatprep.mubr.msk.f32.mxu1 %vm11674_vm1, %v14268_v22  ;;  %v462_v33 = vld [vmem:[%s14336_s2 + $0x188] sm:$0xff] }
 0xa0a   :  { %v2496_v36 = vmul.f32 %v11252_v34, %v11244_v21  ;;  %10159 = vmatprep.mubr.msk.f32.mxu0 %vm11674_vm1, %v14268_v22  ;;  %10430 = vmatprep.subr.bf16.mxu0 %v10429_v30  ;;  %v448_v34 = vld [vmem:[%s14336_s2 + $0x118] sm:$0xff] }
 0xa0b   :  { %10165 = vmatmul.mubr.msk.f32.vlgmr.msra.gmra.mrb[30].mxu1 %vm1332_vm2, %v2497_v35  ;;  %10438 = vmatprep.subr.bf16.mxu1 %v10437_v23  ;;  %v10441_v35 = vpack.c.bf16 %v462_v33, %v446_v32  ;;  %v465_v23 = vld [vmem:[%s14336_s2 + $0x1a0] sm:$0xff]  ;;  %v440_v32 = vld [vmem:[%s14336_s2 + $0xd8] sm:$0xff]  ;;  %v10467_v33 = vpack.c.bf16 %v467_v25, %v451_v24  ;;  %v528_v24 = vld [vmem:[%s14341_s6 + $0x188] sm:$0xff] }
 0xa0c   :  { %10160 = vmatmul.mubr.msk.f32.vlgmr.msra.gmra.mrb[26].mxu0 %vm1332_vm2, %v2496_v36  ;;  %3127 = vmatprep.mubr.f32.mxu1 %v14268_v22  ;;  %v464_v36 = vld [vmem:[%s14336_s2 + $0x198] sm:$0xff] }
 0xa0d   :  { %10432 = vmatpush3.bf16.msra.mxu0 %v10429_v30  ;;  %v431_v30 = vld [vmem:[%s14336_s2 + $0x90] sm:$0xff]  ;;  %10440 = vmatpush1.bf16.msra.mxu1 %v10439_v28 }
 0xa0e   :  { %10434 = vmatprep.subr.bf16.mxu0 %v10433_v37  ;;  %v10447_v31 = vpack.c.bf16 %v431_v30, %v415_v29  ;;  %10442 = vmatprep.subr.bf16.mxu1 %v10441_v35  ;;  %v422_v29 = vld [vmem:[%s14336_s2 + $0x48] sm:$0xff] }
 0xa0f   :  { %v438_v30 = vld [vmem:[%s14336_s2 + $0xc8] sm:$0xff] }
 0xa11   :  { %10436 = vmatpush3.bf16.msra.mxu0 %v10433_v37  ;;  %v445_v37 = vld [vmem:[%s14336_s2 + $0x100] sm:$0xff] }
 0xa12   :  { %10446 = vmatprep.subr.bf16.mxu0 %v10445_v27 }
 0xada   :  { %v2640_v38 = vpop.f32.mrb[28].mxu1 }
 0xadb   :  { %v2567_v39 = vpop.f32.mrb[24].mxu0  ;;  %v10156_v41 = vpop.f32.mrb[29].mxu1 }
 0xadc   :  { %v10151_v42 = vpop.f32.mrb[25].mxu0  ;;  %10175 = vmatprep.mubr.msk.f32.mxu0 %vm744_vm0, %v2567_v39  ;;  %v10449_v39 = vpack.c.bf16 %v464_v36, %v448_v34 }
 0xadd   :  { %10176 = vmatmul.mubr.msk.f32.vlgmr.msra.gmra.mrb[28].mxu0 %vm744_vm0, %v2640_v38  ;;  %v461_v38 = vld [vmem:[%s14336_s2 + $0x180] sm:$0xff]  ;;  %v447_v42 = vld [vmem:[%s14336_s2 + $0x110] sm:$0xff] }
 0xade   :  { %v2786_v44 = vpop.f32.mrb[30].mxu1  ;;  %10448 = vmatpush1.bf16.msra.mxu0 %v10447_v31  ;;  %v10443_v41 = vpack.c.bf16 %v461_v38, %v445_v37  ;;  %v424_v31 = vld [vmem:[%s14336_s2 + $0x58] sm:$0xff]  ;;  %v10469_v37 = vpack.c.bf16 %v438_v30, %v422_v29  ;;  %v479_v29 = vld [vmem:[%s14341_s6] sm:$0xff]  ;;  %v480_v30 = vld [vmem:[%s14341_s6 + $0x8] sm:$0xff] }
 0xadf   :  { %v2713_v45 = vpop.f32.mrb[26].mxu0  ;;  %v10166_v46 = vpop.f32.mrb[31].mxu1  ;;  %10450 = vmatprep.subr.bf16.mxu0 %v10449_v39  ;;  %v10477_v38 = vpack.c.bf16 %v440_v32, %v424_v31  ;;  %v511_v31 = vld [vmem:[%s14341_s6 + $0x100] sm:$0xff]  ;;  %v512_v32 = vld [vmem:[%s14341_s6 + $0x108] sm:$0xff] }
 0xae0   :  { %v10161_v40 = vpop.f32.mrb[27].mxu0  ;;  %10178 = vmatprep.mubr.msk.f32.mxu0 %vm744_vm0, %v2713_v45  ;;  %10444 = vmatpush1.bf16.msra.mxu1 %v10443_v41  ;;  %v418_v46 = vld [vmem:[%s14336_s2 + $0x28] sm:$0xff] }
 0xae1   :  { %10179 = vmatmul.mubr.msk.f32.gmra.mrb[30].mxu0 %vm744_vm0, %v2786_v44  ;;  %v463_v44 = vld [vmem:[%s14336_s2 + $0x190] sm:$0xff]  ;;  %v434_v40 = vld [vmem:[%s14336_s2 + $0xa8] sm:$0xff] }
 0xae2   :  { %3216 = vmatprep.mubr.f32.mxu0 %v14268_v22  ;;  %v10451_v45 = vpack.c.bf16 %v463_v44, %v447_v42  ;;  %v421_v42 = vld [vmem:[%s14336_s2 + $0x40] sm:$0xff] }
 0xae3   :  { %v437_v44 = vld [vmem:[%s14336_s2 + $0xc0] sm:$0xff] }
 0xae4   :  { %10452 = vmatpush1.bf16.msra.mxu0 %v10451_v45  ;;  %v423_v45 = vld [vmem:[%s14336_s2 + $0x50] sm:$0xff] }
 0xbb0   :  { %v10177_v47 = vpop.f32.mrb[28].mxu0 }
 0xbb1   :  { %v2880_v48 = vadd.f32 %v10177_v47, %v8948_v43  ;;  %v2874_v49 = vpop.f32.mrb[29].mxu0  ;;  %v10453_v47 = vpack.c.bf16 %v434_v40, %v418_v46  ;;  %v439_v46 = vld [vmem:[%s14336_s2 + $0xd0] sm:$0xff]  ;;  %v454_v40 = vld [vmem:[%s14336_s2 + $0x148] sm:$0xff] }
 0xbb2   :  { %v2875_v50 = vadd.f32 %v8948_v43, %v2874_v49 }
 0xbb3   :  { %v2894_v51 = vadd.f32 %v2880_v48, %v12181_v7  ;;  %v436_v48 = vld [vmem:[%s14336_s2 + $0xb8] sm:$0xff]  ;;  %10454 = vmatprep.subr.bf16.mxu1 %v10453_v47 }
 0xbb4   :  { %v10180_v52 = vpop.f32.mrb[30].mxu0  ;;  %v2893_v53 = vadd.f32 %v2875_v50, %v12178_v5  ;;  %v456_v47 = vld [vmem:[%s14336_s2 + $0x158] sm:$0xff] }
 0xbb5   :  { %v2890_v54 = vadd.f32 %v10180_v52, %v8948_v43  ;;  %v2884_v55 = vpop.f32.mrb[31].mxu0  ;;  %v2900_v56 = vsel %vm744_vm0, %v2894_v51, 0.0 }
 0xbb6   :  { %v2885_v57 = vadd.f32 %v8948_v43, %v2884_v55  ;;  %2901 = vadd.xlane.f32.xlu1 %v2900_v56  ;;  %v2897_v58 = vsel %vm744_vm0, %v2893_v53, 0.0  ;;  %v420_v43 = vld [vmem:[%s14336_s2 + $0x38] sm:$0xff] }
 0xbb7   :  { %2898 = vadd.xlane.f32.xlu0 %v2897_v58  ;;  %v2896_v59 = vadd.f32 %v2890_v54, %v12189_v13  ;;  %v10461_v49 = vpack.c.bf16 %v436_v48, %v420_v43  ;;  %v470_v43 = vld [vmem:[%s14336_s2 + $0x1c8] sm:$0xff]  ;;  %v472_v48 = vld [vmem:[%s14336_s2 + $0x1d8] sm:$0xff] }
 0xbb8   :  { %v2895_v60 = vadd.f32 %v2885_v57, %v12187_v9 }
 0xbb9   :  { %v2906_v61 = vsel %vm744_vm0, %v2896_v59, 0.0  ;;  %10462 = vmatprep.subr.bf16.mxu0 %v10461_v49  ;;  %v10471_v49 = vpack.c.bf16 %v437_v44, %v421_v42  ;;  %v482_v42 = vld [vmem:[%s14341_s6 + $0x18] sm:$0xff] }
 0xbba   :  { %2907 = vadd.xlane.f32.xlu1 %v2906_v61  ;;  %v2903_v7 = vsel %vm744_vm0, %v2895_v60, 0.0 }
 0xbbb   :  { %2904 = vadd.xlane.f32.xlu0 %v2903_v7 }
 0xc43   :  { %v2902_v5 = vpop.xlane.xlu1 %2901 }
 0xc44   :  { %v2910_v62 = vmul.f32 0.03125, %v2902_v5  ;;  %v2899_v63 = vpop.xlane.xlu0 %2898 }
 0xc45   :  { %v2909_v0 = vmul.f32 0.03125, %v2899_v63  ;;  %v8954_v63 = vld [vmem:[%s14338_s24] ss:$0 sm:$0xff] }
 0xc46   :  { %v12269_v1 = vsub.f32 %v2894_v51, %v2910_v62  ;;  %v8953_v62 = vld [vmem:[%s14337_s7] ss:$0 sm:$0xff] }
 0xc47   :  { %v12271_v2 = vsub.f32 %v2893_v53, %v2909_v0  ;;  %v2908_v3 = vpop.xlane.xlu1 %2907 }
 0xc48   :  { %v2912_v4 = vmul.f32 0.03125, %v2908_v3  ;;  %v2905_v18 = vpop.xlane.xlu0 %2904  ;;  %v2918_v9 = vmul.f32 %v12269_v1, %v12269_v1 }
 0xc49   :  { %v2911_v13 = vmul.f32 0.03125, %v2905_v18  ;;  %v2917_v11 = vmul.f32 %v12271_v2, %v12271_v2  ;;  %v433_v18 = vld [vmem:[%s14336_s2 + $0xa0] sm:$0xff] }
 0xc4a   :  { %v12277_v6 = vsub.f32 %v2896_v59, %v2912_v4  ;;  %v2924_v10 = vsel %vm744_vm0, %v2918_v9, 0.0  ;;  %v417_v4 = vld [vmem:[%s14336_s2 + $0x20] sm:$0xff]  ;;  %v419_v9 = vld [vmem:[%s14336_s2 + $0x30] sm:$0xff] }
 0xc4b   :  { %v12280_v12 = vsub.f32 %v2895_v60, %v2911_v13  ;;  %2925 = vadd.xlane.f32.xlu1 %v2924_v10  ;;  %v2921_v8 = vsel %vm744_vm0, %v2917_v11, 0.0  ;;  %v435_v13 = vld [vmem:[%s14336_s2 + $0xb0] sm:$0xff]  ;;  %v450_v11 = vld [vmem:[%s14336_s2 + $0x128] sm:$0xff] }
 0xc4c   :  { %2922 = vadd.xlane.f32.xlu0 %v2921_v8  ;;  %v2920_v19 = vmul.f32 %v12277_v6, %v12277_v6  ;;  %v466_v8 = vld [vmem:[%s14336_s2 + $0x1a8] sm:$0xff]  ;;  %v10463_v20 = vpack.c.bf16 %v435_v13, %v419_v9  ;;  %v460_v13 = vld [vmem:[%s14336_s2 + $0x178] sm:$0xff] }
 0xc4d   :  { %v2919_v21 = vmul.f32 %v12280_v12, %v12280_v12  ;;  %v10457_v27 = vpack.c.bf16 %v466_v8, %v450_v11  ;;  %v474_v9 = vld [vmem:[%s14336_s2 + $0x1e8] sm:$0xff]  ;;  %v476_v11 = vld [vmem:[%s14336_s2 + $0x1f8] sm:$0xff] }
 0xc4e   :  { %v2930_v14 = vsel %vm744_vm0, %v2920_v19, 0.0  ;;  %v452_v19 = vld [vmem:[%s14336_s2 + $0x138] sm:$0xff] }
 0xc4f   :  { %2931 = vadd.xlane.f32.xlu1 %v2930_v14  ;;  %v2927_v15 = vsel %vm744_vm0, %v2919_v21, 0.0  ;;  %v468_v21 = vld [vmem:[%s14336_s2 + $0x1b8] sm:$0xff] }
 0xc50   :  { %2928 = vadd.xlane.f32.xlu0 %v2927_v15  ;;  %v10455_v15 = vpack.c.bf16 %v433_v18, %v417_v4  ;;  %v10465_v28 = vpack.c.bf16 %v468_v21, %v452_v19  ;;  %v443_v4 = vld [vmem:[%s14336_s2 + $0xf0] sm:$0xff]  ;;  %v458_v18 = vld [vmem:[%s14336_s2 + $0x168] sm:$0xff]  ;;  %v457_v19 = vld [vmem:[%s14336_s2 + $0x160] sm:$0xff] }
 0xc51   :  { %v473_v21 = vld [vmem:[%s14336_s2 + $0x1e0] sm:$0xff] }
 0xc52   :  { %v10491_v25 = vpack.c.bf16 %v473_v21, %v457_v19  ;;  %v487_v21 = vld [vmem:[%s14341_s6 + $0x40] sm:$0xff] }
 0xcd8   :  { %v2926_v50 = vpop.xlane.xlu1 %2925 }
 0xcd9   :  { %v2934_v51 = vmul.f32 0.03125, %v2926_v50  ;;  %v2923_v52 = vpop.xlane.xlu0 %2922  ;;  %v10479_v50 = vpack.c.bf16 %v439_v46, %v423_v45  ;;  %v513_v46 = vld [vmem:[%s14341_s6 + $0x110] sm:$0xff] }
 0xcda   :  { %v2933_v53 = vmul.f32 0.03125, %v2923_v52  ;;  %v469_v52 = vld [vmem:[%s14336_s2 + $0x1c0] sm:$0xff] }
 0xcdb   :  { %v2938_v54 = vadd.f32 1e-05, %v2934_v51  ;;  %v453_v51 = vld [vmem:[%s14336_s2 + $0x140] sm:$0xff] }
 0xcdc   :  { %v2937_v55 = vadd.f32 1e-05, %v2933_v53  ;;  %v2932_v56 = vpop.xlane.xlu1 %2931  ;;  %v10473_v53 = vpack.c.bf16 %v470_v43, %v454_v40  ;;  %v514_v40 = vld [vmem:[%s14341_s6 + $0x118] sm:$0xff]  ;;  %v499_v43 = vld [vmem:[%s14341_s6 + $0xa0] sm:$0xff] }
 0xcdd   :  { %11253 = vrsqrt.f32 %v2938_v54  ;;  %v2936_v57 = vmul.f32 0.03125, %v2932_v56  ;;  %v2929_v58 = vpop.xlane.xlu0 %2928  ;;  %v10481_v54 = vpack.c.bf16 %v472_v48, %v456_v47  ;;  %v471_v56 = vld [vmem:[%s14336_s2 + $0x1d0] sm:$0xff]  ;;  %v500_v47 = vld [vmem:[%s14341_s6 + $0xa8] sm:$0xff]  ;;  %v531_v48 = vld [vmem:[%s14341_s6 + $0x1a0] sm:$0xff] }
 0xcde   :  { %11255 = vrsqrt.f32 %v2937_v55  ;;  %v2935_v59 = vmul.f32 0.03125, %v2929_v58  ;;  %v455_v55 = vld [vmem:[%s14336_s2 + $0x150] sm:$0xff]  ;;  %v442_v58 = vld [vmem:[%s14336_s2 + $0xe8] sm:$0xff] }
 0xcdf   :  { %v2940_v60 = vadd.f32 1e-05, %v2936_v57  ;;  %v426_v57 = vld [vmem:[%s14336_s2 + $0x68] sm:$0xff] }
 0xce0   :  { %v2939_v61 = vadd.f32 1e-05, %v2935_v59  ;;  %v428_v59 = vld [vmem:[%s14336_s2 + $0x78] sm:$0xff] }
 0xce2   :  { %11257 = vrsqrt.f32 %v2939_v61  ;;  %v10475_v61 = vpack.c.bf16 %v469_v52, %v453_v51  ;;  %v10539_v51 = vpack.c.bf16 %v514_v40, %v513_v46  ;;  %v483_v52 = vld [vmem:[%s14341_s6 + $0x20] sm:$0xff]  ;;  %v492_v46 = vld [vmem:[%s14341_s6 + $0x68] sm:$0xff] }
 0xce3   :  { %11259 = vrsqrt.f32 %v2940_v60  ;;  %v444_v60 = vld [vmem:[%s14336_s2 + $0xf8] sm:$0xff]  ;;  %v523_v40 = vld [vmem:[%s14341_s6 + $0x160] sm:$0xff] }
 0xce7   :  { %v11254_v7 = vpop.eup %11253 }
 0xce8   :  { %v11256_v5 = vpop.eup %11255  ;;  %v2946_v0 = vmul.f32 %v11254_v7, %v12269_v1  ;;  %v449_v1 = vld [vmem:[%s14336_s2 + $0x120] sm:$0xff]  ;;  %v10483_v7 = vpack.c.bf16 %v471_v56, %v455_v55 }
 0xce9   :  { %v2945_v3 = vmul.f32 %v11256_v5, %v12271_v2  ;;  %v10485_v5 = vpack.c.bf16 %v442_v58, %v426_v57  ;;  %v515_v56 = vld [vmem:[%s14341_s6 + $0x120] sm:$0xff]  ;;  %v516_v57 = vld [vmem:[%s14341_s6 + $0x128] sm:$0xff]  ;;  %v501_v58 = vld [vmem:[%s14341_s6 + $0xb0] sm:$0xff] }
 0xcea   :  { %v2956_v2 = vmul.f32 %v8953_v62, %v2946_v0  ;;  %v441_v0 = vld [vmem:[%s14336_s2 + $0xe0] sm:$0xff] }
 0xceb   :  { %v2955_v10 = vmul.f32 %v8953_v62, %v2945_v3  ;;  %v427_v3 = vld [vmem:[%s14336_s2 + $0x70] sm:$0xff] }
 0xcec   :  { %v11258_v14 = vpop.eup %11257  ;;  %v12338_v34 = vadd.f32 %v8954_v63, %v2956_v2  ;;  %v10495_v8 = vpack.c.bf16 %v443_v4, %v427_v3  ;;  %v475_v2 = vld [vmem:[%s14336_s2 + $0x1f0] sm:$0xff] }
 0xced   :  { %v12322_v16 = vadd.f32 %v8954_v63, %v2955_v10  ;;  %v2947_v17 = vmul.f32 %v11258_v14, %v12280_v12  ;;  %v11260_v26 = vpop.eup %11259  ;;  %v10459_v12 = vpack.c.bf16 %v465_v23, %v449_v1  ;;  %v10489_v14 = vpack.c.bf16 %v474_v9, %v458_v18  ;;  %v459_v1 = vld [vmem:[%s14336_s2 + $0x170] sm:$0xff]  ;;  %v527_v23 = vld [vmem:[%s14341_s6 + $0x180] sm:$0xff]  ;;  %v518_v18 = vld [vmem:[%s14341_s6 + $0x138] sm:$0xff] }
 0xcee   :  { %v2948_v35 = vmul.f32 %v11260_v26, %v12277_v6  ;;  %v10499_v26 = vpack.c.bf16 %v475_v2, %v459_v1  ;;  %v517_v4 = vld [vmem:[%s14341_s6 + $0x130] sm:$0xff]  ;;  %v503_v9 = vld [vmem:[%s14341_s6 + $0xc0] sm:$0xff] }
 0xcef   :  { %8955 = vmatmul.mubr.msk.f32.vlgmr.msra.gmra.mrb[32].mxu1 %vm744_vm0, %v12322_v16  ;;  %8959 = vmatmul.mubr.msk.f32.vlgmr.msra.gmra.mrb[32].mxu0 %vm744_vm0, %v12322_v16  ;;  %v2957_v36 = vmul.f32 %v8953_v62, %v2947_v17  ;;  %v495_v17 = vld [vmem:[%s14341_s6 + $0x80] sm:$0xff]  ;;  %v10547_v19 = vpack.c.bf16 %v518_v18, %v517_v4 }
 0xcf0   :  { %3133 = vmatprep.mubr.f32.mxu1 %v14268_v22  ;;  %3222 = vmatprep.mubr.f32.mxu0 %v14268_v22  ;;  %v2958_v6 = vmul.f32 %v8953_v62, %v2948_v35  ;;  %v10493_v62 = vpack.c.bf16 %v444_v60, %v428_v59  ;;  %v529_v35 = vld [vmem:[%s14341_s6 + $0x190] sm:$0xff]  ;;  %v502_v59 = vld [vmem:[%s14341_s6 + $0xb8] sm:$0xff]  ;;  %v519_v2 = vld [vmem:[%s14341_s6 + $0x140] sm:$0xff] }
 0xcf1   :  { %10456 = vmatpush1.bf16.msra.mxu1 %v10455_v15  ;;  %10464 = vmatpush1.bf16.msra.mxu0 %v10463_v20  ;;  %v12347_v39 = vadd.f32 %v8954_v63, %v2957_v36  ;;  %v10497_v15 = vpack.c.bf16 %v476_v11, %v460_v13  ;;  %v496_v20 = vld [vmem:[%s14341_s6 + $0x88] sm:$0xff]  ;;  %v530_v36 = vld [vmem:[%s14341_s6 + $0x198] sm:$0xff]  ;;  %v533_v60 = vld [vmem:[%s14341_s6 + $0x1b0] sm:$0xff] }
 0xcf2   :  { %10458 = vmatprep.subr.bf16.mxu1 %v10457_v27  ;;  %10466 = vmatprep.subr.bf16.mxu0 %v10465_v28  ;;  %v12355_v41 = vadd.f32 %v8954_v63, %v2958_v6  ;;  %v425_v63 = vld [vmem:[%s14336_s2 + $0x60] sm:$0xff]  ;;  %v10501_v27 = vpack.c.bf16 %v496_v20, %v495_v17  ;;  %v10533_v28 = vpack.c.bf16 %v528_v24, %v527_v23  ;;  %v481_v6 = vld [vmem:[%s14341_s6 + $0x10] sm:$0xff]  ;;  %v504_v13 = vld [vmem:[%s14341_s6 + $0xc8] sm:$0xff] }
 0xcf3   :  { %8956 = vmatmul.mubr.msk.f32.gmra.mrb[34].mxu1 %vm744_vm0, %v12338_v34  ;;  %8960 = vmatmul.mubr.msk.f32.gmra.mrb[34].mxu0 %vm744_vm0, %v12338_v34  ;;  %14339 = vst [vmem:[#allocation65_spill] sm:$0xff] %v12347_v39  ;;  %v10487_v10 = vpack.c.bf16 %v441_v0, %v425_v63  ;;  %v10537_v45 = vpack.c.bf16 %v530_v36, %v529_v35  ;;  %v486_v63 = vld [vmem:[%s14341_s6 + $0x38] sm:$0xff]  ;;  %v535_v11 = vld [vmem:[%s14341_s6 + $0x1c0] sm:$0xff]  ;;  %v520_v17 = vld [vmem:[%s14341_s6 + $0x148] sm:$0xff] }
 0xcf4   :  { %3139 = vmatprep.mubr.f32.mxu1 %v14268_v22  ;;  %3228 = vmatprep.mubr.f32.mxu0 %v14268_v22  ;;  %14340 = vst [vmem:[#allocation66_spill] sm:$0xff] %v12355_v41  ;;  %v10513_v0 = vpack.c.bf16 %v502_v59, %v501_v58  ;;  %v505_v20 = vld [vmem:[%s14341_s6 + $0xd0] sm:$0xff]  ;;  %v506_v23 = vld [vmem:[%s14341_s6 + $0xd8] sm:$0xff]  ;;  %v508_v35 = vld [vmem:[%s14341_s6 + $0xe8] sm:$0xff] }
 0xcf5   :  { %10460 = vmatpush1.bf16.msra.mxu1 %v10459_v12  ;;  %10468 = vmatpush1.bf16.msra.mxu0 %v10467_v33  ;;  %v497_v12 = vld [vmem:[%s14341_s6 + $0x90] sm:$0xff]  ;;  %v498_v33 = vld [vmem:[%s14341_s6 + $0x98] sm:$0xff]  ;;  %v539_v36 = vld [vmem:[%s14341_s6 + $0x1e0] sm:$0xff] }
 0xcf6   :  { %10470 = vmatprep.subr.bf16.mxu1 %v10469_v37  ;;  %10478 = vmatprep.subr.bf16.mxu0 %v10477_v38  ;;  %v10503_v37 = vpack.c.bf16 %v480_v30, %v479_v29  ;;  %v10535_v38 = vpack.c.bf16 %v512_v32, %v511_v31  ;;  %v10505_v44 = vpack.c.bf16 %v498_v33, %v497_v12  ;;  %v537_v24 = vld [vmem:[%s14341_s6 + $0x1d0] sm:$0xff]  ;;  %v490_v29 = vld [vmem:[%s14341_s6 + $0x58] sm:$0xff]  ;;  %v507_v33 = vld [vmem:[%s14341_s6 + $0xe0] sm:$0xff] }
 0xcf7   :  { %8957 = vmatmul.mubr.msk.f32.gmra.mrb[36].mxu1 %vm744_vm0, %v12347_v39  ;;  %8961 = vmatmul.mubr.msk.f32.gmra.mrb[36].mxu0 %vm744_vm0, %v12347_v39  ;;  %v10521_v30 = vpack.c.bf16 %v506_v23, %v505_v20  ;;  %v521_v32 = vld [vmem:[%s14341_s6 + $0x150] sm:$0xff]  ;;  %v522_v12 = vld [vmem:[%s14341_s6 + $0x158] sm:$0xff]  ;;  %v575_v20 = vld [vmem:[%s14341_s6 + $0x300] sm:$0xff] }
 0xcf8   :  { %3145 = vmatprep.mubr.f32.mxu1 %v14268_v22  ;;  %3234 = vmatprep.mubr.f32.mxu0 %v14268_v22  ;;  %v525_v58 = vld [vmem:[%s14341_s6 + $0x170] sm:$0xff]  ;;  %v526_v59 = vld [vmem:[%s14341_s6 + $0x178] sm:$0xff]  ;;  %v576_v23 = vld [vmem:[%s14341_s6 + $0x308] sm:$0xff] }
 0xcfb   :  { %8958 = vmatmul.mubr.msk.f32.gmra.mrb[38].mxu1 %vm744_vm0, %v12355_v41  ;;  %8962 = vmatmul.mubr.msk.f32.gmra.mrb[38].mxu0 %vm744_vm0, %v12355_v41 }
 0xcfc   :  { %3305 = vmatprep.mubr.f32.mxu1 %v14268_v22  ;;  %3394 = vmatprep.mubr.f32.mxu0 %v14268_v22 }
 0xcff   :  { %8963 = vmatmul.mubr.msk.f32.vlgmr.msra.gmra.mrb[40].mxu1 %vm744_vm0, %v12322_v16  ;;  %8967 = vmatmul.mubr.msk.f32.vlgmr.msra.gmra.mrb[40].mxu0 %vm744_vm0, %v12322_v16 }
 0xd00   :  { %3311 = vmatprep.mubr.f32.mxu1 %v14268_v22  ;;  %3400 = vmatprep.mubr.f32.mxu0 %v14268_v22 }
 0xd01   :  { %10472 = vmatpush1.bf16.msra.mxu1 %v10471_v49  ;;  %10480 = vmatpush1.bf16.msra.mxu0 %v10479_v50  ;;  %v532_v49 = vld [vmem:[%s14341_s6 + $0x1a8] sm:$0xff]  ;;  %v10507_v50 = vpack.c.bf16 %v482_v42, %v481_v6  ;;  %v10555_v6 = vpack.c.bf16 %v522_v12, %v521_v32  ;;  %v491_v42 = vld [vmem:[%s14341_s6 + $0x60] sm:$0xff] }
 0xd02   :  { %10474 = vmatprep.subr.bf16.mxu1 %v10473_v53  ;;  %10482 = vmatprep.subr.bf16.mxu0 %v10481_v54  ;;  %v484_v53 = vld [vmem:[%s14341_s6 + $0x28] sm:$0xff]  ;;  %v10509_v54 = vpack.c.bf16 %v500_v47, %v499_v43  ;;  %v10541_v55 = vpack.c.bf16 %v532_v49, %v531_v48  ;;  %v10527_v47 = vpack.c.bf16 %v492_v46, %v491_v42  ;;  %v509_v49 = vld [vmem:[%s14341_s6 + $0xf0] sm:$0xff] }
 0xd03   :  { %8964 = vmatmul.mubr.msk.f32.gmra.mrb[42].mxu1 %vm744_vm0, %v12338_v34  ;;  %8968 = vmatmul.mubr.msk.f32.gmra.mrb[42].mxu0 %vm744_vm0, %v12338_v34  ;;  %v524_v43 = vld [vmem:[%s14341_s6 + $0x168] sm:$0xff] }
 0xd04   :  { %3317 = vmatprep.mubr.f32.mxu1 %v14268_v22  ;;  %3406 = vmatprep.mubr.f32.mxu0 %v14268_v22  ;;  %v10559_v48 = vpack.c.bf16 %v524_v43, %v523_v40 }
 0xd05   :  { %10476 = vmatpush1.bf16.msra.mxu1 %v10475_v61  ;;  %10484 = vmatpush1.bf16.msra.mxu0 %v10483_v7  ;;  %v534_v61 = vld [vmem:[%s14341_s6 + $0x1b8] sm:$0xff]  ;;  %v10511_v7 = vpack.c.bf16 %v484_v53, %v483_v52 }
 0xd06   :  { %10486 = vmatprep.subr.bf16.mxu1 %v10485_v5  ;;  %10494 = vmatprep.subr.bf16.mxu0 %v10493_v62  ;;  %v10543_v5 = vpack.c.bf16 %v516_v57, %v515_v56  ;;  %v485_v62 = vld [vmem:[%s14341_s6 + $0x30] sm:$0xff]  ;;  %v10545_v3 = vpack.c.bf16 %v534_v61, %v533_v60  ;;  %v542_v53 = vld [vmem:[%s14341_s6 + $0x1f8] sm:$0xff]  ;;  %v10563_v60 = vpack.c.bf16 %v526_v59, %v525_v58  ;;  %v559_v61 = vld [vmem:[%s14341_s6 + $0x280] sm:$0xff] }
 0xd07   :  { %8965 = vmatmul.mubr.msk.f32.gmra.mrb[44].mxu1 %vm744_vm0, %v12347_v39  ;;  %8969 = vmatmul.mubr.msk.f32.gmra.mrb[44].mxu0 %vm744_vm0, %v12347_v39  ;;  %v12601_v59 = vld [vmem:[%s14341_s6 + $0x220] sm:$0xff] }
 0xd08   :  { %3323 = vmatprep.mubr.f32.mxu1 %v14268_v22  ;;  %3412 = vmatprep.mubr.f32.mxu0 %v14268_v22 }
 0xd0b   :  { %8966 = vmatmul.mubr.msk.f32.gmra.mrb[46].mxu1 %vm744_vm0, %v12355_v41  ;;  %8970 = vmatmul.mubr.msk.f32.gmra.mrb[46].mxu0 %vm744_vm0, %v12355_v41 }
 0xd0c   :  { %3483 = vmatprep.mubr.f32.mxu1 %v14268_v22  ;;  %3572 = vmatprep.mubr.f32.mxu0 %v14268_v22 }
 0xd0f   :  { %8971 = vmatmul.mubr.msk.f32.vlgmr.msra.gmra.mrb[48].mxu1 %vm744_vm0, %v12322_v16  ;;  %8975 = vmatmul.mubr.msk.f32.vlgmr.msra.gmra.mrb[48].mxu0 %vm744_vm0, %v12322_v16 }
 0xd10   :  { %3489 = vmatprep.mubr.f32.mxu1 %v14268_v22  ;;  %3578 = vmatprep.mubr.f32.mxu0 %v14268_v22 }
 0xd11   :  { %10488 = vmatpush1.bf16.msra.mxu1 %v10487_v10  ;;  %10496 = vmatpush1.bf16.msra.mxu0 %v10495_v8  ;;  %v536_v10 = vld [vmem:[%s14341_s6 + $0x1c8] sm:$0xff]  ;;  %v10515_v8 = vpack.c.bf16 %v486_v63, %v485_v62 }
 0xd12   :  { %10490 = vmatprep.subr.bf16.mxu1 %v10489_v14  ;;  %10498 = vmatprep.subr.bf16.mxu0 %v10497_v15  ;;  %v488_v14 = vld [vmem:[%s14341_s6 + $0x48] sm:$0xff]  ;;  %v10517_v15 = vpack.c.bf16 %v504_v13, %v503_v9  ;;  %v10549_v1 = vpack.c.bf16 %v536_v10, %v535_v11  ;;  %v12538_v13 = vld [vmem:[%s14342_s27] sm:$0xff] }
 0xd13   :  { %8972 = vmatmul.mubr.msk.f32.gmra.mrb[50].mxu1 %vm744_vm0, %v12338_v34  ;;  %8976 = vmatmul.mubr.msk.f32.gmra.mrb[50].mxu0 %vm744_vm0, %v12338_v34  ;;  %v592_v63 = vld [vmem:[%s14341_s6 + $0x388] sm:$0xff] }
 0xd14   :  { %3495 = vmatprep.mubr.f32.mxu1 %v14268_v22  ;;  %3584 = vmatprep.mubr.f32.mxu0 %v14268_v22 }
 0xd15   :  { %10492 = vmatpush1.bf16.msra.mxu1 %v10491_v25  ;;  %10500 = vmatpush1.bf16.msra.mxu0 %v10499_v26  ;;  %v538_v25 = vld [vmem:[%s14341_s6 + $0x1d8] sm:$0xff]  ;;  %v10519_v26 = vpack.c.bf16 %v488_v14, %v487_v21 }
 0xd16   :  { %10502 = vmatprep.subr.bf16.mxu1 %v10501_v27  ;;  %10534 = vmatprep.subr.bf16.mxu0 %v10533_v28  ;;  %v10551_v27 = vpack.c.bf16 %v520_v17, %v519_v2  ;;  %v489_v28 = vld [vmem:[%s14341_s6 + $0x50] sm:$0xff]  ;;  %v10553_v31 = vpack.c.bf16 %v538_v25, %v537_v24 }
 0xd17   :  { %8973 = vmatmul.mubr.msk.f32.gmra.mrb[52].mxu1 %vm744_vm0, %v12347_v39  ;;  %8977 = vmatmul.mubr.msk.f32.gmra.mrb[52].mxu0 %vm744_vm0, %v12347_v39  ;;  %v561_v24 = vld [vmem:[%s14341_s6 + $0x290] sm:$0xff] }
 0xd18   :  { %3501 = vmatprep.mubr.f32.mxu1 %v14268_v22  ;;  %3590 = vmatprep.mubr.f32.mxu0 %v14268_v22 }
 0xd1b   :  { %8974 = vmatmul.mubr.msk.f32.gmra.mrb[54].mxu1 %vm744_vm0, %v12355_v41  ;;  %8978 = vmatmul.mubr.msk.f32.gmra.mrb[54].mxu0 %vm744_vm0, %v12355_v41 }
 0xd1c   :  { %3661 = vmatprep.mubr.f32.mxu1 %v14268_v22  ;;  %3750 = vmatprep.mubr.f32.mxu0 %v14268_v22 }
 0xd1f   :  { %8979 = vmatmul.mubr.msk.f32.vlgmr.msra.gmra.mrb[56].mxu1 %vm744_vm0, %v12322_v16  ;;  %8983 = vmatmul.mubr.msk.f32.vlgmr.msra.gmra.mrb[56].mxu0 %vm744_vm0, %v12322_v16 }
 0xd20   :  { %3667 = vmatprep.mubr.f32.mxu1 %v14268_v22  ;;  %3756 = vmatprep.mubr.f32.mxu0 %v14268_v22 }
 0xd21   :  { %10504 = vmatpush3.bf16.msra.mxu1 %v10503_v37  ;;  %10536 = vmatpush3.bf16.msra.mxu0 %v10535_v38  ;;  %v540_v37 = vld [vmem:[%s14341_s6 + $0x1e8] sm:$0xff]  ;;  %v10523_v38 = vpack.c.bf16 %v490_v29, %v489_v28  ;;  %v562_v29 = vld [vmem:[%s14341_s6 + $0x298] sm:$0xff] }
 0xd22   :  { %10506 = vmatprep.subr.bf16.mxu1 %v10505_v44  ;;  %10538 = vmatprep.subr.bf16.mxu0 %v10537_v45  ;;  %v10525_v44 = vpack.c.bf16 %v508_v35, %v507_v33  ;;  %v10557_v45 = vpack.c.bf16 %v540_v37, %v539_v36  ;;  %v12575_v33 = vld [vmem:[%s14341_s6 + $0x210] sm:$0xff]  ;;  %v10599_v36 = vpack.c.bf16 %v576_v23, %v575_v20  ;;  %v12578_v37 = vld [vmem:[%s14341_s6 + $0x218] sm:$0xff] }
 0xd23   :  { %8980 = vmatmul.mubr.msk.f32.gmra.mrb[58].mxu1 %vm744_vm0, %v12338_v34  ;;  %8984 = vmatmul.mubr.msk.f32.gmra.mrb[58].mxu0 %vm744_vm0, %v12338_v34  ;;  %v10569_v40 = vpack.c.bf16 %v562_v29, %v561_v24  ;;  %v12623_v20 = vld [vmem:[%s14341_s6 + $0x2b0] sm:$0xff]  ;;  %v12626_v23 = vld [vmem:[%s14341_s6 + $0x2b8] sm:$0xff] }
 0xd24   :  { %3673 = vmatprep.mubr.f32.mxu1 %v14268_v22  ;;  %3762 = vmatprep.mubr.f32.mxu0 %v14268_v22 }
 0xd25   :  { %10508 = vmatpush3.bf16.msra.mxu1 %v10507_v50  ;;  %10540 = vmatpush3.bf16.msra.mxu0 %v10539_v51  ;;  %v510_v50 = vld [vmem:[%s14341_s6 + $0xf8] sm:$0xff]  ;;  %v541_v51 = vld [vmem:[%s14341_s6 + $0x1f0] sm:$0xff] }
 0xd26   :  { %10510 = vmatprep.subr.bf16.mxu1 %v10509_v54  ;;  %10542 = vmatprep.subr.bf16.mxu0 %v10541_v55  ;;  %v10529_v52 = vpack.c.bf16 %v510_v50, %v509_v49  ;;  %v493_v54 = vld [vmem:[%s14341_s6 + $0x70] sm:$0xff]  ;;  %v494_v55 = vld [vmem:[%s14341_s6 + $0x78] sm:$0xff]  ;;  %v10561_v56 = vpack.c.bf16 %v542_v53, %v541_v51 }
 0xd27   :  { %8981 = vmatmul.mubr.msk.f32.gmra.mrb[60].mxu1 %vm744_vm0, %v12347_v39  ;;  %8985 = vmatmul.mubr.msk.f32.gmra.mrb[60].mxu0 %vm744_vm0, %v12347_v39  ;;  %v10531_v57 = vpack.c.bf16 %v494_v55, %v493_v54  ;;  %v12595_v55 = vld [vmem:[%s14341_s6 + $0x3a0] sm:$0xff] }
 0xd28   :  { %3679 = vmatprep.mubr.f32.mxu1 %v14268_v22  ;;  %3768 = vmatprep.mubr.f32.mxu0 %v14268_v22 }
 0xd29   :  { %10512 = vmatpush3.bf16.msra.mxu1 %v10511_v7  ;;  %10544 = vmatpush3.bf16.msra.mxu0 %v10543_v5  ;;  %v560_v7 = vld [vmem:[%s14341_s6 + $0x288] sm:$0xff]  ;;  %v591_v5 = vld [vmem:[%s14341_s6 + $0x380] sm:$0xff] }
 0xd2a   :  { %10514 = vmatprep.subr.bf16.mxu1 %v10513_v0  ;;  %10546 = vmatprep.subr.bf16.mxu0 %v10545_v3  ;;  %v10565_v62 = vpack.c.bf16 %v560_v7, %v559_v61  ;;  %v10597_v0 = vpack.c.bf16 %v592_v63, %v591_v5  ;;  %v2971_v3 = vlaneseq  ;;  %v12608_v7 = vld [vmem:[%s14341_s6 + $0x228] sm:$0xff]  ;;  %v12611_v5 = vld [vmem:[%s14341_s6 + $0x320] sm:$0xff] }
 0xd2b   :  { %8982 = vmatmul.mubr.msk.f32.gmra.mrb[62].mxu1 %vm744_vm0, %v12355_v41  ;;  %8986 = vmatmul.mubr.msk.f32.gmra.mrb[62].mxu0 %vm744_vm0, %v12355_v41 }
 0xd2c   :  { %v12529_v4 = vshrl.u32 %v2971_v3, 7 }
 0xd2d   :  { %10516 = vmatpush3.bf16.msra.mxu1 %v10515_v8  ;;  %10548 = vmatpush3.bf16.msra.mxu0 %v10547_v19 }
 0xd2e   :  { %10518 = vmatprep.subr.bf16.mxu1 %v10517_v15  ;;  %10550 = vmatprep.subr.bf16.mxu0 %v10549_v1  ;;  %v12532_v18 = vsub.s32 0, %v12529_v4  ;;  %v12535_v9 = vsub.s32 2, %v12529_v4  ;;  %v12541_v11 = vsub.s32 1, %v12529_v4  ;;  %v12544_v10 = vsub.s32 3, %v12529_v4  ;;  %v543_v15 = vld [vmem:[%s14341_s6 + $0x200] sm:$0xff]  ;;  %v544_v1 = vld [vmem:[%s14341_s6 + $0x208] sm:$0xff] }
 0xd2f   :  { %v10567_v35 = vpack.c.bf16 %v544_v1, %v543_v15  ;;  %v12617_v63 = vsub.s32 5, %v12529_v4 }
 0xd30   :  { %14343 = vst [vmem:[#allocation67_spill] sm:$0xff] %v12532_v18  ;;  %14344 = vst [vmem:[#allocation68_spill] sm:$0xff] %v12535_v9  ;;  %v12548_v8 = vrot.slane %v12538_v13, %v12532_v18  ;;  %v12552_v19 = vrot.slane %v12538_v13, %v12535_v9  ;;  %v12556_v21 = vrot.slane %v12538_v13, %v12541_v11 }
 0xd31   :  { %10520 = vmatpush3.bf16.msra.mxu1 %v10519_v26  ;;  %10552 = vmatpush3.bf16.msra.mxu0 %v10551_v27  ;;  %14345 = vst [vmem:[#allocation69_spill] sm:$0xff] %v12541_v11  ;;  %14346 = vst [vmem:[#allocation70_spill] sm:$0xff] %v12544_v10  ;;  %v12560_v14 = vrot.slane %v12538_v13, %v12544_v10 }
 0xd32   :  { %10522 = vmatprep.subr.bf16.mxu1 %v10521_v30  ;;  %10554 = vmatprep.subr.bf16.mxu0 %v10553_v31  ;;  %v593_v30 = vld [vmem:[%s14341_s6 + $0x390] sm:$0xff]  ;;  %v594_v31 = vld [vmem:[%s14341_s6 + $0x398] sm:$0xff] }
 0xd33   :  { %v10601_v43 = vpack.c.bf16 %v594_v31, %v593_v30  ;;  %v597_v30 = vld [vmem:[%s14341_s6 + $0x3b0] sm:$0xff]  ;;  %v598_v31 = vld [vmem:[%s14341_s6 + $0x3b8] sm:$0xff] }
 0xd35   :  { %10524 = vmatpush3.bf16.msra.mxu1 %v10523_v38  ;;  %10556 = vmatpush3.bf16.msra.mxu0 %v10555_v6  ;;  %v12581_v38 = vld [vmem:[%s14341_s6 + $0x310] sm:$0xff]  ;;  %v12584_v6 = vld [vmem:[%s14341_s6 + $0x318] sm:$0xff] }
 0xd36   :  { %10526 = vmatprep.subr.bf16.mxu1 %v10525_v44  ;;  %10558 = vmatprep.subr.bf16.mxu0 %v10557_v45  ;;  %v10603_v61 = vpack.c.bf16 %v12584_v6, %v12581_v38  ;;  %v12646_v38 = vld [vmem:[%s14341_s6 + $0x230] sm:$0xff] }
 0xd39   :  { %10528 = vmatpush3.bf16.msra.mxu1 %v10527_v47  ;;  %10560 = vmatpush3.bf16.msra.mxu0 %v10559_v48  ;;  %v12587_v47 = vld [vmem:[%s14341_s6 + $0x2a0] sm:$0xff]  ;;  %v12590_v48 = vld [vmem:[%s14341_s6 + $0x2a8] sm:$0xff] }
 0xd3a   :  { %10530 = vmatprep.subr.bf16.mxu1 %v10529_v52  ;;  %10562 = vmatprep.subr.bf16.mxu0 %v10561_v56  ;;  %v596_v56 = vld [vmem:[%s14341_s6 + $0x3a8] sm:$0xff] }
 0xd3d   :  { %10532 = vmatpush3.bf16.msra.mxu1 %v10531_v57  ;;  %10564 = vmatpush3.bf16.msra.mxu0 %v10563_v60  ;;  %v10571_v60 = vpack.c.bf16 %v12578_v37, %v12575_v33  ;;  %v12635_v33 = vsub.s32 7, %v12529_v4  ;;  %v12643_v37 = vrot.slane %v12538_v13, %v12617_v63 }
 0xd3e   :  { %10566 = vmatprep.subr.bf16.mxu1 %v10565_v62  ;;  %10598 = vmatprep.subr.bf16.mxu0 %v10597_v0  ;;  %v12614_v62 = vld [vmem:[%s14341_s6 + $0x328] sm:$0xff] }
 0xd3f   :  { %14347 = vst [vmem:[#allocation71_spill] sm:$0xff] %v12635_v33 }
 0xdc2   :  { %v3129_v2 = vpop.f32.mrb[32].mxu1  ;;  %v3218_v17 = vpop.f32.mrb[32].mxu0 }
 0xdc3   :  { %v3130_v25 = vadd.f32 %v3129_v2, %v12548_v8  ;;  %v3219_v26 = vadd.f32 %v3218_v17, %v12552_v19  ;;  %v3131_v27 = vpop.f32.mrb[33].mxu1  ;;  %v3220_v28 = vpop.f32.mrb[33].mxu0  ;;  %v10573_v2 = vpack.c.bf16 %v12590_v48, %v12587_v47  ;;  %v10605_v17 = vpack.c.bf16 %v596_v56, %v12595_v55  ;;  %v581_v47 = vld [vmem:[%s14341_s6 + $0x330] sm:$0xff]  ;;  %v567_v55 = vld [vmem:[%s14341_s6 + $0x2c0] sm:$0xff] }
 0xdc4   :  { %v3132_v32 = vadd.f32 %v3131_v27, %v12556_v21  ;;  %v3221_v12 = vadd.f32 %v3220_v28, %v12560_v14 }
 0xdc5   :  { %v3775_v49 = vmax.f32 %v3130_v25, 0.0  ;;  %v3777_v50 = vmax.f32 %v3219_v26, 0.0 }
 0xdc6   :  { %v3776_v42 = vmax.f32 %v3132_v32, 0.0  ;;  %v3778_v44 = vmax.f32 %v3221_v12, 0.0  ;;  %v3135_v45 = vpop.f32.mrb[34].mxu1  ;;  %v3224_v46 = vpop.f32.mrb[34].mxu0 }
 0xdc7   :  { %v3136_v51 = vadd.f32 %v3135_v45, %v12548_v8  ;;  %v3225_v52 = vadd.f32 %v3224_v46, %v12552_v19  ;;  %v3137_v53 = vpop.f32.mrb[35].mxu1  ;;  %v3226_v54 = vpop.f32.mrb[35].mxu0  ;;  %v10577_v46 = vpack.c.bf16 %v12626_v23, %v12623_v20 }
 0xdc8   :  { %v3138_v57 = vadd.f32 %v3137_v53, %v12556_v21  ;;  %v3227_v58 = vadd.f32 %v3226_v54, %v12560_v14  ;;  %3909 = vmatprep.mubr.f32.mxu1 %v3776_v42  ;;  %3994 = vmatprep.mubr.f32.mxu0 %v3778_v44  ;;  %v582_v54 = vld [vmem:[%s14341_s6 + $0x338] sm:$0xff] }
 0xdc9   :  { %3910 = vmatmul.mubr.f32.vlgmr.msra.gmra.mrb[64].mxu1 %v3775_v49  ;;  %3995 = vmatmul.mubr.f32.vlgmr.msra.gmra.mrb[64].mxu0 %v3777_v50  ;;  %v3791_v24 = vmax.f32 %v3136_v51, 0.0  ;;  %v3793_v25 = vmax.f32 %v3225_v52, 0.0 }
 0xdca   :  { %v3792_v0 = vmax.f32 %v3138_v57, 0.0  ;;  %v3794_v3 = vmax.f32 %v3227_v58, 0.0  ;;  %10568 = vmatpush3.bf16.msra.mxu1 %v10567_v35  ;;  %10600 = vmatpush3.bf16.msra.mxu0 %v10599_v36  ;;  %v3141_v15 = vpop.f32.mrb[36].mxu1  ;;  %v3230_v1 = vpop.f32.mrb[36].mxu0  ;;  %v10575_v35 = vpack.c.bf16 %v12608_v7, %v12601_v59  ;;  %v10607_v36 = vpack.c.bf16 %v12614_v62, %v12611_v5  ;;  %v600_v59 = vld [vmem:[%s14341_s6 + $0x3c8] sm:$0xff] }
 0xdcb   :  { %v3142_v26 = vadd.f32 %v3141_v15, %v12548_v8  ;;  %v3231_v27 = vadd.f32 %v3230_v1, %v12552_v19  ;;  %v3143_v28 = vpop.f32.mrb[37].mxu1  ;;  %v3232_v29 = vpop.f32.mrb[37].mxu0  ;;  %10570 = vmatprep.subr.bf16.mxu1 %v10569_v40  ;;  %10602 = vmatprep.subr.bf16.mxu0 %v10601_v43  ;;  %v10609_v40 = vpack.c.bf16 %v598_v31, %v597_v30  ;;  %v550_v43 = vld [vmem:[%s14341_s6 + $0x238] sm:$0xff] }
 0xdcc   :  { %v3144_v32 = vadd.f32 %v3143_v28, %v12556_v21  ;;  %v3233_v12 = vadd.f32 %v3232_v29, %v12560_v14  ;;  %3914 = vmatprep.mubr.f32.mxu1 %v3792_v0  ;;  %3999 = vmatprep.mubr.f32.mxu0 %v3794_v3  ;;  %v12660_v58 = vrot.slane %v12538_v13, %v12635_v33  ;;  %v552_v0 = vld [vmem:[%s14341_s6 + $0x248] sm:$0xff]  ;;  %v583_v3 = vld [vmem:[%s14341_s6 + $0x340] sm:$0xff]  ;;  %v570_v28 = vld [vmem:[%s14341_s6 + $0x2d8] sm:$0xff] }
 0xdcd   :  { %3915 = vmatmul.mubr.f32.gmra.mrb[66].mxu1 %v3791_v24  ;;  %4000 = vmatmul.mubr.f32.gmra.mrb[66].mxu0 %v3793_v25  ;;  %v3807_v48 = vmax.f32 %v3142_v26, 0.0  ;;  %v3809_v49 = vmax.f32 %v3231_v27, 0.0  ;;  %v10579_v5 = vpack.c.bf16 %v550_v43, %v12646_v38  ;;  %v10611_v62 = vpack.c.bf16 %v582_v54, %v581_v47  ;;  %v584_v24 = vld [vmem:[%s14341_s6 + $0x348] sm:$0xff]  ;;  %v569_v25 = vld [vmem:[%s14341_s6 + $0x2d0] sm:$0xff]  ;;  %v602_v30 = vld [vmem:[%s14341_s6 + $0x3d8] sm:$0xff] }
 0xdce   :  { %v3808_v6 = vmax.f32 %v3144_v32, 0.0  ;;  %v3810_v42 = vmax.f32 %v3233_v12, 0.0  ;;  %10572 = vmatpush3.bf16.msra.mxu1 %v10571_v60  ;;  %10604 = vmatpush3.bf16.msra.mxu0 %v10603_v61  ;;  %v3147_v44 = vpop.f32.mrb[38].mxu1  ;;  %v3236_v45 = vpop.f32.mrb[38].mxu0  ;;  %v551_v60 = vld [vmem:[%s14341_s6 + $0x240] sm:$0xff]  ;;  %v601_v29 = vld [vmem:[%s14341_s6 + $0x3d0] sm:$0xff]  ;;  %v10615_v38 = vpack.c.bf16 %v584_v24, %v583_v3 }
 0xdcf   :  { %v3148_v50 = vadd.f32 %v3147_v44, %v12548_v8  ;;  %v3237_v51 = vadd.f32 %v3236_v45, %v12552_v19  ;;  %v3149_v52 = vpop.f32.mrb[39].mxu1  ;;  %v3238_v53 = vpop.f32.mrb[39].mxu0  ;;  %10574 = vmatprep.subr.bf16.mxu1 %v10573_v2  ;;  %10606 = vmatprep.subr.bf16.mxu0 %v10605_v17  ;;  %v568_v8 = vld [vmem:[%s14341_s6 + $0x2c8] sm:$0xff]  ;;  %v599_v19 = vld [vmem:[%s14341_s6 + $0x3c0] sm:$0xff]  ;;  %v585_v43 = vld [vmem:[%s14341_s6 + $0x350] sm:$0xff] }
 0xdd0   :  { %v3150_v56 = vadd.f32 %v3149_v52, %v12556_v21  ;;  %v3239_v57 = vadd.f32 %v3238_v53, %v12560_v14  ;;  %3919 = vmatprep.mubr.f32.mxu1 %v3808_v6  ;;  %4004 = vmatprep.mubr.f32.mxu0 %v3810_v42  ;;  %v10581_v20 = vpack.c.bf16 %v568_v8, %v567_v55  ;;  %v553_v6 = vld [vmem:[%s14341_s6 + $0x250] sm:$0xff]  ;;  %v554_v42 = vld [vmem:[%s14341_s6 + $0x258] sm:$0xff]  ;;  %v12697_v52 = vsub.s32 4, %v12529_v4  ;;  %v556_v8 = vld [vmem:[%s14341_s6 + $0x268] sm:$0xff] }
 0xdd1   :  { %3920 = vmatmul.mubr.f32.gmra.mrb[68].mxu1 %v3807_v48  ;;  %4005 = vmatmul.mubr.f32.gmra.mrb[68].mxu0 %v3809_v49  ;;  %v3823_v15 = vmax.f32 %v3148_v50, 0.0  ;;  %v3825_v1 = vmax.f32 %v3237_v51, 0.0  ;;  %v10613_v23 = vpack.c.bf16 %v600_v59, %v599_v19  ;;  %v586_v47 = vld [vmem:[%s14341_s6 + $0x358] sm:$0xff]  ;;  %v571_v48 = vld [vmem:[%s14341_s6 + $0x2e0] sm:$0xff]  ;;  %v572_v49 = vld [vmem:[%s14341_s6 + $0x2e8] sm:$0xff]  ;;  %v10587_v55 = vpack.c.bf16 %v554_v42, %v553_v6 }
 0xdd2   :  { %v3824_v61 = vmax.f32 %v3150_v56, 0.0  ;;  %v3826_v7 = vmax.f32 %v3239_v57, 0.0  ;;  %10576 = vmatpush3.bf16.msra.mxu1 %v10575_v35  ;;  %10608 = vmatpush3.bf16.msra.mxu0 %v10607_v36  ;;  %v12666_v21 = vpop.f32.mrb[40].mxu1  ;;  %v12668_v14 = vpop.f32.mrb[40].mxu0  ;;  %v10583_v36 = vpack.c.bf16 %v552_v0, %v551_v60  ;;  %v603_v50 = vld [vmem:[%s14341_s6 + $0x3e0] sm:$0xff]  ;;  %v604_v51 = vld [vmem:[%s14341_s6 + $0x3e8] sm:$0xff]  ;;  %v10619_v56 = vpack.c.bf16 %v586_v47, %v585_v43 }
 0xdd3   :  { %v3309_v2 = vpop.f32.mrb[41].mxu1  ;;  %v3398_v17 = vpop.f32.mrb[41].mxu0  ;;  %10578 = vmatprep.subr.bf16.mxu1 %v10577_v46  ;;  %10610 = vmatprep.subr.bf16.mxu0 %v10609_v40  ;;  %v10585_v46 = vpack.c.bf16 %v570_v28, %v569_v25  ;;  %v10617_v40 = vpack.c.bf16 %v602_v30, %v601_v29  ;;  %v555_v57 = vld [vmem:[%s14341_s6 + $0x260] sm:$0xff]  ;;  %v12706_v19 = vsub.s32 6, %v12529_v4  ;;  %v573_v0 = vld [vmem:[%s14341_s6 + $0x2f0] sm:$0xff]  ;;  %v574_v3 = vld [vmem:[%s14341_s6 + $0x2f8] sm:$0xff]  ;;  %v12720_v4 = vrot.slane %v12538_v13, %v12697_v52 }
 0xdd4   :  { %v3310_v26 = vadd.f32 %v3309_v2, %v12643_v37  ;;  %v3399_v27 = vadd.f32 %v3398_v17, %v12660_v58  ;;  %3924 = vmatprep.mubr.f32.mxu1 %v3824_v61  ;;  %4009 = vmatprep.mubr.f32.mxu0 %v3826_v7  ;;  %v10589_v61 = vpack.c.bf16 %v572_v49, %v571_v48  ;;  %v557_v24 = vld [vmem:[%s14341_s6 + $0x270] sm:$0xff]  ;;  %v558_v25 = vld [vmem:[%s14341_s6 + $0x278] sm:$0xff]  ;;  %v655_v6 = vld [vmem:[%s14341_s6 + $0x580] sm:$0xff] }
 0xdd5   :  { %3925 = vmatmul.mubr.f32.gmra.mrb[70].mxu1 %v3823_v15  ;;  %4010 = vmatmul.mubr.f32.gmra.mrb[70].mxu0 %v3825_v1  ;;  %v10621_v7 = vpack.c.bf16 %v604_v51, %v603_v50  ;;  %v605_v15 = vld [vmem:[%s14341_s6 + $0x3f0] sm:$0xff]  ;;  %v606_v1 = vld [vmem:[%s14341_s6 + $0x3f8] sm:$0xff]  ;;  %v10593_v30 = vpack.c.bf16 %v574_v3, %v573_v0  ;;  %v656_v42 = vld [vmem:[%s14341_s6 + $0x588] sm:$0xff]  ;;  %v10595_v47 = vpack.c.bf16 %v558_v25, %v557_v24 }
 0xdd6   :  { %v3780_v31 = vmax.f32 %v3310_v26, 0.0  ;;  %v3782_v32 = vmax.f32 %v3399_v27, 0.0  ;;  %10580 = vmatpush3.bf16.msra.mxu1 %v10579_v5  ;;  %10612 = vmatpush3.bf16.msra.mxu0 %v10611_v62  ;;  %v12680_v12 = vpop.f32.mrb[42].mxu1  ;;  %v12682_v35 = vpop.f32.mrb[42].mxu0  ;;  %v587_v5 = vld [vmem:[%s14341_s6 + $0x360] sm:$0xff]  ;;  %v588_v62 = vld [vmem:[%s14341_s6 + $0x368] sm:$0xff]  ;;  %v12731_v27 = vrot.slane %v12538_v13, %v12706_v19 }
 0xdd7   :  { %v12686_v44 = vpop.f32.mrb[43].mxu1  ;;  %v12688_v45 = vpop.f32.mrb[43].mxu0  ;;  %10582 = vmatprep.subr.bf16.mxu1 %v10581_v20  ;;  %10614 = vmatprep.subr.bf16.mxu0 %v10613_v23  ;;  %v10591_v20 = vpack.c.bf16 %v556_v8, %v555_v57  ;;  %v10623_v23 = vpack.c.bf16 %v588_v62, %v587_v5  ;;  %v589_v26 = vld [vmem:[%s14341_s6 + $0x370] sm:$0xff]  ;;  %v12746_v13 = vld [vmem:[%s14341_s6 + $0x408] sm:$0xff]  ;;  %v12753_v50 = vld [vmem:[%s14341_s6 + $0x500] sm:$0xff] }
 0xdd8   :  { %4079 = vmatprep.mubr.f32.mxu1 %v3780_v31  ;;  %4164 = vmatprep.mubr.f32.mxu0 %v3782_v32  ;;  %v10625_v31 = vpack.c.bf16 %v606_v1, %v605_v15  ;;  %v590_v32 = vld [vmem:[%s14341_s6 + $0x378] sm:$0xff]  ;;  %v12756_v51 = vld [vmem:[%s14341_s6 + $0x508] sm:$0xff]  ;;  %v3397_v57 = vadd.f32 %v12668_v14, %v12731_v27  ;;  %v12773_v62 = vld [vmem:[%s14341_s6 + $0x590] sm:$0xff]  ;;  %v3405_v14 = vadd.f32 %v12688_v45, %v12660_v58 }
 0xdd9   :  { %v10627_v48 = vpack.c.bf16 %v590_v32, %v589_v26  ;;  %v12770_v5 = vld [vmem:[%s14341_s6 + $0x498] sm:$0xff]  ;;  %v12783_v3 = vld [vmem:[%s14342_s27 + $0x8] sm:$0xff]  ;;  %v12788_v1 = vld [vmem:[%s14341_s6 + $0x410] sm:$0xff]  ;;  %v10663_v45 = vpack.c.bf16 %v12756_v51, %v12753_v50 }
 0xdda   :  { %10584 = vmatpush3.bf16.msra.mxu1 %v10583_v36  ;;  %10616 = vmatpush3.bf16.msra.mxu0 %v10615_v38  ;;  %v12699_v53 = vpop.f32.mrb[44].mxu1  ;;  %v12701_v54 = vpop.f32.mrb[44].mxu0  ;;  %v623_v36 = vld [vmem:[%s14341_s6 + $0x480] sm:$0xff]  ;;  %v624_v38 = vld [vmem:[%s14341_s6 + $0x488] sm:$0xff]  ;;  %v12776_v0 = vld [vmem:[%s14341_s6 + $0x598] sm:$0xff]  ;;  %v3798_v51 = vmax.f32 %v3405_v14, 0.0 }
 0xddb   :  { %v12708_v59 = vpop.f32.mrb[45].mxu1  ;;  %v12710_v60 = vpop.f32.mrb[45].mxu0  ;;  %10586 = vmatprep.subr.bf16.mxu1 %v10585_v46  ;;  %10618 = vmatprep.subr.bf16.mxu0 %v10617_v40  ;;  %v12743_v46 = vld [vmem:[%s14341_s6 + $0x400] sm:$0xff]  ;;  %v10629_v49 = vpack.c.bf16 %v624_v38, %v623_v36  ;;  %v10665_v26 = vpack.c.bf16 %v12776_v0, %v12773_v62  ;;  %v12813_v32 = vld [vmem:[%s14341_s6 + $0x4a8] sm:$0xff]  ;;  %v3781_v38 = vmax.f32 %v3397_v57, 0.0 }
 0xddc   :  { %v10631_v15 = vpack.c.bf16 %v12746_v13, %v12743_v46  ;;  %v12847_v57 = vld [vmem:[%s14341_s6 + $0x428] sm:$0xff] }
 0xddd   :  { %v644_v14 = vld [vmem:[%s14341_s6 + $0x528] sm:$0xff] }
 0xdde   :  { %10588 = vmatpush3.bf16.msra.mxu1 %v10587_v55  ;;  %10620 = vmatpush3.bf16.msra.mxu0 %v10619_v56  ;;  %v12722_v2 = vpop.f32.mrb[46].mxu1  ;;  %v12724_v17 = vpop.f32.mrb[46].mxu0  ;;  %v12759_v55 = vld [vmem:[%s14341_s6 + $0x490] sm:$0xff]  ;;  %v3308_v56 = vadd.f32 %v12666_v21, %v12720_v4  ;;  %v3316_v21 = vadd.f32 %v12686_v44, %v12643_v37 }
 0xddf   :  { %v12733_v28 = vpop.f32.mrb[47].mxu1  ;;  %v12735_v29 = vpop.f32.mrb[47].mxu0  ;;  %10590 = vmatprep.subr.bf16.mxu1 %v10589_v61  ;;  %10622 = vmatprep.subr.bf16.mxu0 %v10621_v7  ;;  %v10661_v7 = vpack.c.bf16 %v656_v42, %v655_v6  ;;  %v10633_v25 = vpack.c.bf16 %v12770_v5, %v12759_v55  ;;  %v3314_v6 = vadd.f32 %v12680_v12, %v12720_v4 }
 0xde0   :  { %v3779_v36 = vmax.f32 %v3308_v56, 0.0  ;;  %v3403_v42 = vadd.f32 %v12682_v35, %v12731_v27  ;;  %v3796_v50 = vmax.f32 %v3316_v21, 0.0  ;;  %v3322_v12 = vadd.f32 %v12708_v59, %v12643_v37  ;;  %v12844_v59 = vld [vmem:[%s14341_s6 + $0x420] sm:$0xff] }
 0xde1   :  { %v3411_v35 = vadd.f32 %v12710_v60, %v12660_v58  ;;  %v12835_v55 = vrot.slane %v12783_v3, %v12541_v11  ;;  %v12850_v60 = vld [vmem:[%s14341_s6 + $0x520] sm:$0xff] }
 0xde2   :  { %10592 = vmatpush3.bf16.msra.mxu1 %v10591_v20  ;;  %10624 = vmatpush3.bf16.msra.mxu0 %v10623_v23  ;;  %v12748_v40 = vpop.f32.mrb[48].mxu1  ;;  %v12750_v43 = vpop.f32.mrb[48].mxu0  ;;  %v12791_v20 = vld [vmem:[%s14341_s6 + $0x418] sm:$0xff]  ;;  %v12794_v23 = vld [vmem:[%s14341_s6 + $0x510] sm:$0xff]  ;;  %v687_v11 = vld [vmem:[%s14341_s6 + $0x680] sm:$0xff] }
 0xde3   :  { %v12765_v8 = vpop.f32.mrb[49].mxu1  ;;  %v12767_v61 = vpop.f32.mrb[49].mxu0  ;;  %10594 = vmatprep.subr.bf16.mxu1 %v10593_v30  ;;  %10626 = vmatprep.subr.bf16.mxu0 %v10625_v31  ;;  %v12807_v30 = vld [vmem:[%s14341_s6 + $0x518] sm:$0xff]  ;;  %v12810_v31 = vld [vmem:[%s14341_s6 + $0x4a0] sm:$0xff]  ;;  %v10635_v56 = vpack.c.bf16 %v12791_v20, %v12788_v1  ;;  %v12864_v1 = vld [vmem:[%s14341_s6 + $0x4b0] sm:$0xff] }
 0xde4   :  { %v10667_v62 = vpack.c.bf16 %v12807_v30, %v12794_v23  ;;  %v10637_v0 = vpack.c.bf16 %v12813_v32, %v12810_v31  ;;  %v12867_v20 = vld [vmem:[%s14341_s6 + $0x4b8] sm:$0xff]  ;;  %v661_v31 = vld [vmem:[%s14341_s6 + $0x5b0] sm:$0xff] }
 0xde5   :  { %v662_v32 = vld [vmem:[%s14341_s6 + $0x5b8] sm:$0xff] }
 0xde6   :  { %10596 = vmatpush3.bf16.msra.mxu1 %v10595_v47  ;;  %10628 = vmatpush3.bf16.msra.mxu0 %v10627_v48  ;;  %v12796_v24 = vpop.f32.mrb[50].mxu1  ;;  %v12798_v44 = vpop.f32.mrb[50].mxu0  ;;  %v12824_v47 = vld [vmem:[%s14341_s6 + $0x5a0] sm:$0xff]  ;;  %v12827_v48 = vld [vmem:[%s14341_s6 + $0x5a8] sm:$0xff] }
 0xde7   :  { %v12819_v46 = vpop.f32.mrb[51].mxu1  ;;  %v12821_v13 = vpop.f32.mrb[51].mxu0  ;;  %10630 = vmatprep.subr.bf16.mxu1 %v10629_v49  ;;  %10662 = vmatprep.subr.bf16.mxu0 %v10661_v7  ;;  %v12839_v49 = vrot.slane %v12783_v3, %v12544_v10  ;;  %v10669_v21 = vpack.c.bf16 %v12827_v48, %v12824_v47  ;;  %v3812_v47 = vmax.f32 %v3322_v12, 0.0  ;;  %v3814_v48 = vmax.f32 %v3411_v35, 0.0 }
 0xde9   :  { %4080 = vmatmul.mubr.f32.vlgmr.msra.gmra.mrb[72].mxu1 %v3779_v36  ;;  %4165 = vmatmul.mubr.f32.vlgmr.msra.gmra.mrb[72].mxu0 %v3781_v38  ;;  %v3795_v36 = vmax.f32 %v3314_v6, 0.0  ;;  %v3797_v38 = vmax.f32 %v3403_v42, 0.0  ;;  %v3328_v6 = vadd.f32 %v12733_v28, %v12643_v37  ;;  %v3417_v42 = vadd.f32 %v12735_v29, %v12660_v58 }
 0xdea   :  { %4084 = vmatprep.mubr.f32.mxu1 %v3796_v50  ;;  %4169 = vmatprep.mubr.f32.mxu0 %v3798_v51  ;;  %v12852_v7 = vpop.f32.mrb[52].mxu1  ;;  %v12854_v5 = vpop.f32.mrb[52].mxu0  ;;  %v3320_v50 = vadd.f32 %v12699_v53, %v12720_v4  ;;  %v3409_v51 = vadd.f32 %v12701_v54, %v12731_v27  ;;  %v10639_v53 = vpack.c.bf16 %v12847_v57, %v12844_v59  ;;  %v613_v59 = vld [vmem:[%s14341_s6 + $0x430] sm:$0xff]  ;;  %v614_v57 = vld [vmem:[%s14341_s6 + $0x438] sm:$0xff] }
 0xdeb   :  { %10632 = vmatpush3.bf16.msra.mxu1 %v10631_v15  ;;  %10664 = vmatpush3.bf16.msra.mxu0 %v10663_v45  ;;  %v12873_v23 = vpop.f32.mrb[53].mxu1  ;;  %v12875_v30 = vpop.f32.mrb[53].mxu0  ;;  %v10671_v37 = vpack.c.bf16 %v644_v14, %v12850_v60  ;;  %v10641_v58 = vpack.c.bf16 %v12867_v20, %v12864_v1  ;;  %v10673_v28 = vpack.c.bf16 %v662_v32, %v661_v31  ;;  %v3828_v60 = vmax.f32 %v3328_v6, 0.0  ;;  %v663_v1 = vld [vmem:[%s14341_s6 + $0x5c0] sm:$0xff]  ;;  %v664_v20 = vld [vmem:[%s14341_s6 + $0x5c8] sm:$0xff] }
 0xdec   :  { %10634 = vmatprep.subr.bf16.mxu1 %v10633_v25  ;;  %10666 = vmatprep.subr.bf16.mxu0 %v10665_v26  ;;  %v3811_v29 = vmax.f32 %v3320_v50, 0.0  ;;  %v3813_v45 = vmax.f32 %v3409_v51, 0.0  ;;  %v3326_v25 = vadd.f32 %v12722_v2, %v12720_v4  ;;  %v3415_v26 = vadd.f32 %v12724_v17, %v12731_v27  ;;  %v645_v17 = vld [vmem:[%s14341_s6 + $0x530] sm:$0xff]  ;;  %v646_v27 = vld [vmem:[%s14341_s6 + $0x538] sm:$0xff]  ;;  %v615_v31 = vld [vmem:[%s14341_s6 + $0x440] sm:$0xff] }
 0xded   :  { %4085 = vmatmul.mubr.f32.gmra.mrb[74].mxu1 %v3795_v36  ;;  %4170 = vmatmul.mubr.f32.gmra.mrb[74].mxu0 %v3797_v38  ;;  %v3830_v14 = vmax.f32 %v3417_v42, 0.0  ;;  %v3488_v4 = vadd.f32 %v12765_v8, %v12835_v55  ;;  %v3577_v2 = vadd.f32 %v12767_v61, %v12839_v49  ;;  %v10643_v50 = vpack.c.bf16 %v614_v57, %v613_v59  ;;  %v616_v32 = vld [vmem:[%s14341_s6 + $0x448] sm:$0xff] }
 0xdee   :  { %4089 = vmatprep.mubr.f32.mxu1 %v3812_v47  ;;  %4174 = vmatprep.mubr.f32.mxu0 %v3814_v48  ;;  %v12885_v54 = vpop.f32.mrb[54].mxu1  ;;  %v12887_v15 = vpop.f32.mrb[54].mxu0  ;;  %v3827_v38 = vmax.f32 %v3326_v25, 0.0  ;;  %v3829_v61 = vmax.f32 %v3415_v26, 0.0  ;;  %v10675_v51 = vpack.c.bf16 %v646_v27, %v645_v17  ;;  %v10677_v42 = vpack.c.bf16 %v664_v20, %v663_v1  ;;  %v665_v25 = vld [vmem:[%s14341_s6 + $0x5d0] sm:$0xff]  ;;  %v666_v26 = vld [vmem:[%s14341_s6 + $0x5d8] sm:$0xff] }
 0xdef   :  { %10636 = vmatpush3.bf16.msra.mxu1 %v10635_v56  ;;  %10668 = vmatpush3.bf16.msra.mxu0 %v10667_v62  ;;  %v12896_v12 = vpop.f32.mrb[55].mxu1  ;;  %v12898_v35 = vpop.f32.mrb[55].mxu0  ;;  %v631_v56 = vld [vmem:[%s14341_s6 + $0x4c0] sm:$0xff]  ;;  %v632_v62 = vld [vmem:[%s14341_s6 + $0x4c8] sm:$0xff]  ;;  %v3784_v47 = vmax.f32 %v3488_v4, 0.0  ;;  %v3786_v48 = vmax.f32 %v3577_v2, 0.0  ;;  %v10681_v27 = vpack.c.bf16 %v666_v26, %v665_v25 }
 0xdf0   :  { %10638 = vmatprep.subr.bf16.mxu1 %v10637_v0  ;;  %10670 = vmatprep.subr.bf16.mxu0 %v10669_v21  ;;  %v10645_v6 = vpack.c.bf16 %v632_v62, %v631_v56  ;;  %v617_v4 = vld [vmem:[%s14341_s6 + $0x450] sm:$0xff]  ;;  %v618_v2 = vld [vmem:[%s14341_s6 + $0x458] sm:$0xff]  ;;  %v635_v1 = vld [vmem:[%s14341_s6 + $0x4e0] sm:$0xff] }
 0xdf1   :  { %4090 = vmatmul.mubr.f32.gmra.mrb[76].mxu1 %v3811_v29  ;;  %4175 = vmatmul.mubr.f32.gmra.mrb[76].mxu0 %v3813_v45  ;;  %v648_v29 = vld [vmem:[%s14341_s6 + $0x548] sm:$0xff]  ;;  %v634_v45 = vld [vmem:[%s14341_s6 + $0x4d8] sm:$0xff]  ;;  %v649_v56 = vld [vmem:[%s14341_s6 + $0x550] sm:$0xff] }
 0xdf2   :  { %4094 = vmatprep.mubr.f32.mxu1 %v3828_v60  ;;  %4179 = vmatprep.mubr.f32.mxu0 %v3830_v14  ;;  %v12912_v36 = vpop.f32.mrb[56].mxu1  ;;  %v12914_v8 = vpop.f32.mrb[56].mxu0  ;;  %v10647_v60 = vpack.c.bf16 %v616_v32, %v615_v31  ;;  %v650_v62 = vld [vmem:[%s14341_s6 + $0x558] sm:$0xff]  ;;  %v636_v20 = vld [vmem:[%s14341_s6 + $0x4e8] sm:$0xff]  ;;  %v637_v25 = vld [vmem:[%s14341_s6 + $0x4f0] sm:$0xff] }
 0xdf3   :  { %10640 = vmatpush3.bf16.msra.mxu1 %v10639_v53  ;;  %10672 = vmatpush3.bf16.msra.mxu0 %v10671_v37  ;;  %v12916_v0 = vpop.f32.mrb[57].mxu1  ;;  %v12918_v21 = vpop.f32.mrb[57].mxu0  ;;  %v647_v53 = vld [vmem:[%s14341_s6 + $0x540] sm:$0xff]  ;;  %v633_v37 = vld [vmem:[%s14341_s6 + $0x4d0] sm:$0xff]  ;;  %v638_v26 = vld [vmem:[%s14341_s6 + $0x4f8] sm:$0xff] }
 0xdf4   :  { %10642 = vmatprep.subr.bf16.mxu1 %v10641_v58  ;;  %10674 = vmatprep.subr.bf16.mxu0 %v10673_v28  ;;  %v10679_v14 = vpack.c.bf16 %v648_v29, %v647_v53  ;;  %v10649_v17 = vpack.c.bf16 %v634_v45, %v633_v37  ;;  %v10653_v53 = vpack.c.bf16 %v636_v20, %v635_v1  ;;  %v651_v37 = vld [vmem:[%s14341_s6 + $0x560] sm:$0xff]  ;;  %v652_v45 = vld [vmem:[%s14341_s6 + $0x568] sm:$0xff]  ;;  %v622_v1 = vld [vmem:[%s14341_s6 + $0x478] sm:$0xff] }
 0xdf5   :  { %4095 = vmatmul.mubr.f32.gmra.mrb[78].mxu1 %v3827_v38  ;;  %4180 = vmatmul.mubr.f32.gmra.mrb[78].mxu0 %v3829_v61  ;;  %v667_v38 = vld [vmem:[%s14341_s6 + $0x5e0] sm:$0xff]  ;;  %v668_v61 = vld [vmem:[%s14341_s6 + $0x5e8] sm:$0xff]  ;;  %v653_v20 = vld [vmem:[%s14341_s6 + $0x570] sm:$0xff] }
 0xdf6   :  { %4249 = vmatprep.mubr.f32.mxu1 %v3784_v47  ;;  %4334 = vmatprep.mubr.f32.mxu0 %v3786_v48  ;;  %v12928_v59 = vpop.f32.mrb[58].mxu1  ;;  %v12930_v58 = vpop.f32.mrb[58].mxu0  ;;  %v10651_v47 = vpack.c.bf16 %v618_v2, %v617_v4  ;;  %v10683_v48 = vpack.c.bf16 %v650_v62, %v649_v56  ;;  %v10685_v29 = vpack.c.bf16 %v668_v61, %v667_v38  ;;  %v621_v62 = vld [vmem:[%s14341_s6 + $0x470] sm:$0xff] }
 0xdf7   :  { %10644 = vmatpush3.bf16.msra.mxu1 %v10643_v50  ;;  %10676 = vmatpush3.bf16.msra.mxu0 %v10675_v51  ;;  %v12932_v28 = vpop.f32.mrb[59].mxu1  ;;  %v12934_v57 = vpop.f32.mrb[59].mxu0  ;;  %v12966_v4 = vrot.slane %v12783_v3, %v12532_v18  ;;  %v10687_v56 = vpack.c.bf16 %v652_v45, %v651_v37  ;;  %v12977_v38 = vrot.slane %v12783_v3, %v12535_v9  ;;  %v688_v18 = vld [vmem:[%s14341_s6 + $0x688] sm:$0xff]  ;;  %v12985_v37 = vld [vmem:[%s14341_s6 + $0x600] sm:$0xff] }
 0xdf8   :  { %10646 = vmatprep.subr.bf16.mxu1 %v10645_v6  ;;  %10678 = vmatprep.subr.bf16.mxu0 %v10677_v42  ;;  %v619_v6 = vld [vmem:[%s14341_s6 + $0x460] sm:$0xff]  ;;  %v620_v42 = vld [vmem:[%s14341_s6 + $0x468] sm:$0xff]  ;;  %v10657_v61 = vpack.c.bf16 %v638_v26, %v637_v25 }
 0xdf9   :  { %v672_v45 = vld [vmem:[%s14341_s6 + $0x608] sm:$0xff]  ;;  %v703_v25 = vld [vmem:[%s14341_s6 + $0x700] sm:$0xff]  ;;  %v3575_v41 = vadd.f32 %v12750_v43, %v12977_v38  ;;  %v13009_v43 = vld [vmem:[%s14341_s6 + $0x618] sm:$0xff] }
 0xdfa   :  { %v12944_v50 = vpop.f32.mrb[60].mxu1  ;;  %v12946_v51 = vpop.f32.mrb[60].mxu0  ;;  %v704_v26 = vld [vmem:[%s14341_s6 + $0x708] sm:$0xff] }
 0xdfb   :  { %10648 = vmatpush3.bf16.msra.mxu1 %v10647_v60  ;;  %10680 = vmatpush3.bf16.msra.mxu0 %v10679_v14  ;;  %v12948_v31 = vpop.f32.mrb[61].mxu1  ;;  %v12950_v32 = vpop.f32.mrb[61].mxu0  ;;  %v669_v60 = vld [vmem:[%s14341_s6 + $0x5f0] sm:$0xff]  ;;  %v670_v14 = vld [vmem:[%s14341_s6 + $0x5f8] sm:$0xff]  ;;  %v3785_v39 = vmax.f32 %v3575_v41, 0.0  ;;  %v3500_v41 = vadd.f32 %v12873_v23, %v12835_v55  ;;  %v676_v23 = vld [vmem:[%s14341_s6 + $0x628] sm:$0xff] }
 0xdfc   :  { %10650 = vmatprep.subr.bf16.mxu1 %v10649_v17  ;;  %10682 = vmatprep.subr.bf16.mxu0 %v10681_v27  ;;  %v10655_v27 = vpack.c.bf16 %v620_v42, %v619_v6  ;;  %v719_v6 = vld [vmem:[%s14341_s6 + $0x780] sm:$0xff]  ;;  %v720_v42 = vld [vmem:[%s14341_s6 + $0x788] sm:$0xff] }
 0xdfe   :  { %v12960_v22 = vpop.f32.mrb[62].mxu1  ;;  %v12962_v10 = vpop.f32.mrb[62].mxu0 }
 0xdff   :  { %10652 = vmatpush3.bf16.msra.mxu1 %v10651_v47  ;;  %10684 = vmatpush3.bf16.msra.mxu0 %v10683_v48  ;;  %v12968_v2 = vpop.f32.mrb[63].mxu1  ;;  %v12970_v17 = vpop.f32.mrb[63].mxu0  ;;  %v10689_v47 = vpack.c.bf16 %v670_v14, %v669_v60  ;;  %v654_v48 = vld [vmem:[%s14341_s6 + $0x578] sm:$0xff]  ;;  %v12991_v60 = vld [vmem:[%s14341_s6 + $0x690] sm:$0xff]  ;;  %v3486_v14 = vadd.f32 %v12748_v40, %v12966_v4  ;;  %v10695_v40 = vpack.c.bf16 %v672_v45, %v12985_v37 }
 0xe00   :  { %10654 = vmatprep.subr.bf16.mxu1 %v10653_v53  ;;  %10686 = vmatprep.subr.bf16.mxu0 %v10685_v29  ;;  %v10659_v53 = vpack.c.bf16 %v622_v1, %v621_v62  ;;  %v10691_v9 = vpack.c.bf16 %v654_v48, %v653_v20  ;;  %v10693_v29 = vpack.c.bf16 %v688_v18, %v687_v11  ;;  %v721_v62 = vld [vmem:[%s14341_s6 + $0x790] sm:$0xff]  ;;  %v722_v18 = vld [vmem:[%s14341_s6 + $0x798] sm:$0xff] }
 0xe01   :  { %v3494_v11 = vadd.f32 %v12819_v46, %v12835_v55  ;;  %v3583_v1 = vadd.f32 %v12821_v13, %v12839_v49  ;;  %v13006_v20 = vld [vmem:[%s14341_s6 + $0x610] sm:$0xff]  ;;  %v10729_v48 = vpack.c.bf16 %v722_v18, %v721_v62  ;;  %v706_v46 = vld [vmem:[%s14341_s6 + $0x718] sm:$0xff]  ;;  %v3783_v13 = vmax.f32 %v3486_v14, 0.0  ;;  %v707_v18 = vld [vmem:[%s14341_s6 + $0x720] sm:$0xff] }
 0xe02   :  { %v3492_v37 = vadd.f32 %v12796_v24, %v12966_v4  ;;  %v3581_v45 = vadd.f32 %v12798_v44, %v12977_v38  ;;  %v3589_v24 = vadd.f32 %v12875_v30, %v12839_v49  ;;  %v13030_v44 = vrot.slane %v12783_v3, %v12617_v63 }
 0xe03   :  { %10656 = vmatpush3.bf16.msra.mxu1 %v10655_v27  ;;  %10688 = vmatpush3.bf16.msra.mxu0 %v10687_v56  ;;  %v10725_v27 = vpack.c.bf16 %v720_v42, %v719_v6  ;;  %v690_v56 = vld [vmem:[%s14341_s6 + $0x698] sm:$0xff]  ;;  %v705_v6 = vld [vmem:[%s14341_s6 + $0x710] sm:$0xff]  ;;  %v13015_v42 = vld [vmem:[%s14341_s6 + $0x6a0] sm:$0xff]  ;;  %v10699_v14 = vpack.c.bf16 %v13009_v43, %v13006_v20  ;;  %v3587_v20 = vadd.f32 %v12854_v5, %v12977_v38 }
 0xe04   :  { %10658 = vmatprep.subr.bf16.mxu1 %v10657_v61  ;;  %10690 = vmatprep.subr.bf16.mxu0 %v10689_v47  ;;  %v10727_v61 = vpack.c.bf16 %v704_v26, %v703_v25  ;;  %v10697_v47 = vpack.c.bf16 %v690_v56, %v12991_v60  ;;  %v724_v25 = vld [vmem:[%s14341_s6 + $0x7a8] sm:$0xff]  ;;  %v3800_v26 = vmax.f32 %v3494_v11, 0.0  ;;  %v3802_v60 = vmax.f32 %v3583_v1, 0.0  ;;  %v693_v1 = vld [vmem:[%s14341_s6 + $0x6b0] sm:$0xff]  ;;  %v694_v43 = vld [vmem:[%s14341_s6 + $0x6b8] sm:$0xff] }
 0xe05   :  { %v10731_v30 = vpack.c.bf16 %v706_v46, %v705_v6  ;;  %v708_v11 = vld [vmem:[%s14341_s6 + $0x728] sm:$0xff]  ;;  %v3816_v6 = vmax.f32 %v3500_v41, 0.0  ;;  %v3818_v46 = vmax.f32 %v3589_v24, 0.0 }
 0xe06   :  { %v10735_v5 = vpack.c.bf16 %v708_v11, %v707_v18  ;;  %v728_v41 = vld [vmem:[%s14341_s6 + $0x7c8] sm:$0xff]  ;;  %v711_v11 = vld [vmem:[%s14341_s6 + $0x740] sm:$0xff] }
 0xe07   :  { %10660 = vmatpush3.bf16.msra.mxu1 %v10659_v53  ;;  %10692 = vmatpush3.bf16.msra.mxu0 %v10691_v9  ;;  %v692_v9 = vld [vmem:[%s14341_s6 + $0x6a8] sm:$0xff]  ;;  %v723_v53 = vld [vmem:[%s14341_s6 + $0x7a0] sm:$0xff] }
 0xe08   :  { %10694 = vmatprep.subr.bf16.mxu1 %v10693_v29  ;;  %10726 = vmatprep.subr.bf16.mxu0 %v10725_v27  ;;  %v13034_v29 = vrot.slane %v12783_v3, %v12635_v33  ;;  %v675_v27 = vld [vmem:[%s14341_s6 + $0x620] sm:$0xff]  ;;  %v10701_v56 = vpack.c.bf16 %v692_v9, %v13015_v42  ;;  %v10733_v62 = vpack.c.bf16 %v724_v25, %v723_v53  ;;  %v3799_v33 = vmax.f32 %v3492_v37, 0.0 }
 0xe09   :  { %v3506_v42 = vadd.f32 %v12896_v12, %v12835_v55  ;;  %v3595_v37 = vadd.f32 %v12898_v35, %v12839_v49  ;;  %v3817_v55 = vmax.f32 %v3587_v20, 0.0  ;;  %v3504_v49 = vadd.f32 %v12885_v54, %v12966_v4  ;;  %v678_v35 = vld [vmem:[%s14341_s6 + $0x638] sm:$0xff]  ;;  %v709_v54 = vld [vmem:[%s14341_s6 + $0x730] sm:$0xff]  ;;  %v727_v25 = vld [vmem:[%s14341_s6 + $0x7c0] sm:$0xff] }
 0xe0a   :  { %4250 = vmatmul.mubr.f32.vlgmr.msra.gmra.mrb[80].mxu1 %v3783_v13  ;;  %4335 = vmatmul.mubr.f32.vlgmr.msra.gmra.mrb[80].mxu0 %v3785_v39  ;;  %v3801_v13 = vmax.f32 %v3581_v45, 0.0  ;;  %v3498_v39 = vadd.f32 %v12852_v7, %v12966_v4  ;;  %v10703_v7 = vpack.c.bf16 %v676_v23, %v675_v27  ;;  %v3593_v12 = vadd.f32 %v12887_v15, %v12977_v38  ;;  %v710_v15 = vld [vmem:[%s14341_s6 + $0x738] sm:$0xff]  ;;  %v695_v4 = vld [vmem:[%s14341_s6 + $0x6c0] sm:$0xff]  ;;  %v696_v38 = vld [vmem:[%s14341_s6 + $0x6c8] sm:$0xff] }
 0xe0b   :  { %4254 = vmatprep.mubr.f32.mxu1 %v3800_v26  ;;  %4339 = vmatprep.mubr.f32.mxu0 %v3802_v60  ;;  %v725_v26 = vld [vmem:[%s14341_s6 + $0x7b0] sm:$0xff]  ;;  %v726_v60 = vld [vmem:[%s14341_s6 + $0x7b8] sm:$0xff]  ;;  %v3666_v9 = vadd.f32 %v12916_v0, %v13030_v44  ;;  %v3755_v53 = vadd.f32 %v12918_v21, %v13034_v29  ;;  %v3831_v0 = vmax.f32 %v3504_v49, 0.0  ;;  %v679_v27 = vld [vmem:[%s14341_s6 + $0x640] sm:$0xff]  ;;  %v10741_v18 = vpack.c.bf16 %v728_v41, %v727_v25 }
 0xe0c   :  { %10696 = vmatpush3.bf16.msra.mxu1 %v10695_v40  ;;  %10728 = vmatpush3.bf16.msra.mxu0 %v10727_v61  ;;  %v10705_v40 = vpack.c.bf16 %v694_v43, %v693_v1  ;;  %v10737_v61 = vpack.c.bf16 %v726_v60, %v725_v26  ;;  %v3815_v45 = vmax.f32 %v3498_v39, 0.0  ;;  %v3833_v24 = vmax.f32 %v3593_v12, 0.0  ;;  %v680_v23 = vld [vmem:[%s14341_s6 + $0x648] sm:$0xff]  ;;  %v698_v39 = vld [vmem:[%s14341_s6 + $0x6d8] sm:$0xff]  ;;  %v729_v20 = vld [vmem:[%s14341_s6 + $0x7d0] sm:$0xff] }
 0xe0d   :  { %10698 = vmatprep.subr.bf16.mxu1 %v10697_v47  ;;  %10730 = vmatprep.subr.bf16.mxu0 %v10729_v48  ;;  %v3832_v47 = vmax.f32 %v3506_v42, 0.0  ;;  %v3834_v48 = vmax.f32 %v3595_v37, 0.0  ;;  %v712_v1 = vld [vmem:[%s14341_s6 + $0x748] sm:$0xff]  ;;  %v730_v43 = vld [vmem:[%s14341_s6 + $0x7d8] sm:$0xff]  ;;  %v10711_v26 = vpack.c.bf16 %v680_v23, %v679_v27  ;;  %v3022_v25 = vrot.slane %v12783_v3, %v12697_v52 }
 0xe0e   :  { %4255 = vmatmul.mubr.f32.gmra.mrb[82].mxu1 %v3799_v33  ;;  %4340 = vmatmul.mubr.f32.gmra.mrb[82].mxu0 %v3801_v13  ;;  %v677_v33 = vld [vmem:[%s14341_s6 + $0x630] sm:$0xff]  ;;  %v10743_v60 = vpack.c.bf16 %v712_v1, %v711_v11  ;;  %v10745_v37 = vpack.c.bf16 %v730_v43, %v729_v20  ;;  %v686_v23 = vld [vmem:[%s14341_s6 + $0x678] sm:$0xff] }
 0xe0f   :  { %4259 = vmatprep.mubr.f32.mxu1 %v3816_v6  ;;  %4344 = vmatprep.mubr.f32.mxu0 %v3818_v46  ;;  %v10707_v21 = vpack.c.bf16 %v678_v35, %v677_v33  ;;  %v697_v13 = vld [vmem:[%s14341_s6 + $0x6d0] sm:$0xff]  ;;  %v682_v46 = vld [vmem:[%s14341_s6 + $0x658] sm:$0xff]  ;;  %v683_v33 = vld [vmem:[%s14341_s6 + $0x660] sm:$0xff]  ;;  %v3664_v11 = vadd.f32 %v12912_v36, %v3022_v25  ;;  %v3670_v43 = vadd.f32 %v12928_v59, %v3022_v25 }
 0xe10   :  { %10700 = vmatpush3.bf16.msra.mxu1 %v10699_v14  ;;  %10732 = vmatpush3.bf16.msra.mxu0 %v10731_v30  ;;  %v10739_v14 = vpack.c.bf16 %v710_v15, %v709_v54  ;;  %v3788_v30 = vmax.f32 %v3666_v9, 0.0  ;;  %v681_v6 = vld [vmem:[%s14341_s6 + $0x650] sm:$0xff]  ;;  %v10713_v42 = vpack.c.bf16 %v698_v39, %v697_v13  ;;  %v684_v35 = vld [vmem:[%s14341_s6 + $0x668] sm:$0xff]  ;;  %v715_v9 = vld [vmem:[%s14341_s6 + $0x760] sm:$0xff]  ;;  %v3761_v13 = vadd.f32 %v12934_v57, %v13034_v29 }
 0xe11   :  { %10702 = vmatprep.subr.bf16.mxu1 %v10701_v56  ;;  %10734 = vmatprep.subr.bf16.mxu0 %v10733_v62  ;;  %v3790_v56 = vmax.f32 %v3755_v53, 0.0  ;;  %v10709_v62 = vpack.c.bf16 %v696_v38, %v695_v4  ;;  %v10715_v49 = vpack.c.bf16 %v682_v46, %v681_v6  ;;  %v716_v53 = vld [vmem:[%s14341_s6 + $0x768] sm:$0xff]  ;;  %v701_v54 = vld [vmem:[%s14341_s6 + $0x6f0] sm:$0xff]  ;;  %v702_v15 = vld [vmem:[%s14341_s6 + $0x6f8] sm:$0xff]  ;;  %v10719_v41 = vpack.c.bf16 %v684_v35, %v683_v33 }
 0xe12   :  { %4260 = vmatmul.mubr.f32.gmra.mrb[84].mxu1 %v3815_v45  ;;  %4345 = vmatmul.mubr.f32.gmra.mrb[84].mxu0 %v3817_v55  ;;  %v731_v45 = vld [vmem:[%s14341_s6 + $0x7e0] sm:$0xff]  ;;  %v732_v55 = vld [vmem:[%s14341_s6 + $0x7e8] sm:$0xff]  ;;  %v733_v4 = vld [vmem:[%s14341_s6 + $0x7f0] sm:$0xff]  ;;  %v3787_v39 = vmax.f32 %v3664_v11, 0.0  ;;  %v3806_v36 = vmax.f32 %v3761_v13, 0.0  ;;  %v3767_v6 = vadd.f32 %v12950_v32, %v13034_v29  ;;  %v3676_v46 = vadd.f32 %v12944_v50, %v3022_v25 }
 0xe13   :  { %4264 = vmatprep.mubr.f32.mxu1 %v3832_v47  ;;  %4349 = vmatprep.mubr.f32.mxu0 %v3834_v48  ;;  %v10749_v48 = vpack.c.bf16 %v732_v55, %v731_v45  ;;  %v734_v38 = vld [vmem:[%s14341_s6 + $0x7f8] sm:$0xff] }
 0xe14   :  { %10704 = vmatpush3.bf16.msra.mxu1 %v10703_v7  ;;  %10736 = vmatpush3.bf16.msra.mxu0 %v10735_v5  ;;  %v713_v7 = vld [vmem:[%s14341_s6 + $0x750] sm:$0xff]  ;;  %v714_v5 = vld [vmem:[%s14341_s6 + $0x758] sm:$0xff]  ;;  %v10753_v27 = vpack.c.bf16 %v734_v38, %v733_v4  ;;  %v3819_v32 = vmax.f32 %v3676_v46, 0.0 }
 0xe15   :  { %10706 = vmatprep.subr.bf16.mxu1 %v10705_v40  ;;  %10738 = vmatprep.subr.bf16.mxu0 %v10737_v61  ;;  %v699_v40 = vld [vmem:[%s14341_s6 + $0x6e0] sm:$0xff]  ;;  %v700_v61 = vld [vmem:[%s14341_s6 + $0x6e8] sm:$0xff]  ;;  %v10747_v12 = vpack.c.bf16 %v714_v5, %v713_v7  ;;  %v3682_v5 = vadd.f32 %v12960_v22, %v3022_v25 }
 0xe16   :  { %4265 = vmatmul.mubr.f32.gmra.mrb[86].mxu1 %v3831_v0  ;;  %4350 = vmatmul.mubr.f32.gmra.mrb[86].mxu0 %v3833_v24  ;;  %v10717_v47 = vpack.c.bf16 %v700_v61, %v699_v40  ;;  %v10751_v0 = vpack.c.bf16 %v716_v53, %v715_v9  ;;  %v685_v24 = vld [vmem:[%s14341_s6 + $0x670] sm:$0xff]  ;;  %v8987_v61 = vld [vmem:[%s14348_s10] ss:$0 sm:$0xff] }
 0xe17   :  { %4419 = vmatprep.mubr.f32.mxu1 %v3788_v30  ;;  %4504 = vmatprep.mubr.f32.mxu0 %v3790_v56  ;;  %v717_v30 = vld [vmem:[%s14341_s6 + $0x770] sm:$0xff]  ;;  %v718_v56 = vld [vmem:[%s14341_s6 + $0x778] sm:$0xff] }
 0xe18   :  { %10708 = vmatpush3.bf16.msra.mxu1 %v10707_v21  ;;  %10740 = vmatpush3.bf16.msra.mxu0 %v10739_v14  ;;  %v3030_v21 = vrot.slane %v12783_v3, %v12706_v19  ;;  %v10721_v14 = vpack.c.bf16 %v702_v15, %v701_v54  ;;  %v3672_v3 = vadd.f32 %v12932_v28, %v13030_v44  ;;  %v3803_v28 = vmax.f32 %v3670_v43, 0.0 }
 0xe19   :  { %10710 = vmatprep.subr.bf16.mxu1 %v10709_v62  ;;  %10742 = vmatprep.subr.bf16.mxu0 %v10741_v18  ;;  %v10723_v62 = vpack.c.bf16 %v686_v23, %v685_v24  ;;  %v10755_v18 = vpack.c.bf16 %v718_v56, %v717_v30 }
 0xe1a   :  { %v3753_v1 = vadd.f32 %v12914_v8, %v3030_v21  ;;  %v3678_v8 = vadd.f32 %v12948_v31, %v13030_v44  ;;  %v3765_v59 = vadd.f32 %v12946_v51, %v3030_v21  ;;  %v3773_v31 = vadd.f32 %v12970_v17, %v13034_v29 }
 0xe1b   :  { %v3771_v50 = vadd.f32 %v12962_v10, %v3030_v21 }
 0xe1c   :  { %10712 = vmatpush3.bf16.msra.mxu1 %v10711_v26  ;;  %10744 = vmatpush3.bf16.msra.mxu0 %v10743_v60  ;;  %v3789_v20 = vmax.f32 %v3753_v1, 0.0  ;;  %v3759_v26 = vadd.f32 %v12930_v58, %v3030_v21  ;;  %v3804_v60 = vmax.f32 %v3672_v3, 0.0  ;;  %v3822_v58 = vmax.f32 %v3767_v6, 0.0 }
 0xe1d   :  { %10714 = vmatprep.subr.bf16.mxu1 %v10713_v42  ;;  %10746 = vmatprep.subr.bf16.mxu0 %v10745_v37  ;;  %v3820_v42 = vmax.f32 %v3678_v8, 0.0  ;;  %v3684_v37 = vadd.f32 %v12968_v2, %v13030_v44  ;;  %v3821_v7 = vmax.f32 %v3765_v59, 0.0  ;;  %v3838_v40 = vmax.f32 %v3773_v31, 0.0 }
 0xe1e   :  { %v3805_v57 = vmax.f32 %v3759_v26, 0.0  ;;  %v3835_v2 = vmax.f32 %v3682_v5, 0.0  ;;  %v3837_v44 = vmax.f32 %v3771_v50, 0.0 }
 0xe1f   :  { %v3836_v51 = vmax.f32 %v3684_v37, 0.0 }
 0xe20   :  { %10716 = vmatpush3.bf16.msra.mxu1 %v10715_v49  ;;  %10748 = vmatpush3.bf16.msra.mxu0 %v10747_v12 }
 0xe21   :  { %10718 = vmatprep.subr.bf16.mxu1 %v10717_v47  ;;  %10750 = vmatprep.subr.bf16.mxu0 %v10749_v48 }
 0xe24   :  { %10720 = vmatpush3.bf16.msra.mxu1 %v10719_v41  ;;  %10752 = vmatpush3.bf16.msra.mxu0 %v10751_v0 }
 0xe25   :  { %10722 = vmatprep.subr.bf16.mxu1 %v10721_v14  ;;  %10754 = vmatprep.subr.bf16.mxu0 %v10753_v27 }
 0xe28   :  { %10724 = vmatpush3.bf16.msra.mxu1 %v10723_v62  ;;  %10756 = vmatpush3.bf16.msra.mxu0 %v10755_v18 }
 0xe2b   :  { %4420 = vmatmul.mubr.f32.vlgmr.msra.gmra.mrb[88].mxu1 %v3787_v39  ;;  %4505 = vmatmul.mubr.f32.vlgmr.msra.gmra.mrb[88].mxu0 %v3789_v20 }
 0xe2c   :  { %4424 = vmatprep.mubr.f32.mxu1 %v3804_v60  ;;  %4509 = vmatprep.mubr.f32.mxu0 %v3806_v36 }
 0xe2f   :  { %4425 = vmatmul.mubr.f32.gmra.mrb[90].mxu1 %v3803_v28  ;;  %4510 = vmatmul.mubr.f32.gmra.mrb[90].mxu0 %v3805_v57 }
 0xe30   :  { %4429 = vmatprep.mubr.f32.mxu1 %v3820_v42  ;;  %4514 = vmatprep.mubr.f32.mxu0 %v3822_v58 }
 0xe33   :  { %4430 = vmatmul.mubr.f32.gmra.mrb[92].mxu1 %v3819_v32  ;;  %4515 = vmatmul.mubr.f32.gmra.mrb[92].mxu0 %v3821_v7 }
 0xe34   :  { %4434 = vmatprep.mubr.f32.mxu1 %v3836_v51  ;;  %4519 = vmatprep.mubr.f32.mxu0 %v3838_v40 }
 0xe37   :  { %4435 = vmatmul.mubr.f32.gmra.mrb[94].mxu1 %v3835_v2  ;;  %4520 = vmatmul.mubr.f32.gmra.mrb[94].mxu0 %v3837_v44 }
 0xe9c   :  { %v9221_v17 = vpop.f32.mrb[64].mxu1  ;;  %v9265_v29 = vpop.f32.mrb[64].mxu0 }
 0xe9d   :  { %v9222_v45 = vpop.f32.mrb[65].mxu1  ;;  %v9266_v55 = vpop.f32.mrb[65].mxu0 }
 0xe9e   :  { %v9223_v49 = vadd.f32 %v9222_v45, %v9221_v17  ;;  %v9267_v12 = vadd.f32 %v9266_v55, %v9265_v29 }
 0xea0   :  { %v3912_v22 = vadd.f32 %v9223_v49, %v8987_v61  ;;  %v9224_v33 = vpop.f32.mrb[66].mxu1  ;;  %v9268_v10 = vpop.f32.mrb[66].mxu0 }
 0xea1   :  { %v9225_v35 = vpop.f32.mrb[67].mxu1  ;;  %v9269_v47 = vpop.f32.mrb[67].mxu0 }
 0xea2   :  { %v3997_v48 = vadd.f32 %v9267_v12, %v3912_v22  ;;  %v9226_v9 = vadd.f32 %v9225_v35, %v9224_v33  ;;  %v9270_v53 = vadd.f32 %v9269_v47, %v9268_v10 }
 0xea4   :  { %v3917_v54 = vadd.f32 %v9226_v9, %v8987_v61  ;;  %v9227_v15 = vpop.f32.mrb[68].mxu1  ;;  %v9271_v4 = vpop.f32.mrb[68].mxu0 }
 0xea5   :  { %v9228_v38 = vpop.f32.mrb[69].mxu1  ;;  %v9272_v25 = vpop.f32.mrb[69].mxu0 }
 0xea6   :  { %v4002_v41 = vadd.f32 %v9270_v53, %v3917_v54  ;;  %v9229_v0 = vadd.f32 %v9228_v38, %v9227_v15  ;;  %v9273_v24 = vadd.f32 %v9272_v25, %v9271_v4 }
 0xea8   :  { %v3922_v21 = vadd.f32 %v9229_v0, %v8987_v61  ;;  %v9230_v14 = vpop.f32.mrb[70].mxu1  ;;  %v9274_v27 = vpop.f32.mrb[70].mxu0 }
 0xea9   :  { %v9231_v23 = vpop.f32.mrb[71].mxu1  ;;  %v9275_v30 = vpop.f32.mrb[71].mxu0 }
 0xeaa   :  { %v4007_v56 = vadd.f32 %v9273_v24, %v3922_v21  ;;  %v9232_v62 = vadd.f32 %v9231_v23, %v9230_v14  ;;  %v9276_v18 = vadd.f32 %v9275_v30, %v9274_v27 }
 0xeac   :  { %v3927_v11 = vadd.f32 %v9232_v62, %v8987_v61 }
 0xeae   :  { %v4012_v1 = vadd.f32 %v9276_v18, %v3927_v11 }
 0xebc   :  { %v9309_v3 = vpop.f32.mrb[72].mxu1  ;;  %v9353_v13 = vpop.f32.mrb[72].mxu0 }
 0xebd   :  { %v9310_v39 = vpop.f32.mrb[73].mxu1  ;;  %v9354_v20 = vpop.f32.mrb[73].mxu0 }
 0xebe   :  { %v9311_v43 = vadd.f32 %v9310_v39, %v9309_v3  ;;  %v9355_v26 = vadd.f32 %v9354_v20, %v9353_v13 }
 0xec0   :  { %v4082_v60 = vadd.f32 %v9311_v43, %v3997_v48  ;;  %v9312_v36 = vpop.f32.mrb[74].mxu1  ;;  %v9356_v8 = vpop.f32.mrb[74].mxu0 }
 0xec1   :  { %v9313_v6 = vpop.f32.mrb[75].mxu1  ;;  %v9357_v28 = vpop.f32.mrb[75].mxu0 }
 0xec2   :  { %v4167_v57 = vadd.f32 %v9355_v26, %v4082_v60  ;;  %v9314_v46 = vadd.f32 %v9313_v6, %v9312_v36  ;;  %v9358_v59 = vadd.f32 %v9357_v28, %v9356_v8 }
 0xec4   :  { %v4087_v42 = vadd.f32 %v9314_v46, %v4002_v41  ;;  %v9315_v58 = vpop.f32.mrb[76].mxu1  ;;  %v9359_v37 = vpop.f32.mrb[76].mxu0 }
 0xec5   :  { %v9316_v31 = vpop.f32.mrb[77].mxu1  ;;  %v9360_v32 = vpop.f32.mrb[77].mxu0 }
 0xec6   :  { %v4172_v7 = vadd.f32 %v9358_v59, %v4087_v42  ;;  %v9317_v5 = vadd.f32 %v9316_v31, %v9315_v58  ;;  %v9361_v50 = vadd.f32 %v9360_v32, %v9359_v37 }
 0xec8   :  { %v4092_v51 = vadd.f32 %v9317_v5, %v4007_v56  ;;  %v9318_v40 = vpop.f32.mrb[78].mxu1  ;;  %v9362_v2 = vpop.f32.mrb[78].mxu0 }
 0xec9   :  { %v9319_v44 = vpop.f32.mrb[79].mxu1  ;;  %v9363_v17 = vpop.f32.mrb[79].mxu0 }
 0xeca   :  { %v4177_v29 = vadd.f32 %v9361_v50, %v4092_v51  ;;  %v9320_v61 = vadd.f32 %v9319_v44, %v9318_v40  ;;  %v9364_v45 = vadd.f32 %v9363_v17, %v9362_v2 }
 0xecc   :  { %v4097_v55 = vadd.f32 %v9320_v61, %v4012_v1 }
 0xece   :  { %v4182_v49 = vadd.f32 %v9364_v45, %v4097_v55 }
 0xedd   :  { %v9397_v12 = vpop.f32.mrb[80].mxu1  ;;  %v9441_v22 = vpop.f32.mrb[80].mxu0 }
 0xede   :  { %v9398_v33 = vpop.f32.mrb[81].mxu1  ;;  %v9442_v10 = vpop.f32.mrb[81].mxu0 }
 0xedf   :  { %v9399_v35 = vadd.f32 %v9398_v33, %v9397_v12  ;;  %v9443_v47 = vadd.f32 %v9442_v10, %v9441_v22 }
 0xee1   :  { %v4252_v48 = vadd.f32 %v9399_v35, %v4167_v57  ;;  %v9400_v9 = vpop.f32.mrb[82].mxu1  ;;  %v9444_v53 = vpop.f32.mrb[82].mxu0 }
 0xee2   :  { %v9401_v54 = vpop.f32.mrb[83].mxu1  ;;  %v9445_v15 = vpop.f32.mrb[83].mxu0 }
 0xee3   :  { %v4337_v4 = vadd.f32 %v9443_v47, %v4252_v48  ;;  %v9402_v38 = vadd.f32 %v9401_v54, %v9400_v9  ;;  %v9446_v25 = vadd.f32 %v9445_v15, %v9444_v53  ;;  %v14349_v9 = vld [vmem:[#allocation65_spill] sm:$0xff] }
 0xee5   :  { %v4257_v41 = vadd.f32 %v9402_v38, %v4172_v7  ;;  %v9403_v0 = vpop.f32.mrb[84].mxu1  ;;  %v9447_v24 = vpop.f32.mrb[84].mxu0 }
 0xee6   :  { %v9404_v21 = vpop.f32.mrb[85].mxu1  ;;  %v9448_v14 = vpop.f32.mrb[85].mxu0 }
 0xee7   :  { %v4342_v27 = vadd.f32 %v9446_v25, %v4257_v41  ;;  %v9405_v23 = vadd.f32 %v9404_v21, %v9403_v0  ;;  %v9449_v30 = vadd.f32 %v9448_v14, %v9447_v24 }
 0xee9   :  { %v4262_v56 = vadd.f32 %v9405_v23, %v4177_v29  ;;  %v9406_v62 = vpop.f32.mrb[86].mxu1  ;;  %v9450_v18 = vpop.f32.mrb[86].mxu0 }
 0xeea   :  { %v9407_v11 = vpop.f32.mrb[87].mxu1  ;;  %v9451_v1 = vpop.f32.mrb[87].mxu0 }
 0xeeb   :  { %v4347_v3 = vadd.f32 %v9449_v30, %v4262_v56  ;;  %v9408_v13 = vadd.f32 %v9407_v11, %v9406_v62  ;;  %v9452_v39 = vadd.f32 %v9451_v1, %v9450_v18 }
 0xeed   :  { %v4267_v20 = vadd.f32 %v9408_v13, %v4182_v49 }
 0xeef   :  { %v4352_v43 = vadd.f32 %v9452_v39, %v4267_v20 }
 0xefe   :  { %v9485_v26 = vpop.f32.mrb[88].mxu1  ;;  %v9529_v60 = vpop.f32.mrb[88].mxu0 }
 0xeff   :  { %v9486_v36 = vpop.f32.mrb[89].mxu1  ;;  %v9530_v8 = vpop.f32.mrb[89].mxu0 }
 0xf00   :  { %v9487_v6 = vadd.f32 %v9486_v36, %v9485_v26  ;;  %v9531_v28 = vadd.f32 %v9530_v8, %v9529_v60  ;;  %v4605_v60 = vld [vmem:[%s14351_s30] sm:$0xff]  ;;  %v4606_v36 = vld [vmem:[%s14351_s30 + $0x8] sm:$0xff] }
 0xf01   :  { %v4601_v8 = vld [vmem:[%s14352_s11] sm:$0xff] }
 0xf02   :  { %v4422_v57 = vadd.f32 %v9487_v6, %v4337_v4  ;;  %v9488_v46 = vpop.f32.mrb[90].mxu1  ;;  %v9532_v59 = vpop.f32.mrb[90].mxu0  ;;  %v14350_v4 = vld [vmem:[#allocation66_spill] sm:$0xff]  ;;  %v10765_v6 = vpack.c.bf16 %v4606_v36, %v4605_v60 }
 0xf03   :  { %v9489_v42 = vpop.f32.mrb[91].mxu1  ;;  %v9533_v58 = vpop.f32.mrb[91].mxu0 }
 0xf04   :  { %v4507_v37 = vadd.f32 %v9531_v28, %v4422_v57  ;;  %v9490_v31 = vadd.f32 %v9489_v42, %v9488_v46  ;;  %v9534_v32 = vadd.f32 %v9533_v58, %v9532_v59  ;;  %v4602_v28 = vld [vmem:[%s14352_s11 + $0x8] sm:$0xff]  ;;  %10766 = vmatprep.subr.bf16.mxu0 %v10765_v6  ;;  %v4603_v46 = vld [vmem:[%s14352_s11 + $0x10] sm:$0xff]  ;;  %v4604_v59 = vld [vmem:[%s14352_s11 + $0x18] sm:$0xff] }
 0xf05   :  { %v10757_v57 = vpack.c.bf16 %v4602_v28, %v4601_v8  ;;  %10768 = vmatpush3.bf16.msra.mxu0 %v10765_v6  ;;  %v10761_v42 = vpack.c.bf16 %v4604_v59, %v4603_v46  ;;  %v4607_v58 = vld [vmem:[%s14351_s30 + $0x10] sm:$0xff]  ;;  %v9000_v28 = vld [vmem:[%s14359_s9] ss:$0 sm:$0xff] }
 0xf06   :  { %v4427_v7 = vadd.f32 %v9490_v31, %v4342_v27  ;;  %v9491_v5 = vpop.f32.mrb[92].mxu1  ;;  %v9535_v50 = vpop.f32.mrb[92].mxu0  ;;  %v4525_v51 = vadd.f32 %v4507_v37, %v12322_v16  ;;  %v4608_v37 = vld [vmem:[%s14351_s30 + $0x18] sm:$0xff] }
 0xf07   :  { %v9492_v40 = vpop.f32.mrb[93].mxu1  ;;  %v9536_v2 = vpop.f32.mrb[93].mxu0  ;;  %10758 = vmatprep.subr.bf16.mxu1 %v10757_v57  ;;  %v10769_v31 = vpack.c.bf16 %v4608_v37, %v4607_v58 }
 0xf08   :  { %v4512_v44 = vadd.f32 %v9534_v32, %v4427_v7  ;;  %v9493_v17 = vadd.f32 %v9492_v40, %v9491_v5  ;;  %v9537_v29 = vadd.f32 %v9536_v2, %v9535_v50  ;;  %v4529_v61 = vsel %vm744_vm0, %v4525_v51, 0.0  ;;  %10760 = vmatpush3.bf16.msra.mxu1 %v10757_v57  ;;  %v4609_v7 = vld [vmem:[%s14353_s25] sm:$0xff]  ;;  %v4610_v5 = vld [vmem:[%s14353_s25 + $0x8] sm:$0xff] }
 0xf09   :  { %4530 = vadd.xlane.f32.xlu0 %v4529_v61  ;;  %10762 = vmatprep.subr.bf16.mxu1 %v10761_v42  ;;  %v14354_v32 = vmov 0.0   ;;  %v10773_v50 = vpack.c.bf16 %v4610_v5, %v4609_v7 }
 0xf0a   :  { %v4432_v45 = vadd.f32 %v9493_v17, %v4347_v3  ;;  %v9494_v55 = vpop.f32.mrb[94].mxu1  ;;  %v9538_v49 = vpop.f32.mrb[94].mxu0  ;;  %v4526_v12 = vadd.f32 %v4512_v44, %v12338_v34  ;;  %10770 = vmatprep.subr.bf16.mxu0 %v10769_v31 }
 0xf0b   :  { %v9495_v22 = vpop.f32.mrb[95].mxu1  ;;  %v9539_v33 = vpop.f32.mrb[95].mxu0  ;;  %10772 = vmatpush3.bf16.msra.mxu0 %v10769_v31 }
 0xf0c   :  { %v4517_v10 = vadd.f32 %v9537_v29, %v4432_v45  ;;  %v9496_v35 = vadd.f32 %v9495_v22, %v9494_v55  ;;  %v9540_v47 = vadd.f32 %v9539_v33, %v9538_v49  ;;  %v4532_v16 = vsel %vm744_vm0, %v4526_v12, 0.0  ;;  %10764 = vmatpush3.bf16.msra.mxu1 %v10761_v42  ;;  %10223 = vmatprep.subr.mxu0 %v14354_v32 }
 0xf0d   :  { %4533 = vadd.xlane.f32.xlu1 %v4532_v16  ;;  %10774 = vmatprep.subr.bf16.mxu1 %v10773_v50 }
 0xf0e   :  { %v4437_v48 = vadd.f32 %v9496_v35, %v4352_v43  ;;  %v4527_v53 = vadd.f32 %v4517_v10, %v14349_v9  ;;  %v8988_v10 = vld [vmem:[%s14355_s15] ss:$0 sm:$0xff] }
 0xf10   :  { %v4522_v54 = vadd.f32 %v9540_v47, %v4437_v48  ;;  %v4535_v15 = vsel %vm744_vm0, %v4527_v53, 0.0  ;;  %v8989_v47 = vld [vmem:[%s14356_s16] ss:$0 sm:$0xff] }
 0xf11   :  { %4536 = vadd.xlane.f32.xlu0 %v4535_v15  ;;  %v4612_v15 = vld [vmem:[%s14353_s25 + $0x18] sm:$0xff] }
 0xf12   :  { %v4528_v38 = vadd.f32 %v4522_v54, %v14350_v4  ;;  %v4611_v54 = vld [vmem:[%s14353_s25 + $0x10] sm:$0xff] }
 0xf14   :  { %v4538_v25 = vsel %vm744_vm0, %v4528_v38, 0.0 }
 0xf15   :  { %4539 = vadd.xlane.f32.xlu1 %v4538_v25 }
 0xf96   :  { %v4531_v34 = vpop.xlane.xlu0 %4530 }
 0xf97   :  { %v4541_v41 = vmul.f32 0.03125, %v4531_v34 }
 0xf99   :  { %v13132_v0 = vsub.f32 %v4525_v51, %v4541_v41  ;;  %v10777_v41 = vpack.c.bf16 %v4612_v15, %v4611_v54 }
 0xf9a   :  { %v4534_v24 = vpop.xlane.xlu1 %4533 }
 0xf9b   :  { %v4542_v21 = vmul.f32 0.03125, %v4534_v24  ;;  %v4549_v14 = vmul.f32 %v13132_v0, %v13132_v0 }
 0xf9d   :  { %v13136_v27 = vsub.f32 %v4526_v12, %v4542_v21  ;;  %v4553_v23 = vsel %vm744_vm0, %v4549_v14, 0.0 }
 0xf9e   :  { %4554 = vadd.xlane.f32.xlu0 %v4553_v23  ;;  %v4537_v30 = vpop.xlane.xlu0 %4536 }
 0xf9f   :  { %v4543_v56 = vmul.f32 0.03125, %v4537_v30  ;;  %v4550_v62 = vmul.f32 %v13136_v27, %v13136_v27  ;;  %v8995_v30 = vld [vmem:[%s14357_s18] ss:$0 sm:$0xff] }
 0xfa1   :  { %v13141_v18 = vsub.f32 %v4527_v53, %v4543_v56  ;;  %v4556_v11 = vsel %vm744_vm0, %v4550_v62, 0.0 }
 0xfa2   :  { %4557 = vadd.xlane.f32.xlu1 %v4556_v11  ;;  %v4540_v1 = vpop.xlane.xlu1 %4539 }
 0xfa3   :  { %v4544_v3 = vmul.f32 0.03125, %v4540_v1  ;;  %v4551_v13 = vmul.f32 %v13141_v18, %v13141_v18 }
 0xfa5   :  { %v13146_v39 = vsub.f32 %v4528_v38, %v4544_v3  ;;  %v4559_v20 = vsel %vm744_vm0, %v4551_v13, 0.0 }
 0xfa6   :  { %4560 = vadd.xlane.f32.xlu0 %v4559_v20 }
 0xfa7   :  { %v4552_v43 = vmul.f32 %v13146_v39, %v13146_v39 }
 0xfa9   :  { %v4562_v26 = vsel %vm744_vm0, %v4552_v43, 0.0 }
 0xfaa   :  { %4563 = vadd.xlane.f32.xlu1 %v4562_v26 }
0x102b   :  { %v4555_v51 = vpop.xlane.xlu0 %4554 }
0x102c   :  { %v4565_v40 = vmul.f32 0.03125, %v4555_v51 }
0x102e   :  { %v4569_v2 = vadd.f32 1e-05, %v4565_v40 }
0x102f   :  { %v4558_v44 = vpop.xlane.xlu1 %4557 }
0x1030   :  { %11261 = vrsqrt.f32 %v4569_v2  ;;  %v4566_v17 = vmul.f32 0.03125, %v4558_v44 }
0x1032   :  { %v4570_v29 = vadd.f32 1e-05, %v4566_v17 }
0x1033   :  { %v4561_v61 = vpop.xlane.xlu0 %4560 }
0x1034   :  { %11263 = vrsqrt.f32 %v4570_v29  ;;  %v4567_v45 = vmul.f32 0.03125, %v4561_v61 }
0x1036   :  { %v4571_v55 = vadd.f32 1e-05, %v4567_v45 }
0x1037   :  { %v4564_v49 = vpop.xlane.xlu1 %4563 }
0x1038   :  { %11265 = vrsqrt.f32 %v4571_v55  ;;  %v4568_v12 = vmul.f32 0.03125, %v4564_v49 }
0x103a   :  { %v11262_v22 = vpop.eup %11261  ;;  %v4572_v33 = vadd.f32 1e-05, %v4568_v12 }
0x103b   :  { %v4577_v35 = vmul.f32 %v11262_v22, %v13132_v0 }
0x103c   :  { %11267 = vrsqrt.f32 %v4572_v33 }
0x103d   :  { %v4587_v16 = vmul.f32 %v8988_v10, %v4577_v35 }
0x103e   :  { %v11264_v48 = vpop.eup %11263 }
0x103f   :  { %v4578_v9 = vmul.f32 %v11264_v48, %v13136_v27  ;;  %v13167_v53 = vadd.f32 %v8989_v47, %v4587_v16 }
0x1041   :  { %v4588_v4 = vmul.f32 %v8988_v10, %v4578_v9  ;;  %10189 = vmatprep.mubr.msk.f32.mxu1 %vm744_vm0, %v13167_v53  ;;  %10203 = vmatprep.mubr.msk.f32.mxu0 %vm744_vm0, %v13167_v53 }
0x1042   :  { %v11266_v38 = vpop.eup %11265 }
0x1043   :  { %v13175_v25 = vadd.f32 %v8989_v47, %v4588_v4  ;;  %v4579_v34 = vmul.f32 %v11266_v38, %v13141_v18  ;;  %v8990_v18 = vld [vmem:[%s14358_s14] ss:$0 sm:$0xff] }
0x1045   :  { %10190 = vmatmul.mubr.msk.f32.vlgmr.msra.gmra.mrb[96].mxu1 %vm744_vm0, %v13175_v25  ;;  %10204 = vmatmul.mubr.msk.f32.vlgmr.msra.gmra.mrb[96].mxu0 %vm744_vm0, %v13175_v25  ;;  %v4589_v0 = vmul.f32 %v8988_v10, %v4579_v34 }
0x1046   :  { %v11268_v24 = vpop.eup %11267  ;;  %10776 = vmatpush3.bf16.msra.mxu1 %v10773_v50 }
0x1047   :  { %v13182_v21 = vadd.f32 %v8989_v47, %v4589_v0  ;;  %v4580_v14 = vmul.f32 %v11268_v24, %v13146_v39  ;;  %10778 = vmatprep.subr.bf16.mxu1 %v10777_v41 }
0x1049   :  { %10192 = vmatprep.mubr.msk.f32.mxu1 %vm744_vm0, %v13182_v21  ;;  %10206 = vmatprep.mubr.msk.f32.mxu0 %vm744_vm0, %v13182_v21  ;;  %v4590_v27 = vmul.f32 %v8988_v10, %v4580_v14 }
0x104a   :  { %10780 = vmatpush3.bf16.msra.mxu1 %v10777_v41 }
0x104b   :  { %v13189_v23 = vadd.f32 %v8989_v47, %v4590_v27  ;;  %10228 = vmatprep.subr.mxu1 %v14354_v32 }
0x104d   :  { %10193 = vmatmul.mubr.msk.f32.gmra.mrb[98].mxu1 %vm744_vm0, %v13189_v23  ;;  %10207 = vmatmul.mubr.msk.f32.gmra.mrb[98].mxu0 %vm744_vm0, %v13189_v23 }
0x104e   :  { %10217 = vmatprep.mubr.msk.f32.mxu1 %vm744_vm0, %v13167_v53  ;;  %10225 = vmatprep.mubr.msk.f32.mxu0 %vm11674_vm1, %v14354_v32 }
0x1051   :  { %10218 = vmatmul.mubr.msk.f32.vlgmr.msra.gmra.mrb[100].mxu1 %vm744_vm0, %v13175_v25 }
0x1052   :  { %10220 = vmatprep.mubr.msk.f32.mxu1 %vm744_vm0, %v13182_v21 }
0x1055   :  { %10221 = vmatmul.mubr.msk.f32.gmra.mrb[102].mxu1 %vm744_vm0, %v13189_v23 }
0x1056   :  { %10230 = vmatprep.mubr.msk.f32.mxu1 %vm11674_vm1, %v14354_v32 }
0x1118   :  { %v10191_v56 = vpop.f32.mrb[96].mxu1  ;;  %v10205_v62 = vpop.f32.mrb[96].mxu0 }
0x1119   :  { %v5151_v11 = vadd.f32 %v10205_v62, %v8995_v30  ;;  %v5054_v1 = vpop.f32.mrb[97].mxu1  ;;  %v5145_v3 = vpop.f32.mrb[97].mxu0  ;;  %v5060_v39 = vadd.f32 %v10191_v56, %v8990_v18 }
0x111a   :  { %v5146_v13 = vadd.f32 %v8995_v30, %v5145_v3  ;;  %v5055_v20 = vadd.f32 %v8990_v18, %v5054_v1 }
0x111b   :  { %10229 = vmatpush3.xpose.msk.msra.mxu1 %vm744_vm0, %v5151_v11 }
0x111c   :  { %10224 = vmatpush3.xpose.msk.msra.mxu0 %vm744_vm0, %v5146_v13  ;;  %10238 = vmatprep.subr.mxu1 %v14354_v32 }
0x111d   :  { %10233 = vmatprep.subr.mxu0 %v14354_v32 }
0x111e   :  { %10231 = vmatmul.mubr.msk.f32.vlgmr.msra.gmra.mrb[104].mxu1 %vm744_vm0, %v5060_v39 }
0x111f   :  { %10226 = vmatmul.mubr.msk.f32.vlgmr.msra.gmra.mrb[100].mxu0 %vm744_vm0, %v5055_v20  ;;  %10240 = vmatprep.mubr.msk.f32.mxu1 %vm11674_vm1, %v14354_v32 }
0x1120   :  { %v10194_v43 = vpop.f32.mrb[98].mxu1  ;;  %v10208_v26 = vpop.f32.mrb[98].mxu0  ;;  %10235 = vmatprep.mubr.msk.f32.mxu0 %vm11674_vm1, %v14354_v32 }
0x1121   :  { %v5161_v60 = vadd.f32 %v10208_v26, %v8995_v30  ;;  %v5064_v36 = vpop.f32.mrb[99].mxu1  ;;  %v5155_v8 = vpop.f32.mrb[99].mxu0  ;;  %v5070_v57 = vadd.f32 %v10194_v43, %v8990_v18  ;;  %v4616_v26 = vld [vmem:[%s14360_s22] sm:$0xff] }
0x1122   :  { %v5156_v6 = vadd.f32 %v8995_v30, %v5155_v8  ;;  %v5065_v59 = vadd.f32 %v8990_v18, %v5064_v36 }
0x1123   :  { %10239 = vmatpush3.xpose.msk.msra.mxu1 %vm744_vm0, %v5161_v60  ;;  %v4617_v60 = vld [vmem:[%s14360_s22 + $0x8] sm:$0xff] }
0x1124   :  { %v10219_v46 = vpop.f32.mrb[100].mxu1  ;;  %10234 = vmatpush3.xpose.msk.msra.mxu0 %vm744_vm0, %v5156_v6  ;;  %10248 = vmatprep.subr.mxu1 %v14354_v32 }
0x1125   :  { %v5242_v42 = vadd.f32 %v10219_v46, %v9000_v28  ;;  %v5236_v58 = vpop.f32.mrb[101].mxu1  ;;  %10243 = vmatprep.subr.mxu0 %v14354_v32  ;;  %v4618_v46 = vld [vmem:[%s14360_s22 + $0x10] sm:$0xff] }
0x1126   :  { %v5237_v37 = vadd.f32 %v9000_v28, %v5236_v58  ;;  %10241 = vmatmul.mubr.msk.f32.vlgmr.msra.gmra.mrb[106].mxu1 %vm744_vm0, %v5070_v57  ;;  %v10781_v57 = vpack.c.bf16 %v4617_v60, %v4616_v26  ;;  %v4627_v26 = vld [vmem:[%s14361_s13] sm:$0xff]  ;;  %v4628_v60 = vld [vmem:[%s14361_s13 + $0x8] sm:$0xff] }
0x1127   :  { %10236 = vmatmul.mubr.msk.f32.vlgmr.msra.gmra.mrb[102].mxu0 %vm744_vm0, %v5065_v59  ;;  %10249 = vmatpush3.msra.mxu1 %v5242_v42  ;;  %v4619_v59 = vld [vmem:[%s14360_s22 + $0x18] sm:$0xff] }
0x1128   :  { %v10222_v31 = vpop.f32.mrb[102].mxu1  ;;  %10244 = vmatpush3.msra.mxu0 %v5237_v37  ;;  %10250 = vmatprep.mubr.msk.f32.mxu1 %vm11674_vm1, %v14354_v32 }
0x1129   :  { %v13229_v7 = vadd.f32 %v10222_v31, %v9000_v28  ;;  %v5246_v5 = vpop.f32.mrb[103].mxu1  ;;  %10258 = vmatprep.subr.mxu1 %v14354_v32  ;;  %10245 = vmatprep.mubr.msk.f32.mxu0 %vm11674_vm1, %v14354_v32 }
0x112a   :  { %v13234_v50 = vadd.f32 %v9000_v28, %v5246_v5  ;;  %10253 = vmatprep.subr.mxu0 %v14354_v32  ;;  %v10785_v5 = vpack.c.bf16 %v4619_v59, %v4618_v46  ;;  %v4630_v46 = vld [vmem:[%s14361_s13 + $0x18] sm:$0xff] }
0x11f1   :  { %v5403_v51 = vpop.f32.mrb[104].mxu1 }
0x11f2   :  { %v5560_v40 = vmul.f32 0.17677669, %v5403_v51  ;;  %v5327_v2 = vpop.f32.mrb[100].mxu0  ;;  %v10232_v44 = vpop.f32.mrb[105].mxu1 }
0x11f3   :  { %v5559_v17 = vmul.f32 0.17677669, %v5327_v2  ;;  %v10227_v29 = vpop.f32.mrb[101].mxu0 }
0x11f4   :  { %v5566_v61 = vsel %vm1332_vm2, %v5560_v40, -inf }
0x11f5   :  { %5567 = vmax.xlane.f32.xlu1 %v5566_v61  ;;  %v5563_v45 = vsel %vm1332_vm2, %v5559_v17, -inf  ;;  %v13264_v61 = vld [vmem:[%s14327_s12] sm:$0xff] }
0x11f6   :  { %5564 = vmax.xlane.f32.xlu0 %v5563_v45  ;;  %v9017_v45 = vld [vmem:[#allocation2] ss:$0 sm:$0xff] }
0x11f9   :  { %v5555_v55 = vpop.f32.mrb[106].mxu1 }
0x11fa   :  { %v5562_v49 = vmul.f32 0.17677669, %v5555_v55  ;;  %v5479_v12 = vpop.f32.mrb[102].mxu0  ;;  %v10242_v22 = vpop.f32.mrb[107].mxu1 }
0x11fb   :  { %v5561_v33 = vmul.f32 0.17677669, %v5479_v12  ;;  %v10237_v10 = vpop.f32.mrb[103].mxu0 }
0x11fc   :  { %v5572_v35 = vsel %vm1332_vm2, %v5562_v49, -inf }
0x11fd   :  { %5573 = vmax.xlane.f32.xlu1 %v5572_v35  ;;  %v5569_v47 = vsel %vm1332_vm2, %v5561_v33, -inf }
0x11fe   :  { %5570 = vmax.xlane.f32.xlu0 %v5569_v47 }
0x1282   :  { %v5568_v16 = vpop.xlane.xlu1 %5567 }
0x1283   :  { %v5576_v48 = vsub.f32 %v5560_v40, %v5568_v16  ;;  %v5565_v9 = vpop.xlane.xlu0 %5564 }
0x1284   :  { %v5575_v54 = vsub.f32 %v5559_v17, %v5565_v9 }
0x1285   :  { %v5581_v15 = vmul.f32 1.442695, %v5576_v48 }
0x1286   :  { %v5579_v4 = vmul.f32 1.442695, %v5575_v54 }
0x1287   :  { %11269 = vpow2.f32 %v5581_v15 }
0x1288   :  { %11271 = vpow2.f32 %v5579_v4 }
0x128a   :  { %v5574_v38 = vpop.xlane.xlu1 %5573 }
0x128b   :  { %v5578_v34 = vsub.f32 %v5562_v49, %v5574_v38  ;;  %v5571_v41 = vpop.xlane.xlu0 %5570 }
0x128c   :  { %v5577_v0 = vsub.f32 %v5561_v33, %v5571_v41 }
0x128d   :  { %v5585_v24 = vmul.f32 1.442695, %v5578_v34 }
0x128e   :  { %v5583_v14 = vmul.f32 1.442695, %v5577_v0 }
0x128f   :  { %11273 = vpow2.f32 %v5585_v24 }
0x1290   :  { %11275 = vpow2.f32 %v5583_v14 }
0x1291   :  { %v11270_v27 = vpop.eup %11269 }
0x1292   :  { %v11272_v30 = vpop.eup %11271  ;;  %v5590_v56 = vsel %vm1332_vm2, %v11270_v27, 0.0 }
0x1293   :  { %5591 = vadd.xlane.f32.xlu1 %v5590_v56  ;;  %v5587_v62 = vsel %vm1332_vm2, %v11272_v30, 0.0 }
0x1294   :  { %5588 = vadd.xlane.f32.xlu0 %v5587_v62 }
0x1299   :  { %v11274_v18 = vpop.eup %11273 }
0x129a   :  { %v11276_v11 = vpop.eup %11275  ;;  %v5596_v1 = vsel %vm1332_vm2, %v11274_v18, 0.0 }
0x129b   :  { %5597 = vadd.xlane.f32.xlu1 %v5596_v1  ;;  %v5593_v3 = vsel %vm1332_vm2, %v11276_v11, 0.0 }
0x129c   :  { %5594 = vadd.xlane.f32.xlu0 %v5593_v3 }
0x1320   :  { %v5592_v13 = vpop.xlane.xlu1 %5591 }
0x1321   :  { %11277 = vrcp.f32 %v5592_v13  ;;  %v5589_v39 = vpop.xlane.xlu0 %5588 }
0x1322   :  { %11279 = vrcp.f32 %v5589_v39 }
0x1328   :  { %v5598_v20 = vpop.xlane.xlu1 %5597 }
0x1329   :  { %11281 = vrcp.f32 %v5598_v20  ;;  %v5595_v43 = vpop.xlane.xlu0 %5594 }
0x132a   :  { %11283 = vrcp.f32 %v5595_v43 }
0x132b   :  { %v11278_v36 = vpop.eup %11277 }
0x132c   :  { %v11280_v8 = vpop.eup %11279  ;;  %v5604_v6 = vmul.f32 %v11278_v36, %v11270_v27  ;;  %v10797_v36 = vpack.c.bf16 %v4628_v60, %v4627_v26  ;;  %v9024_v26 = vld [vmem:[#allocation7] ss:$0 sm:$0xff] }
0x132d   :  { %v5603_v28 = vmul.f32 %v11280_v8, %v11272_v30  ;;  %v4623_v8 = vld [vmem:[%s14362_s5] sm:$0xff] }
0x132e   :  { %10251 = vmatmul.mubr.msk.f32.vlgmr.msra.gmra.mrb[108].mxu1 %vm1332_vm2, %v5604_v6  ;;  %v4624_v6 = vld [vmem:[%s14362_s5 + $0x8] sm:$0xff] }
0x132f   :  { %10259 = vmatpush3.msra.mxu1 %v13229_v7  ;;  %10246 = vmatmul.mubr.msk.f32.vlgmr.msra.gmra.mrb[104].mxu0 %vm1332_vm2, %v5603_v28  ;;  %v4629_v28 = vld [vmem:[%s14361_s13 + $0x10] sm:$0xff] }
0x1330   :  { %10254 = vmatpush3.msra.mxu0 %v13234_v50  ;;  %10260 = vmatprep.mubr.msk.f32.mxu1 %vm11674_vm1, %v14354_v32  ;;  %v10801_v59 = vpack.c.bf16 %v4630_v46, %v4629_v28 }
0x1331   :  { %10255 = vmatprep.mubr.msk.f32.mxu0 %vm11674_vm1, %v14354_v32  ;;  %10782 = vmatprep.subr.bf16.mxu0 %v10781_v57 }
0x1333   :  { %v11282_v42 = vpop.eup %11281 }
0x1334   :  { %v11284_v58 = vpop.eup %11283  ;;  %v5606_v37 = vmul.f32 %v11282_v42, %v11274_v18  ;;  %v4625_v42 = vld [vmem:[%s14362_s5 + $0x10] sm:$0xff] }
0x1335   :  { %v5605_v31 = vmul.f32 %v11284_v58, %v11276_v11  ;;  %v4626_v58 = vld [vmem:[%s14362_s5 + $0x18] sm:$0xff] }
0x1336   :  { %10261 = vmatmul.mubr.msk.f32.vlgmr.msra.gmra.mrb[110].mxu1 %vm1332_vm2, %v5606_v37  ;;  %v10793_v37 = vpack.c.bf16 %v4626_v58, %v4625_v42  ;;  %v9034_v42 = vld [vmem:[#allocation10] ss:$0 sm:$0xff] }
0x1337   :  { %10256 = vmatmul.mubr.msk.f32.vlgmr.msra.gmra.mrb[106].mxu0 %vm1332_vm2, %v5605_v31  ;;  %v11326_v31 = vld [vmem:[%s14327_s12 + $0x8] sm:$0xff] }
0x1338   :  { %10784 = vmatpush3.bf16.msra.mxu0 %v10781_v57  ;;  %v10789_v57 = vpack.c.bf16 %v4624_v6, %v4623_v8 }
0x1339   :  { %10786 = vmatprep.subr.bf16.mxu0 %v10785_v5 }
0x133a   :  { %10790 = vmatprep.subr.bf16.mxu1 %v10789_v57 }
0x133b   :  { %10792 = vmatpush3.bf16.msra.mxu1 %v10789_v57 }
0x133c   :  { %10788 = vmatpush3.bf16.msra.mxu0 %v10785_v5  ;;  %10794 = vmatprep.subr.bf16.mxu1 %v10793_v37  ;;  %v11327_v5 = vld [vmem:[%s14327_s12 + $0x10] sm:$0xff] }
0x133d   :  { %10798 = vmatprep.subr.bf16.mxu0 %v10797_v36 }
0x133f   :  { %10796 = vmatpush3.bf16.msra.mxu1 %v10793_v37 }
0x1401   :  { %v5749_v7 = vpop.f32.mrb[108].mxu1 }
0x1402   :  { %v5676_v50 = vpop.f32.mrb[104].mxu0  ;;  %v10252_v51 = vpop.f32.mrb[109].mxu1 }
0x1403   :  { %v10247_v40 = vpop.f32.mrb[105].mxu0  ;;  %10271 = vmatprep.mubr.msk.f32.mxu0 %vm744_vm0, %v5676_v50  ;;  %v4631_v50 = vld [vmem:[%s14363_s17] sm:$0xff]  ;;  %v4632_v51 = vld [vmem:[%s14363_s17 + $0x8] sm:$0xff] }
0x1404   :  { %10272 = vmatmul.mubr.msk.f32.vlgmr.msra.gmra.mrb[108].mxu0 %vm744_vm0, %v5749_v7  ;;  %v11328_v7 = vld [vmem:[%s14327_s12 + $0x18] sm:$0xff]  ;;  %v10805_v40 = vpack.c.bf16 %v4632_v51, %v4631_v50  ;;  %s14369_s12 = sld [smem:[#allocation63_spill]] }
0x1405   :  { %10800 = vmatpush3.bf16.msra.mxu0 %v10797_v36 }
0x1406   :  { %10802 = vmatprep.subr.bf16.mxu0 %v10801_v59  ;;  %10806 = vmatprep.subr.bf16.mxu1 %v10805_v40 }
0x1409   :  { %v5895_v2 = vpop.f32.mrb[110].mxu1  ;;  %10804 = vmatpush3.bf16.msra.mxu0 %v10801_v59 }
0x140a   :  { %v5822_v44 = vpop.f32.mrb[106].mxu0  ;;  %v10262_v17 = vpop.f32.mrb[111].mxu1  ;;  %10319 = vmatprep.subr.mxu0 %v14354_v32 }
0x140b   :  { %v10257_v29 = vpop.f32.mrb[107].mxu0  ;;  %10274 = vmatprep.mubr.msk.f32.mxu0 %vm744_vm0, %v5822_v44 }
0x140c   :  { %10275 = vmatmul.mubr.msk.f32.gmra.mrb[110].mxu0 %vm744_vm0, %v5895_v2 }
0x140d   :  { %10299 = vmatprep.mubr.msk.f32.mxu0 %vm744_vm0, %v13264_v61 }
0x1410   :  { %10300 = vmatmul.mubr.msk.f32.vlgmr.msra.gmra.mrb[112].mxu0 %vm744_vm0, %v11326_v31 }
0x1411   :  { %10302 = vmatprep.mubr.msk.f32.mxu0 %vm744_vm0, %v11327_v5 }
0x1414   :  { %10303 = vmatmul.mubr.msk.f32.gmra.mrb[114].mxu0 %vm744_vm0, %v11328_v7 }
0x1415   :  { %10321 = vmatprep.mubr.msk.f32.mxu0 %vm11674_vm1, %v14354_v32 }
0x14d7   :  { %v10273_v55 = vpop.f32.mrb[108].mxu0 }
0x14d8   :  { %v5989_v49 = vadd.f32 %v10273_v55, %v9017_v45  ;;  %v5983_v12 = vpop.f32.mrb[109].mxu0 }
0x14d9   :  { %v5984_v22 = vadd.f32 %v9017_v45, %v5983_v12 }
0x14da   :  { %v6003_v33 = vadd.f32 %v5989_v49, %v13175_v25 }
0x14db   :  { %v6002_v10 = vadd.f32 %v5984_v22, %v13167_v53 }
0x14dc   :  { %v6009_v35 = vsel %vm744_vm0, %v6003_v33, 0.0 }
0x14dd   :  { %6010 = vadd.xlane.f32.xlu1 %v6009_v35  ;;  %v6006_v47 = vsel %vm744_vm0, %v6002_v10, 0.0 }
0x14de   :  { %6007 = vadd.xlane.f32.xlu0 %v6006_v47 }
0x14df   :  { %v10276_v16 = vpop.f32.mrb[110].mxu0 }
0x14e0   :  { %v5999_v48 = vadd.f32 %v10276_v16, %v9017_v45  ;;  %v5993_v9 = vpop.f32.mrb[111].mxu0  ;;  %v9022_v16 = vld [vmem:[#allocation4] ss:$0 sm:$0xff] }
0x14e1   :  { %v5994_v54 = vadd.f32 %v9017_v45, %v5993_v9 }
0x14e2   :  { %v6005_v15 = vadd.f32 %v5999_v48, %v13189_v23 }
0x14e3   :  { %v6004_v4 = vadd.f32 %v5994_v54, %v13182_v21 }
0x14e4   :  { %v6015_v38 = vsel %vm744_vm0, %v6005_v15, 0.0 }
0x14e5   :  { %6016 = vadd.xlane.f32.xlu1 %v6015_v38  ;;  %v6012_v25 = vsel %vm744_vm0, %v6004_v4, 0.0 }
0x14e6   :  { %6013 = vadd.xlane.f32.xlu0 %v6012_v25  ;;  %v4633_v25 = vld [vmem:[%s14363_s17 + $0x10] sm:$0xff] }
0x156a   :  { %v6011_v53 = vpop.xlane.xlu1 %6010 }
0x156b   :  { %v6019_v34 = vmul.f32 0.03125, %v6011_v53  ;;  %v6008_v41 = vpop.xlane.xlu0 %6007  ;;  %v4634_v53 = vld [vmem:[%s14363_s17 + $0x18] sm:$0xff] }
0x156c   :  { %v6018_v0 = vmul.f32 0.03125, %v6008_v41 }
0x156d   :  { %v13276_v24 = vsub.f32 %v6003_v33, %v6019_v34 }
0x156e   :  { %v13278_v14 = vsub.f32 %v6002_v10, %v6018_v0  ;;  %v10809_v0 = vpack.c.bf16 %v4634_v53, %v4633_v25 }
0x156f   :  { %v6027_v27 = vmul.f32 %v13276_v24, %v13276_v24 }
0x1570   :  { %v6026_v21 = vmul.f32 %v13278_v14, %v13278_v14 }
0x1571   :  { %v6033_v23 = vsel %vm744_vm0, %v6027_v27, 0.0 }
0x1572   :  { %6034 = vadd.xlane.f32.xlu1 %v6033_v23  ;;  %v6017_v30 = vpop.xlane.xlu1 %6016  ;;  %v6030_v56 = vsel %vm744_vm0, %v6026_v21, 0.0 }
0x1573   :  { %v6021_v62 = vmul.f32 0.03125, %v6017_v30  ;;  %6031 = vadd.xlane.f32.xlu0 %v6030_v56  ;;  %v6014_v18 = vpop.xlane.xlu0 %6013 }
0x1574   :  { %v6020_v11 = vmul.f32 0.03125, %v6014_v18  ;;  %v9029_v18 = vld [vmem:[#allocation9] ss:$0 sm:$0xff] }
0x1575   :  { %v13286_v1 = vsub.f32 %v6005_v15, %v6021_v62  ;;  %v9023_v15 = vld [vmem:[#allocation6] ss:$0 sm:$0xff] }
0x1576   :  { %v13288_v3 = vsub.f32 %v6004_v4, %v6020_v11  ;;  %v10301_v11 = vpop.f32.mrb[112].mxu0 }
0x1577   :  { %v6029_v13 = vmul.f32 %v13286_v1, %v13286_v1 }
0x1578   :  { %v6028_v39 = vmul.f32 %v13288_v3, %v13288_v3 }
0x1579   :  { %v6039_v20 = vsel %vm744_vm0, %v6029_v13, 0.0 }
0x157a   :  { %6040 = vadd.xlane.f32.xlu1 %v6039_v20  ;;  %v6036_v43 = vsel %vm744_vm0, %v6028_v39, 0.0 }
0x157b   :  { %6037 = vadd.xlane.f32.xlu0 %v6036_v43 }
0x15ff   :  { %v6035_v2 = vpop.xlane.xlu1 %6034 }
0x1600   :  { %v6043_v44 = vmul.f32 0.03125, %v6035_v2  ;;  %v6032_v17 = vpop.xlane.xlu0 %6031 }
0x1601   :  { %v6042_v29 = vmul.f32 0.03125, %v6032_v17 }
0x1602   :  { %v6047_v45 = vadd.f32 1e-05, %v6043_v44 }
0x1603   :  { %v6046_v55 = vadd.f32 1e-05, %v6042_v29 }
0x1604   :  { %11285 = vrsqrt.f32 %v6047_v45 }
0x1605   :  { %11287 = vrsqrt.f32 %v6046_v55 }
0x1607   :  { %v6041_v49 = vpop.xlane.xlu1 %6040 }
0x1608   :  { %v6045_v12 = vmul.f32 0.03125, %v6041_v49  ;;  %v6038_v22 = vpop.xlane.xlu0 %6037 }
0x1609   :  { %v6044_v33 = vmul.f32 0.03125, %v6038_v22 }
0x160a   :  { %v6049_v10 = vadd.f32 1e-05, %v6045_v12 }
0x160b   :  { %v6048_v35 = vadd.f32 1e-05, %v6044_v33 }
0x160c   :  { %11289 = vrsqrt.f32 %v6049_v10 }
0x160d   :  { %11291 = vrsqrt.f32 %v6048_v35 }
0x160e   :  { %v11286_v47 = vpop.eup %11285 }
0x160f   :  { %v11288_v48 = vpop.eup %11287  ;;  %v6055_v9 = vmul.f32 %v11286_v47, %v13276_v24 }
0x1610   :  { %v6054_v54 = vmul.f32 %v11288_v48, %v13278_v14 }
0x1611   :  { %v6065_v4 = vmul.f32 %v9022_v16, %v6055_v9 }
0x1612   :  { %v6064_v38 = vmul.f32 %v9022_v16, %v6054_v54 }
0x1613   :  { %v13321_v41 = vadd.f32 %v9023_v15, %v6065_v4 }
0x1614   :  { %v13319_v34 = vadd.f32 %v9023_v15, %v6064_v38 }
0x1616   :  { %v11290_v27 = vpop.eup %11289  ;;  %10285 = vmatprep.mubr.msk.f32.mxu1 %vm744_vm0, %v13319_v34 }
0x1617   :  { %v11292_v21 = vpop.eup %11291  ;;  %10286 = vmatmul.mubr.msk.f32.vlgmr.msra.gmra.mrb[112].mxu1 %vm744_vm0, %v13321_v41  ;;  %v6057_v24 = vmul.f32 %v11290_v27, %v13286_v1  ;;  %v6259_v1 = vadd.f32 %v10301_v11, %v9029_v18 }
0x1618   :  { %v6056_v14 = vmul.f32 %v11292_v21, %v13288_v3  ;;  %10808 = vmatpush3.bf16.msra.mxu1 %v10805_v40  ;;  %v6253_v3 = vpop.f32.mrb[113].mxu0 }
0x1619   :  { %v6067_v23 = vmul.f32 %v9022_v16, %v6057_v24  ;;  %10810 = vmatprep.subr.bf16.mxu1 %v10809_v0  ;;  %v6254_v13 = vadd.f32 %v9029_v18, %v6253_v3 }
0x161a   :  { %v6066_v30 = vmul.f32 %v9022_v16, %v6056_v14 }
0x161b   :  { %v13331_v62 = vadd.f32 %v9023_v15, %v6067_v23  ;;  %10320 = vmatpush3.xpose.msk.msra.mxu0 %vm744_vm0, %v6254_v13 }
0x161c   :  { %v13329_v56 = vadd.f32 %v9023_v15, %v6066_v30  ;;  %10812 = vmatpush3.bf16.msra.mxu1 %v10809_v0  ;;  %10329 = vmatprep.subr.mxu0 %v14354_v32 }
0x161d   :  { %10324 = vmatprep.subr.mxu1 %v14354_v32 }
0x161e   :  { %10288 = vmatprep.mubr.msk.f32.mxu1 %vm744_vm0, %v13329_v56 }
0x161f   :  { %10289 = vmatmul.mubr.msk.f32.gmra.mrb[114].mxu1 %vm744_vm0, %v13331_v62 }
0x1620   :  { %10313 = vmatprep.mubr.msk.f32.mxu1 %vm744_vm0, %v13264_v61  ;;  %v10304_v61 = vpop.f32.mrb[114].mxu0 }
0x1621   :  { %v6269_v39 = vadd.f32 %v10304_v61, %v9029_v18  ;;  %v6263_v20 = vpop.f32.mrb[115].mxu0 }
0x1622   :  { %v6264_v43 = vadd.f32 %v9029_v18, %v6263_v20 }
0x1623   :  { %10314 = vmatmul.mubr.msk.f32.vlgmr.msra.gmra.mrb[116].mxu1 %vm744_vm0, %v11326_v31 }
0x1624   :  { %10316 = vmatprep.mubr.msk.f32.mxu1 %vm744_vm0, %v11327_v5 }
0x1625   :  { %10325 = vmatpush3.xpose.msk.msra.mxu1 %vm744_vm0, %v6259_v1 }
0x1626   :  { %10334 = vmatprep.subr.mxu1 %v14354_v32 }
0x1627   :  { %10317 = vmatmul.mubr.msk.f32.gmra.mrb[118].mxu1 %vm744_vm0, %v11328_v7 }
0x1628   :  { %10326 = vmatprep.mubr.msk.f32.mxu1 %vm11674_vm1, %v14354_v32 }
0x16ea   :  { %v10287_v60 = vpop.f32.mrb[112].mxu1 }
0x16eb   :  { %v6168_v36 = vadd.f32 %v10287_v60, %v9024_v26  ;;  %v6162_v8 = vpop.f32.mrb[113].mxu1 }
0x16ec   :  { %v6163_v6 = vadd.f32 %v9024_v26, %v6162_v8  ;;  %v4639_v8 = vld [vmem:[%s14364_s21 + $0x8] sm:$0xff] }
0x16ed   :  { %10327 = vmatmul.mubr.msk.f32.vlgmr.msra.gmra.mrb[120].mxu1 %vm744_vm0, %v6168_v36  ;;  %v4638_v36 = vld [vmem:[%s14364_s21] sm:$0xff] }
0x16ee   :  { %10322 = vmatmul.mubr.msk.f32.vlgmr.msra.gmra.mrb[116].mxu0 %vm744_vm0, %v6163_v6  ;;  %10335 = vmatpush3.xpose.msk.msra.mxu1 %vm744_vm0, %v6269_v39 }
0x16ef   :  { %10330 = vmatpush3.xpose.msk.msra.mxu0 %vm744_vm0, %v6264_v43  ;;  %10336 = vmatprep.mubr.msk.f32.mxu1 %vm11674_vm1, %v14354_v32 }
0x16f0   :  { %10331 = vmatprep.mubr.msk.f32.mxu0 %vm11674_vm1, %v14354_v32  ;;  %10339 = vmatprep.subr.mxu0 %v14354_v32 }
0x16f1   :  { %10344 = vmatprep.subr.mxu1 %v14354_v32 }
0x16f2   :  { %v10290_v28 = vpop.f32.mrb[114].mxu1 }
0x16f3   :  { %v6178_v57 = vadd.f32 %v10290_v28, %v9024_v26  ;;  %v6172_v46 = vpop.f32.mrb[115].mxu1 }
0x16f4   :  { %v6173_v59 = vadd.f32 %v9024_v26, %v6172_v46 }
0x16f5   :  { %10337 = vmatmul.mubr.msk.f32.vlgmr.msra.gmra.mrb[122].mxu1 %vm744_vm0, %v6178_v57 }
0x16f6   :  { %10332 = vmatmul.mubr.msk.f32.vlgmr.msra.gmra.mrb[118].mxu0 %vm744_vm0, %v6173_v59  ;;  %v10315_v58 = vpop.f32.mrb[116].mxu1  ;;  %10346 = vmatprep.mubr.msk.f32.mxu1 %vm11674_vm1, %v14354_v32  ;;  %v10813_v59 = vpack.c.bf16 %v4639_v8, %v4638_v36  ;;  %v4662_v36 = vld [vmem:[%s14365_s29 + $0x88] sm:$0xff]  ;;  %v4648_v8 = vld [vmem:[%s14365_s29 + $0x18] sm:$0xff] }
0x16f7   :  { %v6350_v37 = vadd.f32 %v10315_v58, %v9034_v42  ;;  %v6344_v31 = vpop.f32.mrb[117].mxu1  ;;  %10341 = vmatprep.mubr.msk.f32.mxu0 %vm11674_vm1, %v14354_v32  ;;  %v4641_v58 = vld [vmem:[%s14364_s21 + $0x18] sm:$0xff] }
0x16f8   :  { %v6345_v5 = vadd.f32 %v9034_v42, %v6344_v31 }
0x16f9   :  { %10345 = vmatpush3.msra.mxu1 %v6350_v37 }
0x16fa   :  { %v10318_v7 = vpop.f32.mrb[118].mxu1  ;;  %10340 = vmatpush3.msra.mxu0 %v6345_v5  ;;  %10354 = vmatprep.subr.mxu1 %v14354_v32 }
0x16fb   :  { %v13366_v50 = vadd.f32 %v10318_v7, %v9034_v42  ;;  %v6354_v51 = vpop.f32.mrb[119].mxu1  ;;  %10349 = vmatprep.subr.mxu0 %v14354_v32 }
0x16fc   :  { %v13369_v40 = vadd.f32 %v9034_v42, %v6354_v51  ;;  %v4640_v42 = vld [vmem:[%s14364_s21 + $0x10] sm:$0xff] }
0x16fd   :  { %v10817_v51 = vpack.c.bf16 %v4641_v58, %v4640_v42  ;;  %v4647_v58 = vld [vmem:[%s14365_s29 + $0x10] sm:$0xff] }
0x17c0   :  { %v6511_v2 = vpop.f32.mrb[120].mxu1 }
0x17c1   :  { %v6668_v44 = vmul.f32 0.17677669, %v6511_v2  ;;  %v6435_v17 = vpop.f32.mrb[116].mxu0  ;;  %v10328_v29 = vpop.f32.mrb[121].mxu1 }
0x17c2   :  { %v6667_v45 = vmul.f32 0.17677669, %v6435_v17  ;;  %v10323_v55 = vpop.f32.mrb[117].mxu0 }
0x17c3   :  { %v6674_v49 = vsel %vm1332_vm2, %v6668_v44, -inf }
0x17c4   :  { %6675 = vmax.xlane.f32.xlu1 %v6674_v49  ;;  %v6671_v12 = vsel %vm1332_vm2, %v6667_v45, -inf  ;;  %v9051_v49 = vld [vmem:[#allocation12] ss:$0 sm:$0xff] }
0x17c5   :  { %6672 = vmax.xlane.f32.xlu0 %v6671_v12 }
0x17c8   :  { %v6663_v22 = vpop.f32.mrb[122].mxu1 }
0x17c9   :  { %v6670_v33 = vmul.f32 0.17677669, %v6663_v22  ;;  %v6587_v10 = vpop.f32.mrb[118].mxu0  ;;  %v10338_v35 = vpop.f32.mrb[123].mxu1 }
0x17ca   :  { %v6669_v47 = vmul.f32 0.17677669, %v6587_v10  ;;  %v10333_v16 = vpop.f32.mrb[119].mxu0 }
0x17cb   :  { %v6680_v48 = vsel %vm1332_vm2, %v6670_v33, -inf }
0x17cc   :  { %6681 = vmax.xlane.f32.xlu1 %v6680_v48  ;;  %v6677_v9 = vsel %vm1332_vm2, %v6669_v47, -inf }
0x17cd   :  { %6678 = vmax.xlane.f32.xlu0 %v6677_v9 }
0x1851   :  { %v6676_v54 = vpop.xlane.xlu1 %6675 }
0x1852   :  { %v6684_v15 = vsub.f32 %v6668_v44, %v6676_v54  ;;  %v6673_v4 = vpop.xlane.xlu0 %6672 }
0x1853   :  { %v6683_v38 = vsub.f32 %v6667_v45, %v6673_v4 }
0x1854   :  { %v6689_v25 = vmul.f32 1.442695, %v6684_v15 }
0x1855   :  { %v6687_v53 = vmul.f32 1.442695, %v6683_v38 }
0x1856   :  { %11293 = vpow2.f32 %v6689_v25 }
0x1857   :  { %11295 = vpow2.f32 %v6687_v53 }
0x1859   :  { %v6682_v0 = vpop.xlane.xlu1 %6681 }
0x185a   :  { %v6686_v27 = vsub.f32 %v6670_v33, %v6682_v0  ;;  %v6679_v21 = vpop.xlane.xlu0 %6678 }
0x185b   :  { %v6685_v24 = vsub.f32 %v6669_v47, %v6679_v21 }
0x185c   :  { %v6693_v14 = vmul.f32 1.442695, %v6686_v27 }
0x185d   :  { %v6691_v23 = vmul.f32 1.442695, %v6685_v24 }
0x185e   :  { %11297 = vpow2.f32 %v6693_v14 }
0x185f   :  { %11299 = vpow2.f32 %v6691_v23 }
0x1860   :  { %v11294_v30 = vpop.eup %11293 }
0x1861   :  { %v11296_v18 = vpop.eup %11295  ;;  %v6698_v11 = vsel %vm1332_vm2, %v11294_v30, 0.0 }
0x1862   :  { %6699 = vadd.xlane.f32.xlu1 %v6698_v11  ;;  %v6695_v1 = vsel %vm1332_vm2, %v11296_v18, 0.0 }
0x1863   :  { %6696 = vadd.xlane.f32.xlu0 %v6695_v1 }
0x1868   :  { %v11298_v3 = vpop.eup %11297 }
0x1869   :  { %v11300_v13 = vpop.eup %11299  ;;  %v6704_v61 = vsel %vm1332_vm2, %v11298_v3, 0.0 }
0x186a   :  { %6705 = vadd.xlane.f32.xlu1 %v6704_v61  ;;  %v6701_v39 = vsel %vm1332_vm2, %v11300_v13, 0.0 }
0x186b   :  { %6702 = vadd.xlane.f32.xlu0 %v6701_v39 }
0x18ef   :  { %v6700_v20 = vpop.xlane.xlu1 %6699 }
0x18f0   :  { %11301 = vrcp.f32 %v6700_v20  ;;  %v6697_v43 = vpop.xlane.xlu0 %6696 }
0x18f1   :  { %11303 = vrcp.f32 %v6697_v43 }
0x18f7   :  { %v6706_v26 = vpop.xlane.xlu1 %6705 }
0x18f8   :  { %11305 = vrcp.f32 %v6706_v26  ;;  %v6703_v60 = vpop.xlane.xlu0 %6702 }
0x18f9   :  { %11307 = vrcp.f32 %v6703_v60  ;;  %v4646_v60 = vld [vmem:[%s14365_s29 + $0x8] sm:$0xff] }
0x18fa   :  { %v11302_v6 = vpop.eup %11301 }
0x18fb   :  { %v11304_v28 = vpop.eup %11303  ;;  %v6712_v57 = vmul.f32 %v11302_v6, %v11294_v30  ;;  %v10821_v6 = vpack.c.bf16 %v4662_v36, %v4646_v60  ;;  %v4700_v60 = vld [vmem:[%s14365_s29 + $0x1b8] sm:$0xff]  ;;  %v4681_v36 = vld [vmem:[%s14365_s29 + $0x120] sm:$0xff] }
0x18fc   :  { %v6711_v46 = vmul.f32 %v11304_v28, %v11296_v18  ;;  %v4664_v28 = vld [vmem:[%s14365_s29 + $0x98] sm:$0xff] }
0x18fd   :  { %10347 = vmatmul.mubr.msk.f32.vlgmr.msra.gmra.mrb[124].mxu1 %vm1332_vm2, %v6712_v57  ;;  %v4645_v57 = vld [vmem:[%s14365_s29] sm:$0xff] }
0x18fe   :  { %10355 = vmatpush3.msra.mxu1 %v13366_v50  ;;  %10342 = vmatmul.mubr.msk.f32.vlgmr.msra.gmra.mrb[120].mxu0 %vm1332_vm2, %v6711_v46  ;;  %v4661_v46 = vld [vmem:[%s14365_s29 + $0x80] sm:$0xff] }
0x18ff   :  { %10350 = vmatpush3.msra.mxu0 %v13369_v40  ;;  %10356 = vmatprep.mubr.msk.f32.mxu1 %vm11674_vm1, %v14354_v32  ;;  %v10823_v42 = vpack.c.bf16 %v4661_v46, %v4645_v57  ;;  %v4683_v57 = vld [vmem:[%s14365_s29 + $0x130] sm:$0xff] }
0x1900   :  { %10351 = vmatprep.mubr.msk.f32.mxu0 %vm11674_vm1, %v14354_v32  ;;  %10814 = vmatprep.subr.bf16.mxu0 %v10813_v59  ;;  %v4699_v46 = vld [vmem:[%s14365_s29 + $0x1b0] sm:$0xff] }
0x1901   :  { %10822 = vmatprep.subr.bf16.mxu1 %v10821_v6 }
0x1902   :  { %v11306_v37 = vpop.eup %11305 }
0x1903   :  { %v11308_v31 = vpop.eup %11307  ;;  %v6714_v5 = vmul.f32 %v11306_v37, %v11298_v3  ;;  %v4663_v37 = vld [vmem:[%s14365_s29 + $0x90] sm:$0xff] }
0x1904   :  { %v6713_v7 = vmul.f32 %v11308_v31, %v11300_v13  ;;  %v10831_v31 = vpack.c.bf16 %v4663_v37, %v4647_v58  ;;  %v4654_v58 = vld [vmem:[%s14365_s29 + $0x48] sm:$0xff] }
0x1905   :  { %10357 = vmatmul.mubr.msk.f32.vlgmr.msra.gmra.mrb[126].mxu1 %vm1332_vm2, %v6714_v5  ;;  %v4678_v5 = vld [vmem:[%s14365_s29 + $0x108] sm:$0xff] }
0x1906   :  { %10352 = vmatmul.mubr.msk.f32.vlgmr.msra.gmra.mrb[122].mxu0 %vm1332_vm2, %v6713_v7  ;;  %7344 = vmatprep.mubr.f32.mxu1 %v14354_v32  ;;  %v4694_v7 = vld [vmem:[%s14365_s29 + $0x188] sm:$0xff] }
0x1907   :  { %10816 = vmatpush3.bf16.msra.mxu0 %v10813_v59  ;;  %v10829_v59 = vpack.c.bf16 %v4664_v28, %v4648_v8  ;;  %10824 = vmatpush1.bf16.msra.mxu1 %v10823_v42  ;;  %v4697_v28 = vld [vmem:[%s14365_s29 + $0x1a0] sm:$0xff] }
0x1908   :  { %10818 = vmatprep.subr.bf16.mxu0 %v10817_v51 }
0x190b   :  { %10820 = vmatpush3.bf16.msra.mxu0 %v10817_v51  ;;  %v4680_v51 = vld [vmem:[%s14365_s29 + $0x118] sm:$0xff] }
0x190c   :  { %10830 = vmatprep.subr.bf16.mxu0 %v10829_v59 }
0x19d0   :  { %v6857_v50 = vpop.f32.mrb[124].mxu1 }
0x19d1   :  { %v6784_v40 = vpop.f32.mrb[120].mxu0  ;;  %v10348_v2 = vpop.f32.mrb[125].mxu1 }
0x19d2   :  { %v10343_v44 = vpop.f32.mrb[121].mxu0  ;;  %10367 = vmatprep.mubr.msk.f32.mxu0 %vm744_vm0, %v6784_v40  ;;  %v4696_v40 = vld [vmem:[%s14365_s29 + $0x198] sm:$0xff]  ;;  %v4677_v2 = vld [vmem:[%s14365_s29 + $0x100] sm:$0xff] }
0x19d3   :  { %10368 = vmatmul.mubr.msk.f32.vlgmr.msra.gmra.mrb[124].mxu0 %vm744_vm0, %v6857_v50  ;;  %v10825_v50 = vpack.c.bf16 %v4694_v7, %v4678_v5  ;;  %v4693_v44 = vld [vmem:[%s14365_s29 + $0x180] sm:$0xff]  ;;  %v4656_v5 = vld [vmem:[%s14365_s29 + $0x58] sm:$0xff] }
0x19d4   :  { %10832 = vmatpush1.bf16.msra.mxu0 %v10831_v31  ;;  %v4670_v31 = vld [vmem:[%s14365_s29 + $0xc8] sm:$0xff]  ;;  %v4672_v7 = vld [vmem:[%s14365_s29 + $0xd8] sm:$0xff] }
0x19d5   :  { %10826 = vmatprep.subr.bf16.mxu1 %v10825_v50  ;;  %v10843_v50 = vpack.c.bf16 %v4697_v28, %v4681_v36 }
0x19d8   :  { %v7003_v17 = vpop.f32.mrb[126].mxu1 }
0x19d9   :  { %v6930_v29 = vpop.f32.mrb[122].mxu0  ;;  %v10358_v45 = vpop.f32.mrb[127].mxu1 }
0x19da   :  { %v10353_v55 = vpop.f32.mrb[123].mxu0  ;;  %10370 = vmatprep.mubr.msk.f32.mxu0 %vm744_vm0, %v6930_v29  ;;  %v10827_v29 = vpack.c.bf16 %v4693_v44, %v4677_v2  ;;  %v4679_v45 = vld [vmem:[%s14365_s29 + $0x110] sm:$0xff] }
0x19db   :  { %10371 = vmatmul.mubr.msk.f32.gmra.mrb[126].mxu0 %vm744_vm0, %v7003_v17  ;;  %v10833_v17 = vpack.c.bf16 %v4696_v40, %v4680_v51  ;;  %v4695_v55 = vld [vmem:[%s14365_s29 + $0x190] sm:$0xff]  ;;  %v10851_v40 = vpack.c.bf16 %v4699_v46, %v4683_v57 }
0x19dc   :  { %7433 = vmatprep.mubr.f32.mxu0 %v14354_v32  ;;  %10828 = vmatpush1.bf16.msra.mxu1 %v10827_v29  ;;  %v10853_v29 = vpack.c.bf16 %v4670_v31, %v4654_v58  ;;  %v4691_v57 = vld [vmem:[%s14365_s29 + $0x170] sm:$0xff]  ;;  %v4759_v58 = vld [vmem:[%s14368_s8 + $0x180] sm:$0xff] }
0x19dd   :  { %10834 = vmatprep.subr.bf16.mxu0 %v10833_v17  ;;  %v4707_v46 = vld [vmem:[%s14365_s29 + $0x1f0] sm:$0xff] }
0x1aa6   :  { %v10369_v12 = vpop.f32.mrb[124].mxu0 }
0x1aa7   :  { %v7097_v22 = vadd.f32 %v10369_v12, %v9051_v49  ;;  %v7091_v33 = vpop.f32.mrb[125].mxu0  ;;  %v4650_v12 = vld [vmem:[%s14365_s29 + $0x28] sm:$0xff] }
0x1aa8   :  { %v7092_v10 = vadd.f32 %v9051_v49, %v7091_v33  ;;  %v4652_v33 = vld [vmem:[%s14365_s29 + $0x38] sm:$0xff] }
0x1aa9   :  { %v7111_v35 = vadd.f32 %v7097_v22, %v13321_v41  ;;  %v4666_v22 = vld [vmem:[%s14365_s29 + $0xa8] sm:$0xff] }
0x1aaa   :  { %v7110_v47 = vadd.f32 %v7092_v10, %v13319_v34  ;;  %v10837_v10 = vpack.c.bf16 %v4666_v22, %v4650_v12  ;;  %v4653_v12 = vld [vmem:[%s14365_s29 + $0x40] sm:$0xff] }
0x1aab   :  { %v7117_v16 = vsel %vm744_vm0, %v7111_v35, 0.0  ;;  %v4669_v22 = vld [vmem:[%s14365_s29 + $0xc0] sm:$0xff] }
0x1aac   :  { %7118 = vadd.xlane.f32.xlu1 %v7117_v16  ;;  %v7114_v48 = vsel %vm744_vm0, %v7110_v47, 0.0  ;;  %10838 = vmatprep.subr.bf16.mxu1 %v10837_v10  ;;  %v4671_v10 = vld [vmem:[%s14365_s29 + $0xd0] sm:$0xff] }
0x1aad   :  { %7115 = vadd.xlane.f32.xlu0 %v7114_v48 }
0x1aae   :  { %v10372_v9 = vpop.f32.mrb[126].mxu0 }
0x1aaf   :  { %v7107_v54 = vadd.f32 %v10372_v9, %v9051_v49  ;;  %v7101_v15 = vpop.f32.mrb[127].mxu0 }
0x1ab0   :  { %v7102_v4 = vadd.f32 %v9051_v49, %v7101_v15  ;;  %v10835_v49 = vpack.c.bf16 %v4695_v55, %v4679_v45  ;;  %v10861_v45 = vpack.c.bf16 %v4672_v7, %v4656_v5  ;;  %v10883_v5 = vpack.c.bf16 %v4707_v46, %v4691_v57  ;;  %v4719_v57 = vld [vmem:[%s14368_s8 + $0x40] sm:$0xff]  ;;  %v4720_v46 = vld [vmem:[%s14368_s8 + $0x48] sm:$0xff] }
0x1ab1   :  { %v7113_v38 = vadd.f32 %v7107_v54, %v13331_v62 }
0x1ab2   :  { %v7112_v25 = vadd.f32 %v7102_v4, %v13329_v56  ;;  %10836 = vmatpush1.bf16.msra.mxu0 %v10835_v49 }
0x1ab3   :  { %v7123_v53 = vsel %vm744_vm0, %v7113_v38, 0.0 }
0x1ab4   :  { %7124 = vadd.xlane.f32.xlu1 %v7123_v53  ;;  %v7120_v41 = vsel %vm744_vm0, %v7112_v25, 0.0 }
0x1ab5   :  { %7121 = vadd.xlane.f32.xlu0 %v7120_v41 }
0x1b39   :  { %v7119_v34 = vpop.xlane.xlu1 %7118 }
0x1b3a   :  { %v7127_v0 = vmul.f32 0.03125, %v7119_v34  ;;  %v7116_v27 = vpop.xlane.xlu0 %7115 }
0x1b3b   :  { %v7126_v21 = vmul.f32 0.03125, %v7116_v27 }
0x1b3c   :  { %v13407_v24 = vsub.f32 %v7111_v35, %v7127_v0  ;;  %v4668_v35 = vld [vmem:[%s14365_s29 + $0xb8] sm:$0xff] }
0x1b3d   :  { %v13409_v14 = vsub.f32 %v7110_v47, %v7126_v21  ;;  %v10845_v47 = vpack.c.bf16 %v4668_v35, %v4652_v33  ;;  %v4655_v33 = vld [vmem:[%s14365_s29 + $0x50] sm:$0xff]  ;;  %v4686_v35 = vld [vmem:[%s14365_s29 + $0x148] sm:$0xff] }
0x1b3e   :  { %v7135_v23 = vmul.f32 %v13407_v24, %v13407_v24 }
0x1b3f   :  { %v7134_v56 = vmul.f32 %v13409_v14, %v13409_v14  ;;  %10846 = vmatprep.subr.bf16.mxu0 %v10845_v47  ;;  %v4702_v47 = vld [vmem:[%s14365_s29 + $0x1c8] sm:$0xff] }
0x1b40   :  { %v7141_v62 = vsel %vm744_vm0, %v7135_v23, 0.0  ;;  %v9056_v23 = vld [vmem:[#allocation13] ss:$0 sm:$0xff] }
0x1b41   :  { %7142 = vadd.xlane.f32.xlu1 %v7141_v62  ;;  %v7125_v30 = vpop.xlane.xlu1 %7124  ;;  %v7138_v18 = vsel %vm744_vm0, %v7134_v56, 0.0  ;;  %v9057_v56 = vld [vmem:[#allocation15] ss:$0 sm:$0xff] }
0x1b42   :  { %v7129_v11 = vmul.f32 0.03125, %v7125_v30  ;;  %7139 = vadd.xlane.f32.xlu0 %v7138_v18  ;;  %v7122_v1 = vpop.xlane.xlu0 %7121  ;;  %v4649_v18 = vld [vmem:[%s14365_s29 + $0x20] sm:$0xff] }
0x1b43   :  { %v7128_v3 = vmul.f32 0.03125, %v7122_v1  ;;  %v4651_v1 = vld [vmem:[%s14365_s29 + $0x30] sm:$0xff] }
0x1b44   :  { %v13417_v13 = vsub.f32 %v7113_v38, %v7129_v11  ;;  %v4665_v11 = vld [vmem:[%s14365_s29 + $0xa0] sm:$0xff] }
0x1b45   :  { %v13419_v61 = vsub.f32 %v7112_v25, %v7128_v3  ;;  %v4667_v3 = vld [vmem:[%s14365_s29 + $0xb0] sm:$0xff] }
0x1b46   :  { %v7137_v39 = vmul.f32 %v13417_v13, %v13417_v13  ;;  %v10847_v6 = vpack.c.bf16 %v4667_v3, %v4651_v1  ;;  %v4659_v1 = vld [vmem:[%s14365_s29 + $0x70] sm:$0xff] }
0x1b47   :  { %v7136_v20 = vmul.f32 %v13419_v61, %v13419_v61  ;;  %v4675_v3 = vld [vmem:[%s14365_s29 + $0xf0] sm:$0xff] }
0x1b48   :  { %v7147_v43 = vsel %vm744_vm0, %v7137_v39, 0.0  ;;  %v4682_v39 = vld [vmem:[%s14365_s29 + $0x128] sm:$0xff]  ;;  %v10879_v36 = vpack.c.bf16 %v4675_v3, %v4659_v1  ;;  %v4717_v1 = vld [vmem:[%s14368_s8 + $0x30] sm:$0xff]  ;;  %v4718_v3 = vld [vmem:[%s14368_s8 + $0x38] sm:$0xff] }
0x1b49   :  { %7148 = vadd.xlane.f32.xlu1 %v7147_v43  ;;  %v7144_v26 = vsel %vm744_vm0, %v7136_v20, 0.0  ;;  %v4698_v43 = vld [vmem:[%s14365_s29 + $0x1a8] sm:$0xff] }
0x1b4a   :  { %7145 = vadd.xlane.f32.xlu0 %v7144_v26  ;;  %v4684_v26 = vld [vmem:[%s14365_s29 + $0x138] sm:$0xff]  ;;  %v10841_v59 = vpack.c.bf16 %v4698_v43, %v4682_v39  ;;  %v4690_v39 = vld [vmem:[%s14365_s29 + $0x168] sm:$0xff] }
0x1b4b   :  { %v10849_v42 = vpack.c.bf16 %v4700_v60, %v4684_v26  ;;  %v4692_v43 = vld [vmem:[%s14365_s29 + $0x178] sm:$0xff] }
0x1b4c   :  { %v4708_v26 = vld [vmem:[%s14365_s29 + $0x1f8] sm:$0xff] }
0x1b4d   :  { %v10881_v28 = vpack.c.bf16 %v4708_v26, %v4692_v43  ;;  %v4749_v43 = vld [vmem:[%s14368_s8 + $0x130] sm:$0xff]  ;;  %v4750_v26 = vld [vmem:[%s14368_s8 + $0x138] sm:$0xff] }
0x1bce   :  { %v7143_v16 = vpop.xlane.xlu1 %7142 }
0x1bcf   :  { %v7151_v48 = vmul.f32 0.03125, %v7143_v16  ;;  %v7140_v9 = vpop.xlane.xlu0 %7139  ;;  %v4688_v16 = vld [vmem:[%s14365_s29 + $0x158] sm:$0xff] }
0x1bd0   :  { %v7150_v54 = vmul.f32 0.03125, %v7140_v9  ;;  %v10855_v9 = vpack.c.bf16 %v4669_v22, %v4653_v12 }
0x1bd1   :  { %v7155_v15 = vadd.f32 1e-05, %v7151_v48  ;;  %v4704_v48 = vld [vmem:[%s14365_s29 + $0x1d8] sm:$0xff] }
0x1bd2   :  { %v7154_v4 = vadd.f32 1e-05, %v7150_v54  ;;  %v10863_v54 = vpack.c.bf16 %v4671_v10, %v4655_v33  ;;  %v4713_v33 = vld [vmem:[%s14368_s8 + $0x10] sm:$0xff]  ;;  %v4714_v10 = vld [vmem:[%s14368_s8 + $0x18] sm:$0xff] }
0x1bd3   :  { %11309 = vrsqrt.f32 %v7155_v15  ;;  %v4685_v15 = vld [vmem:[%s14365_s29 + $0x140] sm:$0xff] }
0x1bd4   :  { %11311 = vrsqrt.f32 %v7154_v4  ;;  %v4701_v4 = vld [vmem:[%s14365_s29 + $0x1c0] sm:$0xff] }
0x1bd6   :  { %v7149_v38 = vpop.xlane.xlu1 %7148 }
0x1bd7   :  { %v7153_v25 = vmul.f32 0.03125, %v7149_v38  ;;  %v7146_v53 = vpop.xlane.xlu0 %7145  ;;  %v10857_v38 = vpack.c.bf16 %v4702_v47, %v4686_v35 }
0x1bd8   :  { %v7152_v41 = vmul.f32 0.03125, %v7146_v53  ;;  %v4687_v53 = vld [vmem:[%s14365_s29 + $0x150] sm:$0xff] }
0x1bd9   :  { %v7157_v34 = vadd.f32 1e-05, %v7153_v25  ;;  %v10865_v25 = vpack.c.bf16 %v4704_v48, %v4688_v16  ;;  %v4745_v16 = vld [vmem:[%s14368_s8 + $0x110] sm:$0xff]  ;;  %v4746_v48 = vld [vmem:[%s14368_s8 + $0x118] sm:$0xff] }
0x1bda   :  { %v7156_v0 = vadd.f32 1e-05, %v7152_v41  ;;  %v4703_v41 = vld [vmem:[%s14365_s29 + $0x1d0] sm:$0xff] }
0x1bdb   :  { %11313 = vrsqrt.f32 %v7157_v34  ;;  %v4658_v34 = vld [vmem:[%s14365_s29 + $0x68] sm:$0xff] }
0x1bdc   :  { %11315 = vrsqrt.f32 %v7156_v0  ;;  %v4674_v0 = vld [vmem:[%s14365_s29 + $0xe8] sm:$0xff] }
0x1bdd   :  { %v11310_v27 = vpop.eup %11309 }
0x1bde   :  { %v11312_v21 = vpop.eup %11311  ;;  %v7163_v62 = vmul.f32 %v11310_v27, %v13407_v24  ;;  %v4660_v27 = vld [vmem:[%s14365_s29 + $0x78] sm:$0xff] }
0x1bdf   :  { %v7162_v30 = vmul.f32 %v11312_v21, %v13409_v14  ;;  %v10839_v14 = vpack.c.bf16 %v4665_v11, %v4649_v18  ;;  %v4676_v21 = vld [vmem:[%s14365_s29 + $0xf8] sm:$0xff]  ;;  %v4657_v18 = vld [vmem:[%s14365_s29 + $0x60] sm:$0xff] }
0x1be0   :  { %v7173_v24 = vmul.f32 %v9056_v23, %v7163_v62  ;;  %v10869_v62 = vpack.c.bf16 %v4674_v0, %v4658_v34  ;;  %v4673_v11 = vld [vmem:[%s14365_s29 + $0xe0] sm:$0xff] }
0x1be1   :  { %v7172_v20 = vmul.f32 %v9056_v23, %v7162_v30  ;;  %v10877_v30 = vpack.c.bf16 %v4676_v21, %v4660_v27  ;;  %v10871_v60 = vpack.c.bf16 %v4673_v11, %v4657_v18  ;;  %v4747_v27 = vld [vmem:[%s14368_s8 + $0x120] sm:$0xff]  ;;  %v4748_v21 = vld [vmem:[%s14368_s8 + $0x128] sm:$0xff] }
0x1be2   :  { %v13473_v2 = vadd.f32 %v9057_v56, %v7173_v24  ;;  %v4689_v24 = vld [vmem:[%s14365_s29 + $0x160] sm:$0xff]  ;;  %v10927_v11 = vpack.c.bf16 %v4748_v21, %v4747_v27  ;;  %v4725_v27 = vld [vmem:[%s14368_s8 + $0x70] sm:$0xff]  ;;  %v4726_v21 = vld [vmem:[%s14368_s8 + $0x78] sm:$0xff] }
0x1be3   :  { %v13458_v8 = vadd.f32 %v9057_v56, %v7172_v20  ;;  %v4706_v20 = vld [vmem:[%s14365_s29 + $0x1e8] sm:$0xff] }
0x1be5   :  { %v11314_v37 = vpop.eup %11313  ;;  %9058 = vmatmul.mubr.msk.f32.vlgmr.msra.gmra.mrb[128].mxu1 %vm744_vm0, %v13458_v8  ;;  %9062 = vmatmul.mubr.msk.f32.vlgmr.msra.gmra.mrb[128].mxu0 %vm744_vm0, %v13458_v8 }
0x1be6   :  { %v11316_v51 = vpop.eup %11315  ;;  %7350 = vmatprep.mubr.f32.mxu1 %v14354_v32  ;;  %7439 = vmatprep.mubr.f32.mxu0 %v14354_v32  ;;  %v7165_v44 = vmul.f32 %v11314_v37, %v13417_v13  ;;  %v4760_v37 = vld [vmem:[%s14368_s8 + $0x188] sm:$0xff] }
0x1be7   :  { %v7164_v17 = vmul.f32 %v11316_v51, %v13419_v61  ;;  %10840 = vmatpush1.bf16.msra.mxu1 %v10839_v14  ;;  %10848 = vmatpush1.bf16.msra.mxu0 %v10847_v6  ;;  %v4705_v14 = vld [vmem:[%s14365_s29 + $0x1e0] sm:$0xff]  ;;  %v10873_v6 = vpack.c.bf16 %v4706_v20, %v4690_v39  ;;  %v10917_v51 = vpack.c.bf16 %v4760_v37, %v4759_v58  ;;  %v4752_v37 = vld [vmem:[%s14368_s8 + $0x148] sm:$0xff] }
0x1be8   :  { %10842 = vmatprep.subr.bf16.mxu1 %v10841_v59  ;;  %10850 = vmatprep.subr.bf16.mxu0 %v10849_v42  ;;  %v7175_v13 = vmul.f32 %v9056_v23, %v7165_v44  ;;  %v4727_v59 = vld [vmem:[%s14368_s8 + $0x80] sm:$0xff]  ;;  %v4728_v42 = vld [vmem:[%s14368_s8 + $0x88] sm:$0xff]  ;;  %v10875_v31 = vpack.c.bf16 %v4705_v14, %v4689_v24 }
0x1be9   :  { %v7174_v55 = vmul.f32 %v9056_v23, %v7164_v17  ;;  %9059 = vmatmul.mubr.msk.f32.gmra.mrb[130].mxu1 %vm744_vm0, %v13473_v2  ;;  %9063 = vmatmul.mubr.msk.f32.gmra.mrb[130].mxu0 %vm744_vm0, %v13473_v2  ;;  %v10859_v23 = vpack.c.bf16 %v4701_v4, %v4685_v15  ;;  %v10885_v7 = vpack.c.bf16 %v4728_v42, %v4727_v59  ;;  %v4743_v44 = vld [vmem:[%s14368_s8 + $0x100] sm:$0xff]  ;;  %v4744_v17 = vld [vmem:[%s14368_s8 + $0x108] sm:$0xff] }
0x1bea   :  { %7356 = vmatprep.mubr.f32.mxu1 %v14354_v32  ;;  %7445 = vmatprep.mubr.f32.mxu0 %v14354_v32  ;;  %v13491_v49 = vadd.f32 %v9057_v56, %v7175_v13  ;;  %v4762_v13 = vld [vmem:[%s14368_s8 + $0x198] sm:$0xff]  ;;  %v10919_v22 = vpack.c.bf16 %v4744_v17, %v4743_v44  ;;  %v4763_v15 = vld [vmem:[%s14368_s8 + $0x1a0] sm:$0xff]  ;;  %v4764_v4 = vld [vmem:[%s14368_s8 + $0x1a8] sm:$0xff] }
0x1beb   :  { %v13483_v61 = vadd.f32 %v9057_v56, %v7174_v55  ;;  %10844 = vmatpush1.bf16.msra.mxu1 %v10843_v50  ;;  %10852 = vmatpush1.bf16.msra.mxu0 %v10851_v40  ;;  %v10867_v56 = vpack.c.bf16 %v4703_v41, %v4687_v53  ;;  %v4711_v50 = vld [vmem:[%s14368_s8] sm:$0xff]  ;;  %v4712_v40 = vld [vmem:[%s14368_s8 + $0x8] sm:$0xff]  ;;  %v4761_v55 = vld [vmem:[%s14368_s8 + $0x190] sm:$0xff]  ;;  %v10925_v0 = vpack.c.bf16 %v4764_v4, %v4763_v15 }
0x1bec   :  { %10854 = vmatprep.subr.bf16.mxu1 %v10853_v29  ;;  %10862 = vmatprep.subr.bf16.mxu0 %v10861_v45  ;;  %14367 = vst [vmem:[#allocation66_spill] sm:$0xff] %v13491_v49  ;;  %v4729_v29 = vld [vmem:[%s14368_s8 + $0x90] sm:$0xff]  ;;  %v4730_v45 = vld [vmem:[%s14368_s8 + $0x98] sm:$0xff]  ;;  %v10887_v12 = vpack.c.bf16 %v4712_v40, %v4711_v50  ;;  %v10921_v47 = vpack.c.bf16 %v4762_v13, %v4761_v55  ;;  %v4715_v53 = vld [vmem:[%s14368_s8 + $0x20] sm:$0xff] }
0x1bed   :  { %14366 = vst [vmem:[#allocation65_spill] sm:$0xff] %v13483_v61  ;;  %9060 = vmatmul.mubr.msk.f32.gmra.mrb[132].mxu1 %vm744_vm0, %v13483_v61  ;;  %9064 = vmatmul.mubr.msk.f32.gmra.mrb[132].mxu0 %vm744_vm0, %v13483_v61  ;;  %v10889_v35 = vpack.c.bf16 %v4730_v45, %v4729_v29  ;;  %v4716_v41 = vld [vmem:[%s14368_s8 + $0x28] sm:$0xff]  ;;  %v4767_v24 = vld [vmem:[%s14368_s8 + $0x1c0] sm:$0xff]  ;;  %v4721_v40 = vld [vmem:[%s14368_s8 + $0x50] sm:$0xff] }
0x1bee   :  { %7362 = vmatprep.mubr.f32.mxu1 %v14354_v32  ;;  %7451 = vmatprep.mubr.f32.mxu0 %v14354_v32  ;;  %v10895_v18 = vpack.c.bf16 %v4716_v41, %v4715_v53  ;;  %v4768_v14 = vld [vmem:[%s14368_s8 + $0x1c8] sm:$0xff]  ;;  %v4751_v58 = vld [vmem:[%s14368_s8 + $0x140] sm:$0xff]  ;;  %v4722_v44 = vld [vmem:[%s14368_s8 + $0x58] sm:$0xff] }
0x1bef   :  { %v10933_v42 = vpack.c.bf16 %v4768_v14, %v4767_v24  ;;  %v10935_v50 = vpack.c.bf16 %v4752_v37, %v4751_v58  ;;  %v4753_v45 = vld [vmem:[%s14368_s8 + $0x150] sm:$0xff]  ;;  %v4754_v55 = vld [vmem:[%s14368_s8 + $0x158] sm:$0xff]  ;;  %v4739_v13 = vld [vmem:[%s14368_s8 + $0xe0] sm:$0xff] }
0x1bf0   :  { %v4756_v15 = vld [vmem:[%s14368_s8 + $0x168] sm:$0xff]  ;;  %v4742_v53 = vld [vmem:[%s14368_s8 + $0xf8] sm:$0xff]  ;;  %v4773_v41 = vld [vmem:[%s14368_s8 + $0x1f0] sm:$0xff] }
0x1bf1   :  { %9061 = vmatmul.mubr.msk.f32.gmra.mrb[134].mxu1 %vm744_vm0, %v13491_v49  ;;  %9065 = vmatmul.mubr.msk.f32.gmra.mrb[134].mxu0 %vm744_vm0, %v13491_v49  ;;  %v14371_v24 = vld [vmem:[#allocation68_spill] sm:$0xff] }
0x1bf2   :  { %7522 = vmatprep.mubr.f32.mxu1 %v14354_v32  ;;  %7611 = vmatprep.mubr.f32.mxu0 %v14354_v32 }
0x1bf5   :  { %9066 = vmatmul.mubr.msk.f32.vlgmr.msra.gmra.mrb[136].mxu1 %vm744_vm0, %v13458_v8  ;;  %9070 = vmatmul.mubr.msk.f32.vlgmr.msra.gmra.mrb[136].mxu0 %vm744_vm0, %v13458_v8 }
0x1bf6   :  { %7528 = vmatprep.mubr.f32.mxu1 %v14354_v32  ;;  %7617 = vmatprep.mubr.f32.mxu0 %v14354_v32 }
0x1bf7   :  { %10856 = vmatpush1.bf16.msra.mxu1 %v10855_v9  ;;  %10864 = vmatpush1.bf16.msra.mxu0 %v10863_v54  ;;  %v4731_v9 = vld [vmem:[%s14368_s8 + $0xa0] sm:$0xff]  ;;  %v4732_v54 = vld [vmem:[%s14368_s8 + $0xa8] sm:$0xff] }
0x1bf8   :  { %10858 = vmatprep.subr.bf16.mxu1 %v10857_v38  ;;  %10866 = vmatprep.subr.bf16.mxu0 %v10865_v25  ;;  %v10891_v38 = vpack.c.bf16 %v4714_v10, %v4713_v33  ;;  %v10923_v25 = vpack.c.bf16 %v4746_v48, %v4745_v16  ;;  %v10893_v34 = vpack.c.bf16 %v4732_v54, %v4731_v9  ;;  %v4772_v33 = vld [vmem:[%s14368_s8 + $0x1e8] sm:$0xff]  ;;  %v4755_v54 = vld [vmem:[%s14368_s8 + $0x160] sm:$0xff] }
0x1bf9   :  { %9067 = vmatmul.mubr.msk.f32.gmra.mrb[138].mxu1 %vm744_vm0, %v13473_v2  ;;  %9071 = vmatmul.mubr.msk.f32.gmra.mrb[138].mxu0 %vm744_vm0, %v13473_v2  ;;  %v10907_v10 = vpack.c.bf16 %v4722_v44, %v4721_v40  ;;  %v4724_v9 = vld [vmem:[%s14368_s8 + $0x68] sm:$0xff]  ;;  %v4794_v44 = vld [vmem:[%s14368_s8 + $0x298] sm:$0xff] }
0x1bfa   :  { %7534 = vmatprep.mubr.f32.mxu1 %v14354_v32  ;;  %7623 = vmatprep.mubr.f32.mxu0 %v14354_v32 }
0x1bfb   :  { %10860 = vmatpush1.bf16.msra.mxu1 %v10859_v23  ;;  %10868 = vmatpush1.bf16.msra.mxu0 %v10867_v56  ;;  %v4733_v23 = vld [vmem:[%s14368_s8 + $0xb0] sm:$0xff]  ;;  %v4734_v56 = vld [vmem:[%s14368_s8 + $0xb8] sm:$0xff] }
0x1bfc   :  { %10870 = vmatprep.subr.bf16.mxu1 %v10869_v62  ;;  %10878 = vmatprep.subr.bf16.mxu0 %v10877_v30  ;;  %v4765_v62 = vld [vmem:[%s14368_s8 + $0x1b0] sm:$0xff]  ;;  %v4766_v30 = vld [vmem:[%s14368_s8 + $0x1b8] sm:$0xff]  ;;  %v10897_v39 = vpack.c.bf16 %v4734_v56, %v4733_v23  ;;  %v10915_v56 = vpack.c.bf16 %v4726_v21, %v4725_v27  ;;  %v4827_v21 = vld [vmem:[%s14368_s8 + $0x3a0] sm:$0xff] }
0x1bfd   :  { %9068 = vmatmul.mubr.msk.f32.gmra.mrb[140].mxu1 %vm744_vm0, %v13483_v61  ;;  %9072 = vmatmul.mubr.msk.f32.gmra.mrb[140].mxu0 %vm744_vm0, %v13483_v61  ;;  %v10929_v20 = vpack.c.bf16 %v4766_v30, %v4765_v62  ;;  %v4757_v62 = vld [vmem:[%s14368_s8 + $0x170] sm:$0xff]  ;;  %v4758_v30 = vld [vmem:[%s14368_s8 + $0x178] sm:$0xff] }
0x1bfe   :  { %7540 = vmatprep.mubr.f32.mxu1 %v14354_v32  ;;  %7629 = vmatprep.mubr.f32.mxu0 %v14354_v32 }
0x1c01   :  { %9069 = vmatmul.mubr.msk.f32.gmra.mrb[142].mxu1 %vm744_vm0, %v13491_v49  ;;  %9073 = vmatmul.mubr.msk.f32.gmra.mrb[142].mxu0 %vm744_vm0, %v13491_v49 }
0x1c02   :  { %7700 = vmatprep.mubr.f32.mxu1 %v14354_v32  ;;  %7789 = vmatprep.mubr.f32.mxu0 %v14354_v32 }
0x1c05   :  { %9074 = vmatmul.mubr.msk.f32.vlgmr.msra.gmra.mrb[144].mxu1 %vm744_vm0, %v13458_v8  ;;  %9078 = vmatmul.mubr.msk.f32.vlgmr.msra.gmra.mrb[144].mxu0 %vm744_vm0, %v13458_v8 }
0x1c06   :  { %7706 = vmatprep.mubr.f32.mxu1 %v14354_v32  ;;  %7795 = vmatprep.mubr.f32.mxu0 %v14354_v32 }
0x1c07   :  { %10872 = vmatpush1.bf16.msra.mxu1 %v10871_v60  ;;  %10880 = vmatpush1.bf16.msra.mxu0 %v10879_v36  ;;  %v4735_v60 = vld [vmem:[%s14368_s8 + $0xc0] sm:$0xff]  ;;  %v4736_v36 = vld [vmem:[%s14368_s8 + $0xc8] sm:$0xff] }
0x1c08   :  { %10874 = vmatprep.subr.bf16.mxu1 %v10873_v6  ;;  %10882 = vmatprep.subr.bf16.mxu0 %v10881_v28  ;;  %v10899_v6 = vpack.c.bf16 %v4718_v3, %v4717_v1  ;;  %v10931_v28 = vpack.c.bf16 %v4750_v26, %v4749_v43  ;;  %v10901_v59 = vpack.c.bf16 %v4736_v36, %v4735_v60  ;;  %v4792_v1 = vld [vmem:[%s14368_s8 + $0x288] sm:$0xff]  ;;  %v4823_v3 = vld [vmem:[%s14368_s8 + $0x380] sm:$0xff] }
0x1c09   :  { %9075 = vmatmul.mubr.msk.f32.gmra.mrb[146].mxu1 %vm744_vm0, %v13473_v2  ;;  %9079 = vmatmul.mubr.msk.f32.gmra.mrb[146].mxu0 %vm744_vm0, %v13473_v2  ;;  %v13666_v26 = vld [vmem:[%s14369_s12] sm:$0xff]  ;;  %v14370_v60 = vld [vmem:[#allocation67_spill] sm:$0xff] }
0x1c0a   :  { %7712 = vmatprep.mubr.f32.mxu1 %v14354_v32  ;;  %7801 = vmatprep.mubr.f32.mxu0 %v14354_v32  ;;  %v13670_v36 = vrot.slane %v13666_v26, %v14370_v60  ;;  %v13674_v14 = vrot.slane %v13666_v26, %v14371_v24 }
0x1c0b   :  { %10876 = vmatpush1.bf16.msra.mxu1 %v10875_v31  ;;  %10884 = vmatpush1.bf16.msra.mxu0 %v10883_v5  ;;  %v4737_v31 = vld [vmem:[%s14368_s8 + $0xd0] sm:$0xff] }
0x1c0c   :  { %10886 = vmatprep.subr.bf16.mxu1 %v10885_v7  ;;  %10918 = vmatprep.subr.bf16.mxu0 %v10917_v51  ;;  %v4769_v5 = vld [vmem:[%s14368_s8 + $0x1d0] sm:$0xff]  ;;  %v4770_v7 = vld [vmem:[%s14368_s8 + $0x1d8] sm:$0xff]  ;;  %v10903_v51 = vpack.c.bf16 %v4720_v46, %v4719_v57  ;;  %v14373_v57 = vld [vmem:[#allocation70_spill] sm:$0xff] }
0x1c0d   :  { %9076 = vmatmul.mubr.msk.f32.gmra.mrb[148].mxu1 %vm744_vm0, %v13483_v61  ;;  %9080 = vmatmul.mubr.msk.f32.gmra.mrb[148].mxu0 %vm744_vm0, %v13483_v61  ;;  %v10937_v29 = vpack.c.bf16 %v4770_v7, %v4769_v5  ;;  %v13682_v46 = vrot.slane %v13666_v26, %v14373_v57  ;;  %v4793_v5 = vld [vmem:[%s14368_s8 + $0x290] sm:$0xff] }
0x1c0e   :  { %7718 = vmatprep.mubr.f32.mxu1 %v14354_v32  ;;  %7807 = vmatprep.mubr.f32.mxu0 %v14354_v32 }
0x1c11   :  { %9077 = vmatmul.mubr.msk.f32.gmra.mrb[150].mxu1 %vm744_vm0, %v13491_v49  ;;  %9081 = vmatmul.mubr.msk.f32.gmra.mrb[150].mxu0 %vm744_vm0, %v13491_v49 }
0x1c12   :  { %7878 = vmatprep.mubr.f32.mxu1 %v14354_v32  ;;  %7967 = vmatprep.mubr.f32.mxu0 %v14354_v32 }
0x1c15   :  { %9082 = vmatmul.mubr.msk.f32.vlgmr.msra.gmra.mrb[152].mxu1 %vm744_vm0, %v13458_v8  ;;  %9086 = vmatmul.mubr.msk.f32.vlgmr.msra.gmra.mrb[152].mxu0 %vm744_vm0, %v13458_v8 }
0x1c16   :  { %7884 = vmatprep.mubr.f32.mxu1 %v14354_v32  ;;  %7973 = vmatprep.mubr.f32.mxu0 %v14354_v32 }
0x1c17   :  { %10888 = vmatpush3.bf16.msra.mxu1 %v10887_v12  ;;  %10920 = vmatpush3.bf16.msra.mxu0 %v10919_v22  ;;  %v4740_v12 = vld [vmem:[%s14368_s8 + $0xe8] sm:$0xff]  ;;  %v4771_v22 = vld [vmem:[%s14368_s8 + $0x1e0] sm:$0xff] }
0x1c18   :  { %10890 = vmatprep.subr.bf16.mxu1 %v10889_v35  ;;  %10922 = vmatprep.subr.bf16.mxu0 %v10921_v47  ;;  %v10939_v35 = vpack.c.bf16 %v4754_v55, %v4753_v45  ;;  %v4723_v47 = vld [vmem:[%s14368_s8 + $0x60] sm:$0xff]  ;;  %v10909_v16 = vpack.c.bf16 %v4740_v12, %v4739_v13  ;;  %v10941_v48 = vpack.c.bf16 %v4772_v33, %v4771_v22  ;;  %v13697_v13 = vld [vmem:[%s14368_s8 + $0x210] sm:$0xff]  ;;  %v13700_v33 = vld [vmem:[%s14368_s8 + $0x218] sm:$0xff] }
0x1c19   :  { %9083 = vmatmul.mubr.msk.f32.gmra.mrb[154].mxu1 %vm744_vm0, %v13473_v2  ;;  %9087 = vmatmul.mubr.msk.f32.gmra.mrb[154].mxu0 %vm744_vm0, %v13473_v2  ;;  %v10911_v4 = vpack.c.bf16 %v4724_v9, %v4723_v47 }
0x1c1a   :  { %7890 = vmatprep.mubr.f32.mxu1 %v14354_v32  ;;  %7979 = vmatprep.mubr.f32.mxu0 %v14354_v32 }
0x1c1b   :  { %10892 = vmatpush3.bf16.msra.mxu1 %v10891_v38  ;;  %10924 = vmatpush3.bf16.msra.mxu0 %v10923_v25  ;;  %v10943_v38 = vpack.c.bf16 %v4756_v15, %v4755_v54  ;;  %v4741_v25 = vld [vmem:[%s14368_s8 + $0xf0] sm:$0xff]  ;;  %v10953_v54 = vpack.c.bf16 %v4794_v44, %v4793_v5 }
0x1c1c   :  { %10894 = vmatprep.subr.bf16.mxu1 %v10893_v34  ;;  %10926 = vmatprep.subr.bf16.mxu0 %v10925_v0  ;;  %v10913_v34 = vpack.c.bf16 %v4742_v53, %v4741_v25  ;;  %v4774_v0 = vld [vmem:[%s14368_s8 + $0x1f8] sm:$0xff] }
0x1c1d   :  { %9084 = vmatmul.mubr.msk.f32.gmra.mrb[156].mxu1 %vm744_vm0, %v13483_v61  ;;  %9088 = vmatmul.mubr.msk.f32.gmra.mrb[156].mxu0 %vm744_vm0, %v13483_v61  ;;  %v10945_v23 = vpack.c.bf16 %v4774_v0, %v4773_v41 }
0x1c1e   :  { %7896 = vmatprep.mubr.f32.mxu1 %v14354_v32  ;;  %7985 = vmatprep.mubr.f32.mxu0 %v14354_v32  ;;  %v4738_v32 = vld [vmem:[%s14368_s8 + $0xd8] sm:$0xff] }
0x1c1f   :  { %10896 = vmatpush3.bf16.msra.mxu1 %v10895_v18  ;;  %10928 = vmatpush3.bf16.msra.mxu0 %v10927_v11  ;;  %v10905_v17 = vpack.c.bf16 %v4738_v32, %v4737_v31  ;;  %v10947_v18 = vpack.c.bf16 %v4758_v30, %v4757_v62  ;;  %v4791_v11 = vld [vmem:[%s14368_s8 + $0x280] sm:$0xff]  ;;  %v4808_v32 = vld [vmem:[%s14368_s8 + $0x308] sm:$0xff] }
0x1c20   :  { %10898 = vmatprep.subr.bf16.mxu1 %v10897_v39  ;;  %10930 = vmatprep.subr.bf16.mxu0 %v10929_v20  ;;  %v10949_v39 = vpack.c.bf16 %v4792_v1, %v4791_v11  ;;  %v4824_v20 = vld [vmem:[%s14368_s8 + $0x388] sm:$0xff]  ;;  %v4807_v31 = vld [vmem:[%s14368_s8 + $0x300] sm:$0xff] }
0x1c21   :  { %9085 = vmatmul.mubr.msk.f32.gmra.mrb[158].mxu1 %vm744_vm0, %v13491_v49  ;;  %9089 = vmatmul.mubr.msk.f32.gmra.mrb[158].mxu0 %vm744_vm0, %v13491_v49  ;;  %v10981_v43 = vpack.c.bf16 %v4824_v20, %v4823_v3  ;;  %v10983_v22 = vpack.c.bf16 %v4808_v32, %v4807_v31  ;;  %v13719_v30 = vld [vmem:[%s14368_s8 + $0x220] sm:$0xff]  ;;  %v13725_v1 = vld [vmem:[%s14368_s8 + $0x228] sm:$0xff]  ;;  %v13736_v31 = vld [vmem:[%s14368_s8 + $0x2b0] sm:$0xff] }
0x1c22   :  { %v13728_v3 = vld [vmem:[%s14368_s8 + $0x320] sm:$0xff]  ;;  %v13739_v32 = vld [vmem:[%s14368_s8 + $0x2b8] sm:$0xff] }
0x1c23   :  { %10900 = vmatpush3.bf16.msra.mxu1 %v10899_v6  ;;  %10932 = vmatpush3.bf16.msra.mxu0 %v10931_v28  ;;  %v14372_v6 = vld [vmem:[#allocation69_spill] sm:$0xff] }
0x1c24   :  { %10902 = vmatprep.subr.bf16.mxu1 %v10901_v59  ;;  %10934 = vmatprep.subr.bf16.mxu0 %v10933_v42  ;;  %v13678_v28 = vrot.slane %v13666_v26, %v14372_v6  ;;  %v4775_v59 = vld [vmem:[%s14368_s8 + $0x200] sm:$0xff]  ;;  %v4776_v42 = vld [vmem:[%s14368_s8 + $0x208] sm:$0xff] }
0x1c25   :  { %v10951_v12 = vpack.c.bf16 %v4776_v42, %v4775_v59 }
0x1c27   :  { %10904 = vmatpush3.bf16.msra.mxu1 %v10903_v51  ;;  %10936 = vmatpush3.bf16.msra.mxu0 %v10935_v50 }
0x1c28   :  { %10906 = vmatprep.subr.bf16.mxu1 %v10905_v17  ;;  %10938 = vmatprep.subr.bf16.mxu0 %v10937_v29  ;;  %v4825_v17 = vld [vmem:[%s14368_s8 + $0x390] sm:$0xff]  ;;  %v4826_v29 = vld [vmem:[%s14368_s8 + $0x398] sm:$0xff] }
0x1c29   :  { %v10985_v15 = vpack.c.bf16 %v4826_v29, %v4825_v17  ;;  %v4829_v17 = vld [vmem:[%s14368_s8 + $0x3b0] sm:$0xff]  ;;  %v4830_v29 = vld [vmem:[%s14368_s8 + $0x3b8] sm:$0xff] }
0x1c2b   :  { %10908 = vmatpush3.bf16.msra.mxu1 %v10907_v10  ;;  %10940 = vmatpush3.bf16.msra.mxu0 %v10939_v35  ;;  %v13703_v10 = vld [vmem:[%s14368_s8 + $0x310] sm:$0xff]  ;;  %v4810_v35 = vld [vmem:[%s14368_s8 + $0x318] sm:$0xff] }
0x1c2c   :  { %10910 = vmatprep.subr.bf16.mxu1 %v10909_v16  ;;  %10942 = vmatprep.subr.bf16.mxu0 %v10941_v48  ;;  %v10987_v11 = vpack.c.bf16 %v4810_v35, %v13703_v10 }
0x1c2f   :  { %10912 = vmatpush3.bf16.msra.mxu1 %v10911_v4  ;;  %10944 = vmatpush3.bf16.msra.mxu0 %v10943_v38  ;;  %v13707_v4 = vld [vmem:[%s14368_s8 + $0x2a0] sm:$0xff]  ;;  %v13710_v38 = vld [vmem:[%s14368_s8 + $0x2a8] sm:$0xff] }
0x1c30   :  { %10914 = vmatprep.subr.bf16.mxu1 %v10913_v34  ;;  %10946 = vmatprep.subr.bf16.mxu0 %v10945_v23  ;;  %v4828_v23 = vld [vmem:[%s14368_s8 + $0x3a8] sm:$0xff] }
0x1c33   :  { %10916 = vmatpush3.bf16.msra.mxu1 %v10915_v56  ;;  %10948 = vmatpush3.bf16.msra.mxu0 %v10947_v18  ;;  %v10955_v18 = vpack.c.bf16 %v13700_v33, %v13697_v13  ;;  %v10959_v13 = vpack.c.bf16 %v13725_v1, %v13719_v30  ;;  %v13756_v33 = vld [vmem:[%s14368_s8 + $0x230] sm:$0xff]  ;;  %v4832_v30 = vld [vmem:[%s14368_s8 + $0x3c8] sm:$0xff] }
0x1c34   :  { %10950 = vmatprep.subr.bf16.mxu1 %v10949_v39  ;;  %10982 = vmatprep.subr.bf16.mxu0 %v10981_v43  ;;  %v13731_v39 = vld [vmem:[%s14368_s8 + $0x328] sm:$0xff] }
0x1cb8   :  { %v7346_v58 = vpop.f32.mrb[128].mxu1  ;;  %v7435_v37 = vpop.f32.mrb[128].mxu0 }
0x1cb9   :  { %v7347_v7 = vadd.f32 %v7346_v58, %v13670_v36  ;;  %v7436_v51 = vadd.f32 %v7435_v37, %v13674_v14  ;;  %v7348_v50 = vpop.f32.mrb[129].mxu1  ;;  %v7437_v40 = vpop.f32.mrb[129].mxu0  ;;  %v10957_v58 = vpack.c.bf16 %v13710_v38, %v13707_v4  ;;  %v10989_v37 = vpack.c.bf16 %v4828_v23, %v4827_v21 }
0x1cba   :  { %v7349_v45 = vadd.f32 %v7348_v50, %v13678_v28  ;;  %v7438_v55 = vadd.f32 %v7437_v40, %v13682_v46 }
0x1cbb   :  { %v7992_v25 = vmax.f32 %v7347_v7, 0.0  ;;  %v7994_v53 = vmax.f32 %v7436_v51, 0.0 }
0x1cbc   :  { %v7993_v47 = vmax.f32 %v7349_v45, 0.0  ;;  %v7995_v16 = vmax.f32 %v7438_v55, 0.0  ;;  %v7352_v48 = vpop.f32.mrb[130].mxu1  ;;  %v7441_v9 = vpop.f32.mrb[130].mxu0 }
0x1cbd   :  { %v7353_v41 = vadd.f32 %v7352_v48, %v13670_v36  ;;  %v7442_v34 = vadd.f32 %v7441_v9, %v13674_v14  ;;  %v7354_v0 = vpop.f32.mrb[131].mxu1  ;;  %v7443_v27 = vpop.f32.mrb[131].mxu0  ;;  %v10961_v48 = vpack.c.bf16 %v13739_v32, %v13736_v31  ;;  %v10993_v9 = vpack.c.bf16 %v4830_v29, %v4829_v17  ;;  %v4834_v17 = vld [vmem:[%s14368_s8 + $0x3d8] sm:$0xff] }
0x1cbe   :  { %v7355_v56 = vadd.f32 %v7354_v0, %v13678_v28  ;;  %v7444_v62 = vadd.f32 %v7443_v27, %v13682_v46  ;;  %8126 = vmatprep.mubr.f32.mxu1 %v7993_v47  ;;  %8211 = vmatprep.mubr.f32.mxu0 %v7995_v16  ;;  %v4814_v0 = vld [vmem:[%s14368_s8 + $0x338] sm:$0xff]  ;;  %v4799_v27 = vld [vmem:[%s14368_s8 + $0x2c0] sm:$0xff] }
0x1cbf   :  { %8127 = vmatmul.mubr.f32.vlgmr.msra.gmra.mrb[160].mxu1 %v7992_v25  ;;  %8212 = vmatmul.mubr.f32.vlgmr.msra.gmra.mrb[160].mxu0 %v7994_v53  ;;  %v8008_v5 = vmax.f32 %v7353_v41, 0.0  ;;  %v8010_v7 = vmax.f32 %v7442_v34, 0.0 }
0x1cc0   :  { %v8009_v20 = vmax.f32 %v7355_v56, 0.0  ;;  %v8011_v43 = vmax.f32 %v7444_v62, 0.0  ;;  %10952 = vmatpush3.bf16.msra.mxu1 %v10951_v12  ;;  %10984 = vmatpush3.bf16.msra.mxu0 %v10983_v22  ;;  %v7358_v59 = vpop.f32.mrb[132].mxu1  ;;  %v7447_v42 = vpop.f32.mrb[132].mxu0  ;;  %v10991_v12 = vpack.c.bf16 %v13731_v39, %v13728_v3  ;;  %v13753_v22 = vrot.slane %v13666_v26, %v12617_v63  ;;  %v14374_v56 = vld [vmem:[#allocation71_spill] sm:$0xff] }
0x1cc1   :  { %v7359_v51 = vadd.f32 %v7358_v59, %v13670_v36  ;;  %v7448_v50 = vadd.f32 %v7447_v42, %v13674_v14  ;;  %v7360_v40 = vpop.f32.mrb[133].mxu1  ;;  %v7449_v44 = vpop.f32.mrb[133].mxu0  ;;  %10954 = vmatprep.subr.bf16.mxu1 %v10953_v54  ;;  %10986 = vmatprep.subr.bf16.mxu0 %v10985_v15  ;;  %v4782_v54 = vld [vmem:[%s14368_s8 + $0x238] sm:$0xff]  ;;  %v4813_v15 = vld [vmem:[%s14368_s8 + $0x330] sm:$0xff]  ;;  %v13770_v62 = vrot.slane %v13666_v26, %v14374_v56 }
0x1cc2   :  { %v7361_v45 = vadd.f32 %v7360_v40, %v13678_v28  ;;  %v7450_v55 = vadd.f32 %v7449_v44, %v13682_v46  ;;  %8131 = vmatprep.mubr.f32.mxu1 %v8009_v20  ;;  %8216 = vmatprep.mubr.f32.mxu0 %v8011_v43  ;;  %v10963_v3 = vpack.c.bf16 %v4782_v54, %v13756_v33  ;;  %v4784_v20 = vld [vmem:[%s14368_s8 + $0x248] sm:$0xff]  ;;  %v4815_v43 = vld [vmem:[%s14368_s8 + $0x340] sm:$0xff]  ;;  %v4802_v40 = vld [vmem:[%s14368_s8 + $0x2d8] sm:$0xff] }
0x1cc3   :  { %8132 = vmatmul.mubr.f32.gmra.mrb[162].mxu1 %v8008_v5  ;;  %8217 = vmatmul.mubr.f32.gmra.mrb[162].mxu0 %v8010_v7  ;;  %v8024_v4 = vmax.f32 %v7359_v51, 0.0  ;;  %v8026_v38 = vmax.f32 %v7448_v50, 0.0  ;;  %v10995_v39 = vpack.c.bf16 %v4814_v0, %v4813_v15  ;;  %v4816_v5 = vld [vmem:[%s14368_s8 + $0x348] sm:$0xff]  ;;  %v4801_v7 = vld [vmem:[%s14368_s8 + $0x2d0] sm:$0xff]  ;;  %v4818_v15 = vld [vmem:[%s14368_s8 + $0x358] sm:$0xff] }
0x1cc4   :  { %v8025_v10 = vmax.f32 %v7361_v45, 0.0  ;;  %v8027_v35 = vmax.f32 %v7450_v55, 0.0  ;;  %10956 = vmatpush3.bf16.msra.mxu1 %v10955_v18  ;;  %10988 = vmatpush3.bf16.msra.mxu0 %v10987_v11  ;;  %v7364_v47 = vpop.f32.mrb[134].mxu1  ;;  %v7453_v16 = vpop.f32.mrb[134].mxu0  ;;  %v4783_v18 = vld [vmem:[%s14368_s8 + $0x240] sm:$0xff]  ;;  %v4833_v44 = vld [vmem:[%s14368_s8 + $0x3d0] sm:$0xff]  ;;  %v10999_v33 = vpack.c.bf16 %v4816_v5, %v4815_v43 }
0x1cc5   :  { %v7365_v25 = vadd.f32 %v7364_v47, %v13670_v36  ;;  %v7454_v53 = vadd.f32 %v7453_v16, %v13674_v14  ;;  %v7366_v41 = vpop.f32.mrb[135].mxu1  ;;  %v7455_v34 = vpop.f32.mrb[135].mxu0  ;;  %10958 = vmatprep.subr.bf16.mxu1 %v10957_v58  ;;  %10990 = vmatprep.subr.bf16.mxu0 %v10989_v37  ;;  %v4800_v36 = vld [vmem:[%s14368_s8 + $0x2c8] sm:$0xff]  ;;  %v4831_v14 = vld [vmem:[%s14368_s8 + $0x3c0] sm:$0xff]  ;;  %v4817_v54 = vld [vmem:[%s14368_s8 + $0x350] sm:$0xff] }
0x1cc6   :  { %v7367_v21 = vadd.f32 %v7366_v41, %v13678_v28  ;;  %v7456_v23 = vadd.f32 %v7455_v34, %v13682_v46  ;;  %8136 = vmatprep.mubr.f32.mxu1 %v8025_v10  ;;  %8221 = vmatprep.mubr.f32.mxu0 %v8027_v35  ;;  %v10965_v31 = vpack.c.bf16 %v4800_v36, %v4799_v27  ;;  %v4785_v10 = vld [vmem:[%s14368_s8 + $0x250] sm:$0xff]  ;;  %v4786_v35 = vld [vmem:[%s14368_s8 + $0x258] sm:$0xff] }
0x1cc7   :  { %8137 = vmatmul.mubr.f32.gmra.mrb[164].mxu1 %v8024_v4  ;;  %8222 = vmatmul.mubr.f32.gmra.mrb[164].mxu0 %v8026_v38  ;;  %v8040_v59 = vmax.f32 %v7365_v25, 0.0  ;;  %v8042_v42 = vmax.f32 %v7454_v53, 0.0  ;;  %v10997_v32 = vpack.c.bf16 %v4832_v30, %v4831_v14  ;;  %v4803_v4 = vld [vmem:[%s14368_s8 + $0x2e0] sm:$0xff]  ;;  %v4804_v38 = vld [vmem:[%s14368_s8 + $0x2e8] sm:$0xff]  ;;  %v10971_v0 = vpack.c.bf16 %v4786_v35, %v4785_v10  ;;  %v4838_v43 = vld [vmem:[%s14368_s8 + $0x3f8] sm:$0xff] }
0x1cc8   :  { %v8041_v11 = vmax.f32 %v7367_v21, 0.0  ;;  %v8043_v1 = vmax.f32 %v7456_v23, 0.0  ;;  %10960 = vmatpush3.bf16.msra.mxu1 %v10959_v13  ;;  %10992 = vmatpush3.bf16.msra.mxu0 %v10991_v12  ;;  %v13776_v28 = vpop.f32.mrb[136].mxu1  ;;  %v13778_v46 = vpop.f32.mrb[136].mxu0  ;;  %v10967_v12 = vpack.c.bf16 %v4784_v20, %v4783_v18  ;;  %v4835_v25 = vld [vmem:[%s14368_s8 + $0x3e0] sm:$0xff]  ;;  %v4836_v53 = vld [vmem:[%s14368_s8 + $0x3e8] sm:$0xff]  ;;  %v11003_v27 = vpack.c.bf16 %v4818_v15, %v4817_v54 }
0x1cc9   :  { %v7526_v58 = vpop.f32.mrb[137].mxu1  ;;  %v7615_v37 = vpop.f32.mrb[137].mxu0  ;;  %10962 = vmatprep.subr.bf16.mxu1 %v10961_v48  ;;  %10994 = vmatprep.subr.bf16.mxu0 %v10993_v9  ;;  %v10969_v48 = vpack.c.bf16 %v4802_v40, %v4801_v7  ;;  %v11001_v9 = vpack.c.bf16 %v4834_v17, %v4833_v44  ;;  %v4787_v21 = vld [vmem:[%s14368_s8 + $0x260] sm:$0xff]  ;;  %v4788_v23 = vld [vmem:[%s14368_s8 + $0x268] sm:$0xff]  ;;  %v10973_v30 = vpack.c.bf16 %v4804_v38, %v4803_v4  ;;  %v4837_v20 = vld [vmem:[%s14368_s8 + $0x3f0] sm:$0xff] }
0x1cca   :  { %v7527_v51 = vadd.f32 %v7526_v58, %v13753_v22  ;;  %v7616_v50 = vadd.f32 %v7615_v37, %v13770_v62  ;;  %8141 = vmatprep.mubr.f32.mxu1 %v8041_v11  ;;  %8226 = vmatprep.mubr.f32.mxu0 %v8043_v1  ;;  %v11005_v18 = vpack.c.bf16 %v4836_v53, %v4835_v25  ;;  %v4819_v11 = vld [vmem:[%s14368_s8 + $0x360] sm:$0xff]  ;;  %v4820_v1 = vld [vmem:[%s14368_s8 + $0x368] sm:$0xff]  ;;  %v4790_v5 = vld [vmem:[%s14368_s8 + $0x278] sm:$0xff] }
0x1ccb   :  { %8142 = vmatmul.mubr.f32.gmra.mrb[166].mxu1 %v8040_v59  ;;  %8227 = vmatmul.mubr.f32.gmra.mrb[166].mxu0 %v8042_v42  ;;  %v13824_v59 = vrot.slane %v13666_v26, %v12697_v52  ;;  %v10975_v37 = vpack.c.bf16 %v4788_v23, %v4787_v21  ;;  %v4821_v7 = vld [vmem:[%s14368_s8 + $0x370] sm:$0xff]  ;;  %v11009_v17 = vpack.c.bf16 %v4838_v43, %v4837_v20  ;;  %v4888_v10 = vld [vmem:[%s14368_s8 + $0x588] sm:$0xff]  ;;  %v13847_v35 = vld [vmem:[%s14368_s8 + $0x400] sm:$0xff] }
0x1ccc   :  { %v7997_v29 = vmax.f32 %v7527_v51, 0.0  ;;  %v7999_v45 = vmax.f32 %v7616_v50, 0.0  ;;  %10964 = vmatpush3.bf16.msra.mxu1 %v10963_v3  ;;  %10996 = vmatpush3.bf16.msra.mxu0 %v10995_v39  ;;  %v13790_v55 = vpop.f32.mrb[138].mxu1  ;;  %v13792_v13 = vpop.f32.mrb[138].mxu0  ;;  %v4805_v3 = vld [vmem:[%s14368_s8 + $0x2f0] sm:$0xff]  ;;  %v4806_v39 = vld [vmem:[%s14368_s8 + $0x2f8] sm:$0xff]  ;;  %v13835_v51 = vrot.slane %v13666_v26, %v12706_v19 }
0x1ccd   :  { %v13796_v47 = vpop.f32.mrb[139].mxu1  ;;  %v13798_v16 = vpop.f32.mrb[139].mxu0  ;;  %10966 = vmatprep.subr.bf16.mxu1 %v10965_v31  ;;  %10998 = vmatprep.subr.bf16.mxu0 %v10997_v32  ;;  %v11007_v31 = vpack.c.bf16 %v4820_v1, %v4819_v11  ;;  %v4789_v32 = vld [vmem:[%s14368_s8 + $0x270] sm:$0xff]  ;;  %v10977_v44 = vpack.c.bf16 %v4806_v39, %v4805_v3  ;;  %v13850_v26 = vld [vmem:[%s14368_s8 + $0x408] sm:$0xff]  ;;  %v13857_v38 = vld [vmem:[%s14368_s8 + $0x500] sm:$0xff] }
0x1cce   :  { %8296 = vmatprep.mubr.f32.mxu1 %v7997_v29  ;;  %8381 = vmatprep.mubr.f32.mxu0 %v7999_v45  ;;  %v4822_v29 = vld [vmem:[%s14368_s8 + $0x378] sm:$0xff]  ;;  %v4855_v45 = vld [vmem:[%s14368_s8 + $0x480] sm:$0xff]  ;;  %v10979_v54 = vpack.c.bf16 %v4790_v5, %v4789_v32  ;;  %v13860_v25 = vld [vmem:[%s14368_s8 + $0x508] sm:$0xff]  ;;  %v11015_v39 = vpack.c.bf16 %v13850_v26, %v13847_v35 }
0x1ccf   :  { %v11011_v15 = vpack.c.bf16 %v4822_v29, %v4821_v7  ;;  %v13863_v53 = vld [vmem:[%s14368_s8 + $0x490] sm:$0xff]  ;;  %v13880_v1 = vld [vmem:[%s14368_s8 + $0x598] sm:$0xff]  ;;  %v13887_v3 = vld [vmem:[%s14369_s12 + $0x8] sm:$0xff] }
0x1cd0   :  { %10968 = vmatpush3.bf16.msra.mxu1 %v10967_v12  ;;  %11000 = vmatpush3.bf16.msra.mxu0 %v10999_v33  ;;  %v13806_v41 = vpop.f32.mrb[140].mxu1  ;;  %v13808_v34 = vpop.f32.mrb[140].mxu0  ;;  %v4856_v12 = vld [vmem:[%s14368_s8 + $0x488] sm:$0xff]  ;;  %v4887_v33 = vld [vmem:[%s14368_s8 + $0x580] sm:$0xff]  ;;  %v13877_v11 = vld [vmem:[%s14368_s8 + $0x590] sm:$0xff] }
0x1cd1   :  { %v13812_v36 = vpop.f32.mrb[141].mxu1  ;;  %v13814_v14 = vpop.f32.mrb[141].mxu0  ;;  %10970 = vmatprep.subr.bf16.mxu1 %v10969_v48  ;;  %11002 = vmatprep.subr.bf16.mxu0 %v11001_v9  ;;  %v11013_v4 = vpack.c.bf16 %v4856_v12, %v4855_v45  ;;  %v13892_v20 = vld [vmem:[%s14368_s8 + $0x410] sm:$0xff]  ;;  %v13895_v43 = vld [vmem:[%s14368_s8 + $0x418] sm:$0xff]  ;;  %v11049_v5 = vpack.c.bf16 %v13880_v1, %v13877_v11  ;;  %v7531_v12 = vadd.f32 %v13790_v55, %v13824_v59  ;;  %v13928_v26 = vld [vmem:[%s14368_s8 + $0x5a0] sm:$0xff] }
0x1cd2   :  { %v13911_v7 = vld [vmem:[%s14368_s8 + $0x518] sm:$0xff]  ;;  %v7539_v55 = vadd.f32 %v13812_v36, %v13753_v22  ;;  %v13948_v36 = vld [vmem:[%s14368_s8 + $0x420] sm:$0xff]  ;;  %v4876_v11 = vld [vmem:[%s14368_s8 + $0x528] sm:$0xff] }
0x1cd3   :  { %v13968_v1 = vld [vmem:[%s14368_s8 + $0x4b0] sm:$0xff] }
0x1cd4   :  { %10972 = vmatpush3.bf16.msra.mxu1 %v10971_v0  ;;  %11004 = vmatpush3.bf16.msra.mxu0 %v11003_v27  ;;  %v13826_v42 = vpop.f32.mrb[142].mxu1  ;;  %v13828_v58 = vpop.f32.mrb[142].mxu0  ;;  %v7525_v0 = vadd.f32 %v13776_v28, %v13824_v59  ;;  %v7614_v27 = vadd.f32 %v13778_v46, %v13835_v51  ;;  %v7533_v28 = vadd.f32 %v13796_v47, %v13753_v22 }
0x1cd5   :  { %v13837_v50 = vpop.f32.mrb[143].mxu1  ;;  %v13839_v40 = vpop.f32.mrb[143].mxu0  ;;  %10974 = vmatprep.subr.bf16.mxu1 %v10973_v30  ;;  %11006 = vmatprep.subr.bf16.mxu0 %v11005_v18  ;;  %v11045_v30 = vpack.c.bf16 %v4888_v10, %v4887_v33  ;;  %v13874_v18 = vld [vmem:[%s14368_s8 + $0x498] sm:$0xff]  ;;  %v7622_v46 = vadd.f32 %v13798_v16, %v13770_v62  ;;  %v11047_v16 = vpack.c.bf16 %v13860_v25, %v13857_v38 }
0x1cd6   :  { %v11017_v32 = vpack.c.bf16 %v13874_v18, %v13863_v53  ;;  %v7996_v29 = vmax.f32 %v7525_v0, 0.0  ;;  %v7998_v45 = vmax.f32 %v7614_v27, 0.0  ;;  %v7620_v33 = vadd.f32 %v13792_v13, %v13835_v51  ;;  %v13951_v0 = vld [vmem:[%s14368_s8 + $0x428] sm:$0xff] }
0x1cd7   :  { %v8015_v38 = vmax.f32 %v7622_v46, 0.0  ;;  %v7628_v13 = vadd.f32 %v13814_v14, %v13770_v62  ;;  %v13939_v25 = vrot.slane %v13887_v3, %v14372_v6  ;;  %v11019_v53 = vpack.c.bf16 %v13895_v43, %v13892_v20  ;;  %v13954_v14 = vld [vmem:[%s14368_s8 + $0x520] sm:$0xff] }
0x1cd8   :  { %10976 = vmatpush3.bf16.msra.mxu1 %v10975_v37  ;;  %11008 = vmatpush3.bf16.msra.mxu0 %v11007_v31  ;;  %v13852_v48 = vpop.f32.mrb[144].mxu1  ;;  %v13854_v9 = vpop.f32.mrb[144].mxu0  ;;  %v13898_v37 = vld [vmem:[%s14368_s8 + $0x510] sm:$0xff]  ;;  %v8012_v46 = vmax.f32 %v7531_v12, 0.0  ;;  %v8014_v20 = vmax.f32 %v7620_v33, 0.0  ;;  %v7537_v43 = vadd.f32 %v13806_v41, %v13824_v59  ;;  %v7545_v12 = vadd.f32 %v13837_v50, %v13753_v22 }
0x1cd9   :  { %v13869_v21 = vpop.f32.mrb[145].mxu1  ;;  %v13871_v23 = vpop.f32.mrb[145].mxu0  ;;  %10978 = vmatprep.subr.bf16.mxu1 %v10977_v44  ;;  %11010 = vmatprep.subr.bf16.mxu0 %v11009_v17  ;;  %v13914_v44 = vld [vmem:[%s14368_s8 + $0x4a0] sm:$0xff]  ;;  %v13917_v17 = vld [vmem:[%s14368_s8 + $0x4a8] sm:$0xff]  ;;  %v7634_v33 = vadd.f32 %v13839_v40, %v13770_v62  ;;  %v11023_v41 = vpack.c.bf16 %v13951_v0, %v13948_v36  ;;  %v11055_v22 = vpack.c.bf16 %v4876_v11, %v13954_v14 }
0x1cda   :  { %v8028_v40 = vmax.f32 %v7537_v43, 0.0  ;;  %v4864_v0 = vld [vmem:[%s14368_s8 + $0x4c8] sm:$0xff]  ;;  %v4895_v14 = vld [vmem:[%s14368_s8 + $0x5c0] sm:$0xff] }
0x1cdb   :  { %v8047_v36 = vmax.f32 %v7634_v33, 0.0  ;;  %v4848_v43 = vld [vmem:[%s14368_s8 + $0x448] sm:$0xff]  ;;  %v4865_v33 = vld [vmem:[%s14368_s8 + $0x4d0] sm:$0xff] }
0x1cdc   :  { %10980 = vmatpush3.bf16.msra.mxu1 %v10979_v54  ;;  %11012 = vmatpush3.bf16.msra.mxu0 %v11011_v15  ;;  %v13900_v31 = vpop.f32.mrb[146].mxu1  ;;  %v13902_v47 = vpop.f32.mrb[146].mxu0  ;;  %v13931_v54 = vld [vmem:[%s14368_s8 + $0x5a8] sm:$0xff]  ;;  %v8013_v15 = vmax.f32 %v7533_v28, 0.0  ;;  %v13971_v28 = vld [vmem:[%s14368_s8 + $0x4b8] sm:$0xff] }
0x1cdd   :  { %v13923_v10 = vpop.f32.mrb[147].mxu1  ;;  %v13925_v35 = vpop.f32.mrb[147].mxu0  ;;  %11014 = vmatprep.subr.bf16.mxu1 %v11013_v4  ;;  %11046 = vmatprep.subr.bf16.mxu0 %v11045_v30  ;;  %v13943_v4 = vrot.slane %v13887_v3, %v14373_v57  ;;  %v11051_v57 = vpack.c.bf16 %v13911_v7, %v13898_v37  ;;  %v11021_v30 = vpack.c.bf16 %v13917_v17, %v13914_v44  ;;  %v4893_v44 = vld [vmem:[%s14368_s8 + $0x5b0] sm:$0xff]  ;;  %v4894_v17 = vld [vmem:[%s14368_s8 + $0x5b8] sm:$0xff] }
0x1cde   :  { %v11053_v18 = vpack.c.bf16 %v13931_v54, %v13928_v26  ;;  %v8031_v26 = vmax.f32 %v7628_v13, 0.0  ;;  %v11025_v62 = vpack.c.bf16 %v13971_v28, %v13968_v1  ;;  %v11057_v50 = vpack.c.bf16 %v4894_v17, %v4893_v44 }
0x1cdf   :  { %8297 = vmatmul.mubr.f32.vlgmr.msra.gmra.mrb[168].mxu1 %v7996_v29  ;;  %8382 = vmatmul.mubr.f32.vlgmr.msra.gmra.mrb[168].mxu0 %v7998_v45  ;;  %v7626_v29 = vadd.f32 %v13808_v34, %v13835_v51  ;;  %v8029_v45 = vmax.f32 %v7539_v55, 0.0  ;;  %v4846_v55 = vld [vmem:[%s14368_s8 + $0x438] sm:$0xff]  ;;  %v8045_v13 = vmax.f32 %v7545_v12, 0.0  ;;  %v4880_v12 = vld [vmem:[%s14368_s8 + $0x548] sm:$0xff] }
0x1ce0   :  { %8301 = vmatprep.mubr.f32.mxu1 %v8013_v15  ;;  %8386 = vmatprep.mubr.f32.mxu0 %v8015_v38  ;;  %v13956_v6 = vpop.f32.mrb[148].mxu1  ;;  %v13958_v27 = vpop.f32.mrb[148].mxu0  ;;  %v4845_v38 = vld [vmem:[%s14368_s8 + $0x430] sm:$0xff] }
0x1ce1   :  { %11016 = vmatpush3.bf16.msra.mxu1 %v11015_v39  ;;  %11048 = vmatpush3.bf16.msra.mxu0 %v11047_v16  ;;  %v13977_v37 = vpop.f32.mrb[149].mxu1  ;;  %v13979_v7 = vpop.f32.mrb[149].mxu0  ;;  %v8030_v16 = vmax.f32 %v7626_v29, 0.0  ;;  %v11027_v28 = vpack.c.bf16 %v4846_v55, %v4845_v38  ;;  %v4849_v55 = vld [vmem:[%s14368_s8 + $0x450] sm:$0xff] }
0x1ce2   :  { %11018 = vmatprep.subr.bf16.mxu1 %v11017_v32  ;;  %11050 = vmatprep.subr.bf16.mxu0 %v11049_v5  ;;  %v7543_v32 = vadd.f32 %v13826_v42, %v13824_v59  ;;  %v7632_v5 = vadd.f32 %v13828_v58, %v13835_v51  ;;  %v7705_v59 = vadd.f32 %v13869_v21, %v13939_v25  ;;  %v4877_v58 = vld [vmem:[%s14368_s8 + $0x530] sm:$0xff]  ;;  %v4878_v51 = vld [vmem:[%s14368_s8 + $0x538] sm:$0xff] }
0x1ce3   :  { %8302 = vmatmul.mubr.f32.gmra.mrb[170].mxu1 %v8012_v46  ;;  %8387 = vmatmul.mubr.f32.gmra.mrb[170].mxu0 %v8014_v20  ;;  %v7794_v42 = vadd.f32 %v13871_v23, %v13943_v4  ;;  %v11059_v46 = vpack.c.bf16 %v4878_v51, %v4877_v58  ;;  %v4847_v20 = vld [vmem:[%s14368_s8 + $0x440] sm:$0xff]  ;;  %v4882_v58 = vld [vmem:[%s14368_s8 + $0x558] sm:$0xff] }
0x1ce4   :  { %8306 = vmatprep.mubr.f32.mxu1 %v8029_v45  ;;  %8391 = vmatprep.mubr.f32.mxu0 %v8031_v26  ;;  %v13989_v34 = vpop.f32.mrb[150].mxu1  ;;  %v13991_v39 = vpop.f32.mrb[150].mxu0  ;;  %v8044_v1 = vmax.f32 %v7543_v32, 0.0  ;;  %v8046_v23 = vmax.f32 %v7632_v5, 0.0  ;;  %v8001_v29 = vmax.f32 %v7705_v59, 0.0  ;;  %v4879_v26 = vld [vmem:[%s14368_s8 + $0x540] sm:$0xff]  ;;  %v11031_v5 = vpack.c.bf16 %v4848_v43, %v4847_v20 }
0x1ce5   :  { %11020 = vmatpush3.bf16.msra.mxu1 %v11019_v53  ;;  %11052 = vmatpush3.bf16.msra.mxu0 %v11051_v57  ;;  %v14000_v54 = vpop.f32.mrb[151].mxu1  ;;  %v14002_v15 = vpop.f32.mrb[151].mxu0  ;;  %v4863_v53 = vld [vmem:[%s14368_s8 + $0x4c0] sm:$0xff]  ;;  %v4896_v57 = vld [vmem:[%s14368_s8 + $0x5c8] sm:$0xff]  ;;  %v8003_v44 = vmax.f32 %v7794_v42, 0.0  ;;  %v11063_v38 = vpack.c.bf16 %v4880_v12, %v4879_v26  ;;  %v4881_v42 = vld [vmem:[%s14368_s8 + $0x550] sm:$0xff] }
0x1ce6   :  { %11022 = vmatprep.subr.bf16.mxu1 %v11021_v30  ;;  %11054 = vmatprep.subr.bf16.mxu0 %v11053_v18  ;;  %v11029_v17 = vpack.c.bf16 %v4864_v0, %v4863_v53  ;;  %v11061_v45 = vpack.c.bf16 %v4896_v57, %v4895_v14  ;;  %v4867_v51 = vld [vmem:[%s14368_s8 + $0x4e0] sm:$0xff]  ;;  %v4868_v53 = vld [vmem:[%s14368_s8 + $0x4e8] sm:$0xff]  ;;  %v11067_v20 = vpack.c.bf16 %v4882_v58, %v4881_v42  ;;  %v4869_v12 = vld [vmem:[%s14368_s8 + $0x4f0] sm:$0xff] }
0x1ce7   :  { %8307 = vmatmul.mubr.f32.gmra.mrb[172].mxu1 %v8028_v40  ;;  %8392 = vmatmul.mubr.f32.gmra.mrb[172].mxu0 %v8030_v16  ;;  %v4898_v40 = vld [vmem:[%s14368_s8 + $0x5d8] sm:$0xff]  ;;  %v4899_v0 = vld [vmem:[%s14368_s8 + $0x5e0] sm:$0xff]  ;;  %v4900_v14 = vld [vmem:[%s14368_s8 + $0x5e8] sm:$0xff] }
0x1ce8   :  { %8311 = vmatprep.mubr.f32.mxu1 %v8045_v13  ;;  %8396 = vmatprep.mubr.f32.mxu0 %v8047_v36  ;;  %v14016_v11 = vpop.f32.mrb[152].mxu1  ;;  %v14018_v21 = vpop.f32.mrb[152].mxu0  ;;  %v4850_v13 = vld [vmem:[%s14368_s8 + $0x458] sm:$0xff]  ;;  %v4851_v43 = vld [vmem:[%s14368_s8 + $0x460] sm:$0xff]  ;;  %v4884_v26 = vld [vmem:[%s14368_s8 + $0x568] sm:$0xff] }
0x1ce9   :  { %11024 = vmatpush3.bf16.msra.mxu1 %v11023_v41  ;;  %11056 = vmatpush3.bf16.msra.mxu0 %v11055_v22  ;;  %v14020_v30 = vpop.f32.mrb[153].mxu1  ;;  %v14022_v18 = vpop.f32.mrb[153].mxu0  ;;  %v4866_v41 = vld [vmem:[%s14368_s8 + $0x4d8] sm:$0xff]  ;;  %v4897_v22 = vld [vmem:[%s14368_s8 + $0x5d0] sm:$0xff] }
0x1cea   :  { %11026 = vmatprep.subr.bf16.mxu1 %v11025_v62  ;;  %11058 = vmatprep.subr.bf16.mxu0 %v11057_v50  ;;  %v11033_v36 = vpack.c.bf16 %v4866_v41, %v4865_v33  ;;  %v11065_v59 = vpack.c.bf16 %v4898_v40, %v4897_v22  ;;  %v4870_v33 = vld [vmem:[%s14368_s8 + $0x4f8] sm:$0xff]  ;;  %v4901_v41 = vld [vmem:[%s14368_s8 + $0x5f0] sm:$0xff] }
0x1ceb   :  { %8312 = vmatmul.mubr.f32.gmra.mrb[174].mxu1 %v8044_v1  ;;  %8397 = vmatmul.mubr.f32.gmra.mrb[174].mxu0 %v8046_v23  ;;  %v4902_v22 = vld [vmem:[%s14368_s8 + $0x5f8] sm:$0xff]  ;;  %v4853_v42 = vld [vmem:[%s14368_s8 + $0x470] sm:$0xff] }
0x1cec   :  { %8466 = vmatprep.mubr.f32.mxu1 %v8001_v29  ;;  %8551 = vmatprep.mubr.f32.mxu0 %v8003_v44  ;;  %v14032_v16 = vpop.f32.mrb[154].mxu1  ;;  %v14034_v62 = vpop.f32.mrb[154].mxu0  ;;  %v4852_v29 = vld [vmem:[%s14368_s8 + $0x468] sm:$0xff]  ;;  %v11037_v44 = vpack.c.bf16 %v4868_v53, %v4867_v51  ;;  %v4854_v58 = vld [vmem:[%s14368_s8 + $0x478] sm:$0xff]  ;;  %v4885_v51 = vld [vmem:[%s14368_s8 + $0x570] sm:$0xff]  ;;  %v11041_v53 = vpack.c.bf16 %v4870_v33, %v4869_v12 }
0x1ced   :  { %11028 = vmatpush3.bf16.msra.mxu1 %v11027_v28  ;;  %11060 = vmatpush3.bf16.msra.mxu0 %v11059_v46  ;;  %v14036_v50 = vpop.f32.mrb[155].mxu1  ;;  %v14038_v32 = vpop.f32.mrb[155].mxu0  ;;  %v11035_v46 = vpack.c.bf16 %v4850_v13, %v4849_v55  ;;  %v4935_v12 = vld [vmem:[%s14368_s8 + $0x700] sm:$0xff]  ;;  %v4936_v33 = vld [vmem:[%s14368_s8 + $0x708] sm:$0xff] }
0x1cee   :  { %11030 = vmatprep.subr.bf16.mxu1 %v11029_v17  ;;  %11062 = vmatprep.subr.bf16.mxu0 %v11061_v45  ;;  %v11069_v17 = vpack.c.bf16 %v4900_v14, %v4899_v0  ;;  %v4883_v45 = vld [vmem:[%s14368_s8 + $0x560] sm:$0xff]  ;;  %v11073_v0 = vpack.c.bf16 %v4902_v22, %v4901_v41  ;;  %v4886_v14 = vld [vmem:[%s14368_s8 + $0x578] sm:$0xff]  ;;  %v14095_v41 = vld [vmem:[%s14368_s8 + $0x690] sm:$0xff] }
0x1cf0   :  { %v14048_v57 = vpop.f32.mrb[156].mxu1  ;;  %v14050_v1 = vpop.f32.mrb[156].mxu0 }
0x1cf1   :  { %11032 = vmatpush3.bf16.msra.mxu1 %v11031_v5  ;;  %11064 = vmatpush3.bf16.msra.mxu0 %v11063_v38  ;;  %v14052_v23 = vpop.f32.mrb[157].mxu1  ;;  %v14054_v28 = vpop.f32.mrb[157].mxu0  ;;  %v14070_v38 = vrot.slane %v13887_v3, %v14370_v60  ;;  %v14081_v60 = vrot.slane %v13887_v3, %v14371_v24  ;;  %v11043_v24 = vpack.c.bf16 %v4854_v58, %v4853_v42  ;;  %v4953_v42 = vld [vmem:[%s14368_s8 + $0x790] sm:$0xff]  ;;  %v4954_v58 = vld [vmem:[%s14368_s8 + $0x798] sm:$0xff] }
0x1cf2   :  { %11034 = vmatprep.subr.bf16.mxu1 %v11033_v36  ;;  %11066 = vmatprep.subr.bf16.mxu0 %v11065_v59  ;;  %v11039_v36 = vpack.c.bf16 %v4852_v29, %v4851_v43  ;;  %v11071_v59 = vpack.c.bf16 %v4884_v26, %v4883_v45  ;;  %v4951_v43 = vld [vmem:[%s14368_s8 + $0x780] sm:$0xff]  ;;  %v4952_v29 = vld [vmem:[%s14368_s8 + $0x788] sm:$0xff] }
0x1cf3   :  { %v14089_v45 = vld [vmem:[%s14368_s8 + $0x600] sm:$0xff]  ;;  %v4904_v26 = vld [vmem:[%s14368_s8 + $0x608] sm:$0xff]  ;;  %v7703_v22 = vadd.f32 %v13852_v48, %v14070_v38  ;;  %v7792_v49 = vadd.f32 %v13854_v9, %v14081_v60  ;;  %v14113_v9 = vld [vmem:[%s14368_s8 + $0x618] sm:$0xff] }
0x1cf4   :  { %v14064_v40 = vpop.f32.mrb[158].mxu1  ;;  %v14066_v5 = vpop.f32.mrb[158].mxu0  ;;  %v11079_v48 = vpack.c.bf16 %v4904_v26, %v14089_v45  ;;  %v7709_v45 = vadd.f32 %v13900_v31, %v14070_v38  ;;  %v7798_v26 = vadd.f32 %v13902_v47, %v14081_v60  ;;  %v7806_v31 = vadd.f32 %v13979_v7, %v13943_v4 }
0x1cf5   :  { %11036 = vmatpush3.bf16.msra.mxu1 %v11035_v46  ;;  %11068 = vmatpush3.bf16.msra.mxu0 %v11067_v20  ;;  %v14072_v55 = vpop.f32.mrb[159].mxu1  ;;  %v14074_v13 = vpop.f32.mrb[159].mxu0  ;;  %v4919_v46 = vld [vmem:[%s14368_s8 + $0x680] sm:$0xff]  ;;  %v4920_v20 = vld [vmem:[%s14368_s8 + $0x688] sm:$0xff]  ;;  %v8002_v61 = vmax.f32 %v7792_v49, 0.0  ;;  %v7717_v49 = vadd.f32 %v13977_v37, %v13939_v25  ;;  %v14134_v47 = vrot.slane %v13887_v3, %v12617_v63 }
0x1cf6   :  { %11038 = vmatprep.subr.bf16.mxu1 %v11037_v44  ;;  %11070 = vmatprep.subr.bf16.mxu0 %v11069_v17  ;;  %v11075_v44 = vpack.c.bf16 %v4886_v14, %v4885_v51  ;;  %v11077_v17 = vpack.c.bf16 %v4920_v20, %v4919_v46  ;;  %v7711_v51 = vadd.f32 %v13923_v10, %v13939_v25  ;;  %v14110_v46 = vld [vmem:[%s14368_s8 + $0x610] sm:$0xff]  ;;  %v4938_v10 = vld [vmem:[%s14368_s8 + $0x718] sm:$0xff]  ;;  %v4908_v37 = vld [vmem:[%s14368_s8 + $0x628] sm:$0xff] }
0x1cf7   :  { %v7800_v14 = vadd.f32 %v13925_v35, %v13943_v4  ;;  %v11113_v20 = vpack.c.bf16 %v4954_v58, %v4953_v42  ;;  %v8000_v35 = vmax.f32 %v7703_v22, 0.0  ;;  %v11083_v22 = vpack.c.bf16 %v14113_v9, %v14110_v46  ;;  %v4939_v42 = vld [vmem:[%s14368_s8 + $0x720] sm:$0xff]  ;;  %v4940_v58 = vld [vmem:[%s14368_s8 + $0x728] sm:$0xff]  ;;  %v4926_v9 = vld [vmem:[%s14368_s8 + $0x6b8] sm:$0xff] }
0x1cf8   :  { %v7804_v46 = vadd.f32 %v13958_v27, %v14081_v60  ;;  %v11119_v27 = vpack.c.bf16 %v4940_v58, %v4939_v42  ;;  %v4943_v58 = vld [vmem:[%s14368_s8 + $0x740] sm:$0xff] }
0x1cf9   :  { %11040 = vmatpush3.bf16.msra.mxu1 %v11039_v36  ;;  %11072 = vmatpush3.bf16.msra.mxu0 %v11071_v59  ;;  %v11109_v36 = vpack.c.bf16 %v4952_v29, %v4951_v43  ;;  %v4922_v59 = vld [vmem:[%s14368_s8 + $0x698] sm:$0xff]  ;;  %v4937_v43 = vld [vmem:[%s14368_s8 + $0x710] sm:$0xff]  ;;  %v14119_v29 = vld [vmem:[%s14368_s8 + $0x6a0] sm:$0xff] }
0x1cfa   :  { %11042 = vmatprep.subr.bf16.mxu1 %v11041_v53  ;;  %11074 = vmatprep.subr.bf16.mxu0 %v11073_v0  ;;  %v11111_v53 = vpack.c.bf16 %v4936_v33, %v4935_v12  ;;  %v11081_v0 = vpack.c.bf16 %v4922_v59, %v14095_v41  ;;  %v4956_v12 = vld [vmem:[%s14368_s8 + $0x7a8] sm:$0xff]  ;;  %v8017_v33 = vmax.f32 %v7711_v51, 0.0  ;;  %v8019_v41 = vmax.f32 %v7800_v14, 0.0 }
0x1cfb   :  { %v11115_v7 = vpack.c.bf16 %v4938_v10, %v4937_v43  ;;  %v8016_v51 = vmax.f32 %v7709_v45, 0.0  ;;  %v8018_v14 = vmax.f32 %v7798_v26, 0.0  ;;  %v8033_v43 = vmax.f32 %v7717_v49, 0.0  ;;  %v4960_v49 = vld [vmem:[%s14368_s8 + $0x7c8] sm:$0xff] }
0x1cfc   :  { %v8035_v10 = vmax.f32 %v7806_v31, 0.0  ;;  %v7812_v45 = vadd.f32 %v14002_v15, %v13943_v4  ;;  %v7721_v4 = vadd.f32 %v13989_v34, %v14070_v38  ;;  %v4909_v15 = vld [vmem:[%s14368_s8 + $0x630] sm:$0xff] }
0x1cfd   :  { %11044 = vmatpush3.bf16.msra.mxu1 %v11043_v24  ;;  %11076 = vmatpush3.bf16.msra.mxu0 %v11075_v44  ;;  %v4924_v24 = vld [vmem:[%s14368_s8 + $0x6a8] sm:$0xff]  ;;  %v4955_v44 = vld [vmem:[%s14368_s8 + $0x7a0] sm:$0xff]  ;;  %v4941_v34 = vld [vmem:[%s14368_s8 + $0x730] sm:$0xff] }
0x1cfe   :  { %11078 = vmatprep.subr.bf16.mxu1 %v11077_v17  ;;  %11110 = vmatprep.subr.bf16.mxu0 %v11109_v36  ;;  %v14138_v17 = vrot.slane %v13887_v3, %v14374_v56  ;;  %v4907_v36 = vld [vmem:[%s14368_s8 + $0x620] sm:$0xff]  ;;  %v11085_v63 = vpack.c.bf16 %v4924_v24, %v14119_v29  ;;  %v11117_v59 = vpack.c.bf16 %v4956_v12, %v4955_v44  ;;  %v4925_v56 = vld [vmem:[%s14368_s8 + $0x6b0] sm:$0xff]  ;;  %v8051_v24 = vmax.f32 %v7812_v45, 0.0 }
0x1cff   :  { %v7723_v29 = vadd.f32 %v14000_v54, %v13939_v25  ;;  %v8034_v25 = vmax.f32 %v7804_v46, 0.0  ;;  %v7810_v54 = vadd.f32 %v13991_v39, %v14081_v60  ;;  %v7883_v44 = vadd.f32 %v14020_v30, %v14134_v47  ;;  %v4942_v39 = vld [vmem:[%s14368_s8 + $0x738] sm:$0xff]  ;;  %v4928_v60 = vld [vmem:[%s14368_s8 + $0x6c8] sm:$0xff]  ;;  %v4945_v45 = vld [vmem:[%s14368_s8 + $0x750] sm:$0xff] }
0x1d00   :  { %8467 = vmatmul.mubr.f32.vlgmr.msra.gmra.mrb[176].mxu1 %v8000_v35  ;;  %8552 = vmatmul.mubr.f32.vlgmr.msra.gmra.mrb[176].mxu0 %v8002_v61  ;;  %v7715_v61 = vadd.f32 %v13956_v6, %v14070_v38  ;;  %v4957_v35 = vld [vmem:[%s14368_s8 + $0x7b0] sm:$0xff]  ;;  %v11087_v6 = vpack.c.bf16 %v4908_v37, %v4907_v36  ;;  %v7972_v12 = vadd.f32 %v14022_v18, %v14138_v17  ;;  %v4927_v38 = vld [vmem:[%s14368_s8 + $0x6c0] sm:$0xff]  ;;  %v8048_v30 = vmax.f32 %v7721_v4, 0.0  ;;  %v4912_v37 = vld [vmem:[%s14368_s8 + $0x648] sm:$0xff] }
0x1d01   :  { %8471 = vmatprep.mubr.f32.mxu1 %v8017_v33  ;;  %8556 = vmatprep.mubr.f32.mxu0 %v8019_v41  ;;  %v4958_v33 = vld [vmem:[%s14368_s8 + $0x7b8] sm:$0xff]  ;;  %v4959_v41 = vld [vmem:[%s14368_s8 + $0x7c0] sm:$0xff]  ;;  %v8050_v31 = vmax.f32 %v7810_v54, 0.0 }
0x1d02   :  { %11080 = vmatpush3.bf16.msra.mxu1 %v11079_v48  ;;  %11112 = vmatpush3.bf16.msra.mxu0 %v11111_v53  ;;  %v11089_v48 = vpack.c.bf16 %v4926_v9, %v4925_v56  ;;  %v11121_v53 = vpack.c.bf16 %v4958_v33, %v4957_v35  ;;  %v8032_v26 = vmax.f32 %v7715_v61, 0.0  ;;  %v4911_v36 = vld [vmem:[%s14368_s8 + $0x640] sm:$0xff]  ;;  %v11125_v42 = vpack.c.bf16 %v4960_v49, %v4959_v41  ;;  %v4944_v56 = vld [vmem:[%s14368_s8 + $0x748] sm:$0xff]  ;;  %v4961_v61 = vld [vmem:[%s14368_s8 + $0x7d0] sm:$0xff] }
0x1d03   :  { %11082 = vmatprep.subr.bf16.mxu1 %v11081_v0  ;;  %11114 = vmatprep.subr.bf16.mxu0 %v11113_v20  ;;  %v4910_v0 = vld [vmem:[%s14368_s8 + $0x638] sm:$0xff]  ;;  %v8049_v20 = vmax.f32 %v7723_v29, 0.0  ;;  %v11095_v9 = vpack.c.bf16 %v4912_v37, %v4911_v36  ;;  %v11127_v35 = vpack.c.bf16 %v4944_v56, %v4943_v58  ;;  %v4913_v33 = vld [vmem:[%s14368_s8 + $0x650] sm:$0xff]  ;;  %v4915_v54 = vld [vmem:[%s14368_s8 + $0x660] sm:$0xff] }
0x1d04   :  { %8472 = vmatmul.mubr.f32.gmra.mrb[178].mxu1 %v8016_v51  ;;  %8557 = vmatmul.mubr.f32.gmra.mrb[178].mxu0 %v8018_v14  ;;  %v11091_v18 = vpack.c.bf16 %v4910_v0, %v4909_v15  ;;  %v4929_v51 = vld [vmem:[%s14368_s8 + $0x6d0] sm:$0xff]  ;;  %v4930_v14 = vld [vmem:[%s14368_s8 + $0x6d8] sm:$0xff]  ;;  %v4916_v15 = vld [vmem:[%s14368_s8 + $0x668] sm:$0xff] }
0x1d05   :  { %8476 = vmatprep.mubr.f32.mxu1 %v8033_v43  ;;  %8561 = vmatprep.mubr.f32.mxu0 %v8035_v10  ;;  %v4962_v46 = vld [vmem:[%s14368_s8 + $0x7d8] sm:$0xff]  ;;  %v11097_v10 = vpack.c.bf16 %v4930_v14, %v4929_v51  ;;  %v11103_v41 = vpack.c.bf16 %v4916_v15, %v4915_v54  ;;  %v4949_v37 = vld [vmem:[%s14368_s8 + $0x770] sm:$0xff] }
0x1d06   :  { %11084 = vmatpush3.bf16.msra.mxu1 %v11083_v22  ;;  %11116 = vmatpush3.bf16.msra.mxu0 %v11115_v7  ;;  %v11123_v22 = vpack.c.bf16 %v4942_v39, %v4941_v34  ;;  %v8005_v7 = vmax.f32 %v7883_v44, 0.0  ;;  %v4914_v43 = vld [vmem:[%s14368_s8 + $0x658] sm:$0xff]  ;;  %v11129_v29 = vpack.c.bf16 %v4962_v46, %v4961_v61  ;;  %v4948_v44 = vld [vmem:[%s14368_s8 + $0x768] sm:$0xff]  ;;  %v4965_v39 = vld [vmem:[%s14368_s8 + $0x7f0] sm:$0xff]  ;;  %v7984_v46 = vadd.f32 %v14054_v28, %v14138_v17 }
0x1d07   :  { %11086 = vmatprep.subr.bf16.mxu1 %v11085_v63  ;;  %11118 = vmatprep.subr.bf16.mxu0 %v11117_v59  ;;  %v8007_v63 = vmax.f32 %v7972_v12, 0.0  ;;  %v11093_v59 = vpack.c.bf16 %v4928_v60, %v4927_v38  ;;  %v4933_v12 = vld [vmem:[%s14368_s8 + $0x6f0] sm:$0xff]  ;;  %v4934_v34 = vld [vmem:[%s14368_s8 + $0x6f8] sm:$0xff]  ;;  %v7239_v60 = vrot.slane %v13887_v3, %v12697_v52 }
0x1d08   :  { %8477 = vmatmul.mubr.f32.gmra.mrb[180].mxu1 %v8032_v26  ;;  %8562 = vmatmul.mubr.f32.gmra.mrb[180].mxu0 %v8034_v25  ;;  %v4964_v26 = vld [vmem:[%s14368_s8 + $0x7e8] sm:$0xff]  ;;  %v11099_v25 = vpack.c.bf16 %v4914_v43, %v4913_v33  ;;  %v4966_v38 = vld [vmem:[%s14368_s8 + $0x7f8] sm:$0xff]  ;;  %v7901_v33 = vadd.f32 %v14072_v55, %v14134_v47 }
0x1d09   :  { %8481 = vmatprep.mubr.f32.mxu1 %v8049_v20  ;;  %8566 = vmatprep.mubr.f32.mxu0 %v8051_v24  ;;  %v4947_v24 = vld [vmem:[%s14368_s8 + $0x760] sm:$0xff]  ;;  %v4918_v36 = vld [vmem:[%s14368_s8 + $0x678] sm:$0xff]  ;;  %v7881_v52 = vadd.f32 %v14016_v11, %v7239_v60  ;;  %v7887_v51 = vadd.f32 %v14032_v16, %v7239_v60 }
0x1d0a   :  { %11088 = vmatpush3.bf16.msra.mxu1 %v11087_v6  ;;  %11120 = vmatpush3.bf16.msra.mxu0 %v11119_v27  ;;  %v4946_v6 = vld [vmem:[%s14368_s8 + $0x758] sm:$0xff]  ;;  %v4931_v27 = vld [vmem:[%s14368_s8 + $0x6e0] sm:$0xff]  ;;  %v11135_v49 = vpack.c.bf16 %v4948_v44, %v4947_v24 }
0x1d0b   :  { %11090 = vmatprep.subr.bf16.mxu1 %v11089_v48  ;;  %11122 = vmatprep.subr.bf16.mxu0 %v11121_v53  ;;  %v4932_v48 = vld [vmem:[%s14368_s8 + $0x6e8] sm:$0xff]  ;;  %v4963_v53 = vld [vmem:[%s14368_s8 + $0x7e0] sm:$0xff]  ;;  %v11131_v4 = vpack.c.bf16 %v4946_v6, %v4945_v45  ;;  %v8004_v58 = vmax.f32 %v7881_v52, 0.0  ;;  %v9090_v45 = vld [vmem:[#allocation16] ss:$0 sm:$0xff] }
0x1d0c   :  { %8482 = vmatmul.mubr.f32.gmra.mrb[182].mxu1 %v8048_v30  ;;  %8567 = vmatmul.mubr.f32.gmra.mrb[182].mxu0 %v8050_v31  ;;  %v11101_v0 = vpack.c.bf16 %v4932_v48, %v4931_v27  ;;  %v11133_v20 = vpack.c.bf16 %v4964_v26, %v4963_v53  ;;  %v4917_v30 = vld [vmem:[%s14368_s8 + $0x670] sm:$0xff]  ;;  %v7247_v31 = vrot.slane %v13887_v3, %v12706_v19 }
0x1d0d   :  { %8636 = vmatprep.mubr.f32.mxu1 %v8005_v7  ;;  %8721 = vmatprep.mubr.f32.mxu0 %v8007_v63  ;;  %v4950_v7 = vld [vmem:[%s14368_s8 + $0x778] sm:$0xff]  ;;  %v11107_v63 = vpack.c.bf16 %v4918_v36, %v4917_v30  ;;  %v7889_v19 = vadd.f32 %v14036_v50, %v14134_v47  ;;  %v7978_v3 = vadd.f32 %v14038_v32, %v14138_v17  ;;  %v8020_v50 = vmax.f32 %v7887_v51, 0.0 }
0x1d0e   :  { %11092 = vmatpush3.bf16.msra.mxu1 %v11091_v18  ;;  %11124 = vmatpush3.bf16.msra.mxu0 %v11123_v22  ;;  %v11105_v18 = vpack.c.bf16 %v4934_v34, %v4933_v12  ;;  %v11137_v22 = vpack.c.bf16 %v4966_v38, %v4965_v39  ;;  %v7976_v14 = vadd.f32 %v14034_v62, %v7247_v31  ;;  %v8039_v62 = vmax.f32 %v7984_v46, 0.0 }
0x1d0f   :  { %11094 = vmatprep.subr.bf16.mxu1 %v11093_v59  ;;  %11126 = vmatprep.subr.bf16.mxu0 %v11125_v42  ;;  %v11139_v59 = vpack.c.bf16 %v4950_v7, %v4949_v37  ;;  %v7970_v42 = vadd.f32 %v14018_v21, %v7247_v31  ;;  %v8021_v61 = vmax.f32 %v7889_v19, 0.0  ;;  %v8023_v11 = vmax.f32 %v7978_v3, 0.0 }
0x1d10   :  { %v7895_v21 = vadd.f32 %v14052_v23, %v14134_v47  ;;  %v8022_v32 = vmax.f32 %v7976_v14, 0.0  ;;  %v7982_v16 = vadd.f32 %v14050_v1, %v7247_v31  ;;  %v7990_v23 = vadd.f32 %v14074_v13, %v14138_v17 }
0x1d11   :  { %v8006_v56 = vmax.f32 %v7970_v42, 0.0 }
0x1d12   :  { %11096 = vmatpush3.bf16.msra.mxu1 %v11095_v9  ;;  %11128 = vmatpush3.bf16.msra.mxu0 %v11127_v35  ;;  %v7893_v9 = vadd.f32 %v14048_v57, %v7239_v60  ;;  %v8037_v35 = vmax.f32 %v7895_v21, 0.0  ;;  %v8038_v43 = vmax.f32 %v7982_v16, 0.0  ;;  %v7988_v57 = vadd.f32 %v14066_v5, %v7247_v31 }
0x1d13   :  { %11098 = vmatprep.subr.bf16.mxu1 %v11097_v10  ;;  %11130 = vmatprep.subr.bf16.mxu0 %v11129_v29  ;;  %v7899_v10 = vadd.f32 %v14064_v40, %v7239_v60  ;;  %v8053_v29 = vmax.f32 %v7901_v33, 0.0  ;;  %v8055_v1 = vmax.f32 %v7990_v23, 0.0 }
0x1d14   :  { %v8036_v28 = vmax.f32 %v7893_v9, 0.0  ;;  %v8054_v47 = vmax.f32 %v7988_v57, 0.0 }
0x1d15   :  { %v8052_v55 = vmax.f32 %v7899_v10, 0.0 }
0x1d16   :  { %11100 = vmatpush3.bf16.msra.mxu1 %v11099_v25  ;;  %11132 = vmatpush3.bf16.msra.mxu0 %v11131_v4 }
0x1d17   :  { %11102 = vmatprep.subr.bf16.mxu1 %v11101_v0  ;;  %11134 = vmatprep.subr.bf16.mxu0 %v11133_v20 }
0x1d1a   :  { %11104 = vmatpush3.bf16.msra.mxu1 %v11103_v41  ;;  %11136 = vmatpush3.bf16.msra.mxu0 %v11135_v49 }
0x1d1b   :  { %11106 = vmatprep.subr.bf16.mxu1 %v11105_v18  ;;  %11138 = vmatprep.subr.bf16.mxu0 %v11137_v22 }
0x1d1e   :  { %11108 = vmatpush3.bf16.msra.mxu1 %v11107_v63  ;;  %11140 = vmatpush3.bf16.msra.mxu0 %v11139_v59 }
0x1d21   :  { %8637 = vmatmul.mubr.f32.vlgmr.msra.gmra.mrb[184].mxu1 %v8004_v58  ;;  %8722 = vmatmul.mubr.f32.vlgmr.msra.gmra.mrb[184].mxu0 %v8006_v56 }
0x1d22   :  { %8641 = vmatprep.mubr.f32.mxu1 %v8021_v61  ;;  %8726 = vmatprep.mubr.f32.mxu0 %v8023_v11 }
0x1d25   :  { %8642 = vmatmul.mubr.f32.gmra.mrb[186].mxu1 %v8020_v50  ;;  %8727 = vmatmul.mubr.f32.gmra.mrb[186].mxu0 %v8022_v32 }
0x1d26   :  { %8646 = vmatprep.mubr.f32.mxu1 %v8037_v35  ;;  %8731 = vmatprep.mubr.f32.mxu0 %v8039_v62 }
0x1d29   :  { %8647 = vmatmul.mubr.f32.gmra.mrb[188].mxu1 %v8036_v28  ;;  %8732 = vmatmul.mubr.f32.gmra.mrb[188].mxu0 %v8038_v43 }
0x1d2a   :  { %8651 = vmatprep.mubr.f32.mxu1 %v8053_v29  ;;  %8736 = vmatprep.mubr.f32.mxu0 %v8055_v1 }
0x1d2d   :  { %8652 = vmatmul.mubr.f32.gmra.mrb[190].mxu1 %v8052_v55  ;;  %8737 = vmatmul.mubr.f32.gmra.mrb[190].mxu0 %v8054_v47 }
0x1d92   :  { %v9669_v13 = vpop.f32.mrb[160].mxu1  ;;  %v9713_v17 = vpop.f32.mrb[160].mxu0 }
0x1d93   :  { %v9670_v6 = vpop.f32.mrb[161].mxu1  ;;  %v9714_v27 = vpop.f32.mrb[161].mxu0 }
0x1d94   :  { %v9671_v48 = vadd.f32 %v9670_v6, %v9669_v13  ;;  %v9715_v53 = vadd.f32 %v9714_v27, %v9713_v17 }
0x1d96   :  { %v8129_v40 = vadd.f32 %v9671_v48, %v9090_v45  ;;  %v9672_v26 = vpop.f32.mrb[162].mxu1  ;;  %v9716_v5 = vpop.f32.mrb[162].mxu0 }
0x1d97   :  { %v9673_v25 = vpop.f32.mrb[163].mxu1  ;;  %v9717_v4 = vpop.f32.mrb[163].mxu0 }
0x1d98   :  { %v8214_v54 = vadd.f32 %v9715_v53, %v8129_v40  ;;  %v9674_v15 = vadd.f32 %v9673_v25, %v9672_v26  ;;  %v9718_v0 = vadd.f32 %v9717_v4, %v9716_v5 }
0x1d9a   :  { %v8134_v20 = vadd.f32 %v9674_v15, %v9090_v45  ;;  %v9675_v24 = vpop.f32.mrb[164].mxu1  ;;  %v9719_v44 = vpop.f32.mrb[164].mxu0 }
0x1d9b   :  { %v9676_v12 = vpop.f32.mrb[165].mxu1  ;;  %v9720_v34 = vpop.f32.mrb[165].mxu0 }
0x1d9c   :  { %v8219_v39 = vadd.f32 %v9718_v0, %v8134_v20  ;;  %v9677_v38 = vadd.f32 %v9676_v12, %v9675_v24  ;;  %v9721_v60 = vadd.f32 %v9720_v34, %v9719_v44 }
0x1d9e   :  { %v8139_v41 = vadd.f32 %v9677_v38, %v9090_v45  ;;  %v9678_v49 = vpop.f32.mrb[166].mxu1  ;;  %v9722_v30 = vpop.f32.mrb[166].mxu0 }
0x1d9f   :  { %v9679_v31 = vpop.f32.mrb[167].mxu1  ;;  %v9723_v18 = vpop.f32.mrb[167].mxu0 }
0x1da0   :  { %v8224_v22 = vadd.f32 %v9721_v60, %v8139_v41  ;;  %v9680_v36 = vadd.f32 %v9679_v31, %v9678_v49  ;;  %v9724_v37 = vadd.f32 %v9723_v18, %v9722_v30 }
0x1da2   :  { %v8144_v7 = vadd.f32 %v9680_v36, %v9090_v45 }
0x1da4   :  { %v8229_v63 = vadd.f32 %v9724_v37, %v8144_v7 }
0x1db2   :  { %v9757_v59 = vpop.f32.mrb[168].mxu1  ;;  %v9801_v52 = vpop.f32.mrb[168].mxu0 }
0x1db3   :  { %v9758_v42 = vpop.f32.mrb[169].mxu1  ;;  %v9802_v19 = vpop.f32.mrb[169].mxu0 }
0x1db4   :  { %v9759_v3 = vadd.f32 %v9758_v42, %v9757_v59  ;;  %v9803_v58 = vadd.f32 %v9802_v19, %v9801_v52 }
0x1db6   :  { %v8299_v56 = vadd.f32 %v9759_v3, %v8214_v54  ;;  %v9760_v51 = vpop.f32.mrb[170].mxu1  ;;  %v9804_v14 = vpop.f32.mrb[170].mxu0 }
0x1db7   :  { %v9761_v61 = vpop.f32.mrb[171].mxu1  ;;  %v9805_v11 = vpop.f32.mrb[171].mxu0 }
0x1db8   :  { %v8384_v21 = vadd.f32 %v9803_v58, %v8299_v56  ;;  %v9762_v46 = vadd.f32 %v9761_v61, %v9760_v51  ;;  %v9806_v50 = vadd.f32 %v9805_v11, %v9804_v14 }
0x1dba   :  { %v8304_v32 = vadd.f32 %v9762_v46, %v8219_v39  ;;  %v9763_v9 = vpop.f32.mrb[172].mxu1  ;;  %v9807_v16 = vpop.f32.mrb[172].mxu0 }
0x1dbb   :  { %v9764_v35 = vpop.f32.mrb[173].mxu1  ;;  %v9808_v62 = vpop.f32.mrb[173].mxu0 }
0x1dbc   :  { %v8389_v33 = vadd.f32 %v9806_v50, %v8304_v32  ;;  %v9765_v23 = vadd.f32 %v9764_v35, %v9763_v9  ;;  %v9809_v28 = vadd.f32 %v9808_v62, %v9807_v16 }
0x1dbe   :  { %v8309_v43 = vadd.f32 %v9765_v23, %v8224_v22  ;;  %v9766_v10 = vpop.f32.mrb[174].mxu1  ;;  %v9810_v57 = vpop.f32.mrb[174].mxu0 }
0x1dbf   :  { %v9767_v29 = vpop.f32.mrb[175].mxu1  ;;  %v9811_v1 = vpop.f32.mrb[175].mxu0 }
0x1dc0   :  { %v8394_v55 = vadd.f32 %v9809_v28, %v8309_v43  ;;  %v9768_v47 = vadd.f32 %v9767_v29, %v9766_v10  ;;  %v9812_v13 = vadd.f32 %v9811_v1, %v9810_v57 }
0x1dc2   :  { %v8314_v17 = vadd.f32 %v9768_v47, %v8229_v63 }
0x1dc4   :  { %v8399_v45 = vadd.f32 %v9812_v13, %v8314_v17 }
0x1dd3   :  { %v9845_v6 = vpop.f32.mrb[176].mxu1  ;;  %v9889_v27 = vpop.f32.mrb[176].mxu0 }
0x1dd4   :  { %v9846_v48 = vpop.f32.mrb[177].mxu1  ;;  %v9890_v53 = vpop.f32.mrb[177].mxu0 }
0x1dd5   :  { %v9847_v40 = vadd.f32 %v9846_v48, %v9845_v6  ;;  %v9891_v26 = vadd.f32 %v9890_v53, %v9889_v27 }
0x1dd7   :  { %v8469_v5 = vadd.f32 %v9847_v40, %v8384_v21  ;;  %v9848_v25 = vpop.f32.mrb[178].mxu1  ;;  %v9892_v4 = vpop.f32.mrb[178].mxu0  ;;  %v14375_v40 = vld [vmem:[#allocation65_spill] sm:$0xff] }
0x1dd8   :  { %v9849_v54 = vpop.f32.mrb[179].mxu1  ;;  %v9893_v15 = vpop.f32.mrb[179].mxu0 }
0x1dd9   :  { %v8554_v0 = vadd.f32 %v9891_v26, %v8469_v5  ;;  %v9850_v20 = vadd.f32 %v9849_v54, %v9848_v25  ;;  %v9894_v24 = vadd.f32 %v9893_v15, %v9892_v4  ;;  %v14376_v4 = vld [vmem:[#allocation66_spill] sm:$0xff] }
0x1ddb   :  { %v8474_v44 = vadd.f32 %v9850_v20, %v8389_v33  ;;  %v9851_v12 = vpop.f32.mrb[180].mxu1  ;;  %v9895_v34 = vpop.f32.mrb[180].mxu0 }
0x1ddc   :  { %v9852_v39 = vpop.f32.mrb[181].mxu1  ;;  %v9896_v38 = vpop.f32.mrb[181].mxu0 }
0x1ddd   :  { %v8559_v60 = vadd.f32 %v9894_v24, %v8474_v44  ;;  %v9853_v41 = vadd.f32 %v9852_v39, %v9851_v12  ;;  %v9897_v49 = vadd.f32 %v9896_v38, %v9895_v34 }
0x1ddf   :  { %v8479_v30 = vadd.f32 %v9853_v41, %v8394_v55  ;;  %v9854_v31 = vpop.f32.mrb[182].mxu1  ;;  %v9898_v18 = vpop.f32.mrb[182].mxu0 }
0x1de0   :  { %v9855_v22 = vpop.f32.mrb[183].mxu1  ;;  %v9899_v36 = vpop.f32.mrb[183].mxu0 }
0x1de1   :  { %v8564_v37 = vadd.f32 %v9897_v49, %v8479_v30  ;;  %v9856_v7 = vadd.f32 %v9855_v22, %v9854_v31  ;;  %v9900_v63 = vadd.f32 %v9899_v36, %v9898_v18 }
0x1de3   :  { %v8484_v59 = vadd.f32 %v9856_v7, %v8399_v45 }
0x1de5   :  { %v8569_v52 = vadd.f32 %v9900_v63, %v8484_v59 }
0x1df4   :  { %v9933_v42 = vpop.f32.mrb[184].mxu1  ;;  %v9977_v19 = vpop.f32.mrb[184].mxu0 }
0x1df5   :  { %v9934_v3 = vpop.f32.mrb[185].mxu1  ;;  %v9978_v58 = vpop.f32.mrb[185].mxu0 }
0x1df6   :  { %v9935_v56 = vadd.f32 %v9934_v3, %v9933_v42  ;;  %v9979_v51 = vadd.f32 %v9978_v58, %v9977_v19 }
0x1df8   :  { %v8639_v14 = vadd.f32 %v9935_v56, %v8554_v0  ;;  %v9936_v61 = vpop.f32.mrb[186].mxu1  ;;  %v9980_v11 = vpop.f32.mrb[186].mxu0 }
0x1df9   :  { %v9937_v21 = vpop.f32.mrb[187].mxu1  ;;  %v9981_v46 = vpop.f32.mrb[187].mxu0 }
0x1dfa   :  { %v8724_v50 = vadd.f32 %v9979_v51, %v8639_v14  ;;  %v9938_v32 = vadd.f32 %v9937_v21, %v9936_v61  ;;  %v9982_v9 = vadd.f32 %v9981_v46, %v9980_v11  ;;  %v9091_v46 = vld [vmem:[#allocation18] ss:$0 sm:$0xff] }
0x1dfc   :  { %v8644_v16 = vadd.f32 %v9938_v32, %v8559_v60  ;;  %v9939_v35 = vpop.f32.mrb[188].mxu1  ;;  %v9983_v62 = vpop.f32.mrb[188].mxu0  ;;  %v8742_v33 = vadd.f32 %v8724_v50, %v13458_v8 }
0x1dfd   :  { %v9940_v23 = vpop.f32.mrb[189].mxu1  ;;  %v9984_v28 = vpop.f32.mrb[189].mxu0 }
0x1dfe   :  { %v8729_v43 = vadd.f32 %v9982_v9, %v8644_v16  ;;  %v9941_v10 = vadd.f32 %v9940_v23, %v9939_v35  ;;  %v9985_v57 = vadd.f32 %v9984_v28, %v9983_v62  ;;  %v8746_v29 = vsel %vm744_vm0, %v8742_v33, 0.0  ;;  %v9092_v9 = vld [vmem:[#allocation19] ss:$0 sm:$0xff] }
0x1dff   :  { %8747 = vadd.xlane.f32.xlu0 %v8746_v29 }
0x1e00   :  { %v8649_v1 = vadd.f32 %v9941_v10, %v8564_v37  ;;  %v9942_v55 = vpop.f32.mrb[190].mxu1  ;;  %v9986_v47 = vpop.f32.mrb[190].mxu0  ;;  %v8743_v13 = vadd.f32 %v8729_v43, %v13473_v2 }
0x1e01   :  { %v9943_v17 = vpop.f32.mrb[191].mxu1  ;;  %v9987_v45 = vpop.f32.mrb[191].mxu0 }
0x1e02   :  { %v8734_v6 = vadd.f32 %v9985_v57, %v8649_v1  ;;  %v9944_v27 = vadd.f32 %v9943_v17, %v9942_v55  ;;  %v9988_v48 = vadd.f32 %v9987_v45, %v9986_v47  ;;  %v8749_v8 = vsel %vm744_vm0, %v8743_v13, 0.0 }
0x1e03   :  { %8750 = vadd.xlane.f32.xlu1 %v8749_v8 }
0x1e04   :  { %v8654_v53 = vadd.f32 %v9944_v27, %v8569_v52  ;;  %v8744_v26 = vadd.f32 %v8734_v6, %v14375_v40 }
0x1e06   :  { %v8739_v5 = vadd.f32 %v9988_v48, %v8654_v53  ;;  %v8752_v25 = vsel %vm744_vm0, %v8744_v26, 0.0 }
0x1e07   :  { %8753 = vadd.xlane.f32.xlu0 %v8752_v25 }
0x1e08   :  { %v8745_v54 = vadd.f32 %v8739_v5, %v14376_v4 }
0x1e0a   :  { %v8755_v15 = vsel %vm744_vm0, %v8745_v54, 0.0 }
0x1e0b   :  { %8756 = vadd.xlane.f32.xlu1 %v8755_v15 }
0x1e8c   :  { %v8748_v2 = vpop.xlane.xlu0 %8747 }
0x1e8d   :  { %v8758_v0 = vmul.f32 0.03125, %v8748_v2 }
0x1e8f   :  { %v8762_v20 = vsub.f32 %v8742_v33, %v8758_v0 }
0x1e90   :  { %v8751_v24 = vpop.xlane.xlu1 %8750 }
0x1e91   :  { %v8759_v44 = vmul.f32 0.03125, %v8751_v24  ;;  %v8766_v12 = vmul.f32 %v8762_v20, %v8762_v20 }
0x1e93   :  { %v8763_v34 = vsub.f32 %v8743_v13, %v8759_v44  ;;  %v8770_v39 = vsel %vm744_vm0, %v8766_v12, 0.0 }
0x1e94   :  { %8771 = vadd.xlane.f32.xlu0 %v8770_v39  ;;  %v8754_v38 = vpop.xlane.xlu0 %8753 }
0x1e95   :  { %v8760_v60 = vmul.f32 0.03125, %v8754_v38  ;;  %v8767_v41 = vmul.f32 %v8763_v34, %v8763_v34 }
0x1e97   :  { %v8764_v49 = vsub.f32 %v8744_v26, %v8760_v60  ;;  %v8773_v30 = vsel %vm744_vm0, %v8767_v41, 0.0 }
0x1e98   :  { %8774 = vadd.xlane.f32.xlu1 %v8773_v30  ;;  %v8757_v31 = vpop.xlane.xlu1 %8756 }
0x1e99   :  { %v8761_v18 = vmul.f32 0.03125, %v8757_v31  ;;  %v8768_v22 = vmul.f32 %v8764_v49, %v8764_v49 }
0x1e9b   :  { %v8765_v36 = vsub.f32 %v8745_v54, %v8761_v18  ;;  %v8776_v37 = vsel %vm744_vm0, %v8768_v22, 0.0 }
0x1e9c   :  { %8777 = vadd.xlane.f32.xlu0 %v8776_v37 }
0x1e9d   :  { %v8769_v7 = vmul.f32 %v8765_v36, %v8765_v36 }
0x1e9f   :  { %v8779_v63 = vsel %vm744_vm0, %v8769_v7, 0.0 }
0x1ea0   :  { %8780 = vadd.xlane.f32.xlu1 %v8779_v63 }
0x1f21   :  { %v8772_v59 = vpop.xlane.xlu0 %8771 }
0x1f22   :  { %v8782_v52 = vmul.f32 0.03125, %v8772_v59 }
0x1f24   :  { %v8786_v42 = vadd.f32 1e-05, %v8782_v52 }
0x1f25   :  { %v8775_v19 = vpop.xlane.xlu1 %8774 }
0x1f26   :  { %11317 = vrsqrt.f32 %v8786_v42  ;;  %v8783_v3 = vmul.f32 0.03125, %v8775_v19 }
0x1f28   :  { %v8787_v58 = vadd.f32 1e-05, %v8783_v3 }
0x1f29   :  { %v8778_v56 = vpop.xlane.xlu0 %8777 }
0x1f2a   :  { %11319 = vrsqrt.f32 %v8787_v58  ;;  %v8784_v51 = vmul.f32 0.03125, %v8778_v56 }
0x1f2c   :  { %v8788_v14 = vadd.f32 1e-05, %v8784_v51 }
0x1f2d   :  { %v8781_v61 = vpop.xlane.xlu1 %8780 }
0x1f2e   :  { %11321 = vrsqrt.f32 %v8788_v14  ;;  %v8785_v11 = vmul.f32 0.03125, %v8781_v61 }
0x1f30   :  { %v11318_v21 = vpop.eup %11317  ;;  %v8789_v50 = vadd.f32 1e-05, %v8785_v11 }
0x1f31   :  { %v8794_v32 = vmul.f32 %v11318_v21, %v8762_v20 }
0x1f32   :  { %11323 = vrsqrt.f32 %v8789_v50 }
0x1f33   :  { %v8804_v16 = vmul.f32 %v9091_v46, %v8794_v32 }
0x1f34   :  { %v11320_v35 = vpop.eup %11319 }
0x1f35   :  { %v8814_v62 = vadd.f32 %v9092_v9, %v8804_v16  ;;  %v8795_v33 = vmul.f32 %v11320_v35, %v8763_v34 }
0x1f37   :  { %8818 = vst.msk [vmem:[%s11953_s3] sm:$0xff] %vm744_vm0, %v8814_v62  ;;  %v8805_v23 = vmul.f32 %v9091_v46, %v8795_v33 }
0x1f38   :  { %v11322_v28 = vpop.eup %11321 }
0x1f39   :  { %v8815_v43 = vadd.f32 %v9092_v9, %v8805_v23  ;;  %v8796_v10 = vmul.f32 %v11322_v28, %v8764_v49 }
0x1f3b   :  { %8819 = vst.msk [vmem:[%s11953_s3 + $0x8] sm:$0xff] %vm744_vm0, %v8815_v43  ;;  %v8806_v57 = vmul.f32 %v9091_v46, %v8796_v10 }
0x1f3c   :  { %v11324_v29 = vpop.eup %11323 }
0x1f3d   :  { %v8816_v1 = vadd.f32 %v9092_v9, %v8806_v57  ;;  %v8797_v55 = vmul.f32 %v11324_v29, %v8765_v36 }
0x1f3f   :  { %8820 = vst.msk [vmem:[%s11953_s3 + $0x10] sm:$0xff] %vm744_vm0, %v8816_v1  ;;  %v8807_v47 = vmul.f32 %v9091_v46, %v8797_v55 }
0x1f41   :  { %v8817_v13 = vadd.f32 %v9092_v9, %v8807_v47 }
0x1f43   :  { %8821 = vst.msk [vmem:[%s11953_s3 + $0x18] sm:$0xff] %vm744_vm0, %v8817_v13 }
0x1f44   :  { %8826 = vsyncpa [#allocation3], 1 }
0x1f45   :  { %8827 = vsyncpa [#allocation5], 1 }
0x1f46   :  { %8828 = vsyncpa [#allocation8], 1 }
0x1f47   :  { %8829 = vsyncpa [#allocation11], 1 }
0x1f48   :  { %8830 = vsyncpa [#allocation14], 1 }
0x1f49   :  { %8831 = vsyncpa [#allocation17], 1 }
0x1f4a   :  { %8832 = vsyncpa [#allocation20], 1 }

</bundles_post_ra>
